<compile_context>
chip_gen: v7x
topology: tpu7x:2x2x1
jax: 0.10.0
libtpu: 0.0.40
codegen_flags: <defaults>
</compile_context>

<pallas_src>
import functools
import math

import jax
import jax.numpy as jnp
from jax import lax
from jax.experimental import pallas as pl
from jax.experimental.pallas import tpu as pltpu


_PARALLEL = pltpu.CompilerParams(dimension_semantics=("parallel",))


# ---------------------------------------------------------------------------
# shared 3x3 conv on the pixel-unshuffled, lane-packed stack
#   x: (h+2, w+2, G, L) bf16  with L = gpack * r^2 (=128 for msfa=4)
#   w: (9*L, L) bf16, block-diagonal over the gpack packed groups (tap-folded)
# ---------------------------------------------------------------------------
def _share_conv_kernel(x_ref, w_ref, b_ref, o_ref, *, h, w, slope):
    gt = x_ref.shape[2]
    lanes = x_ref.shape[3]
    taps = [x_ref[di:di + h, dj:dj + w, :, :]
            for di in range(3) for dj in range(3)]
    slab = jnp.concatenate(taps, axis=-1).reshape(h * w * gt, 9 * lanes)
    acc = jnp.dot(slab, w_ref[...], preferred_element_type=jnp.float32)
    acc = acc + b_ref[...]
    acc = jnp.where(acc >= 0.0, acc, jnp.float32(slope) * acc)
    o_ref[...] = acc.reshape(h, w, gt, lanes).astype(o_ref.dtype)


def share_conv(x_pk, w_big, b_big, slope=0.2):
    h, w, G, L = x_pk.shape
    xp = jnp.pad(x_pk, ((1, 1), (1, 1), (0, 0), (0, 0)))
    # choose a group-block size (full G at small sizes; multiple-of-8 divisor else)
    gt = G
    if h * w * G > 4096:
        best = None
        for d in range(8, G, 8):
            if G % d == 0 and h * w * d <= 4096:
                best = d
        gt = best if best is not None else G
    kernel = functools.partial(_share_conv_kernel, h=h, w=w, slope=float(slope))
    return pl.pallas_call(
        kernel,
        out_shape=jax.ShapeDtypeStruct((h, w, G, L), jnp.bfloat16),
        grid=(G // gt,),
        in_specs=[pl.BlockSpec((h + 2, w + 2, gt, L), lambda i: (0, 0, i, 0)),
                  pl.BlockSpec((9 * L, L), lambda i: (0, 0)),
                  pl.BlockSpec((1, L), lambda i: (0, 0))],
        out_specs=pl.BlockSpec((h, w, gt, L), lambda i: (0, 0, i, 0)),
        compiler_params=_PARALLEL,
    )(xp, w_big, b_big)


# ---------------------------------------------------------------------------
# self.conv : NHWC 3x3 + bias + LeakyReLU(0.2), taps folded into K=9*Cin;
# also emits the spatial mean (AdaptiveAvgPool2d(1), i.e. k_s) as a 2nd output.
# ---------------------------------------------------------------------------
def _conv3x3_mean_kernel(x_ref, w_ref, b_ref, o_ref, mean_ref, *, H, W, slope):
    cin = x_ref.shape[3]
    taps = [x_ref[0, di:di + H, dj:dj + W, :]
            for di in range(3) for dj in range(3)]
    slab = jnp.concatenate(taps, axis=-1).reshape(H * W, 9 * cin)
    acc = jnp.dot(slab, w_ref[...], preferred_element_type=jnp.float32)
    acc = acc + b_ref[...]
    acc = jnp.where(acc >= 0.0, acc, jnp.float32(slope) * acc)
    o_ref[0] = acc.astype(o_ref.dtype)
    mean_ref[0] = jnp.mean(acc, axis=0, keepdims=True)


def conv3x3_leaky_mean(x_nhwc, w_k, bias, slope=0.2):
    N, H, W, Cin = x_nhwc.shape
    Cout = w_k.shape[1]
    assert W % 8 == 0, "W must be a multiple of 8 for the in-kernel tap fold"
    xp = jnp.pad(x_nhwc, ((0, 0), (1, 1), (1, 1), (0, 0)))
    b = jnp.asarray(bias, jnp.float32).reshape(1, Cout)
    kernel = functools.partial(_conv3x3_mean_kernel, H=H, W=W, slope=float(slope))
    out, mean = pl.pallas_call(
        kernel,
        out_shape=(jax.ShapeDtypeStruct((N, H * W, Cout), jnp.bfloat16),
                   jax.ShapeDtypeStruct((N, 1, Cout), jnp.float32)),
        grid=(N,),
        in_specs=[pl.BlockSpec((1, H + 2, W + 2, Cin), lambda n: (n, 0, 0, 0)),
                  pl.BlockSpec((9 * Cin, Cout), lambda n: (0, 0)),
                  pl.BlockSpec((1, Cout), lambda n: (0, 0))],
        out_specs=(pl.BlockSpec((1, H * W, Cout), lambda n: (n, 0, 0)),
                   pl.BlockSpec((1, 1, Cout), lambda n: (n, 0, 0))),
        compiler_params=_PARALLEL,
    )(xp, w_k, b)
    return out, mean


# ---------------------------------------------------------------------------
# fused AWSCA attention front-end (one grid step per batch element):
#   sa = pan . (Wpan . k_s)                 (3 VPU FMAs, lane-dense (1, HW))
#   d_x = conv_down GEMM (K = 36*C bf16)    (fused; patches built by wrapper)
#   k_c = spe . d_x ; ca = (lr . k_c) . Wlr ; fc1 + PReLU + fc2 + Sigmoid
# ---------------------------------------------------------------------------
def _awsca_kernel(kmean_ref, panT_ref, lr_ref, dpat_ref,
                  wdown_ref, bdown_ref, wpan_ref, wlr_ref, wspe_ref,
                  wfc1_ref, wfc2_ref, prelu_ref, sa_ref, ca_ref):
    k_s = kmean_ref[0]                                              # (1, C)
    m = jnp.sum(wpan_ref[...] * k_s, axis=1, keepdims=True)         # (3, 1)
    sa_ref[0] = jnp.sum(m * panT_ref[0], axis=0, keepdims=True)     # (1, HW)

    d_x = jnp.dot(dpat_ref[0], wdown_ref[...],
                  preferred_element_type=jnp.float32) + bdown_ref[...]   # (S2, C)
    k_c = jnp.sum(d_x * wspe_ref[...], axis=1, keepdims=True)       # (S2, 1)
    v = jnp.sum(lr_ref[0] * k_c, axis=0, keepdims=True)             # (1, 32)
    ca = jnp.dot(v, wlr_ref[...], preferred_element_type=jnp.float32)       # (1, C)
    h1 = jnp.dot(ca, wfc1_ref[...], preferred_element_type=jnp.float32)     # (1, Cr)
    h1 = jnp.where(h1 >= 0.0, h1, prelu_ref[...] * h1)              # PReLU
    g = jnp.dot(h1, wfc2_ref[...], preferred_element_type=jnp.float32)      # (1, C)
    ca_ref[0] = jax.nn.sigmoid(g)


def awsca_attention(kmean, panT, lr_flat, dpat, wdown, bdown,
                    wpan, wlr, wspe, wfc1, wfc2, prelu):
    N, _, C = kmean.shape
    HW = panT.shape[2]
    S2, Kd = dpat.shape[1], dpat.shape[2]
    Lc = lr_flat.shape[2]
    Cr = wfc1.shape[1]
    bdown_arr = jnp.asarray(bdown, jnp.float32).reshape(1, C)
    sa, ca = pl.pallas_call(
        _awsca_kernel,
        out_shape=(jax.ShapeDtypeStruct((N, 1, HW), jnp.float32),
                   jax.ShapeDtypeStruct((N, 1, C), jnp.float32)),
        grid=(N,),
        in_specs=[pl.BlockSpec((1, 1, C), lambda n: (n, 0, 0)),
                  pl.BlockSpec((1, 3, HW), lambda n: (n, 0, 0)),
                  pl.BlockSpec((1, S2, Lc), lambda n: (n, 0, 0)),
                  pl.BlockSpec((1, S2, Kd), lambda n: (n, 0, 0)),
                  pl.BlockSpec((Kd, C), lambda n: (0, 0)),
                  pl.BlockSpec((1, C), lambda n: (0, 0)),
                  pl.BlockSpec((3, C), lambda n: (0, 0)),
                  pl.BlockSpec((Lc, C), lambda n: (0, 0)),
                  pl.BlockSpec((1, C), lambda n: (0, 0)),
                  pl.BlockSpec((C, Cr), lambda n: (0, 0)),
                  pl.BlockSpec((Cr, C), lambda n: (0, 0)),
                  pl.BlockSpec((1, 1), lambda n: (0, 0))],
        out_specs=(pl.BlockSpec((1, 1, HW), lambda n: (n, 0, 0)),
                   pl.BlockSpec((1, 1, C), lambda n: (n, 0, 0))),
        compiler_params=_PARALLEL,
    )(kmean, panT, lr_flat, dpat, wdown, bdown_arr, wpan, wlr, wspe,
      wfc1, wfc2, prelu)
    return sa, ca


# ---------------------------------------------------------------------------
# final gated conv: fuses the 1-ch spatial-gate stencil + sigmoid, the sa*x
# pre-scale (hoisted out of the tap loop), the tap-folded 3x3 conv + bias,
# the ca post-scale and the residual add.
# ---------------------------------------------------------------------------
def _final_gated_kernel(x_ref, sa_ref, ca_ref, res_ref, w_ref, b_ref, wsa_ref,
                        o_ref, *, H, W):
    cin = x_ref.shape[3]
    # spatial gate computed on the (H+2, W+2) halo (sa is padded by 2 in the
    # wrapper); halo gate values only ever multiply zero-padded x.
    sg = jnp.zeros((H + 2, W + 2, 1), jnp.float32)
    for t in range(9):
        di, dj = t // 3, t % 3
        sg = sg + wsa_ref[t] * sa_ref[0, di:di + H + 2, dj:dj + W + 2, :]
    sg = jax.nn.sigmoid(sg)
    xs = (x_ref[0].astype(jnp.float32) * sg).astype(jnp.bfloat16)   # gated x (hoisted)
    taps = [xs[di:di + H, dj:dj + W, :] for di in range(3) for dj in range(3)]
    slab = jnp.concatenate(taps, axis=-1).reshape(H * W, 9 * cin)
    acc = jnp.dot(slab, w_ref[...], preferred_element_type=jnp.float32)
    acc = (acc + b_ref[...]) * ca_ref[0] + res_ref[0]
    o_ref[0] = acc


def final_gated_conv(xc_nhwc, sa_raw, ca_gate, res_flat, w_k, bias, w_sa9):
    N, H, W, C = xc_nhwc.shape
    assert W % 8 == 0, "W must be a multiple of 8 for the in-kernel tap fold"
    xp = jnp.pad(xc_nhwc, ((0, 0), (1, 1), (1, 1), (0, 0)))
    sa_map = sa_raw.reshape(N, H, W, 1)
    sp = jnp.pad(sa_map, ((0, 0), (2, 2), (2, 2), (0, 0)))
    b = jnp.asarray(bias, jnp.float32).reshape(1, C)
    kernel = functools.partial(_final_gated_kernel, H=H, W=W)
    return pl.pallas_call(
        kernel,
        out_shape=jax.ShapeDtypeStruct((N, H * W, C), jnp.float32),
        grid=(N,),
        in_specs=[pl.BlockSpec((1, H + 2, W + 2, C), lambda n: (n, 0, 0, 0)),
                  pl.BlockSpec((1, H + 4, W + 4, 1), lambda n: (n, 0, 0, 0)),
                  pl.BlockSpec((1, 1, C), lambda n: (n, 0, 0)),
                  pl.BlockSpec((1, H * W, C), lambda n: (n, 0, 0)),
                  pl.BlockSpec((9 * C, C), lambda n: (0, 0)),
                  pl.BlockSpec((1, C), lambda n: (0, 0)),
                  pl.BlockSpec(memory_space=pltpu.MemorySpace.SMEM)],
        out_specs=pl.BlockSpec((1, H * W, C), lambda n: (n, 0, 0)),
        compiler_params=_PARALLEL,
    )(xp, sp, ca_gate, res_flat, w_k, b, w_sa9)


# ---------------------------------------------------------------------------
# conv_down (6x6, stride 4, pad 2) patches, built with XLA strided slices in
# bf16 and contracted inside the fused AWSCA kernel (K = 36*C).
# ---------------------------------------------------------------------------
def conv_down_patches(x_nhwc):
    # TODO(synk): replace this XLA-side strided im2col with in-kernel strided taps.
    N, H, W, C = x_nhwc.shape
    xp = jnp.pad(x_nhwc, ((0, 0), (2, 2), (2, 2), (0, 0)))
    Ho = (H + 4 - 6) // 4 + 1
    Wo = (W + 4 - 6) // 4 + 1
    cols = []
    for ki in range(6):
        for kj in range(6):
            cols.append(lax.slice(
                xp, (0, ki, kj, 0),
                (N, ki + 4 * (Ho - 1) + 1, kj + 4 * (Wo - 1) + 1, C),
                (1, 4, 4, 1)))
    pat = jnp.stack(cols, axis=-1)                        # (N, Ho, Wo, C, 36)
    pat = pat.reshape(N, Ho * Wo, C * 36).astype(jnp.bfloat16)
    return pat, Ho, Wo


# ---------------------------------------------------------------------------
# Att_Conv forward (NCHW interface, NHWC / lane-packed internally)
# ---------------------------------------------------------------------------
def att_conv_forward(p, x, lr, pan, msfa=4):
    """x: (N,C,H,W); lr: (N,32,H//4,W//4); pan: (N,3,H,W)  — PyTorch NCHW."""
    N, C, H, W = x.shape
    r = msfa
    r2 = r * r
    assert H % r == 0 and W % r == 0 and W % 8 == 0
    h, w = H // r, W // r
    gpack = p["share_wbig"].shape[1] // r2          # packed groups per 128 lanes
    assert C % gpack == 0

    x_nhwc = jnp.transpose(x, (0, 2, 3, 1))                        # f32 residual
    res_flat = x_nhwc.reshape(N, H * W, C)

    # --- pixel-unshuffle into lane-packed layout (h, w, N*C/gpack, gpack*r^2) ---
    xb = x_nhwc.astype(jnp.bfloat16).reshape(N, h, r, w, r, C // gpack, gpack)
    xb = jnp.transpose(xb, (1, 3, 0, 5, 6, 2, 4))
    xb = xb.reshape(h, w, N * (C // gpack), gpack * r2)
    ys = share_conv(xb, p["share_wbig"], p["share_bbig"])          # bf16
    # --- pixel-shuffle back to NHWC ---
    ys = ys.reshape(h, w, N, C // gpack, gpack, r, r)
    y_nhwc = jnp.transpose(ys, (2, 0, 5, 1, 6, 3, 4)).reshape(N, H, W, C)

    # --- self.conv: 3x3 + LeakyReLU(0.2); k_s (spatial mean) fused in ---
    xc_flat, k_mean = conv3x3_leaky_mean(y_nhwc, p["conv_wk"], p["conv_b"])
    xc_nhwc = xc_flat.reshape(N, H, W, C)

    # --- AWSCA attention front-end (conv_down GEMM fused) ---
    dpat, h2, w2 = conv_down_patches(xc_nhwc)
    assert lr.shape[2] * lr.shape[3] == h2 * w2, "lr spatial must match conv_down"
    panT = pan.reshape(N, pan.shape[1], H * W).astype(jnp.float32)   # (N,3,HW)
    lr_flat = jnp.transpose(lr, (0, 2, 3, 1)).reshape(N, h2 * w2, lr.shape[1])
    sa_raw, ca_gate = awsca_attention(
        k_mean, panT, lr_flat, dpat, p["down_wmat"], p["down_b"],
        p["pan_w"], p["lr_w"], p["spe_w"], p["fc1_w"], p["fc2_w"], p["prelu"])

    # --- final conv fused with spatial gate, sa*x, ca*, bias and residual ---
    out_flat = final_gated_conv(xc_nhwc, sa_raw, ca_gate, res_flat,
                                p["final_wk"], p["final_b"], p["sa_w9"])
    out_nhwc = out_flat.reshape(N, H, W, C)
    return jnp.transpose(out_nhwc, (0, 3, 1, 2))                    # back to NCHW


# ---------------------------------------------------------------------------
# parameters: PyTorch-layout init + conversion to kernel-friendly layouts
# ---------------------------------------------------------------------------
def init_params_torch(key, channel=64, msfa=4, reduction=16):
    keys = iter(jax.random.split(key, 32))

    def wgt(shape, scale=0.05):
        return scale * jax.random.normal(next(keys), shape, dtype=jnp.float32)

    r2 = msfa * msfa
    return {
        "share_w": wgt((r2, r2, 3, 3)), "share_b": wgt((r2,)),
        "conv_w": wgt((channel, channel, 3, 3)), "conv_b": wgt((channel,)),
        "pan_w": wgt((channel, 3, 1, 1)),
        "lr_w": wgt((channel, 32, 1, 1)),
        "spe_w": wgt((1, channel, 1, 1)),
        "down_w": wgt((channel, channel, 6, 6)), "down_b": wgt((channel,)),
        "fc1_w": wgt((channel // reduction, channel)),
        "fc2_w": wgt((channel, channel // reduction)),
        "prelu": jnp.full((1, 1), 0.25, jnp.float32),   # PReLU default init
        "sa_w": wgt((1, 1, 3, 3)),
        "final_w": wgt((channel, channel, 3, 3)), "final_b": wgt((channel,)),
    }


def prepare_params(tp, channel=64, msfa=4):
    r2 = msfa * msfa
    gpack = 128 // r2 if 128 % r2 == 0 else 1
    gpack = math.gcd(gpack, channel)

    def conv3x3_wk(wt):
        # (Cout,Cin,3,3) -> (9*Cin, Cout); K index = (di*3+dj)*Cin + cin
        cout, cin = wt.shape[0], wt.shape[1]
        return (jnp.transpose(wt, (2, 3, 1, 0))
                .reshape(9 * cin, cout).astype(jnp.bfloat16))

    # tap-folded block-diagonal share weight: K = t*(gpack*r2)+g*r2+ci, N = g*r2+co
    w9 = jnp.transpose(tp["share_w"], (2, 3, 1, 0)).reshape(9, r2, r2)
    eye = jnp.eye(gpack, dtype=jnp.float32)
    share_wbig = jnp.einsum("gh,tio->tgiho", eye, w9)
    share_wbig = share_wbig.reshape(9 * gpack * r2, gpack * r2).astype(jnp.bfloat16)
    share_bbig = jnp.tile(tp["share_b"], gpack).reshape(1, gpack * r2)
    share_bbig = share_bbig.astype(jnp.float32)

    return {
        "share_wbig": share_wbig, "share_bbig": share_bbig,
        "conv_wk": conv3x3_wk(tp["conv_w"]), "conv_b": tp["conv_b"],
        "pan_w": jnp.transpose(tp["pan_w"][:, :, 0, 0]).astype(jnp.float32),   # (3,C)
        "lr_w": jnp.transpose(tp["lr_w"][:, :, 0, 0]).astype(jnp.float32),     # (32,C)
        "spe_w": tp["spe_w"][:, :, 0, 0].astype(jnp.float32),                  # (1,C)
        "down_wmat": jnp.transpose(tp["down_w"], (1, 2, 3, 0))
                        .reshape(-1, tp["down_w"].shape[0]).astype(jnp.bfloat16),
        "down_b": tp["down_b"],
        "fc1_w": jnp.transpose(tp["fc1_w"]).astype(jnp.float32),   # (C, C//red)
        "fc2_w": jnp.transpose(tp["fc2_w"]).astype(jnp.float32),   # (C//red, C)
        "prelu": tp["prelu"],                                      # (1,1) traced
        "sa_w9": tp["sa_w"].reshape(9).astype(jnp.float32),        # SMEM scalars
        "final_wk": conv3x3_wk(tp["final_w"]), "final_b": tp["final_b"],
    }


# ---------------------------------------------------------------------------
if __name__ == "__main__":
    root = jax.random.PRNGKey(0)
    k_p, k_x, k_lr, k_pan = jax.random.split(root, 4)

    channel, msfa = 64, 4
    N, H, W = 2, 16, 16

    params = prepare_params(init_params_torch(k_p, channel=channel, msfa=msfa),
                            channel=channel, msfa=msfa)
    x = jax.random.normal(k_x, (N, channel, H, W), dtype=jnp.float32)
    lr = jax.random.normal(k_lr, (N, 32, H // 4, W // 4), dtype=jnp.float32)
    pan = jax.random.normal(k_pan, (N, 3, H, W), dtype=jnp.float32)

    fwd = jax.jit(functools.partial(att_conv_forward, msfa=msfa))
    out = fwd(params, x, lr, pan)
    out = jax.block_until_ready(out)

    assert out.shape == (N, channel, H, W)
    assert bool(jnp.all(jnp.isfinite(out)))
    print("KERNEL_OK")
</pallas_src>

<mosaic_0001>
module attributes {stable_mosaic.version = 11 : i64} {
  func.func @_share_conv_kernel(%arg0: i32, %arg1: memref<6x6x16x128xbf16, #tpu.memory_space<vmem>>, %arg2: memref<1152x128xbf16, #tpu.memory_space<vmem>>, %arg3: memref<1x128xf32, #tpu.memory_space<vmem>>, %arg4: memref<4x4x16x128xbf16, #tpu.memory_space<vmem>>) attributes {dimension_semantics = [#tpu.dimension_semantics<parallel>], iteration_bounds = array<i64: 1>, scalar_prefetch = 0 : i64, scratch_operands = 0 : i64, tpu.core_type = #tpu.core_type<tc>, window_params = [{transform_indices = @transform_0, window_bounds = array<i64: 6, 6, 16, 128>}, {pipeline_mode = #tpu.pipeline_mode<synchronous>, transform_indices = @transform_1, window_bounds = array<i64: 1152, 128>}, {pipeline_mode = #tpu.pipeline_mode<synchronous>, transform_indices = @transform_2, window_bounds = array<i64: 1, 128>}, {transform_indices = @transform_3, window_bounds = array<i64: 4, 4, 16, 128>}]} {
    %c0 = arith.constant 0 : index
    %c0_0 = arith.constant 0 : index
    %c0_1 = arith.constant 0 : index
    %c0_2 = arith.constant 0 : index
    %0 = vector.load %arg1[%c0, %c0_0, %c0_1, %c0_2] : memref<6x6x16x128xbf16, #tpu.memory_space<vmem>>, vector<4x4x16x128xbf16>
    %c0_3 = arith.constant 0 : index
    %c1 = arith.constant 1 : index
    %c0_4 = arith.constant 0 : index
    %c0_5 = arith.constant 0 : index
    %1 = vector.load %arg1[%c0_3, %c1, %c0_4, %c0_5] : memref<6x6x16x128xbf16, #tpu.memory_space<vmem>>, vector<4x4x16x128xbf16>
    %c0_6 = arith.constant 0 : index
    %c2 = arith.constant 2 : index
    %c0_7 = arith.constant 0 : index
    %c0_8 = arith.constant 0 : index
    %2 = vector.load %arg1[%c0_6, %c2, %c0_7, %c0_8] : memref<6x6x16x128xbf16, #tpu.memory_space<vmem>>, vector<4x4x16x128xbf16>
    %c1_9 = arith.constant 1 : index
    %c0_10 = arith.constant 0 : index
    %c0_11 = arith.constant 0 : index
    %c0_12 = arith.constant 0 : index
    %3 = vector.load %arg1[%c1_9, %c0_10, %c0_11, %c0_12] : memref<6x6x16x128xbf16, #tpu.memory_space<vmem>>, vector<4x4x16x128xbf16>
    %c1_13 = arith.constant 1 : index
    %c1_14 = arith.constant 1 : index
    %c0_15 = arith.constant 0 : index
    %c0_16 = arith.constant 0 : index
    %4 = vector.load %arg1[%c1_13, %c1_14, %c0_15, %c0_16] : memref<6x6x16x128xbf16, #tpu.memory_space<vmem>>, vector<4x4x16x128xbf16>
    %c1_17 = arith.constant 1 : index
    %c2_18 = arith.constant 2 : index
    %c0_19 = arith.constant 0 : index
    %c0_20 = arith.constant 0 : index
    %5 = vector.load %arg1[%c1_17, %c2_18, %c0_19, %c0_20] : memref<6x6x16x128xbf16, #tpu.memory_space<vmem>>, vector<4x4x16x128xbf16>
    %c2_21 = arith.constant 2 : index
    %c0_22 = arith.constant 0 : index
    %c0_23 = arith.constant 0 : index
    %c0_24 = arith.constant 0 : index
    %6 = vector.load %arg1[%c2_21, %c0_22, %c0_23, %c0_24] : memref<6x6x16x128xbf16, #tpu.memory_space<vmem>>, vector<4x4x16x128xbf16>
    %c2_25 = arith.constant 2 : index
    %c1_26 = arith.constant 1 : index
    %c0_27 = arith.constant 0 : index
    %c0_28 = arith.constant 0 : index
    %7 = vector.load %arg1[%c2_25, %c1_26, %c0_27, %c0_28] : memref<6x6x16x128xbf16, #tpu.memory_space<vmem>>, vector<4x4x16x128xbf16>
    %c2_29 = arith.constant 2 : index
    %c2_30 = arith.constant 2 : index
    %c0_31 = arith.constant 0 : index
    %c0_32 = arith.constant 0 : index
    %8 = vector.load %arg1[%c2_29, %c2_30, %c0_31, %c0_32] : memref<6x6x16x128xbf16, #tpu.memory_space<vmem>>, vector<4x4x16x128xbf16>
    %9 = tpu.concatenate %0, %1, %2, %3, %4, %5, %6, %7, %8 in 3 : vector<4x4x16x128xbf16>, vector<4x4x16x128xbf16>, vector<4x4x16x128xbf16>, vector<4x4x16x128xbf16>, vector<4x4x16x128xbf16>, vector<4x4x16x128xbf16>, vector<4x4x16x128xbf16>, vector<4x4x16x128xbf16>, vector<4x4x16x128xbf16> -> vector<4x4x16x1152xbf16>
    %10 = vector.shape_cast %9 : vector<4x4x16x1152xbf16> to vector<256x1152xbf16>
    %c0_33 = arith.constant 0 : index
    %c0_34 = arith.constant 0 : index
    %11 = vector.load %arg2[%c0_33, %c0_34] : memref<1152x128xbf16, #tpu.memory_space<vmem>>, vector<1152x128xbf16>
    %cst = arith.constant dense<0.000000e+00> : vector<256x128xf32>
    %12 = tpu.matmul %10, %11, %cst {dimension_numbers = #tpu.dot_dimension_numbers<[1], [0], [0], [1], [0, 0, 1, 1], [], []>} : vector<256x1152xbf16>, vector<1152x128xbf16>, vector<256x128xf32> -> vector<256x128xf32>
    %c0_35 = arith.constant 0 : index
    %c0_36 = arith.constant 0 : index
    %13 = vector.load %arg3[%c0_35, %c0_36] : memref<1x128xf32, #tpu.memory_space<vmem>>, vector<1x128xf32>
    %14 = vector.broadcast %13 : vector<1x128xf32> to vector<256x128xf32>
    %15 = arith.addf %12, %14 : vector<256x128xf32>
    %cst_37 = arith.constant 0.000000e+00 : f32
    %16 = vector.broadcast %cst_37 : f32 to vector<256x128xf32>
    %17 = arith.cmpf oge, %15, %16 : vector<256x128xf32>
    %cst_38 = arith.constant 2.000000e-01 : f32
    %18 = vector.broadcast %cst_38 : f32 to vector<256x128xf32>
    %19 = arith.mulf %18, %15 : vector<256x128xf32>
    %20 = arith.select %17, %15, %19 : vector<256x128xi1>, vector<256x128xf32>
    %21 = vector.shape_cast %20 : vector<256x128xf32> to vector<4x4x16x128xf32>
    %22 = arith.truncf %21 : vector<4x4x16x128xf32> to vector<4x4x16x128xbf16>
    %c0_39 = arith.constant 0 : index
    %c0_40 = arith.constant 0 : index
    %c0_41 = arith.constant 0 : index
    %c0_42 = arith.constant 0 : index
    %23 = vector.load %arg4[%c0_39, %c0_40, %c0_41, %c0_42] : memref<4x4x16x128xbf16, #tpu.memory_space<vmem>>, vector<4x4x16x128xbf16>
    tpu.vector_store %arg4[%c0_39, %c0_40, %c0_41, %c0_42], %22 {strides = array<i32>} : memref<4x4x16x128xbf16, #tpu.memory_space<vmem>>, vector<4x4x16x128xbf16>,
    return
  }
  func.func @transform_0(%arg0: i32) -> (i32, i32, i32, i32) {
    %c0_i32 = arith.constant 0 : i32
    %c0_i32_0 = arith.constant 0 : i32
    %c0_i32_1 = arith.constant 0 : i32
    %c0_i32_2 = arith.constant 0 : i32
    return %c0_i32, %c0_i32_0, %arg0, %c0_i32_1 : i32, i32, i32, i32
  }
  func.func @transform_1(%arg0: i32) -> (i32, i32) {
    %c0_i32 = arith.constant 0 : i32
    %c0_i32_0 = arith.constant 0 : i32
    %c0_i32_1 = arith.constant 0 : i32
    return %c0_i32, %c0_i32_0 : i32, i32
  }
  func.func @transform_2(%arg0: i32) -> (i32, i32) {
    %c0_i32 = arith.constant 0 : i32
    %c0_i32_0 = arith.constant 0 : i32
    %c0_i32_1 = arith.constant 0 : i32
    return %c0_i32, %c0_i32_0 : i32, i32
  }
  func.func @transform_3(%arg0: i32) -> (i32, i32, i32, i32) {
    %c0_i32 = arith.constant 0 : i32
    %c0_i32_0 = arith.constant 0 : i32
    %c0_i32_1 = arith.constant 0 : i32
    %c0_i32_2 = arith.constant 0 : i32
    return %c0_i32, %c0_i32_0, %arg0, %c0_i32_1 : i32, i32, i32, i32
  }
}

module attributes {stable_mosaic.version = 11 : i64} {
  func.func @_conv3x3_mean_kernel(%arg0: i32, %arg1: memref<1x18x18x64xbf16, #tpu.memory_space<vmem>>, %arg2: memref<576x64xbf16, #tpu.memory_space<vmem>>, %arg3: memref<1x64xf32, #tpu.memory_space<vmem>>, %arg4: memref<1x256x64xbf16, #tpu.memory_space<vmem>>, %arg5: memref<1x1x64xf32, #tpu.memory_space<vmem>>) attributes {dimension_semantics = [#tpu.dimension_semantics<parallel>], iteration_bounds = array<i64: 2>, scalar_prefetch = 0 : i64, scratch_operands = 0 : i64, tpu.core_type = #tpu.core_type<tc>, window_params = [{transform_indices = @transform_0, window_bounds = array<i64: 1, 18, 18, 64>}, {pipeline_mode = #tpu.pipeline_mode<synchronous>, transform_indices = @transform_1, window_bounds = array<i64: 576, 64>}, {pipeline_mode = #tpu.pipeline_mode<synchronous>, transform_indices = @transform_2, window_bounds = array<i64: 1, 64>}, {transform_indices = @transform_3, window_bounds = array<i64: 1, 256, 64>}, {transform_indices = @transform_4, window_bounds = array<i64: 1, 1, 64>}]} {
    %c0 = arith.constant 0 : index
    %c0_0 = arith.constant 0 : index
    %c0_1 = arith.constant 0 : index
    %c0_2 = arith.constant 0 : index
    %0 = vector.load %arg1[%c0, %c0_0, %c0_1, %c0_2] : memref<1x18x18x64xbf16, #tpu.memory_space<vmem>>, vector<1x16x16x64xbf16>
    %1 = vector.shape_cast %0 : vector<1x16x16x64xbf16> to vector<16x16x64xbf16>
    %c0_3 = arith.constant 0 : index
    %c0_4 = arith.constant 0 : index
    %c1 = arith.constant 1 : index
    %c0_5 = arith.constant 0 : index
    %2 = vector.load %arg1[%c0_3, %c0_4, %c1, %c0_5] : memref<1x18x18x64xbf16, #tpu.memory_space<vmem>>, vector<1x16x16x64xbf16>
    %3 = vector.shape_cast %2 : vector<1x16x16x64xbf16> to vector<16x16x64xbf16>
    %c0_6 = arith.constant 0 : index
    %c0_7 = arith.constant 0 : index
    %c2 = arith.constant 2 : index
    %c0_8 = arith.constant 0 : index
    %4 = vector.load %arg1[%c0_6, %c0_7, %c2, %c0_8] : memref<1x18x18x64xbf16, #tpu.memory_space<vmem>>, vector<1x16x16x64xbf16>
    %5 = vector.shape_cast %4 : vector<1x16x16x64xbf16> to vector<16x16x64xbf16>
    %c0_9 = arith.constant 0 : index
    %c1_10 = arith.constant 1 : index
    %c0_11 = arith.constant 0 : index
    %c0_12 = arith.constant 0 : index
    %6 = vector.load %arg1[%c0_9, %c1_10, %c0_11, %c0_12] : memref<1x18x18x64xbf16, #tpu.memory_space<vmem>>, vector<1x16x16x64xbf16>
    %7 = vector.shape_cast %6 : vector<1x16x16x64xbf16> to vector<16x16x64xbf16>
    %c0_13 = arith.constant 0 : index
    %c1_14 = arith.constant 1 : index
    %c1_15 = arith.constant 1 : index
    %c0_16 = arith.constant 0 : index
    %8 = vector.load %arg1[%c0_13, %c1_14, %c1_15, %c0_16] : memref<1x18x18x64xbf16, #tpu.memory_space<vmem>>, vector<1x16x16x64xbf16>
    %9 = vector.shape_cast %8 : vector<1x16x16x64xbf16> to vector<16x16x64xbf16>
    %c0_17 = arith.constant 0 : index
    %c1_18 = arith.constant 1 : index
    %c2_19 = arith.constant 2 : index
    %c0_20 = arith.constant 0 : index
    %10 = vector.load %arg1[%c0_17, %c1_18, %c2_19, %c0_20] : memref<1x18x18x64xbf16, #tpu.memory_space<vmem>>, vector<1x16x16x64xbf16>
    %11 = vector.shape_cast %10 : vector<1x16x16x64xbf16> to vector<16x16x64xbf16>
    %c0_21 = arith.constant 0 : index
    %c2_22 = arith.constant 2 : index
    %c0_23 = arith.constant 0 : index
    %c0_24 = arith.constant 0 : index
    %12 = vector.load %arg1[%c0_21, %c2_22, %c0_23, %c0_24] : memref<1x18x18x64xbf16, #tpu.memory_space<vmem>>, vector<1x16x16x64xbf16>
    %13 = vector.shape_cast %12 : vector<1x16x16x64xbf16> to vector<16x16x64xbf16>
    %c0_25 = arith.constant 0 : index
    %c2_26 = arith.constant 2 : index
    %c1_27 = arith.constant 1 : index
    %c0_28 = arith.constant 0 : index
    %14 = vector.load %arg1[%c0_25, %c2_26, %c1_27, %c0_28] : memref<1x18x18x64xbf16, #tpu.memory_space<vmem>>, vector<1x16x16x64xbf16>
    %15 = vector.shape_cast %14 : vector<1x16x16x64xbf16> to vector<16x16x64xbf16>
    %c0_29 = arith.constant 0 : index
    %c2_30 = arith.constant 2 : index
    %c2_31 = arith.constant 2 : index
    %c0_32 = arith.constant 0 : index
    %16 = vector.load %arg1[%c0_29, %c2_30, %c2_31, %c0_32] : memref<1x18x18x64xbf16, #tpu.memory_space<vmem>>, vector<1x16x16x64xbf16>
    %17 = vector.shape_cast %16 : vector<1x16x16x64xbf16> to vector<16x16x64xbf16>
    %18 = tpu.concatenate %1, %3, %5, %7, %9, %11, %13, %15, %17 in 2 : vector<16x16x64xbf16>, vector<16x16x64xbf16>, vector<16x16x64xbf16>, vector<16x16x64xbf16>, vector<16x16x64xbf16>, vector<16x16x64xbf16>, vector<16x16x64xbf16>, vector<16x16x64xbf16>, vector<16x16x64xbf16> -> vector<16x16x576xbf16>
    %19 = vector.shape_cast %18 : vector<16x16x576xbf16> to vector<256x576xbf16>
    %c0_33 = arith.constant 0 : index
    %c0_34 = arith.constant 0 : index
    %20 = vector.load %arg2[%c0_33, %c0_34] : memref<576x64xbf16, #tpu.memory_space<vmem>>, vector<576x64xbf16>
    %cst = arith.constant dense<0.000000e+00> : vector<256x64xf32>
    %21 = tpu.matmul %19, %20, %cst {dimension_numbers = #tpu.dot_dimension_numbers<[1], [0], [0], [1], [0, 0, 1, 1], [], []>} : vector<256x576xbf16>, vector<576x64xbf16>, vector<256x64xf32> -> vector<256x64xf32>
    %c0_35 = arith.constant 0 : index
    %c0_36 = arith.constant 0 : index
    %22 = vector.load %arg3[%c0_35, %c0_36] : memref<1x64xf32, #tpu.memory_space<vmem>>, vector<1x64xf32>
    %23 = vector.broadcast %22 : vector<1x64xf32> to vector<256x64xf32>
    %24 = arith.addf %21, %23 : vector<256x64xf32>
    %cst_37 = arith.constant 0.000000e+00 : f32
    %25 = vector.broadcast %cst_37 : f32 to vector<256x64xf32>
    %26 = arith.cmpf oge, %24, %25 : vector<256x64xf32>
    %cst_38 = arith.constant 2.000000e-01 : f32
    %27 = vector.broadcast %cst_38 : f32 to vector<256x64xf32>
    %28 = arith.mulf %27, %24 : vector<256x64xf32>
    %29 = arith.select %26, %24, %28 : vector<256x64xi1>, vector<256x64xf32>
    %30 = arith.truncf %29 : vector<256x64xf32> to vector<256x64xbf16>
    %c0_39 = arith.constant 0 : index
    %c0_40 = arith.constant 0 : index
    %c0_41 = arith.constant 0 : index
    %31 = vector.load %arg4[%c0_39, %c0_40, %c0_41] : memref<1x256x64xbf16, #tpu.memory_space<vmem>>, vector<1x256x64xbf16>
    %32 = vector.shape_cast %31 : vector<1x256x64xbf16> to vector<256x64xbf16>
    %33 = vector.shape_cast %30 : vector<256x64xbf16> to vector<1x256x64xbf16>
    tpu.vector_store %arg4[%c0_39, %c0_40, %c0_41], %33 {strides = array<i32>} : memref<1x256x64xbf16, #tpu.memory_space<vmem>>, vector<1x256x64xbf16>,
    %cst_42 = arith.constant dense<0.000000e+00> : vector<64xf32>
    %34 = vector.multi_reduction <add>, %29, %cst_42 [0] : vector<256x64xf32> to vector<64xf32>
    %35 = vector.shape_cast %34 : vector<64xf32> to vector<1x64xf32>
    %cst_43 = arith.constant 2.560000e+02 : f32
    %36 = vector.broadcast %cst_43 : f32 to vector<1x64xf32>
    %37 = arith.divf %35, %36 : vector<1x64xf32>
    %c0_44 = arith.constant 0 : index
    %c0_45 = arith.constant 0 : index
    %c0_46 = arith.constant 0 : index
    %38 = vector.load %arg5[%c0_44, %c0_45, %c0_46] : memref<1x1x64xf32, #tpu.memory_space<vmem>>, vector<1x1x64xf32>
    %39 = vector.shape_cast %38 : vector<1x1x64xf32> to vector<1x64xf32>
    %40 = vector.shape_cast %37 : vector<1x64xf32> to vector<1x1x64xf32>
    tpu.vector_store %arg5[%c0_44, %c0_45, %c0_46], %40 {strides = array<i32>} : memref<1x1x64xf32, #tpu.memory_space<vmem>>, vector<1x1x64xf32>,
    return
  }
  func.func @transform_0(%arg0: i32) -> (i32, i32, i32, i32) {
    %c0_i32 = arith.constant 0 : i32
    %c0_i32_0 = arith.constant 0 : i32
    %c0_i32_1 = arith.constant 0 : i32
    %c0_i32_2 = arith.constant 0 : i32
    return %arg0, %c0_i32, %c0_i32_0, %c0_i32_1 : i32, i32, i32, i32
  }
  func.func @transform_1(%arg0: i32) -> (i32, i32) {
    %c0_i32 = arith.constant 0 : i32
    %c0_i32_0 = arith.constant 0 : i32
    %c0_i32_1 = arith.constant 0 : i32
    return %c0_i32, %c0_i32_0 : i32, i32
  }
  func.func @transform_2(%arg0: i32) -> (i32, i32) {
    %c0_i32 = arith.constant 0 : i32
    %c0_i32_0 = arith.constant 0 : i32
    %c0_i32_1 = arith.constant 0 : i32
    return %c0_i32, %c0_i32_0 : i32, i32
  }
  func.func @transform_3(%arg0: i32) -> (i32, i32, i32) {
    %c0_i32 = arith.constant 0 : i32
    %c0_i32_0 = arith.constant 0 : i32
    %c0_i32_1 = arith.constant 0 : i32
    return %arg0, %c0_i32, %c0_i32_0 : i32, i32, i32
  }
  func.func @transform_4(%arg0: i32) -> (i32, i32, i32) {
    %c0_i32 = arith.constant 0 : i32
    %c0_i32_0 = arith.constant 0 : i32
    %c0_i32_1 = arith.constant 0 : i32
    return %arg0, %c0_i32, %c0_i32_0 : i32, i32, i32
  }
}

module attributes {stable_mosaic.version = 11 : i64} {
  func.func @_awsca_kernel(%arg0: i32, %arg1: memref<1x1x64xf32, #tpu.memory_space<vmem>>, %arg2: memref<1x3x256xf32, #tpu.memory_space<vmem>>, %arg3: memref<1x16x32xf32, #tpu.memory_space<vmem>>, %arg4: memref<1x16x2304xbf16, #tpu.memory_space<vmem>>, %arg5: memref<2304x64xbf16, #tpu.memory_space<vmem>>, %arg6: memref<1x64xf32, #tpu.memory_space<vmem>>, %arg7: memref<3x64xf32, #tpu.memory_space<vmem>>, %arg8: memref<32x64xf32, #tpu.memory_space<vmem>>, %arg9: memref<1x64xf32, #tpu.memory_space<vmem>>, %arg10: memref<64x4xf32, #tpu.memory_space<vmem>>, %arg11: memref<4x64xf32, #tpu.memory_space<vmem>>, %arg12: memref<1x1xf32, #tpu.memory_space<vmem>>, %arg13: memref<1x1x256xf32, #tpu.memory_space<vmem>>, %arg14: memref<1x1x64xf32, #tpu.memory_space<vmem>>) attributes {dimension_semantics = [#tpu.dimension_semantics<parallel>], iteration_bounds = array<i64: 2>, scalar_prefetch = 0 : i64, scratch_operands = 0 : i64, tpu.core_type = #tpu.core_type<tc>, window_params = [{transform_indices = @transform_0, window_bounds = array<i64: 1, 1, 64>}, {transform_indices = @transform_1, window_bounds = array<i64: 1, 3, 256>}, {transform_indices = @transform_2, window_bounds = array<i64: 1, 16, 32>}, {transform_indices = @transform_3, window_bounds = array<i64: 1, 16, 2304>}, {pipeline_mode = #tpu.pipeline_mode<synchronous>, transform_indices = @transform_4, window_bounds = array<i64: 2304, 64>}, {pipeline_mode = #tpu.pipeline_mode<synchronous>, transform_indices = @transform_5, window_bounds = array<i64: 1, 64>}, {pipeline_mode = #tpu.pipeline_mode<synchronous>, transform_indices = @transform_6, window_bounds = array<i64: 3, 64>}, {pipeline_mode = #tpu.pipeline_mode<synchronous>, transform_indices = @transform_7, window_bounds = array<i64: 32, 64>}, {pipeline_mode = #tpu.pipeline_mode<synchronous>, transform_indices = @transform_8, window_bounds = array<i64: 1, 64>}, {pipeline_mode = #tpu.pipeline_mode<synchronous>, transform_indices = @transform_9, window_bounds = array<i64: 64, 4>}, {pipeline_mode = #tpu.pipeline_mode<synchronous>, transform_indices = @transform_10, window_bounds = array<i64: 4, 64>}, {pipeline_mode = #tpu.pipeline_mode<synchronous>, transform_indices = @transform_11, window_bounds = array<i64: 1, 1>}, {transform_indices = @transform_12, window_bounds = array<i64: 1, 1, 256>}, {transform_indices = @transform_13, window_bounds = array<i64: 1, 1, 64>}]} {
    %c0 = arith.constant 0 : index
    %c0_0 = arith.constant 0 : index
    %c0_1 = arith.constant 0 : index
    %0 = vector.load %arg1[%c0, %c0_0, %c0_1] : memref<1x1x64xf32, #tpu.memory_space<vmem>>, vector<1x1x64xf32>
    %1 = vector.shape_cast %0 : vector<1x1x64xf32> to vector<1x64xf32>
    %c0_2 = arith.constant 0 : index
    %c0_3 = arith.constant 0 : index
    %2 = vector.load %arg7[%c0_2, %c0_3] : memref<3x64xf32, #tpu.memory_space<vmem>>, vector<3x64xf32>
    %3 = vector.broadcast %1 : vector<1x64xf32> to vector<3x64xf32>
    %4 = arith.mulf %2, %3 : vector<3x64xf32>
    %cst = arith.constant dense<0.000000e+00> : vector<3xf32>
    %5 = vector.multi_reduction <add>, %4, %cst [1] : vector<3x64xf32> to vector<3xf32>
    %6 = vector.shape_cast %5 : vector<3xf32> to vector<3x1xf32>
    %c0_4 = arith.constant 0 : index
    %c0_5 = arith.constant 0 : index
    %c0_6 = arith.constant 0 : index
    %7 = vector.load %arg2[%c0_4, %c0_5, %c0_6] : memref<1x3x256xf32, #tpu.memory_space<vmem>>, vector<1x3x256xf32>
    %8 = vector.shape_cast %7 : vector<1x3x256xf32> to vector<3x256xf32>
    %9 = vector.broadcast %6 : vector<3x1xf32> to vector<3x256xf32>
    %10 = arith.mulf %9, %8 : vector<3x256xf32>
    %cst_7 = arith.constant dense<0.000000e+00> : vector<256xf32>
    %11 = vector.multi_reduction <add>, %10, %cst_7 [0] : vector<3x256xf32> to vector<256xf32>
    %12 = vector.shape_cast %11 : vector<256xf32> to vector<1x256xf32>
    %c0_8 = arith.constant 0 : index
    %c0_9 = arith.constant 0 : index
    %c0_10 = arith.constant 0 : index
    %13 = vector.load %arg13[%c0_8, %c0_9, %c0_10] : memref<1x1x256xf32, #tpu.memory_space<vmem>>, vector<1x1x256xf32>
    %14 = vector.shape_cast %13 : vector<1x1x256xf32> to vector<1x256xf32>
    %15 = vector.shape_cast %12 : vector<1x256xf32> to vector<1x1x256xf32>
    tpu.vector_store %arg13[%c0_8, %c0_9, %c0_10], %15 {strides = array<i32>} : memref<1x1x256xf32, #tpu.memory_space<vmem>>, vector<1x1x256xf32>,
    %c0_11 = arith.constant 0 : index
    %c0_12 = arith.constant 0 : index
    %c0_13 = arith.constant 0 : index
    %16 = vector.load %arg4[%c0_11, %c0_12, %c0_13] : memref<1x16x2304xbf16, #tpu.memory_space<vmem>>, vector<1x16x2304xbf16>
    %17 = vector.shape_cast %16 : vector<1x16x2304xbf16> to vector<16x2304xbf16>
    %c0_14 = arith.constant 0 : index
    %c0_15 = arith.constant 0 : index
    %18 = vector.load %arg5[%c0_14, %c0_15] : memref<2304x64xbf16, #tpu.memory_space<vmem>>, vector<2304x64xbf16>
    %cst_16 = arith.constant dense<0.000000e+00> : vector<16x64xf32>
    %19 = tpu.matmul %17, %18, %cst_16 {dimension_numbers = #tpu.dot_dimension_numbers<[1], [0], [0], [1], [0, 0, 1, 1], [], []>} : vector<16x2304xbf16>, vector<2304x64xbf16>, vector<16x64xf32> -> vector<16x64xf32>
    %c0_17 = arith.constant 0 : index
    %c0_18 = arith.constant 0 : index
    %20 = vector.load %arg6[%c0_17, %c0_18] : memref<1x64xf32, #tpu.memory_space<vmem>>, vector<1x64xf32>
    %21 = vector.broadcast %20 : vector<1x64xf32> to vector<16x64xf32>
    %22 = arith.addf %19, %21 : vector<16x64xf32>
    %c0_19 = arith.constant 0 : index
    %c0_20 = arith.constant 0 : index
    %23 = vector.load %arg9[%c0_19, %c0_20] : memref<1x64xf32, #tpu.memory_space<vmem>>, vector<1x64xf32>
    %24 = vector.broadcast %23 : vector<1x64xf32> to vector<16x64xf32>
    %25 = arith.mulf %22, %24 : vector<16x64xf32>
    %cst_21 = arith.constant dense<0.000000e+00> : vector<16xf32>
    %26 = vector.multi_reduction <add>, %25, %cst_21 [1] : vector<16x64xf32> to vector<16xf32>
    %27 = vector.shape_cast %26 : vector<16xf32> to vector<16x1xf32>
    %c0_22 = arith.constant 0 : index
    %c0_23 = arith.constant 0 : index
    %c0_24 = arith.constant 0 : index
    %28 = vector.load %arg3[%c0_22, %c0_23, %c0_24] : memref<1x16x32xf32, #tpu.memory_space<vmem>>, vector<1x16x32xf32>
    %29 = vector.shape_cast %28 : vector<1x16x32xf32> to vector<16x32xf32>
    %30 = vector.broadcast %27 : vector<16x1xf32> to vector<16x32xf32>
    %31 = arith.mulf %29, %30 : vector<16x32xf32>
    %cst_25 = arith.constant dense<0.000000e+00> : vector<32xf32>
    %32 = vector.multi_reduction <add>, %31, %cst_25 [0] : vector<16x32xf32> to vector<32xf32>
    %33 = vector.shape_cast %32 : vector<32xf32> to vector<1x32xf32>
    %c0_26 = arith.constant 0 : index
    %c0_27 = arith.constant 0 : index
    %34 = vector.load %arg8[%c0_26, %c0_27] : memref<32x64xf32, #tpu.memory_space<vmem>>, vector<32x64xf32>
    %cst_28 = arith.constant dense<0.000000e+00> : vector<1x64xf32>
    %35 = tpu.matmul %33, %34, %cst_28 {dimension_numbers = #tpu.dot_dimension_numbers<[1], [0], [0], [1], [0, 0, 1, 1], [], []>} : vector<1x32xf32>, vector<32x64xf32>, vector<1x64xf32> -> vector<1x64xf32>
    %c0_29 = arith.constant 0 : index
    %c0_30 = arith.constant 0 : index
    %36 = vector.load %arg10[%c0_29, %c0_30] : memref<64x4xf32, #tpu.memory_space<vmem>>, vector<64x4xf32>
    %cst_31 = arith.constant dense<0.000000e+00> : vector<1x4xf32>
    %37 = tpu.matmul %35, %36, %cst_31 {dimension_numbers = #tpu.dot_dimension_numbers<[1], [0], [0], [1], [0, 0, 1, 1], [], []>} : vector<1x64xf32>, vector<64x4xf32>, vector<1x4xf32> -> vector<1x4xf32>
    %cst_32 = arith.constant 0.000000e+00 : f32
    %38 = vector.broadcast %cst_32 : f32 to vector<1x4xf32>
    %39 = arith.cmpf oge, %37, %38 : vector<1x4xf32>
    %c0_33 = arith.constant 0 : index
    %c0_34 = arith.constant 0 : index
    %40 = vector.load %arg12[%c0_33, %c0_34] : memref<1x1xf32, #tpu.memory_space<vmem>>, vector<1x1xf32>
    %41 = vector.broadcast %40 : vector<1x1xf32> to vector<1x4xf32>
    %42 = arith.mulf %41, %37 : vector<1x4xf32>
    %43 = arith.select %39, %37, %42 : vector<1x4xi1>, vector<1x4xf32>
    %c0_35 = arith.constant 0 : index
    %c0_36 = arith.constant 0 : index
    %44 = vector.load %arg11[%c0_35, %c0_36] : memref<4x64xf32, #tpu.memory_space<vmem>>, vector<4x64xf32>
    %cst_37 = arith.constant dense<0.000000e+00> : vector<1x64xf32>
    %45 = tpu.matmul %43, %44, %cst_37 {dimension_numbers = #tpu.dot_dimension_numbers<[1], [0], [0], [1], [0, 0, 1, 1], [], []>} : vector<1x4xf32>, vector<4x64xf32>, vector<1x64xf32> -> vector<1x64xf32>
    %46 = arith.negf %45 : vector<1x64xf32>
    %47 = math.exp %46 : vector<1x64xf32>
    %cst_38 = arith.constant 1.000000e+00 : f32
    %48 = vector.broadcast %cst_38 : f32 to vector<1x64xf32>
    %49 = arith.addf %48, %47 : vector<1x64xf32>
    %50 = arith.divf %48, %49 : vector<1x64xf32>
    %c0_39 = arith.constant 0 : index
    %c0_40 = arith.constant 0 : index
    %c0_41 = arith.constant 0 : index
    %51 = vector.load %arg14[%c0_39, %c0_40, %c0_41] : memref<1x1x64xf32, #tpu.memory_space<vmem>>, vector<1x1x64xf32>
    %52 = vector.shape_cast %51 : vector<1x1x64xf32> to vector<1x64xf32>
    %53 = vector.shape_cast %50 : vector<1x64xf32> to vector<1x1x64xf32>
    tpu.vector_store %arg14[%c0_39, %c0_40, %c0_41], %53 {strides = array<i32>} : memref<1x1x64xf32, #tpu.memory_space<vmem>>, vector<1x1x64xf32>,
    return
  }
  func.func @transform_0(%arg0: i32) -> (i32, i32, i32) {
    %c0_i32 = arith.constant 0 : i32
    %c0_i32_0 = arith.constant 0 : i32
    %c0_i32_1 = arith.constant 0 : i32
    return %arg0, %c0_i32, %c0_i32_0 : i32, i32, i32
  }
  func.func @transform_1(%arg0: i32) -> (i32, i32, i32) {
    %c0_i32 = arith.constant 0 : i32
    %c0_i32_0 = arith.constant 0 : i32
    %c0_i32_1 = arith.constant 0 : i32
    return %arg0, %c0_i32, %c0_i32_0 : i32, i32, i32
  }
  func.func @transform_2(%arg0: i32) -> (i32, i32, i32) {
    %c0_i32 = arith.constant 0 : i32
    %c0_i32_0 = arith.constant 0 : i32
    %c0_i32_1 = arith.constant 0 : i32
    return %arg0, %c0_i32, %c0_i32_0 : i32, i32, i32
  }
  func.func @transform_3(%arg0: i32) -> (i32, i32, i32) {
    %c0_i32 = arith.constant 0 : i32
    %c0_i32_0 = arith.constant 0 : i32
    %c0_i32_1 = arith.constant 0 : i32
    return %arg0, %c0_i32, %c0_i32_0 : i32, i32, i32
  }
  func.func @transform_4(%arg0: i32) -> (i32, i32) {
    %c0_i32 = arith.constant 0 : i32
    %c0_i32_0 = arith.constant 0 : i32
    %c0_i32_1 = arith.constant 0 : i32
    return %c0_i32, %c0_i32_0 : i32, i32
  }
  func.func @transform_5(%arg0: i32) -> (i32, i32) {
    %c0_i32 = arith.constant 0 : i32
    %c0_i32_0 = arith.constant 0 : i32
    %c0_i32_1 = arith.constant 0 : i32
    return %c0_i32, %c0_i32_0 : i32, i32
  }
  func.func @transform_6(%arg0: i32) -> (i32, i32) {
    %c0_i32 = arith.constant 0 : i32
    %c0_i32_0 = arith.constant 0 : i32
    %c0_i32_1 = arith.constant 0 : i32
    return %c0_i32, %c0_i32_0 : i32, i32
  }
  func.func @transform_7(%arg0: i32) -> (i32, i32) {
    %c0_i32 = arith.constant 0 : i32
    %c0_i32_0 = arith.constant 0 : i32
    %c0_i32_1 = arith.constant 0 : i32
    return %c0_i32, %c0_i32_0 : i32, i32
  }
  func.func @transform_8(%arg0: i32) -> (i32, i32) {
    %c0_i32 = arith.constant 0 : i32
    %c0_i32_0 = arith.constant 0 : i32
    %c0_i32_1 = arith.constant 0 : i32
    return %c0_i32, %c0_i32_0 : i32, i32
  }
  func.func @transform_9(%arg0: i32) -> (i32, i32) {
    %c0_i32 = arith.constant 0 : i32
    %c0_i32_0 = arith.constant 0 : i32
    %c0_i32_1 = arith.constant 0 : i32
    return %c0_i32, %c0_i32_0 : i32, i32
  }
  func.func @transform_10(%arg0: i32) -> (i32, i32) {
    %c0_i32 = arith.constant 0 : i32
    %c0_i32_0 = arith.constant 0 : i32
    %c0_i32_1 = arith.constant 0 : i32
    return %c0_i32, %c0_i32_0 : i32, i32
  }
  func.func @transform_11(%arg0: i32) -> (i32, i32) {
    %c0_i32 = arith.constant 0 : i32
    %c0_i32_0 = arith.constant 0 : i32
    %c0_i32_1 = arith.constant 0 : i32
    return %c0_i32, %c0_i32_0 : i32, i32
  }
  func.func @transform_12(%arg0: i32) -> (i32, i32, i32) {
    %c0_i32 = arith.constant 0 : i32
    %c0_i32_0 = arith.constant 0 : i32
    %c0_i32_1 = arith.constant 0 : i32
    return %arg0, %c0_i32, %c0_i32_0 : i32, i32, i32
  }
  func.func @transform_13(%arg0: i32) -> (i32, i32, i32) {
    %c0_i32 = arith.constant 0 : i32
    %c0_i32_0 = arith.constant 0 : i32
    %c0_i32_1 = arith.constant 0 : i32
    return %arg0, %c0_i32, %c0_i32_0 : i32, i32, i32
  }
}

module attributes {stable_mosaic.version = 11 : i64} {
  func.func @_final_gated_kernel(%arg0: i32, %arg1: memref<1x18x18x64xbf16, #tpu.memory_space<vmem>>, %arg2: memref<1x20x20x1xf32, #tpu.memory_space<vmem>>, %arg3: memref<1x1x64xf32, #tpu.memory_space<vmem>>, %arg4: memref<1x256x64xf32, #tpu.memory_space<vmem>>, %arg5: memref<576x64xbf16, #tpu.memory_space<vmem>>, %arg6: memref<1x64xf32, #tpu.memory_space<vmem>>, %arg7: memref<9xf32, #tpu.memory_space<smem>>, %arg8: memref<1x256x64xf32, #tpu.memory_space<vmem>>) attributes {dimension_semantics = [#tpu.dimension_semantics<parallel>], iteration_bounds = array<i64: 2>, scalar_prefetch = 0 : i64, scratch_operands = 0 : i64, tpu.core_type = #tpu.core_type<tc>, window_params = [{transform_indices = @transform_0, window_bounds = array<i64: 1, 18, 18, 64>}, {transform_indices = @transform_1, window_bounds = array<i64: 1, 20, 20, 1>}, {transform_indices = @transform_2, window_bounds = array<i64: 1, 1, 64>}, {transform_indices = @transform_3, window_bounds = array<i64: 1, 256, 64>}, {pipeline_mode = #tpu.pipeline_mode<synchronous>, transform_indices = @transform_4, window_bounds = array<i64: 576, 64>}, {pipeline_mode = #tpu.pipeline_mode<synchronous>, transform_indices = @transform_5, window_bounds = array<i64: 1, 64>}, {transform_indices = @transform_6, window_bounds = array<i64: 9>}, {transform_indices = @transform_7, window_bounds = array<i64: 1, 256, 64>}]} {
    %cst = arith.constant 0.000000e+00 : f32
    %0 = vector.broadcast %cst : f32 to vector<18x18x1xf32>
    %c0 = arith.constant 0 : index
    %1 = memref.load %arg7[%c0] : memref<9xf32, #tpu.memory_space<smem>>
    %c0_0 = arith.constant 0 : index
    %c0_1 = arith.constant 0 : index
    %c0_2 = arith.constant 0 : index
    %c0_3 = arith.constant 0 : index
    %2 = vector.load %arg2[%c0_0, %c0_1, %c0_2, %c0_3] : memref<1x20x20x1xf32, #tpu.memory_space<vmem>>, vector<1x18x18x1xf32>
    %3 = vector.shape_cast %2 : vector<1x18x18x1xf32> to vector<18x18x1xf32>
    %4 = vector.broadcast %1 : f32 to vector<18x18x1xf32>
    %5 = arith.mulf %4, %3 : vector<18x18x1xf32>
    %6 = arith.addf %0, %5 : vector<18x18x1xf32>
    %c1 = arith.constant 1 : index
    %7 = memref.load %arg7[%c1] : memref<9xf32, #tpu.memory_space<smem>>
    %c0_4 = arith.constant 0 : index
    %c0_5 = arith.constant 0 : index
    %c1_6 = arith.constant 1 : index
    %c0_7 = arith.constant 0 : index
    %8 = vector.load %arg2[%c0_4, %c0_5, %c1_6, %c0_7] : memref<1x20x20x1xf32, #tpu.memory_space<vmem>>, vector<1x18x18x1xf32>
    %9 = vector.shape_cast %8 : vector<1x18x18x1xf32> to vector<18x18x1xf32>
    %10 = vector.broadcast %7 : f32 to vector<18x18x1xf32>
    %11 = arith.mulf %10, %9 : vector<18x18x1xf32>
    %12 = arith.addf %6, %11 : vector<18x18x1xf32>
    %c2 = arith.constant 2 : index
    %13 = memref.load %arg7[%c2] : memref<9xf32, #tpu.memory_space<smem>>
    %c0_8 = arith.constant 0 : index
    %c0_9 = arith.constant 0 : index
    %c2_10 = arith.constant 2 : index
    %c0_11 = arith.constant 0 : index
    %14 = vector.load %arg2[%c0_8, %c0_9, %c2_10, %c0_11] : memref<1x20x20x1xf32, #tpu.memory_space<vmem>>, vector<1x18x18x1xf32>
    %15 = vector.shape_cast %14 : vector<1x18x18x1xf32> to vector<18x18x1xf32>
    %16 = vector.broadcast %13 : f32 to vector<18x18x1xf32>
    %17 = arith.mulf %16, %15 : vector<18x18x1xf32>
    %18 = arith.addf %12, %17 : vector<18x18x1xf32>
    %c3 = arith.constant 3 : index
    %19 = memref.load %arg7[%c3] : memref<9xf32, #tpu.memory_space<smem>>
    %c0_12 = arith.constant 0 : index
    %c1_13 = arith.constant 1 : index
    %c0_14 = arith.constant 0 : index
    %c0_15 = arith.constant 0 : index
    %20 = vector.load %arg2[%c0_12, %c1_13, %c0_14, %c0_15] : memref<1x20x20x1xf32, #tpu.memory_space<vmem>>, vector<1x18x18x1xf32>
    %21 = vector.shape_cast %20 : vector<1x18x18x1xf32> to vector<18x18x1xf32>
    %22 = vector.broadcast %19 : f32 to vector<18x18x1xf32>
    %23 = arith.mulf %22, %21 : vector<18x18x1xf32>
    %24 = arith.addf %18, %23 : vector<18x18x1xf32>
    %c4 = arith.constant 4 : index
    %25 = memref.load %arg7[%c4] : memref<9xf32, #tpu.memory_space<smem>>
    %c0_16 = arith.constant 0 : index
    %c1_17 = arith.constant 1 : index
    %c1_18 = arith.constant 1 : index
    %c0_19 = arith.constant 0 : index
    %26 = vector.load %arg2[%c0_16, %c1_17, %c1_18, %c0_19] : memref<1x20x20x1xf32, #tpu.memory_space<vmem>>, vector<1x18x18x1xf32>
    %27 = vector.shape_cast %26 : vector<1x18x18x1xf32> to vector<18x18x1xf32>
    %28 = vector.broadcast %25 : f32 to vector<18x18x1xf32>
    %29 = arith.mulf %28, %27 : vector<18x18x1xf32>
    %30 = arith.addf %24, %29 : vector<18x18x1xf32>
    %c5 = arith.constant 5 : index
    %31 = memref.load %arg7[%c5] : memref<9xf32, #tpu.memory_space<smem>>
    %c0_20 = arith.constant 0 : index
    %c1_21 = arith.constant 1 : index
    %c2_22 = arith.constant 2 : index
    %c0_23 = arith.constant 0 : index
    %32 = vector.load %arg2[%c0_20, %c1_21, %c2_22, %c0_23] : memref<1x20x20x1xf32, #tpu.memory_space<vmem>>, vector<1x18x18x1xf32>
    %33 = vector.shape_cast %32 : vector<1x18x18x1xf32> to vector<18x18x1xf32>
    %34 = vector.broadcast %31 : f32 to vector<18x18x1xf32>
    %35 = arith.mulf %34, %33 : vector<18x18x1xf32>
    %36 = arith.addf %30, %35 : vector<18x18x1xf32>
    %c6 = arith.constant 6 : index
    %37 = memref.load %arg7[%c6] : memref<9xf32, #tpu.memory_space<smem>>
    %c0_24 = arith.constant 0 : index
    %c2_25 = arith.constant 2 : index
    %c0_26 = arith.constant 0 : index
    %c0_27 = arith.constant 0 : index
    %38 = vector.load %arg2[%c0_24, %c2_25, %c0_26, %c0_27] : memref<1x20x20x1xf32, #tpu.memory_space<vmem>>, vector<1x18x18x1xf32>
    %39 = vector.shape_cast %38 : vector<1x18x18x1xf32> to vector<18x18x1xf32>
    %40 = vector.broadcast %37 : f32 to vector<18x18x1xf32>
    %41 = arith.mulf %40, %39 : vector<18x18x1xf32>
    %42 = arith.addf %36, %41 : vector<18x18x1xf32>
    %c7 = arith.constant 7 : index
    %43 = memref.load %arg7[%c7] : memref<9xf32, #tpu.memory_space<smem>>
    %c0_28 = arith.constant 0 : index
    %c2_29 = arith.constant 2 : index
    %c1_30 = arith.constant 1 : index
    %c0_31 = arith.constant 0 : index
    %44 = vector.load %arg2[%c0_28, %c2_29, %c1_30, %c0_31] : memref<1x20x20x1xf32, #tpu.memory_space<vmem>>, vector<1x18x18x1xf32>
    %45 = vector.shape_cast %44 : vector<1x18x18x1xf32> to vector<18x18x1xf32>
    %46 = vector.broadcast %43 : f32 to vector<18x18x1xf32>
    %47 = arith.mulf %46, %45 : vector<18x18x1xf32>
    %48 = arith.addf %42, %47 : vector<18x18x1xf32>
    %c8 = arith.constant 8 : index
    %49 = memref.load %arg7[%c8] : memref<9xf32, #tpu.memory_space<smem>>
    %c0_32 = arith.constant 0 : index
    %c2_33 = arith.constant 2 : index
    %c2_34 = arith.constant 2 : index
    %c0_35 = arith.constant 0 : index
    %50 = vector.load %arg2[%c0_32, %c2_33, %c2_34, %c0_35] : memref<1x20x20x1xf32, #tpu.memory_space<vmem>>, vector<1x18x18x1xf32>
    %51 = vector.shape_cast %50 : vector<1x18x18x1xf32> to vector<18x18x1xf32>
    %52 = vector.broadcast %49 : f32 to vector<18x18x1xf32>
    %53 = arith.mulf %52, %51 : vector<18x18x1xf32>
    %54 = arith.addf %48, %53 : vector<18x18x1xf32>
    %55 = arith.negf %54 : vector<18x18x1xf32>
    %56 = math.exp %55 : vector<18x18x1xf32>
    %cst_36 = arith.constant 1.000000e+00 : f32
    %57 = vector.broadcast %cst_36 : f32 to vector<18x18x1xf32>
    %58 = arith.addf %57, %56 : vector<18x18x1xf32>
    %59 = arith.divf %57, %58 : vector<18x18x1xf32>
    %c0_37 = arith.constant 0 : index
    %c0_38 = arith.constant 0 : index
    %c0_39 = arith.constant 0 : index
    %c0_40 = arith.constant 0 : index
    %60 = vector.load %arg1[%c0_37, %c0_38, %c0_39, %c0_40] : memref<1x18x18x64xbf16, #tpu.memory_space<vmem>>, vector<1x18x18x64xbf16>
    %61 = vector.shape_cast %60 : vector<1x18x18x64xbf16> to vector<18x18x64xbf16>
    %62 = arith.extf %61 : vector<18x18x64xbf16> to vector<18x18x64xf32>
    %63 = vector.broadcast %59 : vector<18x18x1xf32> to vector<18x18x64xf32>
    %64 = arith.mulf %62, %63 : vector<18x18x64xf32>
    %65 = arith.truncf %64 : vector<18x18x64xf32> to vector<18x18x64xbf16>
    %66 = vector.extract_strided_slice %65 {offsets = [0, 0, 0], sizes = [16, 16, 64], strides = [1, 1, 1]} : vector<18x18x64xbf16> to vector<16x16x64xbf16>
    %67 = vector.extract_strided_slice %65 {offsets = [0, 1, 0], sizes = [16, 16, 64], strides = [1, 1, 1]} : vector<18x18x64xbf16> to vector<16x16x64xbf16>
    %68 = vector.extract_strided_slice %65 {offsets = [0, 2, 0], sizes = [16, 16, 64], strides = [1, 1, 1]} : vector<18x18x64xbf16> to vector<16x16x64xbf16>
    %69 = vector.extract_strided_slice %65 {offsets = [1, 0, 0], sizes = [16, 16, 64], strides = [1, 1, 1]} : vector<18x18x64xbf16> to vector<16x16x64xbf16>
    %70 = vector.extract_strided_slice %65 {offsets = [1, 1, 0], sizes = [16, 16, 64], strides = [1, 1, 1]} : vector<18x18x64xbf16> to vector<16x16x64xbf16>
    %71 = vector.extract_strided_slice %65 {offsets = [1, 2, 0], sizes = [16, 16, 64], strides = [1, 1, 1]} : vector<18x18x64xbf16> to vector<16x16x64xbf16>
    %72 = vector.extract_strided_slice %65 {offsets = [2, 0, 0], sizes = [16, 16, 64], strides = [1, 1, 1]} : vector<18x18x64xbf16> to vector<16x16x64xbf16>
    %73 = vector.extract_strided_slice %65 {offsets = [2, 1, 0], sizes = [16, 16, 64], strides = [1, 1, 1]} : vector<18x18x64xbf16> to vector<16x16x64xbf16>
    %74 = vector.extract_strided_slice %65 {offsets = [2, 2, 0], sizes = [16, 16, 64], strides = [1, 1, 1]} : vector<18x18x64xbf16> to vector<16x16x64xbf16>
    %75 = tpu.concatenate %66, %67, %68, %69, %70, %71, %72, %73, %74 in 2 : vector<16x16x64xbf16>, vector<16x16x64xbf16>, vector<16x16x64xbf16>, vector<16x16x64xbf16>, vector<16x16x64xbf16>, vector<16x16x64xbf16>, vector<16x16x64xbf16>, vector<16x16x64xbf16>, vector<16x16x64xbf16> -> vector<16x16x576xbf16>
    %76 = vector.shape_cast %75 : vector<16x16x576xbf16> to vector<256x576xbf16>
    %c0_41 = arith.constant 0 : index
    %c0_42 = arith.constant 0 : index
    %77 = vector.load %arg5[%c0_41, %c0_42] : memref<576x64xbf16, #tpu.memory_space<vmem>>, vector<576x64xbf16>
    %cst_43 = arith.constant dense<0.000000e+00> : vector<256x64xf32>
    %78 = tpu.matmul %76, %77, %cst_43 {dimension_numbers = #tpu.dot_dimension_numbers<[1], [0], [0], [1], [0, 0, 1, 1], [], []>} : vector<256x576xbf16>, vector<576x64xbf16>, vector<256x64xf32> -> vector<256x64xf32>
    %c0_44 = arith.constant 0 : index
    %c0_45 = arith.constant 0 : index
    %79 = vector.load %arg6[%c0_44, %c0_45] : memref<1x64xf32, #tpu.memory_space<vmem>>, vector<1x64xf32>
    %80 = vector.broadcast %79 : vector<1x64xf32> to vector<256x64xf32>
    %81 = arith.addf %78, %80 : vector<256x64xf32>
    %c0_46 = arith.constant 0 : index
    %c0_47 = arith.constant 0 : index
    %c0_48 = arith.constant 0 : index
    %82 = vector.load %arg3[%c0_46, %c0_47, %c0_48] : memref<1x1x64xf32, #tpu.memory_space<vmem>>, vector<1x1x64xf32>
    %83 = vector.shape_cast %82 : vector<1x1x64xf32> to vector<1x64xf32>
    %84 = vector.broadcast %83 : vector<1x64xf32> to vector<256x64xf32>
    %85 = arith.mulf %81, %84 : vector<256x64xf32>
    %c0_49 = arith.constant 0 : index
    %c0_50 = arith.constant 0 : index
    %c0_51 = arith.constant 0 : index
    %86 = vector.load %arg4[%c0_49, %c0_50, %c0_51] : memref<1x256x64xf32, #tpu.memory_space<vmem>>, vector<1x256x64xf32>
    %87 = vector.shape_cast %86 : vector<1x256x64xf32> to vector<256x64xf32>
    %88 = arith.addf %85, %87 : vector<256x64xf32>
    %c0_52 = arith.constant 0 : index
    %c0_53 = arith.constant 0 : index
    %c0_54 = arith.constant 0 : index
    %89 = vector.load %arg8[%c0_52, %c0_53, %c0_54] : memref<1x256x64xf32, #tpu.memory_space<vmem>>, vector<1x256x64xf32>
    %90 = vector.shape_cast %89 : vector<1x256x64xf32> to vector<256x64xf32>
    %91 = vector.shape_cast %88 : vector<256x64xf32> to vector<1x256x64xf32>
    tpu.vector_store %arg8[%c0_52, %c0_53, %c0_54], %91 {strides = array<i32>} : memref<1x256x64xf32, #tpu.memory_space<vmem>>, vector<1x256x64xf32>,
    return
  }
  func.func @transform_0(%arg0: i32) -> (i32, i32, i32, i32) {
    %c0_i32 = arith.constant 0 : i32
    %c0_i32_0 = arith.constant 0 : i32
    %c0_i32_1 = arith.constant 0 : i32
    %c0_i32_2 = arith.constant 0 : i32
    return %arg0, %c0_i32, %c0_i32_0, %c0_i32_1 : i32, i32, i32, i32
  }
  func.func @transform_1(%arg0: i32) -> (i32, i32, i32, i32) {
    %c0_i32 = arith.constant 0 : i32
    %c0_i32_0 = arith.constant 0 : i32
    %c0_i32_1 = arith.constant 0 : i32
    %c0_i32_2 = arith.constant 0 : i32
    return %arg0, %c0_i32, %c0_i32_0, %c0_i32_1 : i32, i32, i32, i32
  }
  func.func @transform_2(%arg0: i32) -> (i32, i32, i32) {
    %c0_i32 = arith.constant 0 : i32
    %c0_i32_0 = arith.constant 0 : i32
    %c0_i32_1 = arith.constant 0 : i32
    return %arg0, %c0_i32, %c0_i32_0 : i32, i32, i32
  }
  func.func @transform_3(%arg0: i32) -> (i32, i32, i32) {
    %c0_i32 = arith.constant 0 : i32
    %c0_i32_0 = arith.constant 0 : i32
    %c0_i32_1 = arith.constant 0 : i32
    return %arg0, %c0_i32, %c0_i32_0 : i32, i32, i32
  }
  func.func @transform_4(%arg0: i32) -> (i32, i32) {
    %c0_i32 = arith.constant 0 : i32
    %c0_i32_0 = arith.constant 0 : i32
    %c0_i32_1 = arith.constant 0 : i32
    return %c0_i32, %c0_i32_0 : i32, i32
  }
  func.func @transform_5(%arg0: i32) -> (i32, i32) {
    %c0_i32 = arith.constant 0 : i32
    %c0_i32_0 = arith.constant 0 : i32
    %c0_i32_1 = arith.constant 0 : i32
    return %c0_i32, %c0_i32_0 : i32, i32
  }
  func.func @transform_6(%arg0: i32) -> i32 {
    %c0_i32 = arith.constant 0 : i32
    %c0_i32_0 = arith.constant 0 : i32
    return %c0_i32 : i32
  }
  func.func @transform_7(%arg0: i32) -> (i32, i32, i32) {
    %c0_i32 = arith.constant 0 : i32
    %c0_i32_0 = arith.constant 0 : i32
    %c0_i32_1 = arith.constant 0 : i32
    return %arg0, %c0_i32, %c0_i32_0 : i32, i32, i32
  }
}

</mosaic_0001>

<bundles_post_ra>
// kernel: att_conv_forward.4
= control target key start
LH: loop header
LB: loop body
LE: loop exit
PB: predicated region body
PF: predicated region fallthrough
CT: control target
= control target key end

     0   :  { %s5308_s1 = inlined_call_operand.vmem [shape: bf16[1152,128], index: 1, kind: input, shape index: {}]   ;;  %s5309_s0 = inlined_call_operand.vmem [shape: bf16[6,6,16,128], index: 0, kind: input, shape index: {}]   ;;  %s5310_s2 = inlined_call_operand.vmem [shape: f32[1,128], index: 2, kind: input, shape index: {}]   ;;  %s5311_s3 = inlined_call_operand.vmem [shape: bf16[4,4,16,128], index: 3, kind: output, shape index: {}]  }
   0x1   :  { %v3991_v0 = vld [vmem:[%s5308_s1 + $0x40] sm:$0xff]   ;;  %v3993_v2 = vld [vmem:[%s5308_s1 + $0x48] sm:$0xff]   ;;  %v3995_v4 = vld [vmem:[%s5308_s1 + $0x50] sm:$0xff]  }
   0x2   :  { %v3992_v1 = vld [vmem:[%s5308_s1] sm:$0xff]   ;;  %3455 = vmatprep.subr.bf16.mxu0 %v3991_v0  ;;  %3975 = vmatprep.subr.bf16.mxu1 %v3991_v0  ;;  %v3994_v3 = vld [vmem:[%s5308_s1 + $0x8] sm:$0xff]   ;;  %v3996_v5 = vld [vmem:[%s5308_s1 + $0x10] sm:$0xff]  }
   0x3   :  { %3456 = vmatpush3.bf16.msra.mxu0 %v3992_v1  ;;  %3983 = vmatpush3.bf16.msra.mxu1 %v3992_v1  ;;  %v3997_v6 = vld [vmem:[%s5308_s1 + $0x58] sm:$0xff]   ;;  %v3999_v8 = vld [vmem:[%s5308_s1 + $0x60] sm:$0xff]   ;;  %v4001_v10 = vld [vmem:[%s5308_s1 + $0x68] sm:$0xff]  }
   0x4   :  { %3457 = vmatprep.subr.bf16.mxu0 %v3993_v2  ;;  %3976 = vmatprep.subr.bf16.mxu1 %v3993_v2  ;;  %v3998_v7 = vld [vmem:[%s5308_s1 + $0x18] sm:$0xff]   ;;  %v4000_v9 = vld [vmem:[%s5308_s1 + $0x20] sm:$0xff]   ;;  %v4007_v11 = vld [vmem:[%s5309_s0 + $0x8] sm:$0xff]  }
   0x5   :  { %v4008_v12 = vld [vmem:[%s5309_s0 + $0x98] sm:$0xff]   ;;  %1790 = vmatprep.mubr.bf16.mxu0 %v4007_v11  ;;  %v4002_v13 = vld [vmem:[%s5308_s1 + $0x28] sm:$0xff]   ;;  %v4003_v14 = vld [vmem:[%s5308_s1 + $0x70] sm:$0xff]  }
   0x6   :  { %1886 = vmatprep.mubr.bf16.mxu1 %v4008_v12  ;;  %v4004_v15 = vld [vmem:[%s5308_s1 + $0x30] sm:$0xff]   ;;  %v4005_v16 = vld [vmem:[%s5308_s1 + $0x78] sm:$0xff]   ;;  %v4011_v18 = vld [vmem:[%s5308_s1 + $0xc0] sm:$0xff]  }
   0x7   :  { %3458 = vmatpush3.bf16.msra.mxu0 %v3994_v3  ;;  %3984 = vmatpush3.bf16.msra.mxu1 %v3994_v3  ;;  %v4006_v17 = vld [vmem:[%s5308_s1 + $0x38] sm:$0xff]   ;;  %v4009_v19 = vld [vmem:[%s5309_s0] sm:$0xff]   ;;  %v4010_v20 = vld [vmem:[%s5309_s0 + $0x90] sm:$0xff]  }
   0x8   :  { %3459 = vmatprep.subr.bf16.mxu0 %v3995_v4  ;;  %3977 = vmatprep.subr.bf16.mxu1 %v3995_v4  ;;  %v4014_v21 = vld [vmem:[%s5308_s1 + $0x140] sm:$0xff]   ;;  %v4013_v23 = vld [vmem:[%s5308_s1 + $0xc8] sm:$0xff]   ;;  %v4017_v25 = vld [vmem:[%s5309_s0 + $0x10] sm:$0xff]  }
   0x9   :  { %v4012_v22 = vld [vmem:[%s5308_s1 + $0x80] sm:$0xff]   ;;  %v4015_v27 = vld [vmem:[%s5308_s1 + $0x88] sm:$0xff]   ;;  %v4020_v29 = vld [vmem:[%s5309_s0 + $0x98] sm:$0xff]  }
   0xa   :  { %v4016_v24 = vld [vmem:[%s5308_s1 + $0x100] sm:$0xff]   ;;  %v4019_v28 = vld [vmem:[%s5309_s0 + $0x8] sm:$0xff]   ;;  %v4021_v30 = vld [vmem:[%s5308_s1 + $0xd0] sm:$0xff]  }
   0xb   :  { %3460 = vmatpush3.bf16.msra.mxu0 %v3996_v5  ;;  %3985 = vmatpush3.bf16.msra.mxu1 %v3996_v5  ;;  %v4018_v26 = vld [vmem:[%s5309_s0 + $0xa0] sm:$0xff]   ;;  %v4022_v31 = vld [vmem:[%s5308_s1 + $0x90] sm:$0xff]   ;;  %v4023_v32 = vld [vmem:[%s5308_s1 + $0xd8] sm:$0xff]  }
   0xc   :  { %3461 = vmatprep.subr.bf16.mxu0 %v3997_v6  ;;  %3978 = vmatprep.subr.bf16.mxu1 %v3997_v6  ;;  %v4025_v33 = vld [vmem:[%s5309_s0 + $0x18] sm:$0xff]   ;;  %v4030_v34 = vld [vmem:[%s5308_s1 + $0x148] sm:$0xff]   ;;  %v4027_v38 = vld [vmem:[%s5309_s0 + $0x10] sm:$0xff]  }
   0xd   :  { %v4026_v35 = vld [vmem:[%s5309_s0 + $0xa8] sm:$0xff]   ;;  %v4024_v37 = vld [vmem:[%s5308_s1 + $0x98] sm:$0xff]   ;;  %v4028_v39 = vld [vmem:[%s5309_s0 + $0xa0] sm:$0xff]  }
   0xe   :  { %v4032_v36 = vld [vmem:[%s5308_s1 + $0x108] sm:$0xff]   ;;  %v4029_v40 = vld [vmem:[%s5308_s1 + $0xe0] sm:$0xff]   ;;  %v4036_v44 = vld [vmem:[%s5309_s0 + $0xb0] sm:$0xff]  }
   0xf   :  { %3462 = vmatpush3.bf16.msra.mxu0 %v3998_v7  ;;  %3986 = vmatpush3.bf16.msra.mxu1 %v3998_v7  ;;  %v4031_v41 = vld [vmem:[%s5308_s1 + $0xa0] sm:$0xff]   ;;  %v4033_v42 = vld [vmem:[%s5308_s1 + $0xe8] sm:$0xff]   ;;  %v4042_v46 = vld [vmem:[%s5308_s1 + $0x150] sm:$0xff]  }
  0x10   :  { %3463 = vmatprep.subr.bf16.mxu0 %v3999_v8  ;;  %3979 = vmatprep.subr.bf16.mxu1 %v3999_v8  ;;  %v4035_v43 = vld [vmem:[%s5309_s0 + $0x20] sm:$0xff]   ;;  %v4034_v45 = vld [vmem:[%s5308_s1 + $0xa8] sm:$0xff]   ;;  %v4037_v47 = vld [vmem:[%s5309_s0 + $0x18] sm:$0xff]  }
  0x11   :  { %v4038_v48 = vld [vmem:[%s5309_s0 + $0xa8] sm:$0xff]   ;;  %v4039_v49 = vld [vmem:[%s5308_s1 + $0xf0] sm:$0xff]   ;;  %v4041_v52 = vld [vmem:[%s5308_s1 + $0xf8] sm:$0xff]  }
  0x12   :  { %v4040_v50 = vld [vmem:[%s5308_s1 + $0xb0] sm:$0xff]   ;;  %v4045_v53 = vld [vmem:[%s5309_s0 + $0x38] sm:$0xff]   ;;  %v4049_v58 = vld [vmem:[%s5308_s1 + $0x1c0] sm:$0xff]  }
  0x13   :  { %3464 = vmatpush3.bf16.msra.mxu0 %v4000_v9  ;;  %3987 = vmatpush3.bf16.msra.mxu1 %v4000_v9  ;;  %v4044_v51 = vld [vmem:[%s5308_s1 + $0x110] sm:$0xff]   ;;  %v4043_v55 = vld [vmem:[%s5308_s1 + $0xb8] sm:$0xff]   ;;  %v4050_v59 = vld [vmem:[%s5308_s1 + $0x180] sm:$0xff]  }
  0x14   :  { %3465 = vmatprep.subr.bf16.mxu0 %v4001_v10  ;;  %3980 = vmatprep.subr.bf16.mxu1 %v4001_v10  ;;  %v4046_v54 = vld [vmem:[%s5309_s0 + $0x30] sm:$0xff]   ;;  %v4051_v60 = vld [vmem:[%s5309_s0 + $0x40] sm:$0xff]   ;;  %v4052_v61 = vld [vmem:[%s5309_s0 + $0x38] sm:$0xff]  }
  0x15   :  { %v4047_v56 = vld [vmem:[%s5309_s0 + $0x30] sm:$0xff]   ;;  %v4055_v62 = vld [vmem:[%s5308_s1 + $0x158] sm:$0xff]   ;;  %v4057_v2 = vld [vmem:[%s5309_s0 + $0x48] sm:$0xff]  }
  0x16   :  { %v4048_v57 = vld [vmem:[%s5309_s0 + $0x10] sm:$0xff]   ;;  %v4056_v63 = vld [vmem:[%s5308_s1 + $0x118] sm:$0xff]   ;;  %v4058_v3 = vld [vmem:[%s5309_s0 + $0x40] sm:$0xff]  }
  0x17   :  { %3466 = vmatpush3.bf16.msra.mxu0 %v4002_v13  ;;  %3988 = vmatpush3.bf16.msra.mxu1 %v4002_v13  ;;  %v4053_v0 = vld [vmem:[%s5309_s0 + $0x38] sm:$0xff]   ;;  %v4061_v4 = vld [vmem:[%s5308_s1 + $0x1c8] sm:$0xff]   ;;  %v4063_v6 = vld [vmem:[%s5308_s1 + $0x160] sm:$0xff]  }
  0x18   :  { %3467 = vmatprep.subr.bf16.mxu0 %v4003_v14  ;;  %3981 = vmatprep.subr.bf16.mxu1 %v4003_v14  ;;  %v4054_v1 = vld [vmem:[%s5309_s0 + $0x18] sm:$0xff]   ;;  %v4062_v5 = vld [vmem:[%s5308_s1 + $0x188] sm:$0xff]   ;;  %v4064_v7 = vld [vmem:[%s5308_s1 + $0x120] sm:$0xff]  }
  0x19   :  { %v4059_v8 = vld [vmem:[%s5309_s0 + $0x40] sm:$0xff]   ;;  %v4065_v10 = vld [vmem:[%s5309_s0 + $0x50] sm:$0xff]   ;;  %v4066_v11 = vld [vmem:[%s5309_s0 + $0x48] sm:$0xff]  }
  0x1a   :  { %v4060_v9 = vld [vmem:[%s5309_s0 + $0x20] sm:$0xff]   ;;  %v4073_v12 = vld [vmem:[%s5308_s1 + $0x168] sm:$0xff]   ;;  %v4074_v13 = vld [vmem:[%s5308_s1 + $0x1d0] sm:$0xff]  }
  0x1b   :  { %3468 = vmatpush3.bf16.msra.mxu0 %v4004_v15  ;;  %3989 = vmatpush3.bf16.msra.mxu1 %v4004_v15  ;;  %v4067_v14 = vld [vmem:[%s5309_s0 + $0x48] sm:$0xff]  }
  0x1c   :  { %3469 = vmatprep.subr.bf16.mxu0 %v4005_v16  ;;  %3982 = vmatprep.subr.bf16.mxu1 %v4005_v16  ;;  %v4068_v15 = vld [vmem:[%s5309_s0 + $0x28] sm:$0xff]  }
  0x1d   :  { %v4075_v16 = vld [vmem:[%s5308_s1 + $0x128] sm:$0xff]  }
  0x1f   :  { %3470 = vmatpush3.bf16.msra.mxu0 %v4006_v17  ;;  %3990 = vmatpush3.bf16.msra.mxu1 %v4006_v17  ;;  %v4076_v17 = vld [vmem:[%s5308_s1 + $0x190] sm:$0xff]  }
  0x20   :  { %3567 = vmatprep.subr.bf16.mxu1 %v4011_v18  ;;  %3679 = vmatprep.subr.bf16.mxu0 %v4014_v21  ;;  %v4069_v18 = vld [vmem:[%s5309_s0 + $0x68] sm:$0xff]   ;;  %v4082_v21 = vld [vmem:[%s5308_s1 + $0x130] sm:$0xff]  }
  0x22   :  { %1791 = vmatmul.mubr.bf16.vlgmr.msra.gmra.mrb[0].mxu0 %v4009_v19  ;;  %1887 = vmatmul.mubr.bf16.vlgmr.msra.gmra.mrb[0].mxu1 %v4010_v20  ;;  %v4070_v19 = vld [vmem:[%s5309_s0 + $0x60] sm:$0xff]   ;;  %v4081_v20 = vld [vmem:[%s5308_s1 + $0x170] sm:$0xff]  }
  0x23   :  { %3568 = vmatpush3.bf16.msra.mxu1 %v4012_v22  ;;  %3680 = vmatpush3.bf16.msra.mxu0 %v4016_v24  ;;  %v4071_v22 = vld [vmem:[%s5309_s0 + $0x60] sm:$0xff]   ;;  %v4077_v24 = vld [vmem:[%s5309_s0 + $0x70] sm:$0xff]  }
  0x24   :  { %3569 = vmatprep.subr.bf16.mxu1 %v4013_v23  ;;  %1798 = vmatprep.mubr.bf16.mxu0 %v4017_v25  ;;  %v4072_v23 = vld [vmem:[%s5309_s0 + $0x40] sm:$0xff]   ;;  %v4078_v25 = vld [vmem:[%s5309_s0 + $0x68] sm:$0xff]  }
  0x25   :  { %1894 = vmatprep.mubr.bf16.mxu1 %v4018_v26  ;;  %3681 = vmatprep.subr.bf16.mxu0 %v4030_v34  ;;  %v4087_v26 = vld [vmem:[%s5308_s1 + $0x1d8] sm:$0xff]   ;;  %v4085_v34 = vld [vmem:[%s5309_s0 + $0x70] sm:$0xff]  }
  0x27   :  { %3570 = vmatpush3.bf16.msra.mxu1 %v4015_v27  ;;  %3682 = vmatpush3.bf16.msra.mxu0 %v4032_v36  ;;  %v4088_v27 = vld [vmem:[%s5308_s1 + $0x198] sm:$0xff]   ;;  %v4099_v36 = vld [vmem:[%s5308_s1 + $0x1e0] sm:$0xff]  }
  0x28   :  { %3571 = vmatprep.subr.bf16.mxu1 %v4021_v30  ;;  %3683 = vmatprep.subr.bf16.mxu0 %v4042_v46  ;;  %v4083_v30 = vld [vmem:[%s5309_s0 + $0x78] sm:$0xff]   ;;  %v4111_v46 = vld [vmem:[%s5308_s1 + $0x1a8] sm:$0xff]  }
  0x2a   :  { %1799 = vmatmul.mubr.bf16.gmra.mrb[4].mxu0 %v4019_v28  ;;  %1895 = vmatmul.mubr.bf16.gmra.mrb[4].mxu1 %v4020_v29  ;;  %v4079_v28 = vld [vmem:[%s5309_s0 + $0x68] sm:$0xff]  }
  0x2b   :  { %3572 = vmatpush3.bf16.msra.mxu1 %v4022_v31  ;;  %1806 = vmatprep.mubr.bf16.mxu0 %v4025_v33  ;;  %v4080_v29 = vld [vmem:[%s5309_s0 + $0x48] sm:$0xff]   ;;  %v4084_v31 = vld [vmem:[%s5309_s0 + $0x70] sm:$0xff]   ;;  %v4094_v33 = vld [vmem:[%s5308_s1 + $0x138] sm:$0xff]  }
  0x2c   :  { %3573 = vmatprep.subr.bf16.mxu1 %v4023_v32  ;;  %1902 = vmatprep.mubr.bf16.mxu1 %v4026_v35  ;;  %v4093_v32 = vld [vmem:[%s5308_s1 + $0x178] sm:$0xff]   ;;  %v4086_v35 = vld [vmem:[%s5309_s0 + $0x50] sm:$0xff]  }
  0x2d   :  { %3684 = vmatpush3.bf16.msra.mxu0 %v4044_v51  ;;  %v4112_v51 = vld [vmem:[%s5308_s1 + $0x208] sm:$0xff]  }
  0x2e   :  { %3685 = vmatprep.subr.bf16.mxu0 %v4055_v62  ;;  %v4114_v62 = vld [vmem:[%s5309_s0 + $0x58] sm:$0xff]  }
  0x2f   :  { %3574 = vmatpush3.bf16.msra.mxu1 %v4024_v37  ;;  %v4089_v37 = vld [vmem:[%s5309_s0 + $0x80] sm:$0xff]  }
  0x30   :  { %3575 = vmatprep.subr.bf16.mxu1 %v4029_v40  ;;  %v4090_v40 = vld [vmem:[%s5309_s0 + $0x78] sm:$0xff]  }
  0x31   :  { %3686 = vmatpush3.bf16.msra.mxu0 %v4056_v63  ;;  %v4132_v63 = vld [vmem:[%s5308_s1 + $0x1f8] sm:$0xff]  }
  0x32   :  { %1807 = vmatmul.mubr.bf16.gmra.mrb[8].mxu0 %v4027_v38  ;;  %1903 = vmatmul.mubr.bf16.gmra.mrb[8].mxu1 %v4028_v39  ;;  %v4100_v38 = vld [vmem:[%s5308_s1 + $0x1a0] sm:$0xff]  }
  0x33   :  { %3576 = vmatpush3.bf16.msra.mxu1 %v4031_v41  ;;  %1814 = vmatprep.mubr.bf16.mxu0 %v4035_v43  ;;  %v4101_v39 = vld [vmem:[%s5308_s1 + $0x200] sm:$0xff]   ;;  %v4091_v41 = vld [vmem:[%s5309_s0 + $0x78] sm:$0xff]   ;;  %v4095_v43 = vld [vmem:[%s5309_s0 + $0x90] sm:$0xff]  }
  0x34   :  { %3577 = vmatprep.subr.bf16.mxu1 %v4033_v42  ;;  %1910 = vmatprep.mubr.bf16.mxu1 %v4036_v44  ;;  %v4092_v42 = vld [vmem:[%s5309_s0 + $0x58] sm:$0xff]   ;;  %v4096_v44 = vld [vmem:[%s5309_s0 + $0x40] sm:$0xff]  }
  0x35   :  { %3687 = vmatprep.subr.bf16.mxu0 %v4063_v6  ;;  %v4143_v6 = vld [vmem:[%s5308_s1 + $0x220] sm:$0xff]  }
  0x36   :  { %3688 = vmatpush3.bf16.msra.mxu0 %v4064_v7  ;;  %v4119_v7 = vld [vmem:[%s5309_s0 + $0xa0] sm:$0xff]  }
  0x37   :  { %3578 = vmatpush3.bf16.msra.mxu1 %v4034_v45  ;;  %3689 = vmatprep.subr.bf16.mxu0 %v4073_v12  ;;  %v4110_v45 = vld [vmem:[%s5308_s1 + $0x1e8] sm:$0xff]  }
  0x38   :  { %3579 = vmatprep.subr.bf16.mxu1 %v4039_v49  ;;  %v4102_v49 = vld [vmem:[%s5309_s0 + $0x98] sm:$0xff]   ;;  %v4126_v12 = vld [vmem:[%s5309_s0 + $0xa8] sm:$0xff]  }
  0x3a   :  { %1815 = vmatmul.mubr.bf16.gmra.mrb[12].mxu0 %v4037_v47  ;;  %1911 = vmatmul.mubr.bf16.gmra.mrb[12].mxu1 %v4038_v48  ;;  %v4097_v47 = vld [vmem:[%s5309_s0 + $0x70] sm:$0xff]   ;;  %v4098_v48 = vld [vmem:[%s5309_s0 + $0x38] sm:$0xff]  }
  0x3b   :  { %3580 = vmatpush3.bf16.msra.mxu1 %v4040_v50  ;;  %1822 = vmatprep.mubr.bf16.mxu0 %v4045_v53  ;;  %v4103_v50 = vld [vmem:[%s5309_s0 + $0x48] sm:$0xff]   ;;  %v4122_v53 = vld [vmem:[%s5308_s1 + $0x1b0] sm:$0xff]  }
  0x3c   :  { %3581 = vmatprep.subr.bf16.mxu1 %v4041_v52  ;;  %1951 = vmatprep.mubr.bf16.mxu1 %v4046_v54  ;;  %v4121_v52 = vld [vmem:[%s5308_s1 + $0x1f0] sm:$0xff]   ;;  %v4104_v54 = vld [vmem:[%s5309_s0 + $0x78] sm:$0xff]  }
  0x3d   :  { %3690 = vmatpush3.bf16.msra.mxu0 %v4075_v16  ;;  %v4161_v16 = vld [vmem:[%s5308_s1 + $0x230] sm:$0xff]  }
  0x3e   :  { %3691 = vmatprep.subr.bf16.mxu0 %v4081_v20  ;;  %v4136_v20 = vld [vmem:[%s5309_s0 + $0x88] sm:$0xff]  }
  0x3f   :  { %3582 = vmatpush3.bf16.msra.mxu1 %v4043_v55  ;;  %v4123_v55 = vld [vmem:[%s5308_s1 + $0x210] sm:$0xff]  }
  0x40   :  { %3791 = vmatprep.subr.bf16.mxu1 %v4049_v58  ;;  %v4107_v58 = vld [vmem:[%s5309_s0 + $0x50] sm:$0xff]  }
  0x41   :  { %3692 = vmatpush3.bf16.msra.mxu0 %v4082_v21  ;;  %v4137_v21 = vld [vmem:[%s5309_s0 + $0xb8] sm:$0xff]  }
  0x42   :  { %1823 = vmatmul.mubr.bf16.gmra.mrb[16].mxu0 %v4047_v56  ;;  %1952 = vmatmul.mubr.bf16.vlgmr.msra.gmra.mrb[16].mxu1 %v4048_v57  ;;  %v4105_v56 = vld [vmem:[%s5309_s0 + $0x40] sm:$0xff]  }
  0x43   :  { %3792 = vmatpush3.bf16.msra.mxu1 %v4050_v59  ;;  %1830 = vmatprep.mubr.bf16.mxu0 %v4051_v60  ;;  %v4106_v57 = vld [vmem:[%s5309_s0 + $0xa0] sm:$0xff]   ;;  %v4109_v60 = vld [vmem:[%s5309_s0 + $0x48] sm:$0xff]  }
  0x44   :  { %1959 = vmatprep.mubr.bf16.mxu1 %v4052_v61  ;;  %3793 = vmatprep.subr.bf16.mxu1 %v4061_v4  ;;  %v4108_v59 = vld [vmem:[%s5309_s0 + $0x80] sm:$0xff]   ;;  %v4113_v61 = vld [vmem:[%s5309_s0 + $0xa8] sm:$0xff]  }
  0x45   :  { %3693 = vmatprep.subr.bf16.mxu0 %v4093_v32  ;;  %v4117_v4 = vld [vmem:[%s5309_s0 + $0xc0] sm:$0xff]   ;;  %v4148_v32 = vld [vmem:[%s5309_s0 + $0xb0] sm:$0xff]  }
  0x46   :  { %3694 = vmatpush3.bf16.msra.mxu0 %v4094_v33  ;;  %v4149_v33 = vld [vmem:[%s5309_s0 + $0x78] sm:$0xff]  }
  0x47   :  { %3794 = vmatpush3.bf16.msra.mxu1 %v4062_v5  ;;  %3927 = vmatprep.subr.bf16.mxu0 %v4101_v39  ;;  %v4118_v5 = vld [vmem:[%s5309_s0 + $0x70] sm:$0xff]  }
  0x48   :  { %3795 = vmatprep.subr.bf16.mxu1 %v4074_v13  ;;  %v4127_v13 = vld [vmem:[%s5309_s0 + $0x70] sm:$0xff]  }
  0x4a   :  { %1831 = vmatmul.mubr.bf16.gmra.mrb[20].mxu0 %v4053_v0  ;;  %1960 = vmatmul.mubr.bf16.gmra.mrb[20].mxu1 %v4054_v1  ;;  %v4133_v0 = vld [vmem:[%s5308_s1 + $0x1b8] sm:$0xff]  }
  0x4b   :  { %1838 = vmatprep.mubr.bf16.mxu0 %v4057_v2  ;;  %1967 = vmatprep.mubr.bf16.mxu1 %v4058_v3  ;;  %v4134_v1 = vld [vmem:[%s5308_s1 + $0x218] sm:$0xff]   ;;  %v4115_v2 = vld [vmem:[%s5309_s0 + $0x88] sm:$0xff]   ;;  %v4116_v3 = vld [vmem:[%s5309_s0 + $0x50] sm:$0xff]  }
  0x4c   :  { %3796 = vmatpush3.bf16.msra.mxu1 %v4076_v17  ;;  %v4130_v17 = vld [vmem:[%s5309_s0 + $0xb0] sm:$0xff]  }
  0x4d   :  { %3797 = vmatprep.subr.bf16.mxu1 %v4087_v26  ;;  %v4141_v26 = vld [vmem:[%s5309_s0 + $0x98] sm:$0xff]  }
  0x50   :  { %3798 = vmatpush3.bf16.msra.mxu1 %v4088_v27  ;;  %v4142_v27 = vld [vmem:[%s5309_s0 + $0x60] sm:$0xff]  }
  0x51   :  { %3799 = vmatprep.subr.bf16.mxu1 %v4099_v36  ;;  %v4153_v36 = vld [vmem:[%s5309_s0 + $0xb8] sm:$0xff]  }
  0x52   :  { %1839 = vmatmul.mubr.bf16.gmra.mrb[24].mxu0 %v4059_v8  ;;  %1968 = vmatmul.mubr.bf16.gmra.mrb[24].mxu1 %v4060_v9  ;;  %v4120_v8 = vld [vmem:[%s5309_s0 + $0x68] sm:$0xff]  }
  0x53   :  { %1846 = vmatprep.mubr.bf16.mxu0 %v4065_v10  ;;  %1975 = vmatprep.mubr.bf16.mxu1 %v4066_v11  ;;  %v4124_v9 = vld [vmem:[%s5309_s0 + $0xc8] sm:$0xff]   ;;  %v4125_v10 = vld [vmem:[%s5309_s0 + $0x78] sm:$0xff]  }
  0x54   :  { %3800 = vmatpush3.bf16.msra.mxu1 %v4100_v38  ;;  %v4152_v11 = vld [vmem:[%s5308_s1 + $0x228] sm:$0xff]   ;;  %v4155_v38 = vld [vmem:[%s5309_s0 + $0xb0] sm:$0xff]  }
  0x55   :  { %3801 = vmatprep.subr.bf16.mxu1 %v4110_v45  ;;  %v4163_v45 = vld [vmem:[%s5309_s0 + $0xa0] sm:$0xff]  }
  0x58   :  { %3802 = vmatpush3.bf16.msra.mxu1 %v4111_v46  ;;  %v4164_v46 = vld [vmem:[%s5309_s0 + $0xd0] sm:$0xff]  }
  0x59   :  { %3803 = vmatprep.subr.bf16.mxu1 %v4121_v52  ;;  %v4171_v52 = vld [vmem:[%s5309_s0 + $0xe8] sm:$0xff]  }
  0x5a   :  { %1847 = vmatmul.mubr.bf16.gmra.mrb[28].mxu0 %v4067_v14  ;;  %1976 = vmatmul.mubr.bf16.gmra.mrb[28].mxu1 %v4068_v15  ;;  %v4128_v14 = vld [vmem:[%s5309_s0 + $0xd0] sm:$0xff]   ;;  %v4129_v15 = vld [vmem:[%s5309_s0 + $0x80] sm:$0xff]  }
  0x5b   :  { %1854 = vmatprep.mubr.bf16.mxu0 %v4069_v18  ;;  %1983 = vmatprep.mubr.bf16.mxu1 %v4070_v19  ;;  %v4131_v18 = vld [vmem:[%s5309_s0 + $0x78] sm:$0xff]  }
  0x5c   :  { %3804 = vmatpush3.bf16.msra.mxu1 %v4122_v53  ;;  %v4135_v19 = vld [vmem:[%s5309_s0 + $0xd8] sm:$0xff]   ;;  %v4172_v53 = vld [vmem:[%s5309_s0 + $0xb0] sm:$0xff]  }
  0x5d   :  { %3805 = vmatprep.subr.bf16.mxu1 %v4132_v63 }
  0x60   :  { %3806 = vmatpush3.bf16.msra.mxu1 %v4133_v0  ;;  %v4175_v0 = vld [vmem:[%s5309_s0 + $0xc8] sm:$0xff]  }
  0x62   :  { %1855 = vmatmul.mubr.bf16.gmra.mrb[32].mxu0 %v4071_v22  ;;  %1984 = vmatmul.mubr.bf16.gmra.mrb[32].mxu1 %v4072_v23  ;;  %v4170_v22 = vld [vmem:[%s5308_s1 + $0x238] sm:$0xff]   ;;  %v4138_v23 = vld [vmem:[%s5309_s0 + $0x80] sm:$0xff]  }
  0x63   :  { %1862 = vmatprep.mubr.bf16.mxu0 %v4077_v24  ;;  %1991 = vmatprep.mubr.bf16.mxu1 %v4078_v25  ;;  %v4139_v24 = vld [vmem:[%s5309_s0 + $0xa0] sm:$0xff]   ;;  %v4140_v25 = vld [vmem:[%s5309_s0 + $0x68] sm:$0xff]  }
  0x6a   :  { %1863 = vmatmul.mubr.bf16.gmra.mrb[36].mxu0 %v4079_v28  ;;  %1992 = vmatmul.mubr.bf16.gmra.mrb[36].mxu1 %v4080_v29  ;;  %v4144_v28 = vld [vmem:[%s5309_s0 + $0xa8] sm:$0xff]   ;;  %v4145_v29 = vld [vmem:[%s5309_s0 + $0x70] sm:$0xff]  }
  0x6b   :  { %1870 = vmatprep.mubr.bf16.mxu0 %v4083_v30  ;;  %1999 = vmatprep.mubr.bf16.mxu1 %v4084_v31  ;;  %v4146_v30 = vld [vmem:[%s5309_s0 + $0xa0] sm:$0xff]   ;;  %v4147_v31 = vld [vmem:[%s5309_s0 + $0x68] sm:$0xff]  }
  0x72   :  { %1871 = vmatmul.mubr.bf16.gmra.mrb[40].mxu0 %v4085_v34  ;;  %2000 = vmatmul.mubr.bf16.gmra.mrb[40].mxu1 %v4086_v35  ;;  %v4150_v34 = vld [vmem:[%s5309_s0 + $0xa8] sm:$0xff]   ;;  %v4151_v35 = vld [vmem:[%s5309_s0 + $0x70] sm:$0xff]  }
  0x73   :  { %1878 = vmatprep.mubr.bf16.mxu0 %v4089_v37  ;;  %2007 = vmatprep.mubr.bf16.mxu1 %v4090_v40  ;;  %v4154_v37 = vld [vmem:[%s5309_s0 + $0x80] sm:$0xff]   ;;  %v4157_v40 = vld [vmem:[%s5309_s0 + $0xd0] sm:$0xff]  }
  0x7a   :  { %1879 = vmatmul.mubr.bf16.gmra.mrb[44].mxu0 %v4091_v41  ;;  %2008 = vmatmul.mubr.bf16.gmra.mrb[44].mxu1 %v4092_v42  ;;  %v4158_v41 = vld [vmem:[%s5309_s0 + $0x98] sm:$0xff]   ;;  %v4159_v42 = vld [vmem:[%s5309_s0 + $0xc8] sm:$0xff]  }
  0x7b   :  { %2015 = vmatprep.mubr.bf16.mxu1 %v4095_v43  ;;  %2112 = vmatprep.mubr.bf16.mxu0 %v4096_v44  ;;  %v4160_v43 = vld [vmem:[%s5309_s0 + $0x90] sm:$0xff]   ;;  %v4162_v44 = vld [vmem:[%s5309_s0 + $0xd8] sm:$0xff]  }
  0x82   :  { %2016 = vmatmul.mubr.bf16.gmra.mrb[48].mxu1 %v4097_v47  ;;  %2113 = vmatmul.mubr.bf16.vlgmr.msra.gmra.mrb[48].mxu0 %v4098_v48  ;;  %v4165_v47 = vld [vmem:[%s5309_s0 + $0x98] sm:$0xff]   ;;  %v4166_v48 = vld [vmem:[%s5309_s0 + $0xe0] sm:$0xff]  }
  0x83   :  { %3928 = vmatpush3.bf16.msra.mxu0 %v4101_v39  ;;  %2023 = vmatprep.mubr.bf16.mxu1 %v4102_v49  ;;  %v4156_v39 = vld [vmem:[%s5309_s0 + $0x78] sm:$0xff]   ;;  %v4167_v49 = vld [vmem:[%s5309_s0 + $0xa8] sm:$0xff]  }
  0x84   :  { %2120 = vmatprep.mubr.bf16.mxu0 %v4103_v50  ;;  %3929 = vmatprep.subr.bf16.mxu0 %v4112_v51  ;;  %v4168_v50 = vld [vmem:[%s5309_s0 + $0xd8] sm:$0xff]  }
  0x87   :  { %3930 = vmatpush3.bf16.msra.mxu0 %v4112_v51  ;;  %v4169_v51 = vld [vmem:[%s5309_s0 + $0xa0] sm:$0xff]  }
  0x88   :  { %3931 = vmatprep.subr.bf16.mxu0 %v4123_v55 }
  0x8a   :  { %2024 = vmatmul.mubr.bf16.gmra.mrb[52].mxu1 %v4104_v54  ;;  %2121 = vmatmul.mubr.bf16.gmra.mrb[52].mxu0 %v4105_v56 }
  0x8b   :  { %2031 = vmatprep.mubr.bf16.mxu1 %v4106_v57  ;;  %2128 = vmatprep.mubr.bf16.mxu0 %v4107_v58  ;;  %v4173_v58 = vld [vmem:[%s5309_s0 + $0xe0] sm:$0xff]  }
  0x8c   :  { %3932 = vmatpush3.bf16.msra.mxu0 %v4123_v55 }
  0x8d   :  { %3933 = vmatprep.subr.bf16.mxu0 %v4134_v1 }
  0x90   :  { %3934 = vmatpush3.bf16.msra.mxu0 %v4134_v1  ;;  %v4176_v1 = vld [vmem:[%s5309_s0 + $0x70] sm:$0xff]  }
  0x91   :  { %3935 = vmatprep.subr.bf16.mxu0 %v4143_v6 }
  0x92   :  { %2032 = vmatmul.mubr.bf16.gmra.mrb[56].mxu1 %v4108_v59  ;;  %2129 = vmatmul.mubr.bf16.gmra.mrb[56].mxu0 %v4109_v60  ;;  %v4174_v59 = vld [vmem:[%s5309_s0 + $0xa8] sm:$0xff]  }
  0x93   :  { %2039 = vmatprep.mubr.bf16.mxu1 %v4113_v61  ;;  %2136 = vmatprep.mubr.bf16.mxu0 %v4114_v62 }
  0x94   :  { %3936 = vmatpush3.bf16.msra.mxu0 %v4143_v6 }
  0x95   :  { %3937 = vmatprep.subr.bf16.mxu0 %v4152_v11 }
  0x98   :  { %3938 = vmatpush3.bf16.msra.mxu0 %v4152_v11  ;;  %v4178_v11 = vld [vmem:[%s5309_s0 + $0x78] sm:$0xff]  }
  0x99   :  { %3939 = vmatprep.subr.bf16.mxu0 %v4161_v16 }
  0x9a   :  { %2040 = vmatmul.mubr.bf16.gmra.mrb[60].mxu1 %v4115_v2  ;;  %2137 = vmatmul.mubr.bf16.gmra.mrb[60].mxu0 %v4116_v3 }
  0x9b   :  { %2047 = vmatprep.mubr.bf16.mxu1 %v4117_v4  ;;  %2144 = vmatprep.mubr.bf16.mxu0 %v4118_v5 }
  0x9c   :  { %3940 = vmatpush3.bf16.msra.mxu0 %v4161_v16  ;;  %v4179_v16 = vld [vmem:[%s5309_s0 + $0xd0] sm:$0xff]  }
  0x9d   :  { %3941 = vmatprep.subr.bf16.mxu0 %v4170_v22 }
  0xa0   :  { %3942 = vmatpush3.bf16.msra.mxu0 %v4170_v22 }
  0xa2   :  { %2048 = vmatmul.mubr.bf16.gmra.mrb[64].mxu1 %v4119_v7  ;;  %2145 = vmatmul.mubr.bf16.gmra.mrb[64].mxu0 %v4120_v8 }
  0xa3   :  { %2055 = vmatprep.mubr.bf16.mxu1 %v4124_v9  ;;  %2152 = vmatprep.mubr.bf16.mxu0 %v4125_v10  ;;  %v4177_v10 = vld [vmem:[%s5309_s0 + $0xc0] sm:$0xff]  }
  0xaa   :  { %2056 = vmatmul.mubr.bf16.gmra.mrb[68].mxu1 %v4126_v12  ;;  %2153 = vmatmul.mubr.bf16.gmra.mrb[68].mxu0 %v4127_v13 }
  0xab   :  { %2063 = vmatprep.mubr.bf16.mxu1 %v4128_v14  ;;  %2160 = vmatprep.mubr.bf16.mxu0 %v4129_v15 }
  0xb2   :  { %2064 = vmatmul.mubr.bf16.gmra.mrb[72].mxu1 %v4130_v17  ;;  %2161 = vmatmul.mubr.bf16.gmra.mrb[72].mxu0 %v4131_v18  ;;  %v4180_v17 = vld [vmem:[%s5309_s0 + $0x80] sm:$0xff]  }
  0xb3   :  { %2071 = vmatprep.mubr.bf16.mxu1 %v4135_v19  ;;  %2168 = vmatprep.mubr.bf16.mxu0 %v4136_v20 }
  0xba   :  { %2072 = vmatmul.mubr.bf16.gmra.mrb[76].mxu1 %v4137_v21  ;;  %2169 = vmatmul.mubr.bf16.gmra.mrb[76].mxu0 %v4138_v23 }
  0xbb   :  { %2176 = vmatprep.mubr.bf16.mxu0 %v4139_v24  ;;  %2273 = vmatprep.mubr.bf16.mxu1 %v4140_v25 }
  0xc2   :  { %2177 = vmatmul.mubr.bf16.gmra.mrb[80].mxu0 %v4141_v26  ;;  %2274 = vmatmul.mubr.bf16.vlgmr.msra.gmra.mrb[80].mxu1 %v4142_v27  ;;  %v4181_v26 = vld [vmem:[%s5309_s0 + $0xc8] sm:$0xff]  }
  0xc3   :  { %2184 = vmatprep.mubr.bf16.mxu0 %v4144_v28  ;;  %2281 = vmatprep.mubr.bf16.mxu1 %v4145_v29  ;;  %v4182_v27 = vld [vmem:[%s5309_s0 + $0x88] sm:$0xff]  }
  0xca   :  { %2185 = vmatmul.mubr.bf16.gmra.mrb[84].mxu0 %v4146_v30  ;;  %2282 = vmatmul.mubr.bf16.gmra.mrb[84].mxu1 %v4147_v31 }
  0xcb   :  { %2192 = vmatprep.mubr.bf16.mxu0 %v4148_v32  ;;  %2289 = vmatprep.mubr.bf16.mxu1 %v4149_v33  ;;  %v4183_v32 = vld [vmem:[%s5309_s0 + $0xd8] sm:$0xff]   ;;  %v4184_v33 = vld [vmem:[%s5309_s0 + $0xa0] sm:$0xff]  }
  0xd2   :  { %2193 = vmatmul.mubr.bf16.gmra.mrb[88].mxu0 %v4150_v34  ;;  %2290 = vmatmul.mubr.bf16.gmra.mrb[88].mxu1 %v4151_v35 }
  0xd3   :  { %2200 = vmatprep.mubr.bf16.mxu0 %v4153_v36  ;;  %2297 = vmatprep.mubr.bf16.mxu1 %v4154_v37 }
  0xda   :  { %2201 = vmatmul.mubr.bf16.gmra.mrb[92].mxu0 %v4155_v38  ;;  %2298 = vmatmul.mubr.bf16.gmra.mrb[92].mxu1 %v4156_v39 }
  0xdb   :  { %2208 = vmatprep.mubr.bf16.mxu0 %v4157_v40  ;;  %2305 = vmatprep.mubr.bf16.mxu1 %v4158_v41 }
  0xe2   :  { %2209 = vmatmul.mubr.bf16.gmra.mrb[96].mxu0 %v4159_v42  ;;  %2306 = vmatmul.mubr.bf16.gmra.mrb[96].mxu1 %v4160_v43  ;;  %v4185_v42 = vld [vmem:[%s5309_s0 + $0xd0] sm:$0xff]   ;;  %v4186_v43 = vld [vmem:[%s5309_s0 + $0xa8] sm:$0xff]  }
  0xe3   :  { %2216 = vmatprep.mubr.bf16.mxu0 %v4162_v44  ;;  %2313 = vmatprep.mubr.bf16.mxu1 %v4163_v45 }
  0xea   :  { %2217 = vmatmul.mubr.bf16.gmra.mrb[100].mxu0 %v4164_v46  ;;  %2314 = vmatmul.mubr.bf16.gmra.mrb[100].mxu1 %v4165_v47 }
  0xeb   :  { %2224 = vmatprep.mubr.bf16.mxu0 %v4166_v48  ;;  %2321 = vmatprep.mubr.bf16.mxu1 %v4167_v49  ;;  %v4187_v48 = vld [vmem:[%s5309_s0 + $0xe0] sm:$0xff]   ;;  %v4188_v49 = vld [vmem:[%s5309_s0 + $0xb0] sm:$0xff]  }
  0xf2   :  { %2225 = vmatmul.mubr.bf16.gmra.mrb[104].mxu0 %v4168_v50  ;;  %2322 = vmatmul.mubr.bf16.gmra.mrb[104].mxu1 %v4169_v51 }
  0xf3   :  { %2232 = vmatprep.mubr.bf16.mxu0 %v4171_v52  ;;  %2329 = vmatprep.mubr.bf16.mxu1 %v4172_v53 }
  0xf5   :  { %v3543_v54 = vpop.f32.mrb[0].mxu1  ;;  %v3471_v55 = vpop.f32.mrb[0].mxu0 }
  0xf6   :  { %v3544_v56 = vpop.f32.mrb[1].mxu1  ;;  %v3472_v57 = vpop.f32.mrb[1].mxu0 }
  0xf7   :  { %v4779_v60 = vadd.f32 %v3544_v56, %v3543_v54  ;;  %v3546_v61 = vpop.f32.mrb[2].mxu1  ;;  %v4781_v62 = vadd.f32 %v3472_v57, %v3471_v55  ;;  %v3474_v63 = vpop.f32.mrb[2].mxu0  ;;  %v4856_v56 = vld [vmem:[%s5310_s2] ss:$0 sm:$0xff] }
  0xf8   :  { %v3547_v2 = vpop.f32.mrb[3].mxu1  ;;  %v3475_v3 = vpop.f32.mrb[3].mxu0 }
  0xf9   :  { %v4789_v4 = vadd.f32 %v3547_v2, %v3546_v61  ;;  %v4791_v5 = vadd.f32 %v3475_v3, %v3474_v63  ;;  %v4190_v61 = vld [vmem:[%s5309_s0 + $0xb8] sm:$0xff]   ;;  %v1793_v63 = vadd.f32 %v4781_v62, %v4856_v56 }
  0xfa   :  { %2233 = vmatmul.mubr.bf16.gmra.mrb[108].mxu0 %v4173_v58  ;;  %2330 = vmatmul.mubr.bf16.gmra.mrb[108].mxu1 %v4174_v59  ;;  %v4189_v59 = vld [vmem:[%s5309_s0 + $0xd8] sm:$0xff]  }
  0xfb   :  { %2337 = vmatprep.mubr.bf16.mxu1 %v4175_v0  ;;  %3943 = vmatprep.mubr.bf16.mxu0 %v4176_v1 }
  0xfd   :  { %v3549_v6 = vpop.f32.mrb[4].mxu1  ;;  %v3477_v7 = vpop.f32.mrb[4].mxu0 }
  0xfe   :  { %v3550_v8 = vpop.f32.mrb[5].mxu1  ;;  %v3478_v9 = vpop.f32.mrb[5].mxu0 }
  0xff   :  { %v4799_v12 = vadd.f32 %v3550_v8, %v3549_v6  ;;  %v3552_v13 = vpop.f32.mrb[6].mxu1  ;;  %v4801_v14 = vadd.f32 %v3478_v9, %v3477_v7  ;;  %v3480_v15 = vpop.f32.mrb[6].mxu0  ;;  %v4191_v6 = vld [vmem:[%s5309_s0 + $0xf8] sm:$0xff]   ;;  %v4192_v7 = vld [vmem:[%s5309_s0 + $0xd0] sm:$0xff]  }
 0x100   :  { %v3553_v18 = vpop.f32.mrb[7].mxu1  ;;  %v3481_v19 = vpop.f32.mrb[7].mxu0 }
 0x101   :  { %v4809_v20 = vadd.f32 %v3553_v18, %v3552_v13  ;;  %v4811_v21 = vadd.f32 %v3481_v19, %v3480_v15 }
 0x102   :  { %2338 = vmatmul.mubr.bf16.gmra.mrb[112].mxu1 %v4177_v10  ;;  %3944 = vmatmul.mubr.bf16.vlgmr.msra.gmra.mrb[112].mxu0 %v4178_v11  ;;  %v1796_v10 = vadd.f32 %v4791_v5, %v4856_v56  ;;  %v4194_v5 = vld [vmem:[%s5309_s0 + $0xd8] sm:$0xff]  }
 0x103   :  { %2345 = vmatprep.mubr.bf16.mxu1 %v4179_v16  ;;  %3947 = vmatprep.mubr.bf16.mxu0 %v4180_v17 }
 0x105   :  { %v3555_v22 = vpop.f32.mrb[8].mxu1  ;;  %v3483_v23 = vpop.f32.mrb[8].mxu0 }
 0x106   :  { %v3556_v24 = vpop.f32.mrb[9].mxu1  ;;  %v3484_v25 = vpop.f32.mrb[9].mxu0 }
 0x107   :  { %v4819_v28 = vadd.f32 %v3556_v24, %v3555_v22  ;;  %v3558_v29 = vpop.f32.mrb[10].mxu1  ;;  %v4821_v30 = vadd.f32 %v3484_v25, %v3483_v23  ;;  %v3486_v31 = vpop.f32.mrb[10].mxu0  ;;  %v4193_v22 = vld [vmem:[%s5309_s0 + $0xf0] sm:$0xff]   ;;  %v1801_v23 = vadd.f32 %v4801_v14, %v4856_v56 }
 0x108   :  { %v3559_v34 = vpop.f32.mrb[11].mxu1  ;;  %v3487_v35 = vpop.f32.mrb[11].mxu0 }
 0x109   :  { %v4829_v36 = vadd.f32 %v3559_v34, %v3558_v29  ;;  %v4831_v37 = vadd.f32 %v3487_v35, %v3486_v31  ;;  %v4195_v29 = vld [vmem:[%s5309_s0 + $0x100] sm:$0xff]   ;;  %v1804_v34 = vadd.f32 %v4811_v21, %v4856_v56  ;;  %v4198_v21 = vld [vmem:[%s5309_s0 + $0xe8] sm:$0xff]  }
 0x10a   :  { %2346 = vmatmul.mubr.bf16.gmra.mrb[116].mxu1 %v4181_v26  ;;  %3948 = vmatmul.mubr.bf16.gmra.mrb[116].mxu0 %v4182_v27  ;;  %v4196_v31 = vld [vmem:[%s5309_s0 + $0xe0] sm:$0xff]  }
 0x10b   :  { %2353 = vmatprep.mubr.bf16.mxu1 %v4183_v32  ;;  %3951 = vmatprep.mubr.bf16.mxu0 %v4184_v33 }
 0x10d   :  { %v3561_v38 = vpop.f32.mrb[12].mxu1  ;;  %v3489_v39 = vpop.f32.mrb[12].mxu0 }
 0x10e   :  { %v3562_v40 = vpop.f32.mrb[13].mxu1  ;;  %v3490_v41 = vpop.f32.mrb[13].mxu0 }
 0x10f   :  { %v4839_v44 = vadd.f32 %v3562_v40, %v3561_v38  ;;  %v3564_v45 = vpop.f32.mrb[14].mxu1  ;;  %v4841_v46 = vadd.f32 %v3490_v41, %v3489_v39  ;;  %v3492_v47 = vpop.f32.mrb[14].mxu0 }
 0x110   :  { %v3565_v50 = vpop.f32.mrb[15].mxu1  ;;  %v3493_v51 = vpop.f32.mrb[15].mxu0 }
 0x111   :  { %v4849_v52 = vadd.f32 %v3565_v50, %v3564_v45  ;;  %v4851_v53 = vadd.f32 %v3493_v51, %v3492_v47  ;;  %v4197_v45 = vld [vmem:[%s5309_s0 + $0xf8] sm:$0xff]   ;;  %v1809_v47 = vadd.f32 %v4821_v30, %v4856_v56 }
 0x112   :  { %2354 = vmatmul.mubr.bf16.gmra.mrb[120].mxu1 %v4185_v42  ;;  %3952 = vmatmul.mubr.bf16.gmra.mrb[120].mxu0 %v4186_v43 }
 0x113   :  { %2361 = vmatprep.mubr.bf16.mxu1 %v4187_v48  ;;  %3955 = vmatprep.mubr.bf16.mxu0 %v4188_v49 }
 0x115   :  { %v3583_v54 = vpop.f32.mrb[16].mxu1  ;;  %v3495_v55 = vpop.f32.mrb[16].mxu0 }
 0x116   :  { %v3584_v57 = vpop.f32.mrb[17].mxu1  ;;  %v3496_v58 = vpop.f32.mrb[17].mxu0 }
 0x117   :  { %v3585_v0 = vadd.f32 %v3584_v57, %v3583_v54  ;;  %v3586_v1 = vpop.f32.mrb[18].mxu1  ;;  %v4866_v2 = vadd.f32 %v3496_v58, %v3495_v55  ;;  %v3498_v3 = vpop.f32.mrb[18].mxu0  ;;  %v4199_v54 = vld [vmem:[%s5309_s0 + $0x108] sm:$0xff]   ;;  %v4200_v55 = vld [vmem:[%s5309_s0 + $0x100] sm:$0xff]  }
 0x118   :  { %v3587_v8 = vpop.f32.mrb[19].mxu1  ;;  %v3499_v9 = vpop.f32.mrb[19].mxu0 }
 0x119   :  { %v4876_v11 = vadd.f32 %v3585_v0, %v1793_v63  ;;  %v3588_v62 = vadd.f32 %v3587_v8, %v3586_v1  ;;  %v4878_v13 = vadd.f32 %v3499_v9, %v3498_v3  ;;  %v4201_v8 = vld [vmem:[%s5309_s0 + $0x100] sm:$0xff]   ;;  %v1817_v9 = vadd.f32 %v4841_v46, %v4856_v56 }
 0x11a   :  { %2362 = vmatmul.mubr.bf16.gmra.mrb[124].mxu1 %v4189_v59  ;;  %3956 = vmatmul.mubr.bf16.gmra.mrb[124].mxu0 %v4190_v61  ;;  %v1812_v59 = vadd.f32 %v4831_v37, %v4856_v56  ;;  %v4202_v37 = vld [vmem:[%s5309_s0 + $0x108] sm:$0xff]  }
 0x11b   :  { %v4880_v15 = vadd.f32 %v3588_v62, %v1796_v10  ;;  %2369 = vmatprep.mubr.bf16.mxu1 %v4191_v6  ;;  %3959 = vmatprep.mubr.bf16.mxu0 %v4192_v7 }
 0x11d   :  { %v3589_v16 = vpop.f32.mrb[20].mxu1  ;;  %v3501_v17 = vpop.f32.mrb[20].mxu0 }
 0x11e   :  { %v3590_v18 = vpop.f32.mrb[21].mxu1  ;;  %v3502_v19 = vpop.f32.mrb[21].mxu0 }
 0x11f   :  { %v3591_v24 = vadd.f32 %v3590_v18, %v3589_v16  ;;  %v3592_v25 = vpop.f32.mrb[22].mxu1  ;;  %v4890_v26 = vadd.f32 %v3502_v19, %v3501_v17  ;;  %v3504_v27 = vpop.f32.mrb[22].mxu0  ;;  %v4203_v18 = vld [vmem:[%s5309_s0 + $0x110] sm:$0xff]  }
 0x120   :  { %v3593_v32 = vpop.f32.mrb[23].mxu1  ;;  %v3505_v33 = vpop.f32.mrb[23].mxu0  ;;  %v4204_v19 = vld [vmem:[%s5309_s0 + $0x110] sm:$0xff]  }
 0x121   :  { %v4900_v35 = vadd.f32 %v3591_v24, %v1801_v23  ;;  %v3594_v14 = vadd.f32 %v3593_v32, %v3592_v25  ;;  %v4902_v38 = vadd.f32 %v3505_v33, %v3504_v27  ;;  %v1820_v23 = vadd.f32 %v4851_v53, %v4856_v56  ;;  %v4206_v53 = vld [vmem:[%s5309_s0 + $0x118] sm:$0xff]  }
 0x122   :  { %2370 = vmatmul.mubr.bf16.gmra.mrb[128].mxu1 %v4193_v22  ;;  %3960 = vmatmul.mubr.bf16.gmra.mrb[128].mxu0 %v4194_v5 }
 0x123   :  { %v4904_v39 = vadd.f32 %v3594_v14, %v1804_v34  ;;  %2377 = vmatprep.mubr.bf16.mxu1 %v4195_v29  ;;  %3963 = vmatprep.mubr.bf16.mxu0 %v4196_v31  ;;  %v4205_v34 = vld [vmem:[%s5309_s0 + $0x108] sm:$0xff]   ;;  %v1825_v14 = vadd.f32 %v4866_v2, %v4856_v56 }
 0x125   :  { %v3595_v40 = vpop.f32.mrb[24].mxu1  ;;  %v3507_v41 = vpop.f32.mrb[24].mxu0 }
 0x126   :  { %v3596_v42 = vpop.f32.mrb[25].mxu1  ;;  %v3508_v43 = vpop.f32.mrb[25].mxu0 }
 0x127   :  { %v3597_v48 = vadd.f32 %v3596_v42, %v3595_v40  ;;  %v3598_v49 = vpop.f32.mrb[26].mxu1  ;;  %v4914_v50 = vadd.f32 %v3508_v43, %v3507_v41  ;;  %v3510_v51 = vpop.f32.mrb[26].mxu0 }
 0x128   :  { %v3599_v57 = vpop.f32.mrb[27].mxu1  ;;  %v3511_v58 = vpop.f32.mrb[27].mxu0 }
 0x129   :  { %v4924_v61 = vadd.f32 %v3597_v48, %v1809_v47  ;;  %v3600_v30 = vadd.f32 %v3599_v57, %v3598_v49  ;;  %v4926_v63 = vadd.f32 %v3511_v58, %v3510_v51  ;;  %v1828_v47 = vadd.f32 %v4878_v13, %v4856_v56 }
 0x12a   :  { %2378 = vmatmul.mubr.bf16.gmra.mrb[132].mxu1 %v4197_v45  ;;  %3964 = vmatmul.mubr.bf16.gmra.mrb[132].mxu0 %v4198_v21 }
 0x12b   :  { %v4928_v0 = vadd.f32 %v3600_v30, %v1812_v59  ;;  %2385 = vmatprep.mubr.bf16.mxu1 %v4199_v54  ;;  %3967 = vmatprep.mubr.bf16.mxu0 %v4200_v55  ;;  %v1833_v59 = vadd.f32 %v4890_v26, %v4856_v56 }
 0x12d   :  { %v3601_v1 = vpop.f32.mrb[28].mxu1  ;;  %v3513_v3 = vpop.f32.mrb[28].mxu0 }
 0x12e   :  { %v3602_v6 = vpop.f32.mrb[29].mxu1  ;;  %v3514_v7 = vpop.f32.mrb[29].mxu0 }
 0x12f   :  { %v3603_v10 = vadd.f32 %v3602_v6, %v3601_v1  ;;  %v3604_v62 = vpop.f32.mrb[30].mxu1  ;;  %v4938_v16 = vadd.f32 %v3514_v7, %v3513_v3  ;;  %v3516_v17 = vpop.f32.mrb[30].mxu0 }
 0x130   :  { %v3605_v22 = vpop.f32.mrb[31].mxu1  ;;  %v3517_v5 = vpop.f32.mrb[31].mxu0 }
 0x131   :  { %v4948_v24 = vadd.f32 %v3603_v10, %v1817_v9  ;;  %v3606_v46 = vadd.f32 %v3605_v22, %v3604_v62  ;;  %v4950_v25 = vadd.f32 %v3517_v5, %v3516_v17  ;;  %v1841_v22 = vadd.f32 %v4914_v50, %v4856_v56 }
 0x132   :  { %2386 = vmatmul.mubr.bf16.gmra.mrb[136].mxu1 %v4201_v8  ;;  %3968 = vmatmul.mubr.bf16.gmra.mrb[136].mxu0 %v4202_v37  ;;  %v1836_v8 = vadd.f32 %v4902_v38, %v4856_v56 }
 0x133   :  { %v4952_v27 = vadd.f32 %v3606_v46, %v1820_v23  ;;  %2393 = vmatprep.mubr.bf16.mxu1 %v4203_v18  ;;  %3971 = vmatprep.mubr.bf16.mxu0 %v4204_v19 }
 0x135   :  { %v3607_v29 = vpop.f32.mrb[32].mxu1  ;;  %v3519_v31 = vpop.f32.mrb[32].mxu0 }
 0x136   :  { %v3608_v32 = vpop.f32.mrb[33].mxu1  ;;  %v3520_v33 = vpop.f32.mrb[33].mxu0 }
 0x137   :  { %v3609_v40 = vadd.f32 %v3608_v32, %v3607_v29  ;;  %v3610_v41 = vpop.f32.mrb[34].mxu1  ;;  %v4962_v42 = vadd.f32 %v3520_v33, %v3519_v31  ;;  %v3522_v43 = vpop.f32.mrb[34].mxu0  ;;  %v1844_v32 = vadd.f32 %v4926_v63, %v4856_v56 }
 0x138   :  { %v3611_v45 = vpop.f32.mrb[35].mxu1  ;;  %v3523_v21 = vpop.f32.mrb[35].mxu0 }
 0x139   :  { %v4966_v48 = vadd.f32 %v3609_v40, %v1825_v14  ;;  %v3612_v49 = vadd.f32 %v3611_v45, %v3610_v41  ;;  %v3524_v51 = vadd.f32 %v3523_v21, %v3522_v43  ;;  %v1849_v45 = vadd.f32 %v4938_v16, %v4856_v56 }
 0x13a   :  { %2394 = vmatmul.mubr.bf16.gmra.mrb[140].mxu1 %v4205_v34  ;;  %3972 = vmatmul.mubr.bf16.gmra.mrb[140].mxu0 %v4206_v53 }
 0x13b   :  { %v4968_v54 = vadd.f32 %v3612_v49, %v1828_v47 }
 0x13d   :  { %v3613_v55 = vpop.f32.mrb[36].mxu1  ;;  %v3525_v2 = vpop.f32.mrb[36].mxu0 }
 0x13e   :  { %v3614_v57 = vpop.f32.mrb[37].mxu1  ;;  %v3526_v58 = vpop.f32.mrb[37].mxu0 }
 0x13f   :  { %v3615_v30 = vadd.f32 %v3614_v57, %v3613_v55  ;;  %v3616_v1 = vpop.f32.mrb[38].mxu1  ;;  %v4972_v3 = vadd.f32 %v3526_v58, %v3525_v2  ;;  %v3528_v13 = vpop.f32.mrb[38].mxu0  ;;  %v1852_v57 = vadd.f32 %v4950_v25, %v4856_v56  ;;  %v1860_v25 = vadd.f32 %v3524_v51, %v4856_v56 }
 0x140   :  { %v3617_v6 = vpop.f32.mrb[39].mxu1  ;;  %v3529_v7 = vpop.f32.mrb[39].mxu0 }
 0x141   :  { %v4976_v37 = vadd.f32 %v3615_v30, %v1833_v59  ;;  %v3618_v9 = vadd.f32 %v3617_v6, %v3616_v1  ;;  %v3530_v10 = vadd.f32 %v3529_v7, %v3528_v13  ;;  %v1865_v51 = vadd.f32 %v4972_v3, %v4856_v56 }
 0x143   :  { %v4978_v62 = vadd.f32 %v3618_v9, %v1836_v8  ;;  %v1857_v8 = vadd.f32 %v4962_v42, %v4856_v56 }
 0x145   :  { %v3619_v17 = vpop.f32.mrb[40].mxu1  ;;  %v3531_v18 = vpop.f32.mrb[40].mxu0 }
 0x146   :  { %v3620_v19 = vpop.f32.mrb[41].mxu1  ;;  %v3532_v26 = vpop.f32.mrb[41].mxu0 }
 0x147   :  { %v3621_v5 = vadd.f32 %v3620_v19, %v3619_v17  ;;  %v3622_v23 = vpop.f32.mrb[42].mxu1  ;;  %v4982_v46 = vadd.f32 %v3532_v26, %v3531_v18  ;;  %v3534_v29 = vpop.f32.mrb[42].mxu0 }
 0x148   :  { %v3623_v31 = vpop.f32.mrb[43].mxu1  ;;  %v3535_v38 = vpop.f32.mrb[43].mxu0 }
 0x149   :  { %v4986_v33 = vadd.f32 %v3621_v5, %v1841_v22  ;;  %v3624_v34 = vadd.f32 %v3623_v31, %v3622_v23  ;;  %v4988_v53 = vadd.f32 %v3535_v38, %v3534_v29 }
 0x14b   :  { %v4990_v14 = vadd.f32 %v3624_v34, %v1844_v32 }
 0x14d   :  { %v3625_v40 = vpop.f32.mrb[44].mxu1  ;;  %v3537_v41 = vpop.f32.mrb[44].mxu0 }
 0x14e   :  { %v3626_v50 = vpop.f32.mrb[45].mxu1  ;;  %v3538_v43 = vpop.f32.mrb[45].mxu0 }
 0x14f   :  { %v3627_v21 = vadd.f32 %v3626_v50, %v3625_v40  ;;  %v3628_v47 = vpop.f32.mrb[46].mxu1  ;;  %v4994_v49 = vadd.f32 %v3538_v43, %v3537_v41  ;;  %v3540_v55 = vpop.f32.mrb[46].mxu0 }
 0x150   :  { %v3629_v63 = vpop.f32.mrb[47].mxu1  ;;  %v3541_v2 = vpop.f32.mrb[47].mxu0 }
 0x151   :  { %v4998_v58 = vadd.f32 %v3627_v21, %v1849_v45  ;;  %v3630_v59 = vadd.f32 %v3629_v63, %v3628_v47  ;;  %v5000_v30 = vadd.f32 %v3541_v2, %v3540_v55 }
 0x153   :  { %v5002_v1 = vadd.f32 %v3630_v59, %v1852_v57 }
 0x155   :  { %v3631_v13 = vpop.f32.mrb[48].mxu1  ;;  %v3695_v6 = vpop.f32.mrb[48].mxu0 }
 0x156   :  { %v3632_v16 = vpop.f32.mrb[49].mxu1  ;;  %v3696_v7 = vpop.f32.mrb[49].mxu0 }
 0x157   :  { %v3633_v9 = vadd.f32 %v3632_v16, %v3631_v13  ;;  %v3697_v17 = vadd.f32 %v3696_v7, %v3695_v6  ;;  %v3634_v18 = vpop.f32.mrb[50].mxu1  ;;  %v3698_v19 = vpop.f32.mrb[50].mxu0 }
 0x158   :  { %v3635_v26 = vpop.f32.mrb[51].mxu1  ;;  %v3699_v22 = vpop.f32.mrb[51].mxu0 }
 0x159   :  { %v5007_v5 = vadd.f32 %v3633_v9, %v1857_v8  ;;  %v5010_v23 = vadd.f32 %v3697_v17, %v4876_v11  ;;  %v3636_v29 = vadd.f32 %v3635_v26, %v3634_v18  ;;  %v3700_v31 = vadd.f32 %v3699_v22, %v3698_v19 }
 0x15a   :  { %v1868_v11 = vadd.f32 %v3530_v10, %v4856_v56  ;;  %v1873_v10 = vadd.f32 %v4982_v46, %v4856_v56 }
 0x15b   :  { %v5012_v38 = vadd.f32 %v3636_v29, %v1860_v25  ;;  %v5015_v32 = vadd.f32 %v3700_v31, %v4880_v15 }
 0x15d   :  { %v3637_v42 = vpop.f32.mrb[52].mxu1  ;;  %v3701_v34 = vpop.f32.mrb[52].mxu0 }
 0x15e   :  { %v3638_v40 = vpop.f32.mrb[53].mxu1  ;;  %v3702_v41 = vpop.f32.mrb[53].mxu0 }
 0x15f   :  { %v3639_v50 = vadd.f32 %v3638_v40, %v3637_v42  ;;  %v3703_v43 = vadd.f32 %v3702_v41, %v3701_v34  ;;  %v3640_v45 = vpop.f32.mrb[54].mxu1  ;;  %v3704_v21 = vpop.f32.mrb[54].mxu0 }
 0x160   :  { %v3641_v47 = vpop.f32.mrb[55].mxu1  ;;  %v3705_v55 = vpop.f32.mrb[55].mxu0 }
 0x161   :  { %v5020_v63 = vadd.f32 %v3639_v50, %v1865_v51  ;;  %v5023_v15 = vadd.f32 %v3703_v43, %v4900_v35  ;;  %v3642_v2 = vadd.f32 %v3641_v47, %v3640_v45  ;;  %v3706_v57 = vadd.f32 %v3705_v55, %v3704_v21 }
 0x162   :  { %v1876_v35 = vadd.f32 %v4988_v53, %v4856_v56  ;;  %v1881_v53 = vadd.f32 %v4994_v49, %v4856_v56 }
 0x163   :  { %v5025_v59 = vadd.f32 %v3642_v2, %v1868_v11  ;;  %v5028_v13 = vadd.f32 %v3706_v57, %v4904_v39 }
 0x165   :  { %v3643_v3 = vpop.f32.mrb[56].mxu1  ;;  %v3707_v6 = vpop.f32.mrb[56].mxu0 }
 0x166   :  { %v3644_v16 = vpop.f32.mrb[57].mxu1  ;;  %v3708_v7 = vpop.f32.mrb[57].mxu0 }
 0x167   :  { %v3645_v8 = vadd.f32 %v3644_v16, %v3643_v3  ;;  %v3709_v9 = vadd.f32 %v3708_v7, %v3707_v6  ;;  %v3646_v17 = vpop.f32.mrb[58].mxu1  ;;  %v3710_v18 = vpop.f32.mrb[58].mxu0 }
 0x168   :  { %v3647_v19 = vpop.f32.mrb[59].mxu1  ;;  %v3711_v25 = vpop.f32.mrb[59].mxu0 }
 0x169   :  { %v5034_v26 = vadd.f32 %v3645_v8, %v1873_v10  ;;  %v5037_v39 = vadd.f32 %v3709_v9, %v4924_v61  ;;  %v3648_v22 = vadd.f32 %v3647_v19, %v3646_v17  ;;  %v3712_v29 = vadd.f32 %v3711_v25, %v3710_v18 }
 0x16a   :  { %v1884_v61 = vadd.f32 %v5000_v30, %v4856_v56  ;;  %v1889_v30 = vadd.f32 %v4779_v60, %v4856_v56 }
 0x16b   :  { %v5039_v31 = vadd.f32 %v3648_v22, %v1876_v35  ;;  %v5042_v46 = vadd.f32 %v3712_v29, %v4928_v0 }
 0x16d   :  { %v3649_v42 = vpop.f32.mrb[60].mxu1  ;;  %v3713_v34 = vpop.f32.mrb[60].mxu0 }
 0x16e   :  { %v3650_v40 = vpop.f32.mrb[61].mxu1  ;;  %v3714_v41 = vpop.f32.mrb[61].mxu0 }
 0x16f   :  { %v3651_v51 = vadd.f32 %v3650_v40, %v3649_v42  ;;  %v3715_v50 = vadd.f32 %v3714_v41, %v3713_v34  ;;  %v3652_v43 = vpop.f32.mrb[62].mxu1  ;;  %v3716_v45 = vpop.f32.mrb[62].mxu0 }
 0x170   :  { %v3653_v21 = vpop.f32.mrb[63].mxu1  ;;  %v3717_v11 = vpop.f32.mrb[63].mxu0 }
 0x171   :  { %v5048_v47 = vadd.f32 %v3651_v51, %v1881_v53  ;;  %v5051_v0 = vadd.f32 %v3715_v50, %v4948_v24  ;;  %v3654_v55 = vadd.f32 %v3653_v21, %v3652_v43  ;;  %v3718_v2 = vadd.f32 %v3717_v11, %v3716_v45 }
 0x172   :  { %v1892_v24 = vadd.f32 %v4789_v4, %v4856_v56  ;;  %v1897_v4 = vadd.f32 %v4799_v12, %v4856_v56 }
 0x173   :  { %v5053_v57 = vadd.f32 %v3654_v55, %v1884_v61  ;;  %v5056_v49 = vadd.f32 %v3718_v2, %v4952_v27 }
 0x175   :  { %v3655_v3 = vpop.f32.mrb[64].mxu1  ;;  %v3719_v6 = vpop.f32.mrb[64].mxu0 }
 0x176   :  { %v3656_v16 = vpop.f32.mrb[65].mxu1  ;;  %v3720_v7 = vpop.f32.mrb[65].mxu0 }
 0x177   :  { %v3657_v10 = vadd.f32 %v3656_v16, %v3655_v3  ;;  %v3721_v8 = vadd.f32 %v3720_v7, %v3719_v6  ;;  %v3658_v9 = vpop.f32.mrb[66].mxu1  ;;  %v3722_v17 = vpop.f32.mrb[66].mxu0 }
 0x178   :  { %v3659_v18 = vpop.f32.mrb[67].mxu1  ;;  %v3723_v35 = vpop.f32.mrb[67].mxu0 }
 0x179   :  { %v5062_v19 = vadd.f32 %v3657_v10, %v1889_v30  ;;  %v5065_v27 = vadd.f32 %v3721_v8, %v4966_v48  ;;  %v3660_v25 = vadd.f32 %v3659_v18, %v3658_v9  ;;  %v3724_v22 = vadd.f32 %v3723_v35, %v3722_v17 }
 0x17a   :  { %v1900_v48 = vadd.f32 %v4809_v20, %v4856_v56  ;;  %v1905_v20 = vadd.f32 %v4819_v28, %v4856_v56 }
 0x17b   :  { %v5067_v29 = vadd.f32 %v3660_v25, %v1892_v24  ;;  %v5070_v60 = vadd.f32 %v3724_v22, %v4968_v54 }
 0x17d   :  { %v3661_v42 = vpop.f32.mrb[68].mxu1  ;;  %v3725_v34 = vpop.f32.mrb[68].mxu0 }
 0x17e   :  { %v3662_v40 = vpop.f32.mrb[69].mxu1  ;;  %v3726_v41 = vpop.f32.mrb[69].mxu0 }
 0x17f   :  { %v3663_v53 = vadd.f32 %v3662_v40, %v3661_v42  ;;  %v3727_v51 = vadd.f32 %v3726_v41, %v3725_v34  ;;  %v3664_v50 = vpop.f32.mrb[70].mxu1  ;;  %v3728_v43 = vpop.f32.mrb[70].mxu0 }
 0x180   :  { %v3665_v45 = vpop.f32.mrb[71].mxu1  ;;  %v3729_v61 = vpop.f32.mrb[71].mxu0 }
 0x181   :  { %v5076_v21 = vadd.f32 %v3663_v53, %v1897_v4  ;;  %v5079_v54 = vadd.f32 %v3727_v51, %v4976_v37  ;;  %v3666_v11 = vadd.f32 %v3665_v45, %v3664_v50  ;;  %v3730_v55 = vadd.f32 %v3729_v61, %v3728_v43 }
 0x182   :  { %v1908_v37 = vadd.f32 %v4829_v36, %v4856_v56  ;;  %v1913_v36 = vadd.f32 %v4839_v44, %v4856_v56 }
 0x183   :  { %v5081_v2 = vadd.f32 %v3666_v11, %v1900_v48  ;;  %v5084_v12 = vadd.f32 %v3730_v55, %v4978_v62 }
 0x185   :  { %v3667_v3 = vpop.f32.mrb[72].mxu1  ;;  %v3731_v6 = vpop.f32.mrb[72].mxu0 }
 0x186   :  { %v3668_v16 = vpop.f32.mrb[73].mxu1  ;;  %v3732_v7 = vpop.f32.mrb[73].mxu0 }
 0x187   :  { %v3669_v30 = vadd.f32 %v3668_v16, %v3667_v3  ;;  %v3733_v10 = vadd.f32 %v3732_v7, %v3731_v6  ;;  %v3670_v8 = vpop.f32.mrb[74].mxu1  ;;  %v3734_v9 = vpop.f32.mrb[74].mxu0 }
 0x188   :  { %v3671_v17 = vpop.f32.mrb[75].mxu1  ;;  %v3735_v24 = vpop.f32.mrb[75].mxu0 }
 0x189   :  { %v5090_v18 = vadd.f32 %v3669_v30, %v1905_v20  ;;  %v5093_v62 = vadd.f32 %v3733_v10, %v4986_v33  ;;  %v3672_v35 = vadd.f32 %v3671_v17, %v3670_v8  ;;  %v3736_v25 = vadd.f32 %v3735_v24, %v3734_v9 }
 0x18a   :  { %v1916_v33 = vadd.f32 %v4849_v52, %v4856_v56 }
 0x18b   :  { %v5095_v22 = vadd.f32 %v3672_v35, %v1908_v37  ;;  %v5098_v28 = vadd.f32 %v3736_v25, %v4990_v14 }
 0x18d   :  { %v3673_v42 = vpop.f32.mrb[76].mxu1  ;;  %v3737_v34 = vpop.f32.mrb[76].mxu0 }
 0x18e   :  { %v3674_v40 = vpop.f32.mrb[77].mxu1  ;;  %v3738_v41 = vpop.f32.mrb[77].mxu0 }
 0x18f   :  { %v3675_v4 = vadd.f32 %v3674_v40, %v3673_v42  ;;  %v3739_v53 = vadd.f32 %v3738_v41, %v3737_v34  ;;  %v3676_v51 = vpop.f32.mrb[78].mxu1  ;;  %v3740_v50 = vpop.f32.mrb[78].mxu0 }
 0x190   :  { %v3677_v43 = vpop.f32.mrb[79].mxu1  ;;  %v3741_v48 = vpop.f32.mrb[79].mxu0 }
 0x191   :  { %v5104_v45 = vadd.f32 %v3675_v4, %v1913_v36  ;;  %v5107_v14 = vadd.f32 %v3739_v53, %v4998_v58  ;;  %v3678_v61 = vadd.f32 %v3677_v43, %v3676_v51  ;;  %v3742_v11 = vadd.f32 %v3741_v48, %v3740_v50 }
 0x193   :  { %v5109_v55 = vadd.f32 %v3678_v61, %v1916_v33  ;;  %v5112_v44 = vadd.f32 %v3742_v11, %v5002_v1 }
 0x195   :  { %v3743_v3 = vpop.f32.mrb[80].mxu0  ;;  %v3807_v6 = vpop.f32.mrb[80].mxu1 }
 0x196   :  { %v3744_v16 = vpop.f32.mrb[81].mxu0  ;;  %v3808_v7 = vpop.f32.mrb[81].mxu1 }
 0x197   :  { %v3745_v20 = vadd.f32 %v3744_v16, %v3743_v3  ;;  %v3809_v52 = vadd.f32 %v3808_v7, %v3807_v6  ;;  %v3746_v56 = vpop.f32.mrb[82].mxu0  ;;  %v3810_v30 = vpop.f32.mrb[82].mxu1 }
 0x198   :  { %v3747_v10 = vpop.f32.mrb[83].mxu0  ;;  %v3811_v8 = vpop.f32.mrb[83].mxu1 }
 0x199   :  { %v5115_v58 = vadd.f32 %v3745_v20, %v5007_v5  ;;  %v3748_v9 = vadd.f32 %v3747_v10, %v3746_v56  ;;  %v3812_v37 = vadd.f32 %v3811_v8, %v3810_v30  ;;  %v5118_v17 = vadd.f32 %v3809_v52, %v5010_v23 }
 0x19b   :  { %v5121_v1 = vadd.f32 %v3748_v9, %v5012_v38  ;;  %v5124_v24 = vadd.f32 %v3812_v37, %v5015_v32 }
 0x19d   :  { %v3749_v35 = vpop.f32.mrb[84].mxu0  ;;  %v3813_v25 = vpop.f32.mrb[84].mxu1 }
 0x19e   :  { %v3750_v42 = vpop.f32.mrb[85].mxu0  ;;  %v3814_v34 = vpop.f32.mrb[85].mxu1 }
 0x19f   :  { %v3751_v40 = vadd.f32 %v3750_v42, %v3749_v35  ;;  %v3815_v41 = vadd.f32 %v3814_v34, %v3813_v25  ;;  %v3752_v36 = vpop.f32.mrb[86].mxu0  ;;  %v3816_v5 = vpop.f32.mrb[86].mxu1 }
 0x1a0   :  { %v3753_v4 = vpop.f32.mrb[87].mxu0  ;;  %v3817_v53 = vpop.f32.mrb[87].mxu1 }
 0x1a1   :  { %v5127_v51 = vadd.f32 %v3751_v40, %v5020_v63  ;;  %v3754_v23 = vadd.f32 %v3753_v4, %v3752_v36  ;;  %v3818_v50 = vadd.f32 %v3817_v53, %v3816_v5  ;;  %v5130_v38 = vadd.f32 %v3815_v41, %v5023_v15 }
 0x1a3   :  { %v5133_v32 = vadd.f32 %v3754_v23, %v5025_v59  ;;  %v5136_v33 = vadd.f32 %v3818_v50, %v5028_v13 }
 0x1a5   :  { %v3755_v43 = vpop.f32.mrb[88].mxu0  ;;  %v3819_v48 = vpop.f32.mrb[88].mxu1 }
 0x1a6   :  { %v3756_v61 = vpop.f32.mrb[89].mxu0  ;;  %v3820_v11 = vpop.f32.mrb[89].mxu1 }
 0x1a7   :  { %v3757_v3 = vadd.f32 %v3756_v61, %v3755_v43  ;;  %v3821_v6 = vadd.f32 %v3820_v11, %v3819_v48  ;;  %v3758_v16 = vpop.f32.mrb[90].mxu0  ;;  %v3822_v63 = vpop.f32.mrb[90].mxu1 }
 0x1a8   :  { %v3759_v7 = vpop.f32.mrb[91].mxu0  ;;  %v3823_v20 = vpop.f32.mrb[91].mxu1 }
 0x1a9   :  { %v5139_v52 = vadd.f32 %v3757_v3, %v5034_v26  ;;  %v3760_v15 = vadd.f32 %v3759_v7, %v3758_v16  ;;  %v3824_v56 = vadd.f32 %v3823_v20, %v3822_v63  ;;  %v5142_v59 = vadd.f32 %v3821_v6, %v5037_v39 }
 0x1ab   :  { %v5145_v13 = vadd.f32 %v3760_v15, %v5039_v31  ;;  %v5148_v30 = vadd.f32 %v3824_v56, %v5042_v46 }
 0x1ad   :  { %v3761_v10 = vpop.f32.mrb[92].mxu0  ;;  %v3825_v8 = vpop.f32.mrb[92].mxu1 }
 0x1ae   :  { %v3762_v9 = vpop.f32.mrb[93].mxu0  ;;  %v3826_v37 = vpop.f32.mrb[93].mxu1 }
 0x1af   :  { %v3763_v35 = vadd.f32 %v3762_v9, %v3761_v10  ;;  %v3827_v25 = vadd.f32 %v3826_v37, %v3825_v8  ;;  %v3764_v42 = vpop.f32.mrb[94].mxu0  ;;  %v3828_v26 = vpop.f32.mrb[94].mxu1 }
 0x1b0   :  { %v3765_v34 = vpop.f32.mrb[95].mxu0  ;;  %v3829_v40 = vpop.f32.mrb[95].mxu1 }
 0x1b1   :  { %v5151_v41 = vadd.f32 %v3763_v35, %v5048_v47  ;;  %v3766_v39 = vadd.f32 %v3765_v34, %v3764_v42  ;;  %v3830_v36 = vadd.f32 %v3829_v40, %v3828_v26  ;;  %v5154_v31 = vadd.f32 %v3827_v25, %v5051_v0 }
 0x1b3   :  { %v5157_v46 = vadd.f32 %v3766_v39, %v5053_v57  ;;  %v5160_v5 = vadd.f32 %v3830_v36, %v5056_v49 }
 0x1b5   :  { %v3767_v4 = vpop.f32.mrb[96].mxu0  ;;  %v3831_v53 = vpop.f32.mrb[96].mxu1 }
 0x1b6   :  { %v3768_v23 = vpop.f32.mrb[97].mxu0  ;;  %v3832_v50 = vpop.f32.mrb[97].mxu1 }
 0x1b7   :  { %v3769_v43 = vadd.f32 %v3768_v23, %v3767_v4  ;;  %v3833_v48 = vadd.f32 %v3832_v50, %v3831_v53  ;;  %v3770_v61 = vpop.f32.mrb[98].mxu0  ;;  %v3834_v47 = vpop.f32.mrb[98].mxu1 }
 0x1b8   :  { %v3771_v11 = vpop.f32.mrb[99].mxu0  ;;  %v3835_v3 = vpop.f32.mrb[99].mxu1 }
 0x1b9   :  { %v5163_v6 = vadd.f32 %v3769_v43, %v5062_v19  ;;  %v3772_v0 = vadd.f32 %v3771_v11, %v3770_v61  ;;  %v3836_v16 = vadd.f32 %v3835_v3, %v3834_v47  ;;  %v5166_v57 = vadd.f32 %v3833_v48, %v5065_v27 }
 0x1bb   :  { %v5169_v49 = vadd.f32 %v3772_v0, %v5067_v29  ;;  %v5172_v63 = vadd.f32 %v3836_v16, %v5070_v60 }
 0x1bd   :  { %v3773_v7 = vpop.f32.mrb[100].mxu0  ;;  %v3837_v20 = vpop.f32.mrb[100].mxu1 }
 0x1be   :  { %v3774_v15 = vpop.f32.mrb[101].mxu0  ;;  %v3838_v56 = vpop.f32.mrb[101].mxu1 }
 0x1bf   :  { %v3775_v10 = vadd.f32 %v3774_v15, %v3773_v7  ;;  %v3839_v8 = vadd.f32 %v3838_v56, %v3837_v20  ;;  %v3776_v9 = vpop.f32.mrb[102].mxu0  ;;  %v3840_v19 = vpop.f32.mrb[102].mxu1 }
 0x1c0   :  { %v3777_v37 = vpop.f32.mrb[103].mxu0  ;;  %v3841_v35 = vpop.f32.mrb[103].mxu1 }
 0x1c1   :  { %v5175_v25 = vadd.f32 %v3775_v10, %v5076_v21  ;;  %v3778_v27 = vadd.f32 %v3777_v37, %v3776_v9  ;;  %v3842_v42 = vadd.f32 %v3841_v35, %v3840_v19  ;;  %v5178_v29 = vadd.f32 %v3839_v8, %v5079_v54 }
 0x1c3   :  { %v5181_v60 = vadd.f32 %v3778_v27, %v5081_v2  ;;  %v5184_v26 = vadd.f32 %v3842_v42, %v5084_v12 }
 0x1c5   :  { %v3779_v34 = vpop.f32.mrb[104].mxu0  ;;  %v3843_v40 = vpop.f32.mrb[104].mxu1 }
 0x1c6   :  { %v3780_v39 = vpop.f32.mrb[105].mxu0  ;;  %v3844_v36 = vpop.f32.mrb[105].mxu1 }
 0x1c7   :  { %v3781_v4 = vadd.f32 %v3780_v39, %v3779_v34  ;;  %v3845_v53 = vadd.f32 %v3844_v36, %v3843_v40  ;;  %v3782_v23 = vpop.f32.mrb[106].mxu0  ;;  %v3846_v21 = vpop.f32.mrb[106].mxu1 }
 0x1c8   :  { %v3783_v50 = vpop.f32.mrb[107].mxu0  ;;  %v3847_v43 = vpop.f32.mrb[107].mxu1 }
 0x1c9   :  { %v5187_v48 = vadd.f32 %v3781_v4, %v5090_v18  ;;  %v3784_v54 = vadd.f32 %v3783_v50, %v3782_v23  ;;  %v3848_v61 = vadd.f32 %v3847_v43, %v3846_v21  ;;  %v5190_v2 = vadd.f32 %v3845_v53, %v5093_v62 }
 0x1cb   :  { %v5193_v12 = vadd.f32 %v3784_v54, %v5095_v22  ;;  %v5196_v47 = vadd.f32 %v3848_v61, %v5098_v28 }
 0x1cd   :  { %v3785_v11 = vpop.f32.mrb[108].mxu0  ;;  %v3849_v3 = vpop.f32.mrb[108].mxu1 }
 0x1ce   :  { %v3786_v0 = vpop.f32.mrb[109].mxu0  ;;  %v3850_v16 = vpop.f32.mrb[109].mxu1 }
 0x1cf   :  { %v3787_v7 = vadd.f32 %v3786_v0, %v3785_v11  ;;  %v3851_v20 = vadd.f32 %v3850_v16, %v3849_v3  ;;  %v3788_v15 = vpop.f32.mrb[110].mxu0  ;;  %v3852_v18 = vpop.f32.mrb[110].mxu1 }
 0x1d0   :  { %v3789_v56 = vpop.f32.mrb[111].mxu0  ;;  %v3853_v10 = vpop.f32.mrb[111].mxu1 }
 0x1d1   :  { %v5199_v8 = vadd.f32 %v3787_v7, %v5104_v45  ;;  %v3790_v62 = vadd.f32 %v3789_v56, %v3788_v15  ;;  %v3854_v9 = vadd.f32 %v3853_v10, %v3852_v18  ;;  %v5202_v22 = vadd.f32 %v3851_v20, %v5107_v14 }
 0x1d3   :  { %v5205_v28 = vadd.f32 %v3790_v62, %v5109_v55  ;;  %v5208_v19 = vadd.f32 %v3854_v9, %v5112_v44 }
 0x1d5   :  { %v3855_v37 = vpop.f32.mrb[112].mxu1  ;;  %v3945_v35 = vpop.f32.mrb[112].mxu0 }
 0x1d6   :  { %v2445_v27 = vadd.f32 %v3945_v35, %v5130_v38  ;;  %v3856_v42 = vpop.f32.mrb[113].mxu1  ;;  %v2436_v34 = vpop.f32.mrb[113].mxu0 }
 0x1d7   :  { %v3857_v40 = vadd.f32 %v3856_v42, %v3855_v37  ;;  %v2437_v45 = vadd.f32 %v2436_v34, %v5118_v17  ;;  %v3858_v39 = vpop.f32.mrb[114].mxu1  ;;  %v3946_v36 = vpop.f32.mrb[114].mxu0 }
 0x1d8   :  { %v2597_v4 = vmul.f32 0.2, %v2445_v27  ;;  %v2448_v14 = vadd.f32 %v3946_v36, %v5136_v33  ;;  %v3859_v53 = vpop.f32.mrb[115].mxu1  ;;  %v2439_v55 = vpop.f32.mrb[115].mxu0  ;;  %vm2565_vm0 = vcmp.ge.f32.partialorder %v2445_v27, 0.0 }
 0x1d9   :  { %v2595_v23 = vmul.f32 0.2, %v2437_v45  ;;  %v3860_v44 = vadd.f32 %v3859_v53, %v3858_v39  ;;  %v2440_v21 = vadd.f32 %v2439_v55, %v5124_v24  ;;  %vm2563_vm1 = vcmp.ge.f32.partialorder %v2437_v45, 0.0 }
 0x1da   :  { %vm2566_vm2 = vcmp.ge.f32.partialorder %v2448_v14, 0.0  ;;  %v2598_v38 = vmul.f32 0.2, %v2448_v14  ;;  %v5215_v50 = vadd.f32 %v3857_v40, %v5115_v58  ;;  %v2629_v54 = vsel %vm2565_vm0, %v2445_v27, %v2597_v4 }
 0x1db   :  { %vm2564_vm3 = vcmp.ge.f32.partialorder %v2440_v21, 0.0  ;;  %v2596_v17 = vmul.f32 0.2, %v2440_v21  ;;  %v5218_v43 = vadd.f32 %v3860_v44, %v5121_v1  ;;  %v2627_v61 = vsel %vm2563_vm1, %v2437_v45, %v2595_v23 }
 0x1dc   :  { %v2630_v33 = vsel %vm2566_vm2, %v2448_v14, %v2598_v38 }
 0x1dd   :  { %v3368_v11 = vpack.c.bf16 %v2630_v33, %v2629_v54  ;;  %v2628_v3 = vsel %vm2564_vm3, %v2440_v21, %v2596_v17  ;;  %v3861_v0 = vpop.f32.mrb[116].mxu1  ;;  %v3949_v16 = vpop.f32.mrb[116].mxu0 }
 0x1de   :  { %v3363_v7 = vpack.c.bf16 %v2628_v3, %v2627_v61  ;;  %v2461_v24 = vadd.f32 %v3949_v16, %v5154_v31  ;;  %v3862_v20 = vpop.f32.mrb[117].mxu1  ;;  %v2452_v15 = vpop.f32.mrb[117].mxu0 }
 0x1df   :  { %3440 = vst [vmem:[%s5311_s3 + $0x8] sm:$0xff] %v3368_v11   ;;  %v3863_v58 = vadd.f32 %v3862_v20, %v3861_v0  ;;  %v2453_v1 = vadd.f32 %v2452_v15, %v5142_v59  ;;  %v3864_v18 = vpop.f32.mrb[118].mxu1  ;;  %v3950_v56 = vpop.f32.mrb[118].mxu0 }
 0x1e0   :  { %3364 = vst [vmem:[%s5311_s3] sm:$0xff] %v3363_v7   ;;  %v2601_v10 = vmul.f32 0.2, %v2461_v24  ;;  %v2464_v62 = vadd.f32 %v3950_v56, %v5160_v5  ;;  %v3865_v9 = vpop.f32.mrb[119].mxu1  ;;  %v2455_v31 = vpop.f32.mrb[119].mxu0  ;;  %vm2569_vm4 = vcmp.ge.f32.partialorder %v2461_v24, 0.0 }
 0x1e1   :  { %v2599_v37 = vmul.f32 0.2, %v2453_v1  ;;  %v3866_v35 = vadd.f32 %v3865_v9, %v3864_v18  ;;  %v2456_v27 = vadd.f32 %v2455_v31, %v5148_v30  ;;  %vm2567_vm5 = vcmp.ge.f32.partialorder %v2453_v1, 0.0 }
 0x1e2   :  { %vm2570_vm6 = vcmp.ge.f32.partialorder %v2464_v62, 0.0  ;;  %v2602_v42 = vmul.f32 0.2, %v2464_v62  ;;  %v5231_v59 = vadd.f32 %v3863_v58, %v5127_v51  ;;  %v2633_v45 = vsel %vm2569_vm4, %v2461_v24, %v2601_v10 }
 0x1e3   :  { %vm2568_vm7 = vcmp.ge.f32.partialorder %v2456_v27, 0.0  ;;  %v2600_v34 = vmul.f32 0.2, %v2456_v27  ;;  %v5234_v40 = vadd.f32 %v3866_v35, %v5133_v32  ;;  %v2631_v39 = vsel %vm2567_vm5, %v2453_v1, %v2599_v37 }
 0x1e4   :  { %v2634_v5 = vsel %vm2570_vm6, %v2464_v62, %v2602_v42 }
 0x1e5   :  { %v3378_v36 = vpack.c.bf16 %v2634_v5, %v2633_v45  ;;  %v2632_v4 = vsel %vm2568_vm7, %v2456_v27, %v2600_v34  ;;  %v3867_v14 = vpop.f32.mrb[120].mxu1  ;;  %v3953_v53 = vpop.f32.mrb[120].mxu0 }
 0x1e6   :  { %v3373_v55 = vpack.c.bf16 %v2632_v4, %v2631_v39  ;;  %v2477_v30 = vadd.f32 %v3953_v53, %v5178_v29  ;;  %v3868_v23 = vpop.f32.mrb[121].mxu1  ;;  %v2468_v44 = vpop.f32.mrb[121].mxu0 }
 0x1e7   :  { %3442 = vst [vmem:[%s5311_s3 + $0x18] sm:$0xff] %v3378_v36   ;;  %v3869_v51 = vadd.f32 %v3868_v23, %v3867_v14  ;;  %v2469_v32 = vadd.f32 %v2468_v44, %v5166_v57  ;;  %v3870_v21 = vpop.f32.mrb[122].mxu1  ;;  %v3954_v38 = vpop.f32.mrb[122].mxu0 }
 0x1e8   :  { %3441 = vst [vmem:[%s5311_s3 + $0x10] sm:$0xff] %v3373_v55   ;;  %v2605_v17 = vmul.f32 0.2, %v2477_v30  ;;  %v2480_v54 = vadd.f32 %v3954_v38, %v5184_v26  ;;  %v3871_v33 = vpop.f32.mrb[123].mxu1  ;;  %v2471_v29 = vpop.f32.mrb[123].mxu0  ;;  %vm2573_vm8 = vcmp.ge.f32.partialorder %v2477_v30, 0.0 }
 0x1e9   :  { %v2603_v61 = vmul.f32 0.2, %v2469_v32  ;;  %v3872_v11 = vadd.f32 %v3871_v33, %v3870_v21  ;;  %v2472_v3 = vadd.f32 %v2471_v29, %v5172_v63  ;;  %vm2571_vm9 = vcmp.ge.f32.partialorder %v2469_v32, 0.0 }
 0x1ea   :  { %vm2574_vm10 = vcmp.ge.f32.partialorder %v2480_v54, 0.0  ;;  %v2606_v0 = vmul.f32 0.2, %v2480_v54  ;;  %v5247_v57 = vadd.f32 %v3869_v51, %v5139_v52  ;;  %v2637_v24 = vsel %vm2573_vm8, %v2477_v30, %v2605_v17 }
 0x1eb   :  { %vm2572_vm11 = vcmp.ge.f32.partialorder %v2472_v3, 0.0  ;;  %v2604_v16 = vmul.f32 0.2, %v2472_v3  ;;  %v5250_v7 = vadd.f32 %v3872_v11, %v5145_v13  ;;  %v2635_v20 = vsel %vm2571_vm9, %v2469_v32, %v2603_v61 }
 0x1ec   :  { %v2638_v26 = vsel %vm2574_vm10, %v2480_v54, %v2606_v0 }
 0x1ed   :  { %v3388_v15 = vpack.c.bf16 %v2638_v26, %v2637_v24  ;;  %v2636_v58 = vsel %vm2572_vm11, %v2472_v3, %v2604_v16  ;;  %v3873_v1 = vpop.f32.mrb[124].mxu1  ;;  %v3957_v18 = vpop.f32.mrb[124].mxu0 }
 0x1ee   :  { %v3383_v56 = vpack.c.bf16 %v2636_v58, %v2635_v20  ;;  %v2493_v63 = vadd.f32 %v3957_v18, %v5202_v22  ;;  %v3874_v10 = vpop.f32.mrb[125].mxu1  ;;  %v2484_v62 = vpop.f32.mrb[125].mxu0 }
 0x1ef   :  { %3444 = vst [vmem:[%s5311_s3 + $0x28] sm:$0xff] %v3388_v15   ;;  %v3875_v52 = vadd.f32 %v3874_v10, %v3873_v1  ;;  %v2485_v13 = vadd.f32 %v2484_v62, %v5190_v2  ;;  %v3876_v9 = vpop.f32.mrb[126].mxu1  ;;  %v3958_v31 = vpop.f32.mrb[126].mxu0 }
 0x1f0   :  { %3443 = vst [vmem:[%s5311_s3 + $0x20] sm:$0xff] %v3383_v56   ;;  %v2609_v37 = vmul.f32 0.2, %v2493_v63  ;;  %v2496_v35 = vadd.f32 %v3958_v31, %v5208_v19  ;;  %v3877_v27 = vpop.f32.mrb[127].mxu1  ;;  %v2487_v22 = vpop.f32.mrb[127].mxu0  ;;  %vm2577_vm12 = vcmp.ge.f32.partialorder %v2493_v63, 0.0 }
 0x1f1   :  { %v2607_v42 = vmul.f32 0.2, %v2485_v13  ;;  %v3878_v34 = vadd.f32 %v3877_v27, %v3876_v9  ;;  %v2488_v45 = vadd.f32 %v2487_v22, %v5196_v47  ;;  %vm2575_vm13 = vcmp.ge.f32.partialorder %v2485_v13, 0.0 }
 0x1f2   :  { %vm2578_vm14 = vcmp.ge.f32.partialorder %v2496_v35, 0.0  ;;  %v2610_v5 = vmul.f32 0.2, %v2496_v35  ;;  %v2364_v2 = vadd.f32 %v3875_v52, %v5151_v41  ;;  %v2641_v4 = vsel %vm2577_vm12, %v2493_v63, %v2609_v37 }
 0x1f3   :  { %vm2576_vm15 = vcmp.ge.f32.partialorder %v2488_v45, 0.0  ;;  %v2608_v39 = vmul.f32 0.2, %v2488_v45  ;;  %v2367_v36 = vadd.f32 %v3878_v34, %v5157_v46  ;;  %v2639_v53 = vsel %vm2575_vm13, %v2485_v13, %v2607_v42 }
 0x1f4   :  { %v2642_v14 = vsel %vm2578_vm14, %v2496_v35, %v2610_v5 }
 0x1f5   :  { %v3398_v19 = vpack.c.bf16 %v2642_v14, %v2641_v4  ;;  %v2640_v55 = vsel %vm2576_vm15, %v2488_v45, %v2608_v39  ;;  %v3879_v30 = vpop.f32.mrb[128].mxu1  ;;  %v3961_v23 = vpop.f32.mrb[128].mxu0 }
 0x1f6   :  { %v3393_v44 = vpack.c.bf16 %v2640_v55, %v2639_v53  ;;  %v2509_v51 = vadd.f32 %v3961_v23, %v5231_v59  ;;  %v3880_v47 = vpop.f32.mrb[129].mxu1  ;;  %v2500_v32 = vpop.f32.mrb[129].mxu0 }
 0x1f7   :  { %3446 = vst [vmem:[%s5311_s3 + $0x38] sm:$0xff] %v3398_v19   ;;  %v3881_v41 = vadd.f32 %v3880_v47, %v3879_v30  ;;  %v2501_v21 = vadd.f32 %v2500_v32, %v5215_v50  ;;  %v3882_v46 = vpop.f32.mrb[130].mxu1  ;;  %v3962_v38 = vpop.f32.mrb[130].mxu0 }
 0x1f8   :  { %3445 = vst [vmem:[%s5311_s3 + $0x30] sm:$0xff] %v3393_v44   ;;  %v2613_v17 = vmul.f32 0.2, %v2509_v51  ;;  %v2512_v54 = vadd.f32 %v3962_v38, %v5234_v40  ;;  %v3883_v33 = vpop.f32.mrb[131].mxu1  ;;  %v2503_v59 = vpop.f32.mrb[131].mxu0  ;;  %vm2581_vm0 = vcmp.ge.f32.partialorder %v2509_v51, 0.0 }
 0x1f9   :  { %v2611_v29 = vmul.f32 0.2, %v2501_v21  ;;  %v3884_v61 = vadd.f32 %v3883_v33, %v3882_v46  ;;  %v2504_v11 = vadd.f32 %v2503_v59, %v5218_v43  ;;  %vm2579_vm1 = vcmp.ge.f32.partialorder %v2501_v21, 0.0 }
 0x1fa   :  { %vm2582_vm2 = vcmp.ge.f32.partialorder %v2512_v54, 0.0  ;;  %v2614_v3 = vmul.f32 0.2, %v2512_v54  ;;  %v2372_v50 = vadd.f32 %v3881_v41, %v5163_v6  ;;  %v2645_v24 = vsel %vm2581_vm0, %v2509_v51, %v2613_v17 }
 0x1fb   :  { %vm2580_vm3 = vcmp.ge.f32.partialorder %v2504_v11, 0.0  ;;  %v2612_v0 = vmul.f32 0.2, %v2504_v11  ;;  %v2375_v16 = vadd.f32 %v3884_v61, %v5169_v49  ;;  %v2643_v20 = vsel %vm2579_vm1, %v2501_v21, %v2611_v29 }
 0x1fc   :  { %v2646_v26 = vsel %vm2582_vm2, %v2512_v54, %v2614_v3 }
 0x1fd   :  { %v3408_v40 = vpack.c.bf16 %v2646_v26, %v2645_v24  ;;  %v2644_v15 = vsel %vm2580_vm3, %v2504_v11, %v2612_v0  ;;  %v3885_v58 = vpop.f32.mrb[132].mxu1  ;;  %v3965_v1 = vpop.f32.mrb[132].mxu0 }
 0x1fe   :  { %v3403_v18 = vpack.c.bf16 %v2644_v15, %v2643_v20  ;;  %v2525_v56 = vadd.f32 %v3965_v1, %v2364_v2  ;;  %v3886_v63 = vpop.f32.mrb[133].mxu1  ;;  %v2516_v43 = vpop.f32.mrb[133].mxu0 }
 0x1ff   :  { %3448 = vst [vmem:[%s5311_s3 + $0x48] sm:$0xff] %v3408_v40   ;;  %v3887_v6 = vadd.f32 %v3886_v63, %v3885_v58  ;;  %v2517_v10 = vadd.f32 %v2516_v43, %v5247_v57  ;;  %v3888_v62 = vpop.f32.mrb[134].mxu1  ;;  %v3966_v49 = vpop.f32.mrb[134].mxu0 }
 0x200   :  { %3447 = vst [vmem:[%s5311_s3 + $0x40] sm:$0xff] %v3403_v18   ;;  %v2617_v52 = vmul.f32 0.2, %v2525_v56  ;;  %v2528_v13 = vadd.f32 %v3966_v49, %v2367_v36  ;;  %v3889_v9 = vpop.f32.mrb[135].mxu1  ;;  %v2519_v31 = vpop.f32.mrb[135].mxu0  ;;  %vm2585_vm4 = vcmp.ge.f32.partialorder %v2525_v56, 0.0 }
 0x201   :  { %v2615_v37 = vmul.f32 0.2, %v2517_v10  ;;  %v3890_v35 = vadd.f32 %v3889_v9, %v3888_v62  ;;  %v2520_v27 = vadd.f32 %v2519_v31, %v5250_v7  ;;  %vm2583_vm5 = vcmp.ge.f32.partialorder %v2517_v10, 0.0 }
 0x202   :  { %vm2586_vm6 = vcmp.ge.f32.partialorder %v2528_v13, 0.0  ;;  %v2618_v22 = vmul.f32 0.2, %v2528_v13  ;;  %v2380_v57 = vadd.f32 %v3887_v6, %v5175_v25  ;;  %v2649_v45 = vsel %vm2585_vm4, %v2525_v56, %v2617_v52 }
 0x203   :  { %vm2584_vm7 = vcmp.ge.f32.partialorder %v2520_v27, 0.0  ;;  %v2616_v42 = vmul.f32 0.2, %v2520_v27  ;;  %v2383_v34 = vadd.f32 %v3890_v35, %v5181_v60  ;;  %v2647_v2 = vsel %vm2583_vm5, %v2517_v10, %v2615_v37 }
 0x204   :  { %v2650_v5 = vsel %vm2586_vm6, %v2528_v13, %v2618_v22 }
 0x205   :  { %v3418_v39 = vpack.c.bf16 %v2650_v5, %v2649_v45  ;;  %v2648_v36 = vsel %vm2584_vm7, %v2520_v27, %v2616_v42  ;;  %v3891_v4 = vpop.f32.mrb[136].mxu1  ;;  %v3969_v14 = vpop.f32.mrb[136].mxu0 }
 0x206   :  { %v3413_v53 = vpack.c.bf16 %v2648_v36, %v2647_v2  ;;  %v2541_v19 = vadd.f32 %v3969_v14, %v2380_v57  ;;  %v3892_v55 = vpop.f32.mrb[137].mxu1  ;;  %v2532_v7 = vpop.f32.mrb[137].mxu0 }
 0x207   :  { %3450 = vst [vmem:[%s5311_s3 + $0x58] sm:$0xff] %v3418_v39   ;;  %v3893_v25 = vadd.f32 %v3892_v55, %v3891_v4  ;;  %v2533_v30 = vadd.f32 %v2532_v7, %v2372_v50  ;;  %v3894_v23 = vpop.f32.mrb[138].mxu1  ;;  %v3970_v44 = vpop.f32.mrb[138].mxu0 }
 0x208   :  { %3449 = vst [vmem:[%s5311_s3 + $0x50] sm:$0xff] %v3413_v53   ;;  %v2621_v60 = vmul.f32 0.2, %v2541_v19  ;;  %v2544_v51 = vadd.f32 %v3970_v44, %v2383_v34  ;;  %v3895_v47 = vpop.f32.mrb[139].mxu1  ;;  %v2535_v32 = vpop.f32.mrb[139].mxu0  ;;  %vm2589_vm8 = vcmp.ge.f32.partialorder %v2541_v19, 0.0 }
 0x209   :  { %v2619_v41 = vmul.f32 0.2, %v2533_v30  ;;  %v3896_v21 = vadd.f32 %v3895_v47, %v3894_v23  ;;  %v2536_v46 = vadd.f32 %v2535_v32, %v2375_v16  ;;  %vm2587_vm9 = vcmp.ge.f32.partialorder %v2533_v30, 0.0 }
 0x20a   :  { %vm2590_vm10 = vcmp.ge.f32.partialorder %v2544_v51, 0.0  ;;  %v2622_v38 = vmul.f32 0.2, %v2544_v51  ;;  %v2388_v17 = vadd.f32 %v3893_v25, %v5187_v48  ;;  %v2653_v59 = vsel %vm2589_vm8, %v2541_v19, %v2621_v60 }
 0x20b   :  { %vm2588_vm11 = vcmp.ge.f32.partialorder %v2536_v46, 0.0  ;;  %v2620_v54 = vmul.f32 0.2, %v2536_v46  ;;  %v2391_v33 = vadd.f32 %v3896_v21, %v5193_v12  ;;  %v2651_v61 = vsel %vm2587_vm9, %v2533_v30, %v2619_v41 }
 0x20c   :  { %v2654_v29 = vsel %vm2590_vm10, %v2544_v51, %v2622_v38 }
 0x20d   :  { %v3428_v11 = vpack.c.bf16 %v2654_v29, %v2653_v59  ;;  %v2652_v3 = vsel %vm2588_vm11, %v2536_v46, %v2620_v54  ;;  %v3897_v50 = vpop.f32.mrb[140].mxu1  ;;  %v3973_v0 = vpop.f32.mrb[140].mxu0 }
 0x20e   :  { %v3423_v24 = vpack.c.bf16 %v2652_v3, %v2651_v61  ;;  %v3898_v26 = vpop.f32.mrb[141].mxu1  ;;  %v2548_v20 = vpop.f32.mrb[141].mxu0 }
 0x20f   :  { %3452 = vst [vmem:[%s5311_s3 + $0x68] sm:$0xff] %v3428_v11   ;;  %v3899_v16 = vadd.f32 %v3898_v26, %v3897_v50  ;;  %v2549_v48 = vadd.f32 %v2548_v20, %v2388_v17  ;;  %v3900_v40 = vpop.f32.mrb[142].mxu1  ;;  %v3974_v15 = vpop.f32.mrb[142].mxu0 }
 0x210   :  { %3451 = vst [vmem:[%s5311_s3 + $0x60] sm:$0xff] %v3423_v24   ;;  %v3901_v12 = vpop.f32.mrb[143].mxu1  ;;  %v2551_v58 = vpop.f32.mrb[143].mxu0 }
 0x211   :  { %v2396_v1 = vadd.f32 %v3899_v16, %v5199_v8  ;;  %v3902_v18 = vadd.f32 %v3901_v12, %v3900_v40  ;;  %v2623_v56 = vmul.f32 0.2, %v2549_v48  ;;  %v2552_v63 = vadd.f32 %v2551_v58, %v2391_v33 }
 0x212   :  { %vm2591_vm12 = vcmp.ge.f32.partialorder %v2549_v48, 0.0 }
 0x213   :  { %v2557_v43 = vadd.f32 %v3973_v0, %v2396_v1  ;;  %v2399_v6 = vadd.f32 %v3902_v18, %v5205_v28  ;;  %vm2592_vm13 = vcmp.ge.f32.partialorder %v2552_v63, 0.0  ;;  %v2624_v10 = vmul.f32 0.2, %v2552_v63 }
 0x214   :  { %v2655_v52 = vsel %vm2591_vm12, %v2549_v48, %v2623_v56 }
 0x215   :  { %v2625_v62 = vmul.f32 0.2, %v2557_v43  ;;  %v2560_v49 = vadd.f32 %v3974_v15, %v2399_v6  ;;  %vm2593_vm14 = vcmp.ge.f32.partialorder %v2557_v43, 0.0  ;;  %v2656_v13 = vsel %vm2592_vm13, %v2552_v63, %v2624_v10 }
 0x216   :  { %v3433_v31 = vpack.c.bf16 %v2656_v13, %v2655_v52 }
 0x217   :  { %vm2594_vm15 = vcmp.ge.f32.partialorder %v2560_v49, 0.0  ;;  %v2626_v9 = vmul.f32 0.2, %v2560_v49  ;;  %v2657_v37 = vsel %vm2593_vm14, %v2557_v43, %v2625_v62 }
 0x218   :  { %3453 = vst [vmem:[%s5311_s3 + $0x70] sm:$0xff] %v3433_v31  }
 0x219   :  { %v2658_v35 = vsel %vm2594_vm15, %v2560_v49, %v2626_v9 }
 0x21a   :  { %v3438_v8 = vpack.c.bf16 %v2658_v35, %v2657_v37 }
 0x21c   :  { %3454 = vst [vmem:[%s5311_s3 + $0x78] sm:$0xff] %v3438_v8  }

// kernel: att_conv_forward.5
= control target key start
LH: loop header
LB: loop body
LE: loop exit
PB: predicated region body
PF: predicated region fallthrough
CT: control target
= control target key end

     0   :  { %s4228_s15 = smov 0   ;;  %s5650_s0 = inlined_call_operand.vmem [shape: bf16[2,18,18,64], index: 0, kind: input, shape index: {}]   ;;  %s5651_s1 = inlined_call_operand.vmem [shape: bf16[576,64], index: 1, kind: input, shape index: {}]   ;;  %s5652_s2 = inlined_call_operand.vmem [shape: f32[1,64], index: 2, kind: input, shape index: {}]   ;;  %s5653_s3 = inlined_call_operand.vmem [shape: bf16[2,256,64], index: 3, kind: output, shape index: {0}]   ;;  %s5654_s4 = inlined_call_operand.vmem [shape: f32[2,1,64], index: 4, kind: output, shape index: {1}]  }
   0x1 LB: > { %s3241_s16 = sadd.s32 4294967295, %s4200_s15   ;;  %p3245_p0 = scmp.ge.s32.totalorder %s4200_s15, 1  ;;  %s4200_s15 = sphi %s4228_s15, %s15_s15  }
   0x2   : > { %p165_p1 = scmp.lt.s32.totalorder %s4200_s15, 3 }
   0x4   : > { %p166_p2 = pnand %p3245_p0, %p165_p1 }
   0x6   : > { %169 = sbr.rel (%p166_p2) target bundleno = 548 (0x224), region = 32 }
   0xd   : > { %p194_p3 = scmp.lt.s32.totalorder %s3241_s16, 1  ;;  %v4031_v0 = vld [vmem:[%s5651_s1 + $0x40] sm:$0xff]   ;;  %v4036_v2 = vld [vmem:[%s5651_s1 + $0x48] sm:$0xff]   ;;  %v4042_v4 = vld [vmem:[%s5651_s1 + $0x50] sm:$0xff]   ;;  %s4202_s7 = smov 64   ;;  %vm803_vm1 = vcmask 1046528  }
   0xe   : > { %3641 = vmatprep.subr.bf16.mxu0 %v4031_v0  ;;  %v4035_v1 = vld [vmem:[%s5651_s1] sm:$0xff]   ;;  %3925 = vmatprep.subr.bf16.mxu1 %v4031_v0  ;;  %v4041_v3 = vld [vmem:[%s5651_s1 + $0x8] sm:$0xff]   ;;  %v4044_v10 = vld [vmem:[%s5651_s1 + $0x10] sm:$0xff]   ;;  %vm530_vm0 = vsmask.f32 7424  ;;  %vm1780_vm2 = vcmask 523264  }
   0xf   : > { %s5742_s16 = smov (!%p194_p3, %s3241_s16), 1  ;;  %3642 = vmatpush3.bf16.msra.mxu0 %v4035_v1  ;;  %3933 = vmatpush3.bf16.msra.mxu1 %v4035_v1  ;;  %v4045_v23 = vld [vmem:[%s5651_s1 + $0x58] sm:$0xff]   ;;  %v4049_v40 = vld [vmem:[%s5651_s1 + $0x60] sm:$0xff]   ;;  %vm3055_vm3 = vcmask 519168  }
  0x10   : > { %s3941_s23 = smul.u32 216, %s5742_s16  ;;  %3643 = vmatprep.subr.bf16.mxu0 %v4036_v2  ;;  %3926 = vmatprep.subr.bf16.mxu1 %v4036_v2  ;;  %v4046_v37 = vld [vmem:[%s5651_s1 + $0x18] sm:$0xff]   ;;  %v4051_v63 = vld [vmem:[%s5651_s1 + $0x20] sm:$0xff]   ;;  %s3608_s26 = sshll.u32 %s5742_s16, 7 }
  0x11   : > { %s5470_s29 = scalar_lea.vmem %s5653_s3, %s3608_s26  ;;  %s206_s8 = scalar_lea.vmem %s5654_s4, %s5742_s16 }
  0x12   : > { %s4257_s30 = scalar_lea.vmem %s5650_s0, %s3941_s23 }
  0x13   : > { %v3249_v5 = vld [vmem:[%s4257_s30 + $0xc] sm:$0xf]  ;;  %v4261_v6 = vld [vmem:[%s4257_s30 + $0x10] sm:$0xf]  ;;  %v3273_v8 = vld [vmem:[%s4257_s30 + $0x9c] sm:$0xf]  ;;  %3644 = vmatpush3.bf16.msra.mxu0 %v4041_v3  ;;  %3934 = vmatpush3.bf16.msra.mxu1 %v4041_v3 }
  0x14   : > { %v4264_v7 = vcombine.low %v3249_v5, %v4261_v6  ;;  %v3274_v9 = vld [vmem:[%s4257_s30 + $0xa0] sm:$0xf]  ;;  %v209_v12 = vld [vmem:[%s4257_s30 + $0x4] sm:$0xf]  ;;  %3645 = vmatprep.subr.bf16.mxu0 %v4042_v4  ;;  %3927 = vmatprep.subr.bf16.mxu1 %v4042_v4  ;;  %v3251_v16 = vld [vmem:[%s4257_s30 + $0x18] sm:$0xf] }
  0x15   : > { %v208_v11 = vld [vmem:[%s4257_s30] sm:$0xf]  ;;  %v4275_v13 = vcombine.low %v3273_v8, %v3274_v9  ;;  %v4280_v15 = vld [vmem:[%s4257_s30 + $0x8] ss:$0 sps:$4 sm:$0x11]  }
  0x16   : > { %932 = vrot.lane.b32.xlu0 %v4264_v7, %s4202_s7  ;;  %v4277_v14 = vcombine.low %v208_v11, %v209_v12  ;;  %v4284_v17 = vld [vmem:[%s4257_s30 + $0x1c] sm:$0xf]  ;;  %v539_v20 = vshll.u32 %v4280_v15, 16  ;;  %v232_v21 = vld [vmem:[%s4257_s30 + $0x90] sm:$0xf]  ;;  %v4052_v11 = vld [vmem:[%s5651_s1 + $0x68] sm:$0xff]  }
  0x17   : > { %3646 = vmatpush3.bf16.msra.mxu0 %v4044_v10  ;;  %3935 = vmatpush3.bf16.msra.mxu1 %v4044_v10  ;;  %v233_v22 = vld [vmem:[%s4257_s30 + $0x94] sm:$0xf]  ;;  %v4297_v26 = vcombine.low %v3251_v16, %v4284_v17  ;;  %v210_v28 = vld [vmem:[%s4257_s30 + $0xc] sm:$0xf]  ;;  %v211_v33 = vld [vmem:[%s4257_s30 + $0x10] sm:$0xf] }
  0x18   : > { %v532_v18 = vshrl.u32 %v4277_v14, 16  ;;  %v534_v19 = vshll.u32 %v4277_v14, 16  ;;  %v541_v25 = vrot.slane %v539_v20, 1  ;;  %v4299_v27 = vcombine.low %v232_v21, %v233_v22  ;;  %v4303_v29 = vld [vmem:[%s4257_s30 + $0x98] ss:$0 sps:$4 sm:$0x11]   ;;  %3647 = vmatprep.subr.bf16.mxu0 %v4045_v23  ;;  %3928 = vmatprep.subr.bf16.mxu1 %v4045_v23 }
  0x19   : > { %v683_v34 = vshll.u32 %v4303_v29, 16  ;;  %v4309_v35 = vcombine.low %v210_v28, %v211_v33  ;;  %v3962_v36 = vld [vmem:[%s4257_s30 + $0x14] ss:$0 sps:$4 sm:$0x11]   ;;  %v3275_v46 = vld [vmem:[%s4257_s30 + $0xa8] sm:$0xf] }
  0x1a   : > { %956 = vrot.lane.b32.xlu0 %v4275_v13, %s4202_s7  ;;  %v536_v24 = vrot.slane %v534_v19, 1  ;;  %v676_v31 = vshrl.u32 %v4299_v27, 16  ;;  %v678_v32 = vshll.u32 %v4299_v27, 16  ;;  %v551_v44 = vshll.u32 %v3962_v36, 16  ;;  %v3276_v47 = vld [vmem:[%s4257_s30 + $0xac] sm:$0xf] }
  0x1b   : > { %v685_v41 = vrot.slane %v683_v34, 1  ;;  %v544_v42 = vshrl.u32 %v4309_v35, 16  ;;  %v546_v43 = vshll.u32 %v4309_v35, 16  ;;  %3648 = vmatpush3.bf16.msra.mxu0 %v4046_v37  ;;  %3936 = vmatpush3.bf16.msra.mxu1 %v4046_v37  ;;  %v234_v50 = vld [vmem:[%s4257_s30 + $0x9c] sm:$0xf]  ;;  %v4334_v57 = vcombine.low %v3275_v46, %v3276_v47  ;;  %v4053_v20 = vld [vmem:[%s5651_s1 + $0x28] sm:$0xff]  }
  0x1c   : > { %v537_v30 = vor.u32 %v536_v24, %v532_v18  ;;  %v680_v39 = vrot.slane %v678_v32, 1  ;;  %3649 = vmatprep.subr.bf16.mxu0 %v4049_v40  ;;  %v553_v49 = vrot.slane %v551_v44, 1  ;;  %v235_v51 = vld [vmem:[%s4257_s30 + $0xa0] sm:$0xf]  ;;  %3929 = vmatprep.subr.bf16.mxu1 %v4049_v40  ;;  %v3253_v53 = vld [vmem:[%s4257_s30 + $0x24] sm:$0xf] }
  0x1d   : > { %v548_v48 = vrot.slane %v546_v43, 1  ;;  %v4330_v54 = vcombine.low %v234_v50, %v235_v51  ;;  %v212_v55 = vld [vmem:[%s4257_s30 + $0x18] sm:$0xf]  ;;  %v4337_v58 = vld [vmem:[%s4257_s30 + $0x28] sm:$0xf]  ;;  %v4056_v24 = vld [vmem:[%s5651_s1 + $0x70] sm:$0xff]  }
  0x1e   : > { %v542_v38 = vsel %vm530_vm0, %v537_v30, %v541_v25  ;;  %934 = vrot.lane.b32.xlu0 %v4297_v26, %s4202_s7  ;;  %v681_v45 = vor.u32 %v680_v39, %v676_v31  ;;  %v3968_v59 = vld [vmem:[%s4257_s30 + $0xa4] ss:$0 sps:$4 sm:$0x11]   ;;  %v213_v62 = vld [vmem:[%s4257_s30 + $0x1c] sm:$0xf]  ;;  %v4351_v3 = vcombine.low %v3253_v53, %v4337_v58  ;;  %v4058_v32 = vld [vmem:[%s5651_s1 + $0x30] sm:$0xff]  }
  0x1f   : > { %723 = vrot.lane.b32.xlu1 %v542_v38, %s4202_s7  ;;  %v549_v56 = vor.u32 %v548_v48, %v544_v42  ;;  %v688_v60 = vshrl.u32 %v4330_v54, 16  ;;  %v690_v61 = vshll.u32 %v4330_v54, 16  ;;  %v695_v1 = vshll.u32 %v3968_v59, 16  ;;  %v3970_v5 = vld [vmem:[%s4257_s30 + $0x20] ss:$0 sps:$4 sm:$0x11]   ;;  %3650 = vmatpush3.bf16.msra.mxu0 %v4051_v63 }
  0x20   : > { %v686_v52 = vsel %vm530_vm0, %v681_v45, %v685_v41  ;;  %v4347_v2 = vcombine.low %v212_v55, %v213_v62  ;;  %3937 = vmatpush3.bf16.msra.mxu1 %v4051_v63  ;;  %v563_v16 = vshll.u32 %v3970_v5, 16  ;;  %v3277_v18 = vld [vmem:[%s4257_s30 + $0xb4] sm:$0xf]  ;;  %v3278_v19 = vld [vmem:[%s4257_s30 + $0xb8] sm:$0xf]  ;;  %3651 = vmatprep.subr.bf16.mxu0 %v4052_v11  ;;  %v4066_v63 = vld [vmem:[%s5651_s1 + $0xc0] sm:$0xff]  }
  0x21   : > { %v554_v0 = vsel %vm530_vm0, %v549_v56, %v553_v49  ;;  %v692_v4 = vrot.slane %v690_v61, 1  ;;  %v697_v8 = vrot.slane %v695_v1, 1  ;;  %v3255_v22 = vld [vmem:[%s4257_s30 + $0x30] sm:$0xf]  ;;  %v4368_v23 = vld [vmem:[%s4257_s30 + $0x34] sm:$0xf]  ;;  %3930 = vmatprep.subr.bf16.mxu1 %v4052_v11  ;;  %v4382_v34 = vcombine.low %v3277_v18, %v3278_v19 }
  0x22   : > { %725 = vrot.lane.b32.xlu0 %v554_v0, %s4202_s7  ;;  %v556_v9 = vshrl.u32 %v4347_v2, 16  ;;  %v558_v10 = vshll.u32 %v4347_v2, 16  ;;  %v565_v28 = vrot.slane %v563_v16, 1  ;;  %v236_v30 = vld [vmem:[%s4257_s30 + $0xa8] sm:$0xf]  ;;  %v4059_v39 = vld [vmem:[%s5651_s1 + $0x78] sm:$0xff]   ;;  %v4393_v41 = vcombine.low %v3255_v22, %v4368_v23 }
  0x23   : > { %747 = vrot.lane.b32.xlu1 %v686_v52, %s4202_s7  ;;  %v693_v12 = vor.u32 %v692_v4, %v688_v60  ;;  %v237_v31 = vld [vmem:[%s4257_s30 + $0xac] sm:$0xf]  ;;  %3652 = vmatpush3.bf16.msra.mxu0 %v4053_v20  ;;  %v3976_v37 = vld [vmem:[%s4257_s30 + $0xb0] ss:$0 sps:$4 sm:$0x11]   ;;  %v4060_v43 = vld [vmem:[%s5651_s1 + $0x38] sm:$0xff]  }
  0x24   : > { %v560_v21 = vrot.slane %v558_v10, 1  ;;  %3938 = vmatpush3.bf16.msra.mxu1 %v4053_v20  ;;  %v4384_v36 = vcombine.low %v236_v30, %v237_v31  ;;  %v214_v38 = vld [vmem:[%s4257_s30 + $0x24] sm:$0xf]  ;;  %3653 = vmatprep.subr.bf16.mxu0 %v4056_v24  ;;  %v215_v42 = vld [vmem:[%s4257_s30 + $0x28] sm:$0xf]  ;;  %v707_v46 = vshll.u32 %v3976_v37, 16 }
  0x25   : > { %v698_v25 = vsel %vm530_vm0, %v693_v12, %v697_v8  ;;  %3931 = vmatprep.subr.bf16.mxu1 %v4056_v24  ;;  %v4402_v47 = vcombine.low %v214_v38, %v215_v42  ;;  %v3978_v48 = vld [vmem:[%s4257_s30 + $0x2c] ss:$0 sps:$4 sm:$0x11]   ;;  %v3279_v55 = vld [vmem:[%s4257_s30 + $0xc0] sm:$0xf] }
  0x26   : > { %936 = vrot.lane.b32.xlu0 %v4351_v3, %s4202_s7  ;;  %v561_v33 = vor.u32 %v560_v21, %v556_v9  ;;  %v700_v44 = vshrl.u32 %v4384_v36, 16  ;;  %v702_v45 = vshll.u32 %v4384_v36, 16  ;;  %v709_v50 = vrot.slane %v707_v46, 1  ;;  %v3280_v56 = vld [vmem:[%s4257_s30 + $0xc4] sm:$0xf] }
  0x27   : > { %958 = vrot.lane.b32.xlu1 %v4334_v57, %s4202_s7  ;;  %3654 = vmatpush3.bf16.msra.mxu0 %v4058_v32  ;;  %v568_v51 = vshrl.u32 %v4402_v47, 16  ;;  %v570_v52 = vshll.u32 %v4402_v47, 16  ;;  %v575_v53 = vshll.u32 %v3978_v48, 16  ;;  %v238_v61 = vld [vmem:[%s4257_s30 + $0xb4] sm:$0xf]  ;;  %v4424_v5 = vld [vmem:[%s5651_s1 + $0x100] sm:$0xff]   ;;  %v4432_v12 = vcombine.low %v3279_v55, %v3280_v56 }
  0x28   : > { %v566_v40 = vsel %vm530_vm0, %v561_v33, %v565_v28  ;;  %3939 = vmatpush3.bf16.msra.mxu1 %v4058_v32  ;;  %v704_v49 = vrot.slane %v702_v45, 1  ;;  %3655 = vmatprep.subr.bf16.mxu0 %v4059_v39  ;;  %v239_v62 = vld [vmem:[%s4257_s30 + $0xb8] sm:$0xf]  ;;  %v3257_v1 = vld [vmem:[%s4257_s30 + $0x3c] sm:$0xf] }
  0x29   : > { %3932 = vmatprep.subr.bf16.mxu1 %v4059_v39  ;;  %v572_v60 = vrot.slane %v570_v52, 1  ;;  %v577_v0 = vrot.slane %v575_v53, 1  ;;  %v4419_v4 = vcombine.low %v238_v61, %v239_v62  ;;  %v4428_v10 = vld [vmem:[%s4257_s30 + $0x40] sm:$0xf]  ;;  %v216_v19 = vld [vmem:[%s4257_s30 + $0x30] sm:$0xf] }
  0x2a   : > { %727 = vrot.lane.b32.xlu0 %v566_v40, %s4202_s7  ;;  %v705_v59 = vor.u32 %v704_v49, %v700_v44  ;;  %v3984_v11 = vld [vmem:[%s4257_s30 + $0xbc] ss:$0 sps:$4 sm:$0x11]   ;;  %v217_v22 = vld [vmem:[%s4257_s30 + $0x34] sm:$0xf] }
  0x2b   : > { %749 = vrot.lane.b32.xlu1 %v698_v25, %s4202_s7  ;;  %3656 = vmatpush3.bf16.msra.mxu0 %v4060_v43  ;;  %v573_v9 = vor.u32 %v572_v60, %v568_v51  ;;  %v712_v16 = vshrl.u32 %v4419_v4, 16  ;;  %v714_v18 = vshll.u32 %v4419_v4, 16  ;;  %v719_v21 = vshll.u32 %v3984_v11, 16  ;;  %v3297_v24 = vld [vmem:[%s4257_s30 + $0xc] sm:$0xe] }
  0x2c   : > { %3940 = vmatpush3.bf16.msra.mxu1 %v4060_v43  ;;  %v710_v8 = vsel %vm530_vm0, %v705_v59, %v709_v50  ;;  %3885 = vmatprep.subr.bf16.mxu0 %v4424_v5  ;;  %v4443_v25 = vcombine.low %v3257_v1, %v4428_v10  ;;  %v4445_v30 = vcombine.low %v216_v19, %v217_v22  ;;  %v3986_v31 = vld [vmem:[%s4257_s30 + $0x38] ss:$0 sps:$4 sm:$0x11]   ;;  %v3314_v37 = vld [vmem:[%s4257_s30 + $0x1c] sm:$0xf] }
  0x2d   : > { %3753 = vmatprep.subr.bf16.mxu1 %v4066_v63  ;;  %v578_v20 = vsel %vm530_vm0, %v573_v9, %v577_v0  ;;  %v716_v28 = vrot.slane %v714_v18, 1  ;;  %v3313_v32 = vld [vmem:[%s4257_s30 + $0x18] sm:$0xf]  ;;  %v721_v33 = vrot.slane %v719_v21, 1  ;;  %v587_v42 = vshll.u32 %v3986_v31, 16 }
  0x2e   : > { %938 = vrot.lane.b32.xlu0 %v4393_v41, %s4202_s7  ;;  %v580_v39 = vshrl.u32 %v4445_v30, 16  ;;  %v582_v40 = vshll.u32 %v4445_v30, 16  ;;  %v3988_v43 = vld [vmem:[%s4257_s30 + $0x20] ss:$0 sps:$4 sm:$0x11]   ;;  %v4455_v44 = vcombine.low %v3313_v32, %v3314_v37  ;;  %v3457_v51 = vcombine.low %v3297_v24, %v4261_v6 }
  0x2f   : > { %960 = vrot.lane.b32.xlu1 %v4382_v34, %s4202_s7  ;;  %v717_v38 = vor.u32 %v716_v28, %v712_v16  ;;  %v589_v48 = vrot.slane %v587_v42, 1  ;;  %v1468_v49 = vshll.u32 %v3988_v43, 16  ;;  %v3259_v50 = vld [vmem:[%s4257_s30 + $0x48] sm:$0xf]  ;;  %v4467_v59 = vld [vmem:[%s4257_s30 + $0x4c] sm:$0xf] }
  0x30   : > { %v584_v46 = vrot.slane %v582_v40, 1  ;;  %v1461_v52 = vshrl.u32 %v4455_v44, 16  ;;  %v1463_v53 = vshll.u32 %v4455_v44, 16  ;;  %v3991_v55 = vld [vmem:[%s4257_s30 + $0x14] ss:$0 sps:$4 sm:$0x11]   ;;  %v4479_v16 = vcombine.low %v3259_v50, %v4467_v59 }
  0x31   : > { %v722_v45 = vsel %vm530_vm0, %v717_v38, %v721_v33  ;;  %v218_v60 = vld [vmem:[%s4257_s30 + $0x3c] sm:$0xf]  ;;  %v219_v61 = vld [vmem:[%s4257_s30 + $0x40] sm:$0xf]  ;;  %v1470_v63 = vrot.slane %v1468_v49, 1  ;;  %v1252_v18 = vrot.slane %v3457_v51, 1 }
  0x32   : > { %729 = vrot.lane.b32.xlu0 %v578_v20, %s4202_s7  ;;  %v585_v56 = vor.u32 %v584_v46, %v580_v39  ;;  %v1465_v62 = vrot.slane %v1463_v53, 1  ;;  %v3298_v0 = vld [vmem:[%s4257_s30 + $0x18] sm:$0xe]  ;;  %v4473_v1 = vcombine.low %v218_v60, %v219_v61  ;;  %v3315_v9 = vld [vmem:[%s4257_s30 + $0x24] sm:$0xf]  ;;  %5681 = vst [vmem:[#allocation2_spill] sm:$0xff] %v4479_v16 }
  0x33   : > { %751 = vrot.lane.b32.xlu1 %v710_v8, %s4202_s7  ;;  %v3993_v8 = vld [vmem:[%s4257_s30 + $0x44] ss:$0 sps:$4 sm:$0x11]   ;;  %v1253_v19 = vrot.slane %v3991_v55, 1  ;;  %v3316_v20 = vld [vmem:[%s4257_s30 + $0x28] sm:$0xf]  ;;  %v3458_v42 = vcombine.low %v3298_v0, %v4284_v17 }
  0x34   : > { %v590_v6 = vsel %vm530_vm0, %v585_v56, %v589_v48  ;;  %v1466_v11 = vor.u32 %v1465_v62, %v1461_v52  ;;  %v592_v21 = vshrl.u32 %v4473_v1, 16  ;;  %v594_v22 = vshll.u32 %v4473_v1, 16  ;;  %v3995_v31 = vld [vmem:[%s4257_s30 + $0x2c] ss:$0 sps:$4 sm:$0x11]  }
  0x35   : > { %v599_v24 = vshll.u32 %v3993_v8, 16  ;;  %v4484_v28 = vcombine.low %v3315_v9, %v3316_v20  ;;  %v3261_v40 = vld [vmem:[%s4257_s30 + $0x54] sm:$0xf]  ;;  %v1254_v43 = vsel %vm803_vm1, %v1252_v18, %v1253_v19  ;;  %v4497_v46 = vld [vmem:[%s4257_s30 + $0x58] sm:$0xf]  ;;  %v1255_v0 = vrot.slane %v3458_v42, 1 }
  0x36   : > { %940 = vrot.lane.b32.xlu0 %v4443_v25, %s4202_s7  ;;  %v1471_v32 = vsel %vm530_vm0, %v1466_v11, %v1470_v63  ;;  %v596_v33 = vrot.slane %v594_v22, 1  ;;  %v3998_v48 = vld [vmem:[%s4257_s30 + $0x20] ss:$0 sps:$4 sm:$0x11]   ;;  %v220_v51 = vld [vmem:[%s4257_s30 + $0x48] sm:$0xf]  ;;  %v4511_v63 = vcombine.low %v3261_v40, %v4497_v46 }
  0x37   : > { %962 = vrot.lane.b32.xlu1 %v4432_v12, %s4202_s7  ;;  %v601_v37 = vrot.slane %v599_v24, 1  ;;  %v1473_v38 = vshrl.u32 %v4484_v28, 16  ;;  %v1475_v39 = vshll.u32 %v4484_v28, 16  ;;  %v221_v52 = vld [vmem:[%s4257_s30 + $0x4c] sm:$0xf] }
  0x38   : > { %v597_v49 = vor.u32 %v596_v33, %v592_v21  ;;  %v3299_v55 = vld [vmem:[%s4257_s30 + $0x24] sm:$0xe]  ;;  %v4505_v60 = vcombine.low %v220_v51, %v221_v52  ;;  %v4000_v61 = vld [vmem:[%s4257_s30 + $0x50] ss:$0 sps:$4 sm:$0x11]   ;;  %5682 = vst [vmem:[#allocation3_spill] sm:$0xff] %v4511_v63 }
  0x39   : > { %v1477_v50 = vrot.slane %v1475_v39, 1  ;;  %v3317_v62 = vld [vmem:[%s4257_s30 + $0x30] sm:$0xf]  ;;  %v3318_v8 = vld [vmem:[%s4257_s30 + $0x34] sm:$0xf]  ;;  %v611_v19 = vshll.u32 %v4000_v61, 16 }
  0x3a   : > { %731 = vrot.lane.b32.xlu0 %v590_v6, %s4202_s7  ;;  %v602_v17 = vsel %vm530_vm0, %v597_v49, %v601_v37  ;;  %v1256_v6 = vrot.slane %v3998_v48, 1  ;;  %v604_v11 = vshrl.u32 %v4505_v60, 16  ;;  %v606_v18 = vshll.u32 %v4505_v60, 16  ;;  %v4002_v20 = vld [vmem:[%s4257_s30 + $0x38] ss:$0 sps:$4 sm:$0x11]  }
  0x3b   : > { %753 = vrot.lane.b32.xlu1 %v722_v45, %s4202_s7  ;;  %v1480_v45 = vshll.u32 %v3995_v31, 16  ;;  %v1478_v56 = vor.u32 %v1477_v50, %v1473_v38  ;;  %v4518_v21 = vcombine.low %v3317_v62, %v3318_v8  ;;  %v613_v24 = vrot.slane %v611_v19, 1  ;;  %v4005_v39 = vld [vmem:[%s4257_s30 + $0x2c] ss:$0 sps:$4 sm:$0x11]  }
  0x3c   : > { %v608_v22 = vrot.slane %v606_v18, 1  ;;  %v1492_v31 = vshll.u32 %v4002_v20, 16  ;;  %v1257_v33 = vsel %vm803_vm1, %v1255_v0, %v1256_v6  ;;  %v3300_v40 = vld [vmem:[%s4257_s30 + $0x30] sm:$0xe]  ;;  %v222_v48 = vld [vmem:[%s4257_s30 + $0x54] sm:$0xf] }
  0x3d   : > { %v1482_v53 = vrot.slane %v1480_v45, 1  ;;  %v1485_v37 = vshrl.u32 %v4518_v21, 16  ;;  %v1487_v38 = vshll.u32 %v4518_v21, 16  ;;  %v4531_v45 = vld [vmem:[%s4257_s30 + $0x64] sm:$0xf]  ;;  %v1259_v62 = vrot.slane %v4005_v39, 1 }
  0x3e   : > { %942 = vrot.lane.b32.xlu0 %v4479_v16, %s4202_s7  ;;  %v609_v42 = vor.u32 %v608_v22, %v604_v11  ;;  %v1494_v49 = vrot.slane %v1492_v31, 1  ;;  %v223_v50 = vld [vmem:[%s4257_s30 + $0x58] sm:$0xf]  ;;  %v3320_v0 = vld [vmem:[%s4257_s30 + $0x40] sm:$0xf]  ;;  %v3460_v19 = vcombine.low %v3300_v40, %v4368_v23 }
  0x3f   : > { %1652 = vrot.lane.b32.xlu1 %v1471_v32, %s4202_s7  ;;  %v1483_v9 = vsel %vm530_vm0, %v1478_v56, %v1482_v53  ;;  %v3459_v32 = vcombine.low %v3299_v55, %v4337_v58  ;;  %v1489_v58 = vrot.slane %v1487_v38, 1  ;;  %v4537_v52 = vcombine.low %v222_v48, %v223_v50  ;;  %v4007_v53 = vld [vmem:[%s4257_s30 + $0x5c] ss:$0 sps:$4 sm:$0x11]   ;;  %v224_v38 = vld [vmem:[%s4257_s30 + $0x60] sm:$0xf] }
  0x40   : > { %v614_v51 = vsel %vm530_vm0, %v609_v42, %v613_v24  ;;  %v3319_v55 = vld [vmem:[%s4257_s30 + $0x3c] sm:$0xf]  ;;  %v4009_v18 = vld [vmem:[%s4257_s30 + $0x44] ss:$0 sps:$4 sm:$0x11]  }
  0x41   : > { %5683 = vst [vmem:[#allocation4_spill] sm:$0xff] %v4537_v52  ;;  %v1258_v61 = vrot.slane %v3459_v32, 1  ;;  %v616_v6 = vshrl.u32 %v4537_v52, 16  ;;  %v618_v8 = vshll.u32 %v4537_v52, 16  ;;  %v4548_v11 = vcombine.low %v3319_v55, %v3320_v0  ;;  %v225_v42 = vld [vmem:[%s4257_s30 + $0x64] sm:$0xf] }
  0x42   : > { %733 = vrot.lane.b32.xlu0 %v602_v17, %s4202_s7  ;;  %v1490_v17 = vor.u32 %v1489_v58, %v1485_v37  ;;  %v4558_v37 = vld [vmem:[%s4257_s30 + $0x70] sm:$0xf]  ;;  %v1504_v39 = vshll.u32 %v4009_v18, 16  ;;  %v4012_v40 = vld [vmem:[%s4257_s30 + $0x38] ss:$0 sps:$4 sm:$0x11]   ;;  %v4566_v58 = vcombine.low %v224_v38, %v225_v42 }
  0x43   : > { %1300 = vrot.lane.b32.xlu1 %v1254_v43, %s4202_s7  ;;  %v3263_v43 = vld [vmem:[%s4257_s30 + $0x60] sm:$0xf]  ;;  %5684 = vst [vmem:[#allocation5_spill] sm:$0xff] %v4548_v11  ;;  %v620_v22 = vrot.slane %v618_v8, 1  ;;  %v1497_v31 = vshrl.u32 %v4548_v11, 16  ;;  %v1499_v32 = vshll.u32 %v4548_v11, 16  ;;  %v1260_v23 = vsel %vm803_vm1, %v1258_v61, %v1259_v62 }
  0x44   : > { %v4543_v56 = vcombine.low %v3263_v43, %v4531_v45  ;;  %v1495_v20 = vsel %vm530_vm0, %v1490_v17, %v1494_v49  ;;  %5685 = vst [vmem:[#allocation6_spill] sm:$0xff] %v4566_v58  ;;  %v4014_v49 = vld [vmem:[%s4257_s30 + $0x68] ss:$0 sps:$4 sm:$0x11]   ;;  %v3301_v50 = vld [vmem:[%s4257_s30 + $0x3c] sm:$0xe] }
  0x45   : > { %v621_v43 = vor.u32 %v620_v22, %v616_v6  ;;  %v1501_v48 = vrot.slane %v1499_v32, 1  ;;  %v3321_v55 = vld [vmem:[%s4257_s30 + $0x48] sm:$0xf]  ;;  %v628_v61 = vshrl.u32 %v4566_v58, 16  ;;  %v630_v62 = vshll.u32 %v4566_v58, 16 }
  0x46   : > { %944 = vrot.lane.b32.xlu0 %v4511_v63, %s4202_s7  ;;  %v3322_v6 = vld [vmem:[%s4257_s30 + $0x4c] sm:$0xf]  ;;  %v635_v18 = vshll.u32 %v4014_v49, 16  ;;  %v4858_v11 = vld [vmem:[%s4257_s30 + $0xb8] sm:$0xf] }
  0x47   : > { %1654 = vrot.lane.b32.xlu1 %v1483_v9, %s4202_s7  ;;  %v623_v9 = vshll.u32 %v4007_v53, 16  ;;  %v1261_v53 = vrot.slane %v3460_v19, 1  ;;  %v1502_v0 = vor.u32 %v1501_v48, %v1497_v31  ;;  %v4580_v19 = vcombine.low %v3321_v55, %v3322_v6  ;;  %v226_v55 = vld [vmem:[%s4257_s30 + $0x6c] sm:$0xf]  ;;  %v4861_v52 = vld [vmem:[%s4257_s30 + $0xb4] sm:$0xe] }
  0x48   : > { %v637_v31 = vrot.slane %v635_v18, 1 }
  0x49   : > { %v625_v24 = vrot.slane %v623_v9, 1  ;;  %v1262_v9 = vrot.slane %v4012_v40, 1  ;;  %5686 = vst [vmem:[#allocation7_spill] sm:$0xff] %v4580_v19  ;;  %v1509_v32 = vshrl.u32 %v4580_v19, 16  ;;  %v1511_v38 = vshll.u32 %v4580_v19, 16 }
  0x4a   : > { %735 = vrot.lane.b32.xlu0 %v614_v51, %s4202_s7  ;;  %v1506_v51 = vrot.slane %v1504_v39, 1  ;;  %v4588_v39 = vld [vmem:[%s4257_s30 + $0x7c] sm:$0xf]  ;;  %v3461_v40 = vcombine.low %v3301_v50, %v4428_v10  ;;  %v4021_v50 = vld [vmem:[%s4257_s30 + $0x74] ss:$0 sps:$4 sm:$0x11]  }
  0x4b   : > { %1302 = vrot.lane.b32.xlu1 %v1257_v33, %s4202_s7  ;;  %v3265_v33 = vld [vmem:[%s4257_s30 + $0x6c] sm:$0xf]  ;;  %v626_v17 = vsel %vm530_vm0, %v621_v43, %v625_v24  ;;  %v632_v24 = vrot.slane %v630_v62, 1  ;;  %v4019_v43 = vld [vmem:[%s4257_s30 + $0x44] ss:$0 sps:$4 sm:$0x11]   ;;  %v1263_v48 = vsel %vm803_vm1, %v1261_v53, %v1262_v9 }
  0x4c   : > { %v4578_v8 = vcombine.low %v3265_v33, %v4558_v37  ;;  %v1507_v22 = vsel %vm530_vm0, %v1502_v0, %v1506_v51  ;;  %v3267_v33 = vld [vmem:[%s4257_s30 + $0x78] sm:$0xf]  ;;  %v1513_v49 = vrot.slane %v1511_v38, 1  ;;  %v3302_v62 = vld [vmem:[%s4257_s30 + $0x48] sm:$0xe]  ;;  %v1265_v53 = vrot.slane %v4019_v43, 1 }
  0x4d   : > { %v633_v42 = vor.u32 %v632_v24, %v628_v61  ;;  %v3323_v61 = vld [vmem:[%s4257_s30 + $0x54] sm:$0xf]  ;;  %v4606_v18 = vcombine.low %v3267_v33, %v4588_v39  ;;  %v3324_v9 = vld [vmem:[%s4257_s30 + $0x58] sm:$0xf] }
  0x4e   : > { %946 = vrot.lane.b32.xlu0 %v4543_v56, %s4202_s7  ;;  %v1514_v6 = vor.u32 %v1513_v49, %v1509_v32  ;;  %v647_v32 = vshll.u32 %v4021_v50, 16  ;;  %v4023_v38 = vld [vmem:[%s4257_s30 + $0x5c] ss:$0 sps:$4 sm:$0x11]   ;;  %v4627_v50 = vld [vmem:[%s4257_s30 + $0x88] sm:$0xf] }
  0x4f   : > { %1656 = vrot.lane.b32.xlu1 %v1495_v20, %s4202_s7  ;;  %v4016_v20 = vld [vmem:[%s4257_s30 + $0x50] ss:$0 sps:$4 sm:$0x11]   ;;  %v638_v0 = vsel %vm530_vm0, %v633_v42, %v637_v31  ;;  %v1528_v42 = vshll.u32 %v4023_v38, 16 }
  0x50   : > { %v4028_v43 = vld [vmem:[%s4257_s30 + $0x80] ss:$0 sps:$4 sm:$0x11]  }
  0x52   : > { %737 = vrot.lane.b32.xlu0 %v626_v17, %s4202_s7  ;;  %v227_v17 = vld [vmem:[%s4257_s30 + $0x70] sm:$0xf] }
  0x53   : > { %1304 = vrot.lane.b32.xlu1 %v1260_v23, %s4202_s7  ;;  %v1516_v23 = vshll.u32 %v4016_v20, 16  ;;  %v4600_v10 = vcombine.low %v226_v55, %v227_v17  ;;  %v1264_v20 = vrot.slane %v3461_v40, 1  ;;  %v649_v40 = vrot.slane %v647_v32, 1  ;;  %v4026_v55 = vld [vmem:[%s4257_s30 + $0x50] ss:$0 sps:$4 sm:$0x11]  }
  0x55   : > { %v1518_v51 = vrot.slane %v1516_v23, 1  ;;  %5687 = vst [vmem:[#allocation8_spill] sm:$0xff] %v4600_v10  ;;  %v640_v24 = vshrl.u32 %v4600_v10, 16  ;;  %v642_v31 = vshll.u32 %v4600_v10, 16  ;;  %v4614_v23 = vcombine.low %v3323_v61, %v3324_v9  ;;  %v229_v9 = vld [vmem:[%s4257_s30 + $0x7c] sm:$0xf] }
  0x56   : > { %948 = vrot.lane.b32.xlu0 %v4578_v8, %s4202_s7  ;;  %v1266_v17 = vsel %vm803_vm1, %v1264_v20, %v1265_v53  ;;  %v1530_v61 = vrot.slane %v1528_v42, 1  ;;  %v3326_v42 = vld [vmem:[%s4257_s30 + $0x64] sm:$0xf] }
  0x57   : > { %1658 = vrot.lane.b32.xlu1 %v1507_v22, %s4202_s7  ;;  %v1519_v22 = vsel %vm530_vm0, %v1514_v6, %v1518_v51  ;;  %5688 = vst [vmem:[#allocation9_spill] sm:$0xff] %v4614_v23  ;;  %v644_v33 = vrot.slane %v642_v31, 1  ;;  %v1521_v49 = vshrl.u32 %v4614_v23, 16  ;;  %v1523_v51 = vshll.u32 %v4614_v23, 16  ;;  %v3269_v6 = vld [vmem:[%s4257_s30 + $0x84] sm:$0xf] }
  0x58   : > { %v3303_v31 = vld [vmem:[%s4257_s30 + $0x54] sm:$0xe]  ;;  %v3325_v23 = vld [vmem:[%s4257_s30 + $0x60] sm:$0xf]  ;;  %v4640_v53 = vcombine.low %v3269_v6, %v4627_v50 }
  0x5a   : > { %739 = vrot.lane.b32.xlu0 %v638_v0, %s4202_s7  ;;  %v645_v0 = vor.u32 %v644_v33, %v640_v24  ;;  %v1268_v33 = vrot.slane %v4026_v55, 1 }
  0x5b   : > { %1306 = vrot.lane.b32.xlu1 %v1263_v48, %s4202_s7  ;;  %v3462_v48 = vcombine.low %v3302_v62, %v4467_v59  ;;  %v228_v59 = vld [vmem:[%s4257_s30 + $0x78] sm:$0xf]  ;;  %v1525_v62 = vrot.slane %v1523_v51, 1 }
  0x5c   : > { %v650_v32 = vsel %vm530_vm0, %v645_v0, %v649_v40  ;;  %v4634_v38 = vcombine.low %v228_v59, %v229_v9  ;;  %v659_v0 = vshll.u32 %v4028_v43, 16  ;;  %v4646_v59 = vcombine.low %v3325_v23, %v3326_v42  ;;  %v230_v42 = vld [vmem:[%s4257_s30 + $0x84] sm:$0xf] }
  0x5d   : > { %v1526_v20 = vor.u32 %v1525_v62, %v1521_v49  ;;  %v1267_v24 = vrot.slane %v3462_v48, 1  ;;  %v3304_v62 = vld [vmem:[%s4257_s30 + $0x60] sm:$0xe]  ;;  %v3271_v48 = vld [vmem:[%s4257_s30 + $0x90] sm:$0xf] }
  0x5e   : > { %950 = vrot.lane.b32.xlu0 %v4606_v18, %s4202_s7  ;;  %5689 = vst [vmem:[#allocation10_spill] sm:$0xff] %v4634_v38  ;;  %v652_v51 = vshrl.u32 %v4634_v38, 16  ;;  %v654_v40 = vshll.u32 %v4634_v38, 16  ;;  %5690 = vst [vmem:[#allocation11_spill] sm:$0xff] %v4646_v59  ;;  %v1533_v43 = vshrl.u32 %v4646_v59, 16  ;;  %v1535_v23 = vshll.u32 %v4646_v59, 16 }
  0x5f   : > { %1660 = vrot.lane.b32.xlu1 %v1519_v22, %s4202_s7  ;;  %v1531_v55 = vsel %vm530_vm0, %v1526_v20, %v1530_v61  ;;  %v3463_v22 = vcombine.low %v3303_v31, %v4497_v46  ;;  %v4034_v61 = vld [vmem:[%s4257_s30 + $0x5c] ss:$0 sps:$4 sm:$0x11]   ;;  %v231_v20 = vld [vmem:[%s4257_s30 + $0x88] sm:$0xf] }
  0x60   : > { %v656_v9 = vrot.slane %v654_v40, 1  ;;  %v1269_v40 = vsel %vm803_vm1, %v1267_v24, %v1268_v33  ;;  %v1537_v6 = vrot.slane %v1535_v23, 1  ;;  %v4665_v38 = vcombine.low %v230_v42, %v231_v20  ;;  %v4038_v59 = vld [vmem:[%s4257_s30 + $0x8c] ss:$0 sps:$4 sm:$0x11]  }
  0x61   : > { %v4669_v46 = vld [vmem:[%s4257_s30 + $0x94] sm:$0xf]  ;;  %v3327_v31 = vld [vmem:[%s4257_s30 + $0x6c] sm:$0xf]  ;;  %v3328_v24 = vld [vmem:[%s4257_s30 + $0x70] sm:$0xf]  ;;  %v3464_v33 = vcombine.low %v3304_v62, %v4531_v45 }
  0x62   : > { %741 = vrot.lane.b32.xlu0 %v650_v32, %s4202_s7  ;;  %v661_v32 = vrot.slane %v659_v0, 1  ;;  %v657_v0 = vor.u32 %v656_v9, %v652_v51  ;;  %5691 = vst [vmem:[#allocation12_spill] sm:$0xff] %v4665_v38  ;;  %v1538_v63 = vor.u32 %v1537_v6, %v1533_v43  ;;  %v664_v19 = vshrl.u32 %v4665_v38, 16  ;;  %v4040_v23 = vld [vmem:[%s4257_s30 + $0x74] ss:$0 sps:$4 sm:$0x11]  }
  0x63   : > { %1308 = vrot.lane.b32.xlu1 %v1266_v17, %s4202_s7  ;;  %v4030_v17 = vld [vmem:[%s4257_s30 + $0x68] ss:$0 sps:$4 sm:$0x11]   ;;  %v666_v58 = vshll.u32 %v4665_v38, 16  ;;  %v1270_v51 = vrot.slane %v3463_v22, 1  ;;  %v4679_v9 = vcombine.low %v3327_v31, %v3328_v24  ;;  %v1271_v43 = vrot.slane %v4034_v61, 1 }
  0x64   : > { %v1540_v49 = vshll.u32 %v4030_v17, 16  ;;  %v3305_v20 = vld [vmem:[%s4257_s30 + $0x6c] sm:$0xe]  ;;  %v4048_v24 = vld [vmem:[%s4257_s30 + $0x80] ss:$0 sps:$4 sm:$0x11]  }
  0x65   : > { %5692 = vst [vmem:[#allocation13_spill] sm:$0xff] %v4679_v9  ;;  %v668_v42 = vrot.slane %v666_v58, 1  ;;  %v1545_v62 = vshrl.u32 %v4679_v9, 16  ;;  %v1547_v22 = vshll.u32 %v4679_v9, 16  ;;  %v3330_v58 = vld [vmem:[%s4257_s30 + $0x7c] sm:$0xf]  ;;  %v1272_v61 = vsel %vm803_vm1, %v1270_v51, %v1271_v43 }
  0x66   : > { %952 = vrot.lane.b32.xlu0 %v4640_v53, %s4202_s7  ;;  %v1542_v10 = vrot.slane %v1540_v49, 1  ;;  %v671_v49 = vshll.u32 %v4038_v59, 16  ;;  %v1552_v59 = vshll.u32 %v4040_v23, 16  ;;  %v3465_v51 = vcombine.low %v3305_v20, %v4558_v37  ;;  %v3307_v43 = vld [vmem:[%s4257_s30 + $0x84] sm:$0xe] }
  0x67   : > { %1662 = vrot.lane.b32.xlu1 %v1531_v55, %s4202_s7  ;;  %v662_v55 = vsel %vm530_vm0, %v657_v0, %v661_v32  ;;  %v4685_v32 = vcombine.low %v3271_v48, %v4669_v46  ;;  %v4691_v0 = vld [vmem:[%s4257_s30 + $0x68] ss:$0 sps:$4 sm:$0x11]   ;;  %v3329_v48 = vld [vmem:[%s4257_s30 + $0x78] sm:$0xf] }
  0x68   : > { %v1543_v6 = vsel %vm530_vm0, %v1538_v63, %v1542_v10  ;;  %v673_v45 = vrot.slane %v671_v49, 1  ;;  %v1549_v63 = vrot.slane %v1547_v22, 1  ;;  %v1273_v10 = vrot.slane %v3464_v33, 1  ;;  %v4707_v22 = vld [vmem:[%s4257_s30 + $0x74] ss:$0 sps:$4 sm:$0x11]  }
  0x69   : > { %v1554_v31 = vrot.slane %v1552_v59, 1  ;;  %v1276_v37 = vrot.slane %v3465_v51, 1  ;;  %v4133_v17 = vld [vmem:[%s4257_s30 + $0x14] ss:$0 sps:$4 sm:$0x11]  }
  0x6a   : > { %743 = vrot.lane.b32.xlu0 %v662_v55, %s4202_s7  ;;  %v4699_v55 = vcombine.low %v3329_v48, %v3330_v58  ;;  %v1550_v23 = vor.u32 %v1549_v63, %v1545_v62  ;;  %v1274_v62 = vrot.slane %v4691_v0, 1  ;;  %v3331_v63 = vld [vmem:[%s4257_s30 + $0x84] sm:$0xf] }
  0x6b   : > { %1310 = vrot.lane.b32.xlu1 %v1269_v40, %s4202_s7  ;;  %v669_v40 = vor.u32 %v668_v42, %v664_v19  ;;  %v3306_v19 = vld [vmem:[%s4257_s30 + $0x78] sm:$0xe]  ;;  %v1564_v42 = vshll.u32 %v4048_v24, 16  ;;  %v3332_v24 = vld [vmem:[%s4257_s30 + $0x88] sm:$0xf] }
  0x6c   : > { %5693 = vst [vmem:[#allocation14_spill] sm:$0xff] %v4699_v55  ;;  %v1557_v33 = vshrl.u32 %v4699_v55, 16  ;;  %v3466_v48 = vcombine.low %v3306_v19, %v4588_v39  ;;  %v4719_v20 = vcombine.low %v3331_v63, %v3332_v24  ;;  %v3467_v39 = vcombine.low %v3307_v43, %v4627_v50  ;;  %v4062_v24 = vld [vmem:[%s4257_s30 + $0x98] ss:$0 sps:$4 sm:$0x11]  }
  0x6d   : > { %v674_v49 = vsel %vm530_vm0, %v669_v40, %v673_v45  ;;  %v1555_v45 = vsel %vm530_vm0, %v1550_v23, %v1554_v31  ;;  %v1566_v40 = vrot.slane %v1564_v42, 1  ;;  %v1277_v23 = vrot.slane %v4707_v22, 1 }
  0x6e   : > { %954 = vrot.lane.b32.xlu0 %v4685_v32, %s4202_s7  ;;  %5694 = vst [vmem:[#allocation15_spill] sm:$0xff] %v4719_v20  ;;  %v1569_v19 = vshrl.u32 %v4719_v20, 16 }
  0x6f   : > { %1664 = vrot.lane.b32.xlu1 %v1543_v6, %s4202_s7  ;;  %v1559_v6 = vshll.u32 %v4699_v55, 16  ;;  %v1278_v43 = vsel %vm803_vm1, %v1276_v37, %v1277_v23  ;;  %v1588_v23 = vshll.u32 %v4062_v24, 16 }
  0x71   : > { %v1561_v59 = vrot.slane %v1559_v6, 1  ;;  %v4726_v6 = vld [vmem:[%s4257_s30 + $0x80] ss:$0 sps:$4 sm:$0x11]  }
  0x72   : > { %745 = vrot.lane.b32.xlu0 %v674_v49, %s4202_s7  ;;  %v1275_v49 = vsel %vm803_vm1, %v1273_v10, %v1274_v62  ;;  %v1279_v10 = vrot.slane %v3466_v48, 1  ;;  %v1280_v51 = vrot.slane %v4726_v6, 1  ;;  %v1282_v48 = vrot.slane %v3467_v39, 1 }
  0x73   : > { %1312 = vrot.lane.b32.xlu1 %v1272_v61, %s4202_s7  ;;  %v1562_v58 = vor.u32 %v1561_v59, %v1557_v33  ;;  %v4055_v61 = vld [vmem:[%s4257_s30 + $0x8c] ss:$0 sps:$4 sm:$0x11]   ;;  %v1571_v33 = vshll.u32 %v4719_v20, 16  ;;  %v3333_v59 = vld [vmem:[%s4257_s30 + $0x90] sm:$0xf] }
  0x74   : > { %v1576_v42 = vshll.u32 %v4055_v61, 16  ;;  %v256_v61 = vld [vmem:[%s4257_s30] sm:$0xe]  ;;  %v1281_v39 = vsel %vm803_vm1, %v1279_v10, %v1280_v51  ;;  %v3309_v20 = vld [vmem:[%s4257_s30 + $0x9c] sm:$0xe] }
  0x75   : > { %v1567_v31 = vsel %vm530_vm0, %v1562_v58, %v1566_v40  ;;  %v1573_v62 = vrot.slane %v1571_v33, 1  ;;  %v3334_v40 = vld [vmem:[%s4257_s30 + $0x94] sm:$0xf]  ;;  %v3335_v51 = vld [vmem:[%s4257_s30 + $0x9c] sm:$0xf] }
  0x76   : > { %1668 = vrot.lane.b32.xlu0 %v1567_v31, %s4202_s7  ;;  %v1578_v50 = vrot.slane %v1576_v42, 1  ;;  %v4738_v58 = vcombine.low %v3333_v59, %v3334_v40  ;;  %v268_v31 = vld [vmem:[%s4257_s30 + $0x90] sm:$0xe]  ;;  %v4748_v42 = vld [vmem:[%s4257_s30 + $0x8c] ss:$0 sps:$4 sm:$0x11]  }
  0x77   : > { %1666 = vrot.lane.b32.xlu1 %v1555_v45, %s4202_s7  ;;  %v3308_v45 = vld [vmem:[%s4257_s30 + $0x90] sm:$0xe]  ;;  %v1574_v63 = vor.u32 %v1573_v62, %v1569_v19  ;;  %v4131_v62 = vld [vmem:[%s4257_s30 + $0x4] sm:$0xf]  ;;  %v4132_v59 = vld [vmem:[%s4257_s30 + $0x94] sm:$0xf] }
  0x78   : > { %5695 = vst [vmem:[#allocation16_spill] sm:$0xff] %v4738_v58  ;;  %v1581_v33 = vshrl.u32 %v4738_v58, 16  ;;  %v1583_v37 = vshll.u32 %v4738_v58, 16  ;;  %v3468_v19 = vcombine.low %v3308_v45, %v4669_v46  ;;  %v1283_v24 = vrot.slane %v4748_v42, 1 }
  0x79   : > { %v808_v58 = vrot.slane %v4133_v17, 1 }
  0x7a   : > { %v1585_v40 = vrot.slane %v1583_v37, 1 }
  0x7b   : > { %1314 = vrot.lane.b32.xlu1 %v1275_v49, %s4202_s7  ;;  %v1579_v49 = vsel %vm530_vm0, %v1574_v63, %v1578_v50  ;;  %v3421_v50 = vcombine.low %v268_v31, %v4132_v59  ;;  %v1590_v63 = vrot.slane %v1588_v23, 1  ;;  %v5696_v31 = vrot.slane %v4280_v15, 1 }
  0x7c   : > { %1670 = vrot.lane.b32.xlu0 %v1579_v49, %s4202_s7  ;;  %v1586_v10 = vor.u32 %v1585_v40, %v1581_v33  ;;  %v4761_v49 = vld [vmem:[%s4257_s30 + $0xa0] sm:$0xf]  ;;  %v1284_v23 = vsel %vm803_vm1, %v1282_v48, %v1283_v24  ;;  %v5698_v48 = vrot.slane %v4303_v29, 1 }
  0x7d   : > { %v840_v45 = vrot.slane %v3421_v50, 1  ;;  %v4768_v17 = vcombine.low %v3335_v51, %v4761_v49  ;;  %v4134_v50 = vld [vmem:[%s4257_s30 + $0x10] sm:$0xf] }
  0x7e   : > { %v1591_v33 = vsel %vm530_vm0, %v1586_v10, %v1590_v63  ;;  %v4785_v63 = vld [vmem:[%s4257_s30 + $0x98] ss:$0 sps:$4 sm:$0x11]   ;;  %v5699_v10 = vshll.u32 %v4264_v7, 16 }
  0x7f   : > { %1316 = vrot.lane.b32.xlu1 %v1278_v43, %s4202_s7  ;;  %v3409_v43 = vcombine.low %v256_v61, %v4131_v62  ;;  %5697 = vst [vmem:[#allocation17_spill] sm:$0xff] %v4768_v17  ;;  %v4771_v62 = vld [vmem:[%s4257_s30 + $0xa4] ss:$0 sps:$4 sm:$0x11]   ;;  %v842_v40 = vsel %vm803_vm1, %v840_v45, %v5698_v48  ;;  %v1593_v24 = vshrl.u32 %v4768_v17, 16 }
  0x80   : > { %1672 = vrot.lane.b32.xlu0 %v1591_v33, %s4202_s7  ;;  %v4789_v51 = vrot.slane %v5699_v10, 1  ;;  %v269_v45 = vld [vmem:[%s4257_s30 + $0x9c] sm:$0xe] }
  0x81   : > { %v804_v46 = vrot.slane %v3409_v43, 1  ;;  %v257_v43 = vld [vmem:[%s4257_s30 + $0xc] sm:$0xe] }
  0x82   : > { %v3410_v15 = vcombine.low %v257_v43, %v4134_v50  ;;  %v4136_v50 = vld [vmem:[%s4257_s30 + $0xa4] ss:$0 sps:$4 sm:$0x11]  }
  0x83   : > { %1318 = vrot.lane.b32.xlu1 %v1281_v39, %s4202_s7  ;;  %v806_v37 = vsel %vm803_vm1, %v804_v46, %v5696_v31  ;;  %v1285_v39 = vrot.slane %v3468_v19, 1  ;;  %v1595_v46 = vshll.u32 %v4768_v17, 16  ;;  %v1600_v19 = vshll.u32 %v4771_v62, 16  ;;  %v4137_v17 = vld [vmem:[%s4257_s30 + $0xa0] sm:$0xf] }
  0x84   : > { %v807_v29 = vrot.slane %v3410_v15, 1  ;;  %v844_v48 = vrot.slane %v4136_v50, 1  ;;  %v4808_v50 = vld [vmem:[%s4257_s30 + $0xac] sm:$0xf] }
  0x85   : > { %v1597_v43 = vrot.slane %v1595_v46, 1  ;;  %v1602_v33 = vrot.slane %v1600_v19, 1  ;;  %v3337_v46 = vld [vmem:[%s4257_s30 + $0xa8] sm:$0xf] }
  0x86   : > { %v809_v15 = vsel %vm803_vm1, %v807_v29, %v808_v58  ;;  %v4803_v19 = vld [vmem:[%s4257_s30 + $0x20] ss:$0 sps:$4 sm:$0x11]   ;;  %v4816_v58 = vld [vmem:[%s4257_s30 + $0xb0] ss:$0 sps:$4 sm:$0x11]  }
  0x87   : > { %1320 = vrot.lane.b32.xlu1 %v1284_v23, %s4202_s7  ;;  %v1598_v23 = vor.u32 %v1597_v43, %v1593_v24  ;;  %v4813_v24 = vcombine.low %v3337_v46, %v4808_v50  ;;  %5701 = vst [vmem:[#allocation19_spill] sm:$0xff] %v4816_v58  ;;  %v4139_v43 = vld [vmem:[%s4257_s30 + $0x1c] sm:$0xf] }
  0x88   : > { %v933_v61 = vpop.permute.xlu0 %932 }
  0x89   : > { %v1831_v59 = vsel %vm1780_vm2, %v806_v37, %v933_v61  ;;  %v4135_v61 = vld [vmem:[%s4257_s30 + $0xa0] sm:$0xf]  ;;  %5700 = vst [vmem:[#allocation18_spill] sm:$0xff] %v4813_v24  ;;  %v1607_v46 = vshll.u32 %v4813_v24, 16 }
  0x8a   : > { %2380 = vmatprep.mubr.bf16.mxu0 %v1831_v59  ;;  %v3469_v31 = vcombine.low %v3309_v20, %v4135_v61  ;;  %v1286_v59 = vrot.slane %v4785_v63, 1  ;;  %v3422_v20 = vcombine.low %v269_v45, %v4137_v17  ;;  %v3310_v61 = vld [vmem:[%s4257_s30 + $0xa8] sm:$0xe]  ;;  %v1603_v17 = vsel %vm530_vm0, %v1598_v23, %v1602_v33 }
  0x8b   : > { %1674 = vrot.lane.b32.xlu0 %v1603_v17, %s4202_s7  ;;  %v4095_v33 = vld [vmem:[%s5651_s1 + $0x108] sm:$0xff]   ;;  %v1605_v23 = vshrl.u32 %v4813_v24, 16  ;;  %v4843_v24 = vld [vmem:[%s4257_s30 + $0xb0] ss:$0 sps:$4 sm:$0x11]  }
  0x8c   : > { %v957_v37 = vpop.permute.xlu0 %956  ;;  %v1287_v55 = vsel %vm803_vm1, %v1285_v39, %v1286_v59  ;;  %v1288_v39 = vrot.slane %v3469_v31, 1  ;;  %v843_v45 = vrot.slane %v3422_v20, 1  ;;  %v4068_v31 = vld [vmem:[%s5651_s1 + $0x80] sm:$0xff]   ;;  %v1612_v20 = vshll.u32 %v4816_v58, 16  ;;  %v270_v17 = vld [vmem:[%s4257_s30 + $0xa8] sm:$0xe] }
  0x8d   : > { %v1879_v10 = vsel %vm1780_vm2, %v842_v40, %v957_v37  ;;  %1322 = vrot.lane.b32.xlu1 %v1287_v55, %s4202_s7  ;;  %v258_v40 = vld [vmem:[%s4257_s30 + $0x18] sm:$0xe] }
  0x8e   : > { %2476 = vmatprep.mubr.bf16.mxu1 %v1879_v10  ;;  %v3411_v59 = vcombine.low %v258_v40, %v4139_v43  ;;  %v4140_v40 = vld [vmem:[%s4257_s30 + $0xac] sm:$0xf]  ;;  %v1614_v43 = vrot.slane %v1612_v20, 1  ;;  %v845_v58 = vsel %vm803_vm1, %v843_v45, %v844_v48 }
  0x90   : > { %v935_v37 = vpop.permute.xlu0 %934 }
  0x91   : > { %v724_v29 = vpop.permute.xlu1 %723  ;;  %v1835_v55 = vsel %vm1780_vm2, %v809_v15, %v935_v37  ;;  %v4833_v15 = vld [vmem:[%s4257_s30 + $0xa4] ss:$0 sps:$4 sm:$0x11]   ;;  %v3470_v37 = vcombine.low %v3310_v61, %v4140_v40  ;;  %v810_v40 = vrot.slane %v3411_v59, 1  ;;  %v4142_v61 = vld [vmem:[%s4257_s30 + $0xac] sm:$0xf] }
  0x92   : > { %v1782_v10 = vsel %vm1780_vm2, %v4277_v14, %v724_v29  ;;  %v4072_v14 = vld [vmem:[%s5651_s1 + $0xc8] sm:$0xff]   ;;  %v1609_v29 = vrot.slane %v1607_v46, 1  ;;  %v1289_v9 = vrot.slane %v4833_v15, 1  ;;  %v3423_v16 = vcombine.low %v270_v17, %v4142_v61  ;;  %v3339_v59 = vld [vmem:[%s4257_s30 + $0xb4] sm:$0xf] }
  0x93   : > { %2381 = vmatmul.mubr.bf16.vlgmr.msra.gmra.mrb[0].mxu0 %v1782_v10  ;;  %v4075_v46 = vld [vmem:[%s5651_s1 + $0x88] sm:$0xff]   ;;  %v259_v61 = vld [vmem:[%s4257_s30 + $0x24] sm:$0xe] }
  0x94   : > { %3886 = vmatpush3.bf16.msra.mxu0 %v4424_v5  ;;  %2388 = vmatprep.mubr.bf16.mxu0 %v1835_v55  ;;  %v4108_v5 = vld [vmem:[%s5651_s1 + $0x110] sm:$0xff]   ;;  %v1610_v20 = vor.u32 %v1609_v29, %v1605_v23  ;;  %v1290_v38 = vsel %vm803_vm1, %v1288_v39, %v1289_v9  ;;  %v4869_v23 = vcombine.low %v3339_v59, %v4858_v11  ;;  %v4872_v9 = vld [vmem:[%s4257_s30 + $0xbc] ss:$0 sps:$4 sm:$0x11]   ;;  %v1291_v39 = vrot.slane %v3470_v37, 1  ;;  %v726_v17 = vpop.permute.xlu0 %725 }
  0x95   : > { %v748_v10 = vpop.permute.xlu1 %747  ;;  %3887 = vmatprep.subr.bf16.mxu0 %v4095_v33  ;;  %1324 = vrot.lane.b32.xlu1 %v1290_v38, %s4202_s7  ;;  %5703 = vst [vmem:[#allocation21_spill] sm:$0xff] %v4872_v9  ;;  %v1785_v38 = vsel %vm1780_vm2, %v4309_v35, %v726_v17  ;;  %v4077_v35 = vld [vmem:[%s5651_s1 + $0x90] sm:$0xff]  }
  0x96   : > { %v1818_v55 = vsel %vm1780_vm2, %v4299_v27, %v748_v10  ;;  %v4076_v27 = vld [vmem:[%s5651_s1 + $0xd0] sm:$0xff]   ;;  %5702 = vst [vmem:[#allocation20_spill] sm:$0xff] %v4869_v23  ;;  %v1615_v29 = vsel %vm530_vm0, %v1610_v20, %v1614_v43  ;;  %v1617_v45 = vshrl.u32 %v4869_v23, 16  ;;  %v1619_v37 = vshll.u32 %v4869_v23, 16  ;;  %v4143_v20 = vld [vmem:[%s4257_s30 + $0x28] sm:$0xf] }
  0x97   : > { %2477 = vmatmul.mubr.bf16.vlgmr.msra.gmra.mrb[0].mxu1 %v1818_v55  ;;  %1676 = vrot.lane.b32.xlu0 %v1615_v29, %s4202_s7  ;;  %v846_v55 = vrot.slane %v3423_v16, 1  ;;  %v3412_v59 = vcombine.low %v259_v61, %v4143_v20  ;;  %v4894_v17 = vld [vmem:[%s4257_s30 + $0xb0] ss:$0 sps:$4 sm:$0x11]   ;;  %v4897_v29 = vld [vmem:[%s4257_s30 + $0xc0] sm:$0xe] }
  0x98   : > { %3754 = vmatpush3.bf16.msra.mxu1 %v4068_v31  ;;  %3888 = vmatpush3.bf16.msra.mxu0 %v4095_v33  ;;  %v1624_v31 = vshll.u32 %v4872_v9, 16  ;;  %v4112_v33 = vld [vmem:[%s5651_s1 + $0x118] sm:$0xff]   ;;  %v4900_v23 = vld [vmem:[%s4257_s30 + $0xb4] sm:$0xe]  ;;  %v1292_v61 = vrot.slane %v4894_v17, 1  ;;  %v4085_v20 = vld [vmem:[%s5651_s1 + $0xe0] sm:$0xff]  }
  0x99   : > { %v959_v48 = vpop.permute.xlu1 %958  ;;  %3755 = vmatprep.subr.bf16.mxu1 %v4072_v14  ;;  %v5704_v14 = vrot.slane %v4803_v19, 1  ;;  %3889 = vmatprep.subr.bf16.mxu0 %v4108_v5  ;;  %v4144_v9 = vld [vmem:[%s4257_s30 + $0xb8] sm:$0xf] }
  0x9a   : > { %v1883_v43 = vsel %vm1780_vm2, %v845_v58, %v959_v48  ;;  %v1621_v58 = vrot.slane %v1619_v37, 1  ;;  %v1626_v48 = vrot.slane %v1624_v31, 1  ;;  %v3471_v19 = vcombine.low %v4861_v52, %v4144_v9  ;;  %v4081_v16 = vld [vmem:[%s5651_s1 + $0xd8] sm:$0xff]   ;;  %v4145_v52 = vld [vmem:[%s4257_s30 + $0x2c] ss:$0 sps:$4 sm:$0x11]  }
  0x9b   : > { %v812_v10 = vsel %vm803_vm1, %v810_v40, %v5704_v14  ;;  %2389 = vmatmul.mubr.bf16.gmra.mrb[4].mxu0 %v1785_v38  ;;  %2484 = vmatprep.mubr.bf16.mxu1 %v1883_v43  ;;  %v937_v40 = vpop.permute.xlu0 %936  ;;  %v813_v43 = vrot.slane %v3412_v59, 1  ;;  %v3341_v14 = vld [vmem:[%s4257_s30 + $0xc0] sm:$0xf]  ;;  %v4926_v59 = vld [vmem:[%s4257_s30 + $0xc4] sm:$0xf] }
  0x9c   : > { %3756 = vmatpush3.bf16.msra.mxu1 %v4075_v46  ;;  %3890 = vmatpush3.bf16.msra.mxu0 %v4108_v5  ;;  %v1839_v37 = vsel %vm1780_vm2, %v812_v10, %v937_v40  ;;  %v1622_v31 = vor.u32 %v1621_v58, %v1617_v45  ;;  %v814_v46 = vrot.slane %v4145_v52, 1  ;;  %v4084_v5 = vld [vmem:[%s5651_s1 + $0x98] sm:$0xff]   ;;  %v5705_v45 = vrot.slane %v4843_v24, 1  ;;  %v260_v58 = vld [vmem:[%s4257_s30 + $0x30] sm:$0xe] }
  0x9d   : > { %v750_v38 = vpop.permute.xlu1 %749  ;;  %3757 = vmatprep.subr.bf16.mxu1 %v4076_v27  ;;  %3891 = vmatprep.subr.bf16.mxu0 %v4112_v33  ;;  %v1293_v27 = vsel %vm803_vm1, %v1291_v39, %v1292_v61  ;;  %v4146_v39 = vld [vmem:[%s4257_s30 + $0xc4] sm:$0xf]  ;;  %v4147_v24 = vld [vmem:[%s4257_s30 + $0xb8] sm:$0xf]  ;;  %v4148_v52 = vld [vmem:[%s4257_s30 + $0x34] sm:$0xf] }
  0x9e   : > { %v1821_v9 = vsel %vm1780_vm2, %v4330_v54, %v750_v38  ;;  %2396 = vmatprep.mubr.bf16.mxu0 %v1839_v37  ;;  %v848_v10 = vsel %vm803_vm1, %v846_v55, %v5705_v45  ;;  %v1627_v54 = vsel %vm530_vm0, %v1622_v31, %v1626_v48  ;;  %1326 = vrot.lane.b32.xlu1 %v1293_v27, %s4202_s7  ;;  %v4938_v48 = vld [vmem:[%s4257_s30 + $0xc8] ss:$0 sps:$4 sm:$0x11]   ;;  %v1294_v37 = vrot.slane %v3471_v19, 1  ;;  %v4086_v27 = vld [vmem:[%s5651_s1 + $0xa0] sm:$0xff]  }
  0x9f   : > { %2485 = vmatmul.mubr.bf16.gmra.mrb[4].mxu1 %v1821_v9  ;;  %v3472_v40 = vcombine.low %v4897_v29, %v4146_v39  ;;  %v728_v61 = vpop.permute.xlu0 %727  ;;  %1678 = vrot.lane.b32.xlu0 %v1627_v54, %s4202_s7  ;;  %v3424_v55 = vcombine.low %v4900_v23, %v4147_v24  ;;  %v4935_v38 = vcombine.low %v3341_v14, %v4926_v59  ;;  %v4952_v14 = vld [vmem:[%s4257_s30 + $0xbc] ss:$0 sps:$4 sm:$0x11]   ;;  %v3343_v45 = vld [vmem:[%s4257_s30 + $0xcc] sm:$0xf] }
  0xa0   : > { %3758 = vmatpush3.bf16.msra.mxu1 %v4077_v35  ;;  %5707 = vst [vmem:[#allocation23_spill] sm:$0xff] %v4938_v48  ;;  %v1788_v29 = vsel %vm1780_vm2, %v4347_v2, %v728_v61  ;;  %v815_v35 = vsel %vm803_vm1, %v813_v43, %v814_v46  ;;  %v3413_v9 = vcombine.low %v260_v58, %v4148_v52  ;;  %v1636_v2 = vshll.u32 %v4938_v48, 16  ;;  %v4149_v43 = vld [vmem:[%s4257_s30 + $0xbc] ss:$0 sps:$4 sm:$0x11]  }
  0xa1   : > { %5706 = vst [vmem:[#allocation22_spill] sm:$0xff] %v4935_v38  ;;  %v961_v31 = vpop.permute.xlu1 %960  ;;  %3759 = vmatprep.subr.bf16.mxu1 %v4081_v16  ;;  %3892 = vmatpush3.bf16.msra.mxu0 %v4112_v33  ;;  %v1629_v19 = vshrl.u32 %v4935_v38, 16  ;;  %v1631_v16 = vshll.u32 %v4935_v38, 16  ;;  %v4090_v33 = vld [vmem:[%s5651_s1 + $0xe8] sm:$0xff]   ;;  %v850_v46 = vrot.slane %v4149_v43, 1  ;;  %v1295_v24 = vrot.slane %v4952_v14, 1 }
  0xa2   : > { %v1887_v23 = vsel %vm1780_vm2, %v848_v10, %v961_v31  ;;  %v1638_v58 = vrot.slane %v1636_v2, 1  ;;  %v4150_v39 = vld [vmem:[%s4257_s30 + $0x38] ss:$0 sps:$4 sm:$0x11]   ;;  %v4962_v31 = vld [vmem:[%s4257_s30 + $0xd0] sm:$0xf] }
  0xa3   : > { %2397 = vmatmul.mubr.bf16.gmra.mrb[8].mxu0 %v1788_v29  ;;  %2492 = vmatprep.mubr.bf16.mxu1 %v1887_v23  ;;  %v939_v10 = vpop.permute.xlu0 %938  ;;  %v1633_v54 = vrot.slane %v1631_v16, 1  ;;  %v817_v61 = vrot.slane %v4150_v39, 1  ;;  %v849_v52 = vrot.slane %v3424_v55, 1  ;;  %v4966_v23 = vcombine.low %v3343_v45, %v4962_v31  ;;  %v4969_v43 = vld [vmem:[%s4257_s30 + $0xd4] ss:$0 sps:$4 sm:$0x11]  }
  0xa4   : > { %3760 = vmatpush3.bf16.msra.mxu1 %v4084_v5  ;;  %v1843_v29 = vsel %vm1780_vm2, %v815_v35, %v939_v10  ;;  %v816_v16 = vrot.slane %v3413_v9, 1  ;;  %v1296_v2 = vsel %vm803_vm1, %v1294_v37, %v1295_v24  ;;  %v1297_v39 = vrot.slane %v3472_v40, 1  ;;  %v4977_v35 = vld [vmem:[%s4257_s30 + $0xc8] ss:$0 sps:$4 sm:$0x11]  }
  0xa5   : > { %3761 = vmatprep.subr.bf16.mxu1 %v4085_v20  ;;  %5708 = vst [vmem:[#allocation24_spill] sm:$0xff] %v4966_v23  ;;  %2404 = vmatprep.mubr.bf16.mxu0 %v1843_v29  ;;  %v1634_v5 = vor.u32 %v1633_v54, %v1629_v19  ;;  %v752_v38 = vpop.permute.xlu1 %751  ;;  %v1641_v48 = vshrl.u32 %v4966_v23, 16  ;;  %v1643_v20 = vshll.u32 %v4966_v23, 16  ;;  %v1648_v55 = vshll.u32 %v4969_v43, 16  ;;  %5709 = vst [vmem:[#allocation25_spill] sm:$0xff] %v4977_v35  ;;  %v4093_v40 = vld [vmem:[%s5651_s1 + $0xa8] sm:$0xff]  }
  0xa6   : > { %1328 = vrot.lane.b32.xlu1 %v1296_v2, %s4202_s7  ;;  %v1027_v45 = vshll.u32 %v4297_v26, 16  ;;  %v1824_v9 = vsel %vm1780_vm2, %v4384_v36, %v752_v38  ;;  %v851_v10 = vsel %vm803_vm1, %v849_v52, %v850_v46  ;;  %v4094_v54 = vld [vmem:[%s5651_s1 + $0xf0] sm:$0xff]   ;;  %v261_v2 = vld [vmem:[%s4257_s30 + $0x3c] sm:$0xe]  ;;  %v1298_v36 = vrot.slane %v4977_v35, 1 }
  0xa7   : > { %v1639_v37 = vsel %vm530_vm0, %v1634_v5, %v1638_v58  ;;  %2493 = vmatmul.mubr.bf16.gmra.mrb[8].mxu1 %v1824_v9  ;;  %v730_v19 = vpop.permute.xlu0 %729  ;;  %v1645_v24 = vrot.slane %v1643_v20, 1  ;;  %v1650_v29 = vrot.slane %v1648_v55, 1  ;;  %v5710_v38 = vshll.u32 %v4275_v13, 16 }
  0xa8   : > { %3762 = vmatpush3.bf16.msra.mxu1 %v4086_v27  ;;  %v1171_v58 = vshll.u32 %v4334_v57, 16  ;;  %v1791_v46 = vsel %vm1780_vm2, %v4402_v47, %v730_v19  ;;  %1680 = vrot.lane.b32.xlu0 %v1639_v37, %s4202_s7  ;;  %v1039_v52 = vshll.u32 %v4351_v3, 16  ;;  %v818_v20 = vsel %vm803_vm1, %v816_v16, %v817_v61  ;;  %v4096_v47 = vld [vmem:[%s5651_s1 + $0xb0] sm:$0xff]   ;;  %v4151_v37 = vld [vmem:[%s4257_s30 + $0x40] sm:$0xf] }
  0xa9   : > { %3763 = vmatprep.subr.bf16.mxu1 %v4090_v33  ;;  %v4994_v27 = vrot.slane %v5710_v38, 1  ;;  %v1099_v33 = vshll.u32 %v4543_v56, 16  ;;  %v963_v5 = vpop.permute.xlu1 %962  ;;  %v1646_v55 = vor.u32 %v1645_v24, %v1641_v48  ;;  %v1299_v9 = vsel %vm803_vm1, %v1297_v39, %v1298_v36 }
  0xaa   : > { %v1025_v38 = vshrl.u32 %v4297_v26, 16  ;;  %v5005_v23 = vrot.slane %v1027_v45, 1  ;;  %v1891_v35 = vsel %vm1780_vm2, %v851_v10, %v963_v5  ;;  %v3414_v19 = vcombine.low %v261_v2, %v4151_v37  ;;  %1330 = vrot.lane.b32.xlu1 %v1299_v9, %s4202_s7  ;;  %v4100_v45 = vld [vmem:[%s5651_s1 + $0xf8] sm:$0xff]   ;;  %v264_v26 = vld [vmem:[%s4257_s30 + $0x60] sm:$0xe] }
  0xab   : > { %2405 = vmatmul.mubr.bf16.gmra.mrb[12].mxu0 %v1791_v46  ;;  %v1183_v48 = vshll.u32 %v4382_v34, 16  ;;  %v1111_v16 = vshll.u32 %v4578_v8, 16  ;;  %2500 = vmatprep.mubr.bf16.mxu1 %v1891_v35  ;;  %v941_v39 = vpop.permute.xlu0 %940  ;;  %v1097_v24 = vshrl.u32 %v4543_v56, 16  ;;  %v1101_v2 = vrot.slane %v1099_v33, 1 }
  0xac   : > { %3764 = vmatpush3.bf16.msra.mxu1 %v4093_v40  ;;  %v1651_v40 = vsel %vm530_vm0, %v1646_v55, %v1650_v29  ;;  %v1847_v36 = vsel %vm1780_vm2, %v818_v20, %v941_v39  ;;  %v5024_v46 = vrot.slane %v1171_v58, 1  ;;  %v5026_v35 = vrot.slane %v1039_v52, 1  ;;  %v4152_v29 = vld [vmem:[%s4257_s30 + $0x14] ss:$0 sps:$4 sm:$0x11]   ;;  %v4102_v58 = vld [vmem:[%s5651_s1 + $0xb8] sm:$0xff]  }
  0xad   : > { %3765 = vmatprep.subr.bf16.mxu1 %v4094_v54  ;;  %1682 = vrot.lane.b32.xlu0 %v1651_v40, %s4202_s7  ;;  %v754_v5 = vpop.permute.xlu1 %753  ;;  %v1020_v55 = vshll.u32 %v4152_v29, 16  ;;  %v1123_v9 = vshll.u32 %v4606_v18, 16  ;;  %v819_v33 = vrot.slane %v3414_v19, 1  ;;  %v4153_v52 = vld [vmem:[%s4257_s30 + $0x44] ss:$0 sps:$4 sm:$0x11]   ;;  %v1102_v54 = vor.u32 %v1101_v2, %v1097_v24 }
  0xae   : > { %2412 = vmatprep.mubr.bf16.mxu0 %v1847_v36  ;;  %v1827_v56 = vsel %vm1780_vm2, %v4419_v4, %v754_v5  ;;  %v820_v20 = vrot.slane %v4153_v52, 1  ;;  %v5037_v37 = vrot.slane %v1183_v48, 1  ;;  %v1051_v39 = vshll.u32 %v4393_v41, 16  ;;  %v262_v29 = vld [vmem:[%s4257_s30 + $0x48] sm:$0xe] }
  0xaf   : > { %v1109_v40 = vshrl.u32 %v4578_v8, 16  ;;  %v1113_v36 = vrot.slane %v1111_v16, 1  ;;  %2501 = vmatmul.mubr.bf16.gmra.mrb[12].mxu1 %v1827_v56  ;;  %v732_v5 = vpop.permute.xlu0 %731  ;;  %v1104_v19 = vshll.u32 %v4691_v0, 16  ;;  %v1121_v48 = vshrl.u32 %v4606_v18, 16  ;;  %v4154_v4 = vld [vmem:[%s4257_s30 + $0x4c] sm:$0xf] }
  0xb0   : > { %3766 = vmatpush3.bf16.msra.mxu1 %v4096_v47  ;;  %v1135_v47 = vshll.u32 %v4640_v53, 16  ;;  %v1794_v52 = vsel %vm1780_vm2, %v4445_v30, %v732_v5  ;;  %v5711_v8 = vshrl.u32 %v4264_v7, 16  ;;  %v1022_v56 = vrot.slane %v1020_v55, 1 }
  0xb1   : > { %3767 = vmatprep.subr.bf16.mxu1 %v4100_v45  ;;  %v1125_v45 = vrot.slane %v1123_v9, 1  ;;  %v821_v61 = vsel %vm803_vm1, %v819_v33, %v820_v20  ;;  %v3415_v24 = vcombine.low %v262_v29, %v4154_v4  ;;  %v1106_v2 = vrot.slane %v1104_v19, 1  ;;  %v1653_v10 = vpop.permute.xlu1 %1652  ;;  %v4156_v29 = vld [vmem:[%s4257_s30 + $0x50] ss:$0 sps:$4 sm:$0x11]  }
  0xb2   : > { %v1018_v16 = vor.u32 %v4789_v51, %v5711_v8  ;;  %v5053_v0 = vrot.slane %v1051_v39, 1  ;;  %v1133_v18 = vshrl.u32 %v4640_v53, 16  ;;  %v1114_v30 = vor.u32 %v1113_v36, %v1109_v40  ;;  %v4155_v39 = vld [vmem:[%s4257_s30 + $0x20] ss:$0 sps:$4 sm:$0x11]  }
  0xb3   : > { %2413 = vmatmul.mubr.bf16.gmra.mrb[16].mxu0 %v1794_v52  ;;  %v1116_v7 = vshll.u32 %v4707_v22, 16  ;;  %v1137_v51 = vrot.slane %v1135_v47, 1  ;;  %v1147_v55 = vshll.u32 %v4685_v32, 16  ;;  %v1958_v9 = vsel %vm1780_vm2, %v4455_v44, %v1653_v10  ;;  %v263_v19 = vld [vmem:[%s4257_s30 + $0x54] sm:$0xe] }
  0xb4   : > { %3768 = vmatpush3.bf16.msra.mxu1 %v4102_v58  ;;  %v943_v58 = vpop.permute.xlu0 %942  ;;  %v5061_v33 = vsel %vm530_vm0, %v1102_v54, %v1106_v2  ;;  %2541 = vmatprep.mubr.bf16.mxu1 %v1958_v9  ;;  %v1023_v20 = vsel %vm530_vm0, %v1018_v16, %v1022_v56  ;;  %v1032_v40 = vshll.u32 %v4155_v39, 16  ;;  %v822_v22 = vrot.slane %v3415_v24, 1 }
  0xb5   : > { %v1851_v53 = vsel %vm1780_vm2, %v821_v61, %v943_v58  ;;  %v1118_v36 = vrot.slane %v1116_v7, 1  ;;  %v823_v4 = vrot.slane %v4156_v29, 1  ;;  %v1126_v47 = vor.u32 %v1125_v45, %v1121_v48  ;;  %v1301_v5 = vpop.permute.xlu1 %1300  ;;  %v4158_v7 = vld [vmem:[%s4257_s30 + $0x58] sm:$0xf] }
  0xb6   : > { %2420 = vmatprep.mubr.bf16.mxu0 %v1851_v53  ;;  %v1128_v44 = vshll.u32 %v4726_v6, 16  ;;  %v1195_v10 = vshll.u32 %v4432_v12, 16  ;;  %v1145_v54 = vshrl.u32 %v4685_v32, 16  ;;  %v1030_v61 = vor.u32 %v5005_v23, %v1025_v38  ;;  %v4157_v6 = vld [vmem:[%s4257_s30 + $0x2c] ss:$0 sps:$4 sm:$0x11]  }
  0xb7   : > { %v5075_v52 = vsel %vm530_vm0, %v1114_v30, %v1118_v36  ;;  %v1149_v8 = vrot.slane %v1147_v55, 1  ;;  %v1895_v48 = vsel %vm1780_vm2, %v1023_v20, %v1301_v5  ;;  %v1044_v56 = vshll.u32 %v4157_v6, 16  ;;  %v4159_v36 = vld [vmem:[%s4257_s30 + $0x64] sm:$0xf] }
  0xb8   : > { %v734_v16 = vpop.permute.xlu0 %733  ;;  %v1130_v45 = vrot.slane %v1128_v44, 1  ;;  %2542 = vmatmul.mubr.bf16.vlgmr.msra.gmra.mrb[16].mxu1 %v1895_v48  ;;  %v1034_v24 = vrot.slane %v1032_v40, 1  ;;  %v1138_v2 = vor.u32 %v1137_v51, %v1133_v18  ;;  %v1140_v23 = vshll.u32 %v4748_v42, 16  ;;  %v4160_v44 = vld [vmem:[%s4257_s30 + $0x5c] ss:$0 sps:$4 sm:$0x11]  }
  0xb9   : > { %v1797_v32 = vsel %vm1780_vm2, %v4473_v1, %v734_v16  ;;  %v1193_v38 = vshrl.u32 %v4432_v12, 16  ;;  %v824_v30 = vsel %vm803_vm1, %v822_v22, %v823_v4  ;;  %v3416_v55 = vcombine.low %v263_v19, %v4158_v7  ;;  %v1655_v20 = vpop.permute.xlu1 %1654  ;;  %v5112_v48 = vld [vmem:[%s4257_s30 + $0x6c] sm:$0xe] }
  0xba   : > { %v5087_v9 = vsel %vm530_vm0, %v1126_v47, %v1130_v45  ;;  %v5089_v58 = vrot.slane %v1195_v10, 1  ;;  %v1063_v1 = vshll.u32 %v4443_v25, 16  ;;  %v5712_v18 = vshrl.u32 %v4351_v3, 16  ;;  %v3372_v45 = vld [vmem:[%s4257_s30 + $0x9c] sm:$0xe] }
  0xbb   : > { %2421 = vmatmul.mubr.bf16.gmra.mrb[20].mxu0 %v1797_v32  ;;  %v1142_v51 = vrot.slane %v1140_v23, 1  ;;  %v1961_v53 = vsel %vm1780_vm2, %v4484_v28, %v1655_v20  ;;  %v1046_v40 = vrot.slane %v1044_v56, 1  ;;  %v3417_v22 = vcombine.low %v264_v26, %v4159_v36  ;;  %v4162_v23 = vld [vmem:[%s4257_s30 + $0x68] ss:$0 sps:$4 sm:$0x11]  }
  0xbc   : > { %v1042_v42 = vor.u32 %v5026_v35, %v5712_v18  ;;  %v945_v39 = vpop.permute.xlu0 %944  ;;  %v1150_v29 = vor.u32 %v1149_v8, %v1145_v54  ;;  %2549 = vmatprep.mubr.bf16.mxu1 %v1961_v53  ;;  %v1035_v4 = vsel %vm530_vm0, %v1030_v61, %v1034_v24  ;;  %v1152_v35 = vshll.u32 %v4785_v63, 16  ;;  %v4161_v61 = vld [vmem:[%s4257_s30 + $0x38] ss:$0 sps:$4 sm:$0x11]   ;;  %v4163_v18 = vld [vmem:[%s4257_s30 + $0x70] sm:$0xf] }
  0xbd   : > { %v1855_v3 = vsel %vm1780_vm2, %v824_v30, %v945_v39  ;;  %v5101_v47 = vsel %vm530_vm0, %v1138_v2, %v1142_v51  ;;  %v825_v28 = vrot.slane %v3416_v55, 1  ;;  %v826_v10 = vrot.slane %v4160_v44, 1  ;;  %v1303_v8 = vpop.permute.xlu1 %1302  ;;  %v3374_v53 = vld [vmem:[%s4257_s30 + $0xb4] sm:$0xe]  ;;  %v3375_v36 = vld [vmem:[%s4257_s30 + $0xc0] sm:$0xe] }
  0xbe   : > { %2428 = vmatprep.mubr.bf16.mxu0 %v1855_v3  ;;  %v5713_v5 = vshrl.u32 %v4393_v41, 16  ;;  %v1056_v19 = vshll.u32 %v4161_v61, 16  ;;  %v1154_v16 = vrot.slane %v1152_v35, 1  ;;  %v5714_v6 = vshrl.u32 %v4275_v13, 16  ;;  %v3373_v13 = vld [vmem:[%s4257_s30 + $0xa8] sm:$0xe] }
  0xbf   : > { %v1164_v56 = vshll.u32 %v4833_v15, 16  ;;  %v5715_v32 = vshrl.u32 %v4334_v57, 16  ;;  %v1047_v26 = vsel %vm530_vm0, %v1042_v42, %v1046_v40  ;;  %v828_v2 = vrot.slane %v3417_v22, 1  ;;  %v5717_v3 = vld [vmem:[#allocation19_spill] sm:$0xff] }
  0xc0   : > { %v5108_v54 = vor.u32 %v5053_v0, %v5713_v5  ;;  %v1162_v63 = vor.u32 %v4994_v27, %v5714_v6  ;;  %v1899_v0 = vsel %vm1780_vm2, %v1035_v4, %v1303_v8  ;;  %v736_v24 = vpop.permute.xlu0 %735  ;;  %v829_v30 = vrot.slane %v4162_v23, 1  ;;  %v5718_v5 = vld [vmem:[#allocation21_spill] sm:$0xff] }
  0xc1   : > { %v1174_v41 = vor.u32 %v5024_v46, %v5715_v32  ;;  %2550 = vmatmul.mubr.bf16.gmra.mrb[20].mxu1 %v1899_v0  ;;  %v1800_v15 = vsel %vm1780_vm2, %v4505_v60, %v736_v24  ;;  %v5129_v57 = vsel %vm530_vm0, %v1150_v29, %v1154_v16  ;;  %v1166_v27 = vrot.slane %v1164_v56, 1  ;;  %v1657_v60 = vpop.permute.xlu1 %1656 }
  0xc2   : > { %v5716_v46 = vshrl.u32 %v4382_v34, 16  ;;  %v827_v55 = vsel %vm803_vm1, %v825_v28, %v826_v10  ;;  %v1058_v20 = vrot.slane %v1056_v19, 1  ;;  %v3418_v42 = vcombine.low %v5112_v48, %v4163_v18 }
  0xc3   : > { %2429 = vmatmul.mubr.bf16.gmra.mrb[24].mxu0 %v1800_v15  ;;  %v3516_v51 = vcombine.low %v3372_v45, %v4761_v49  ;;  %v5140_v39 = vsel %vm530_vm0, %v1162_v63, %v1166_v27  ;;  %v1766_v40 = vrot.slane %v4771_v62, 1  ;;  %v1176_v34 = vshll.u32 %v4894_v17, 16  ;;  %v3376_v17 = vld [vmem:[%s4257_s30 + $0xcc] sm:$0xe] }
  0xc4   : > { %v1186_v7 = vor.u32 %v5037_v37, %v5716_v46  ;;  %v3517_v37 = vcombine.low %v3373_v13, %v4808_v50  ;;  %v1964_v22 = vsel %vm1780_vm2, %v4518_v21, %v1657_v60  ;;  %v947_v29 = vpop.permute.xlu0 %946  ;;  %v830_v4 = vsel %vm803_vm1, %v828_v2, %v829_v30  ;;  %v5721_v13 = vld [vmem:[#allocation25_spill] sm:$0xff] }
  0xc5   : > { %v1765_v49 = vrot.slane %v3516_v51, 1  ;;  %v1769_v35 = vrot.slane %v5717_v3, 1  ;;  %2557 = vmatprep.mubr.bf16.mxu1 %v1964_v22  ;;  %v1859_v28 = vsel %vm1780_vm2, %v827_v55, %v947_v29  ;;  %v1178_v44 = vrot.slane %v1176_v34, 1  ;;  %v1305_v8 = vpop.permute.xlu1 %1304  ;;  %v4165_v34 = vld [vmem:[%s4257_s30 + $0x74] ss:$0 sps:$4 sm:$0x11]  }
  0xc6   : > { %v1768_v10 = vrot.slane %v3517_v37, 1  ;;  %v3518_v62 = vcombine.low %v3374_v53, %v4858_v11  ;;  %2436 = vmatprep.mubr.bf16.mxu0 %v1859_v28  ;;  %v1772_v21 = vrot.slane %v5718_v5, 1  ;;  %v1188_v61 = vshll.u32 %v4952_v14, 16  ;;  %v5719_v11 = vld [vmem:[#allocation23_spill] sm:$0xff]  ;;  %v5720_v14 = vld [vmem:[#allocation4_spill] sm:$0xff] }
  0xc7   : > { %v5154_v50 = vsel %vm803_vm1, %v1765_v49, %v1766_v40  ;;  %v3519_v19 = vcombine.low %v3375_v36, %v4926_v59  ;;  %v5160_v48 = vsel %vm530_vm0, %v1174_v41, %v1178_v44  ;;  %v1775_v63 = vrot.slane %v5719_v11, 1  ;;  %v4164_v53 = vld [vmem:[%s4257_s30 + $0x44] ss:$0 sps:$4 sm:$0x11]   ;;  %v266_v29 = vld [vmem:[%s4257_s30 + $0x78] sm:$0xe] }
  0xc8   : > { %v5163_v16 = vsel %vm803_vm1, %v1768_v10, %v1769_v35  ;;  %v1771_v6 = vrot.slane %v3518_v62, 1  ;;  %v1903_v56 = vsel %vm1780_vm2, %v1047_v26, %v1305_v8  ;;  %v738_v45 = vpop.permute.xlu0 %737  ;;  %v1190_v32 = vrot.slane %v1188_v61, 1  ;;  %v5723_v49 = vld [vmem:[#allocation2_spill] sm:$0xff]  ;;  %v4166_v28 = vld [vmem:[%s4257_s30 + $0x7c] sm:$0xf] }
  0xc9   : > { %v1774_v0 = vrot.slane %v3519_v19, 1  ;;  %v3520_v24 = vcombine.low %v3376_v17, %v4962_v31  ;;  %2558 = vmatmul.mubr.bf16.gmra.mrb[24].mxu1 %v1903_v56  ;;  %v1803_v59 = vsel %vm1780_vm2, %v5720_v14, %v738_v45  ;;  %v1778_v2 = vrot.slane %v4969_v43, 1  ;;  %v1659_v27 = vpop.permute.xlu1 %1658  ;;  %v5722_v43 = vld [vmem:[#allocation5_spill] sm:$0xff]  ;;  %v5725_v17 = vld [vmem:[#allocation7_spill] sm:$0xff] }
  0xca   : > { %v5171_v41 = vsel %vm803_vm1, %v1771_v6, %v1772_v21  ;;  %v1198_v23 = vor.u32 %v5089_v58, %v1193_v38  ;;  %v5178_v26 = vsel %vm530_vm0, %v1186_v7, %v1190_v32  ;;  %v1200_v15 = vshll.u32 %v5721_v13, 16  ;;  %v4167_v6 = vld [vmem:[%s4257_s30 + $0x50] ss:$0 sps:$4 sm:$0x11]  }
  0xcb   : > { %2437 = vmatmul.mubr.bf16.gmra.mrb[28].mxu0 %v1803_v59  ;;  %v5181_v31 = vsel %vm803_vm1, %v1774_v0, %v1775_v63  ;;  %v1777_v30 = vrot.slane %v3520_v24, 1  ;;  %v1061_v46 = vshrl.u32 %v4443_v25, 16  ;;  %v1967_v12 = vsel %vm1780_vm2, %v5722_v43, %v1659_v27  ;;  %v4168_v56 = vld [vmem:[%s4257_s30 + $0x80] ss:$0 sps:$4 sm:$0x11]   ;;  %v5726_v59 = vld [vmem:[#allocation3_spill] sm:$0xff] }
  0xcc   : > { %v949_v38 = vpop.permute.xlu0 %948  ;;  %v1202_v7 = vrot.slane %v1200_v15, 1  ;;  %v1065_v55 = vrot.slane %v1063_v1, 1  ;;  %2565 = vmatprep.mubr.bf16.mxu1 %v1967_v12  ;;  %v1059_v18 = vsel %vm530_vm0, %v5108_v54, %v1058_v20  ;;  %v1068_v60 = vshll.u32 %v4164_v53, 16  ;;  %v5724_v54 = vld [vmem:[#allocation6_spill] sm:$0xff] }
  0xcd   : > { %v5188_v58 = vsel %vm803_vm1, %v1777_v30, %v1778_v2  ;;  %v1863_v51 = vsel %vm1780_vm2, %v830_v4, %v949_v38  ;;  %v831_v40 = vrot.slane %v3418_v42, 1  ;;  %v832_v37 = vrot.slane %v4165_v34, 1  ;;  %v1307_v22 = vpop.permute.xlu1 %1306  ;;  %v267_v0 = vld [vmem:[%s4257_s30 + $0x84] sm:$0xe] }
  0xce   : > { %2444 = vmatprep.mubr.bf16.mxu0 %v1863_v51  ;;  %v5198_v36 = vsel %vm530_vm0, %v1198_v23, %v1202_v7  ;;  %v1907_v25 = vsel %vm1780_vm2, %v1059_v18, %v1307_v22  ;;  %v1075_v3 = vshll.u32 %v5723_v49, 16  ;;  %v1066_v4 = vor.u32 %v1065_v55, %v1061_v46  ;;  %v5727_v23 = vld [vmem:[#allocation8_spill] sm:$0xff]  ;;  %v4169_v46 = vld [vmem:[%s4257_s30 + $0x88] sm:$0xf]  ;;  %v5728_v7 = vld [vmem:[#allocation9_spill] sm:$0xff] }
  0xcf   : > { %v1070_v35 = vrot.slane %v1068_v60, 1  ;;  %v833_v42 = vsel %vm803_vm1, %v831_v40, %v832_v37  ;;  %v3419_v44 = vcombine.low %v266_v29, %v4166_v28  ;;  %v1073_v62 = vshrl.u32 %v5723_v49, 16  ;;  %v4170_v40 = vld [vmem:[%s4257_s30 + $0x5c] ss:$0 sps:$4 sm:$0x11]  }
  0xd0   : > { %v740_v1 = vpop.permute.xlu0 %739  ;;  %v1077_v61 = vrot.slane %v1075_v3, 1  ;;  %v1080_v11 = vshll.u32 %v4167_v6, 16  ;;  %v835_v45 = vrot.slane %v4168_v56, 1  ;;  %v1087_v2 = vshll.u32 %v5726_v59, 16  ;;  %v3361_v37 = vld [vmem:[%s4257_s30 + $0x18] sm:$0xe] }
  0xd1   : > { %2566 = vmatmul.mubr.bf16.gmra.mrb[28].mxu1 %v1907_v25  ;;  %v1806_v20 = vsel %vm1780_vm2, %v5724_v54, %v740_v1  ;;  %v1661_v10 = vpop.permute.xlu1 %1660  ;;  %v1071_v19 = vsel %vm530_vm0, %v1066_v4, %v1070_v35  ;;  %v834_v63 = vrot.slane %v3419_v44, 1  ;;  %v3420_v43 = vcombine.low %v267_v0, %v4169_v46  ;;  %v4171_v29 = vld [vmem:[%s4257_s30 + $0x8c] ss:$0 sps:$4 sm:$0x11]   ;;  %v4172_v54 = vld [vmem:[%s4257_s30 + $0x1c] sm:$0xf] }
  0xd2   : > { %v1970_v5 = vsel %vm1780_vm2, %v5725_v17, %v1661_v10  ;;  %v1078_v13 = vor.u32 %v1077_v61, %v1073_v62  ;;  %v1082_v15 = vrot.slane %v1080_v11, 1  ;;  %v1085_v38 = vshrl.u32 %v5726_v59, 16  ;;  %v5729_v4 = vld [vmem:[#allocation10_spill] sm:$0xff]  ;;  %v5730_v62 = vld [vmem:[#allocation11_spill] sm:$0xff]  ;;  %v4175_v59 = vld [vmem:[%s4257_s30 + $0x34] sm:$0xf] }
  0xd3   : > { %2445 = vmatmul.mubr.bf16.gmra.mrb[32].mxu0 %v1806_v20  ;;  %2573 = vmatprep.mubr.bf16.mxu1 %v1970_v5  ;;  %v836_v27 = vsel %vm803_vm1, %v834_v63, %v835_v45  ;;  %v1089_v51 = vrot.slane %v1087_v2, 1  ;;  %v1092_v34 = vshll.u32 %v4170_v40, 16  ;;  %v837_v22 = vrot.slane %v3420_v43, 1  ;;  %v4173_v61 = vld [vmem:[%s4257_s30 + $0x20] ss:$0 sps:$4 sm:$0x11]  }
  0xd4   : > { %v951_v21 = vpop.permute.xlu0 %950  ;;  %v1083_v53 = vsel %vm530_vm0, %v1078_v13, %v1082_v15  ;;  %v838_v25 = vrot.slane %v4171_v29, 1  ;;  %v3505_v20 = vcombine.low %v3361_v37, %v4172_v54  ;;  %v3363_v63 = vld [vmem:[%s4257_s30 + $0x30] sm:$0xe]  ;;  %v4174_v45 = vld [vmem:[%s4257_s30 + $0x28] sm:$0xf]  ;;  %v5732_v43 = vld [vmem:[#allocation13_spill] sm:$0xff] }
  0xd5   : > { %v1867_v8 = vsel %vm1780_vm2, %v833_v42, %v951_v21  ;;  %v1309_v32 = vpop.permute.xlu1 %1308  ;;  %v1090_v42 = vor.u32 %v1089_v51, %v1085_v38  ;;  %v1094_v28 = vrot.slane %v1092_v34, 1  ;;  %v3507_v2 = vcombine.low %v3363_v63, %v4175_v59  ;;  %v4176_v13 = vld [vmem:[%s4257_s30 + $0x2c] ss:$0 sps:$4 sm:$0x11]   ;;  %v5733_v34 = vld [vmem:[#allocation14_spill] sm:$0xff] }
  0xd6   : > { %2452 = vmatprep.mubr.bf16.mxu0 %v1867_v8  ;;  %v1911_v24 = vsel %vm1780_vm2, %v1071_v19, %v1309_v32  ;;  %v839_v44 = vsel %vm803_vm1, %v837_v22, %v838_v25  ;;  %v1732_v21 = vrot.slane %v3505_v20, 1  ;;  %v1733_v19 = vrot.slane %v4173_v61, 1  ;;  %v3362_v8 = vld [vmem:[%s4257_s30 + $0x24] sm:$0xe]  ;;  %v4178_v22 = vld [vmem:[%s4257_s30 + $0x40] sm:$0xf] }
  0xd7   : > { %v1095_v6 = vsel %vm530_vm0, %v1090_v42, %v1094_v28  ;;  %v3506_v32 = vcombine.low %v3362_v8, %v4174_v45  ;;  %v1736_v15 = vrot.slane %v4176_v13, 1  ;;  %v1738_v38 = vrot.slane %v3507_v2, 1  ;;  %v4181_v28 = vld [vmem:[%s4257_s30 + $0x50] ss:$0 sps:$4 sm:$0x11]  }
  0xd8   : > { %v742_v14 = vpop.permute.xlu0 %741  ;;  %v4184_v45 = vld [vmem:[%s4257_s30 + $0x5c] ss:$0 sps:$4 sm:$0x11]   ;;  %v3368_v2 = vld [vmem:[%s4257_s30 + $0x6c] sm:$0xe] }
  0xd9   : > { %2574 = vmatmul.mubr.bf16.gmra.mrb[32].mxu1 %v1911_v24  ;;  %v1809_v30 = vsel %vm1780_vm2, %v5727_v23, %v742_v14  ;;  %v1663_v12 = vpop.permute.xlu1 %1662  ;;  %v1734_v14 = vsel %vm803_vm1, %v1732_v21, %v1733_v19  ;;  %v5731_v23 = vld [vmem:[#allocation12_spill] sm:$0xff]  ;;  %v1735_v46 = vrot.slane %v3506_v32, 1  ;;  %v5734_v21 = vld [vmem:[#allocation15_spill] sm:$0xff]  ;;  %v4182_v19 = vld [vmem:[%s4257_s30 + $0x58] sm:$0xf]  ;;  %v1748_v32 = vrot.slane %v4184_v45, 1 }
  0xda   : > { %v1973_v55 = vsel %vm1780_vm2, %v5728_v7, %v1663_v12  ;;  %v4177_v7 = vld [vmem:[%s4257_s30 + $0x38] ss:$0 sps:$4 sm:$0x11]  }
  0xdb   : > { %2453 = vmatmul.mubr.bf16.gmra.mrb[36].mxu0 %v1809_v30  ;;  %2581 = vmatprep.mubr.bf16.mxu1 %v1973_v55  ;;  %v1739_v55 = vrot.slane %v4177_v7, 1  ;;  %v1737_v40 = vsel %vm803_vm1, %v1735_v46, %v1736_v15  ;;  %v5735_v15 = vld [vmem:[#allocation16_spill] sm:$0xff] }
  0xdc   : > { %v953_v18 = vpop.permute.xlu0 %952  ;;  %v4186_v46 = vld [vmem:[%s4257_s30 + $0x70] sm:$0xf] }
  0xdd   : > { %v1871_v60 = vsel %vm1780_vm2, %v836_v27, %v953_v18  ;;  %v1311_v1 = vpop.permute.xlu1 %1310  ;;  %v3364_v18 = vld [vmem:[%s4257_s30 + $0x3c] sm:$0xe] }
  0xde   : > { %2460 = vmatprep.mubr.bf16.mxu0 %v1871_v60  ;;  %v1915_v49 = vsel %vm1780_vm2, %v1083_v53, %v1311_v1  ;;  %v3365_v53 = vld [vmem:[%s4257_s30 + $0x48] sm:$0xe]  ;;  %v3508_v29 = vcombine.low %v3364_v18, %v4178_v22  ;;  %v1740_v1 = vsel %vm803_vm1, %v1738_v38, %v1739_v55  ;;  %v4187_v38 = vld [vmem:[%s4257_s30 + $0x7c] sm:$0xf]  ;;  %v3371_v22 = vld [vmem:[%s4257_s30 + $0x90] sm:$0xe] }
  0xdf   : > { %v4188_v18 = vld [vmem:[%s4257_s30 + $0x74] ss:$0 sps:$4 sm:$0x11]  }
  0xe0   : > { %v744_v3 = vpop.permute.xlu0 %743  ;;  %v1741_v20 = vrot.slane %v3508_v29, 1 }
  0xe1   : > { %2582 = vmatmul.mubr.bf16.gmra.mrb[36].mxu1 %v1915_v49  ;;  %v1812_v35 = vsel %vm1780_vm2, %v5729_v4, %v744_v3  ;;  %v1665_v10 = vpop.permute.xlu1 %1664  ;;  %v4179_v49 = vld [vmem:[%s4257_s30 + $0x4c] sm:$0xf]  ;;  %v4180_v4 = vld [vmem:[%s4257_s30 + $0x44] ss:$0 sps:$4 sm:$0x11]  }
  0xe2   : > { %v1976_v17 = vsel %vm1780_vm2, %v5730_v62, %v1665_v10  ;;  %v3509_v3 = vcombine.low %v3365_v53, %v4179_v49  ;;  %v3366_v10 = vld [vmem:[%s4257_s30 + $0x54] sm:$0xe]  ;;  %v3367_v62 = vld [vmem:[%s4257_s30 + $0x60] sm:$0xe] }
  0xe3   : > { %2461 = vmatmul.mubr.bf16.gmra.mrb[40].mxu0 %v1812_v35  ;;  %2589 = vmatprep.mubr.bf16.mxu1 %v1976_v17  ;;  %v1742_v35 = vrot.slane %v4180_v4, 1  ;;  %v3510_v8 = vcombine.low %v3366_v10, %v4182_v19  ;;  %v4191_v4 = vld [vmem:[%s4257_s30 + $0x94] sm:$0xf] }
  0xe4   : > { %v955_v5 = vpop.permute.xlu0 %954 }
  0xe5   : > { %v1875_v11 = vsel %vm1780_vm2, %v839_v44, %v955_v5  ;;  %v1313_v56 = vpop.permute.xlu1 %1312  ;;  %v1745_v44 = vrot.slane %v4181_v28, 1  ;;  %v1743_v5 = vsel %vm803_vm1, %v1741_v20, %v1742_v35  ;;  %v3515_v35 = vcombine.low %v3371_v22, %v4191_v4 }
  0xe6   : > { %2468 = vmatprep.mubr.bf16.mxu0 %v1875_v11  ;;  %v1919_v0 = vsel %vm1780_vm2, %v1095_v6, %v1313_v56  ;;  %v4183_v11 = vld [vmem:[%s4257_s30 + $0x64] sm:$0xf]  ;;  %v1747_v56 = vrot.slane %v3510_v8, 1 }
  0xe7   : > { %v3511_v63 = vcombine.low %v3367_v62, %v4183_v11  ;;  %v1762_v10 = vrot.slane %v3515_v35, 1  ;;  %v4193_v62 = vld [vmem:[%s4257_s30 + $0x98] ss:$0 sps:$4 sm:$0x11]  }
  0xe8   : > { %v746_v24 = vpop.permute.xlu0 %745  ;;  %v1749_v13 = vsel %vm803_vm1, %v1747_v56, %v1748_v32 }
  0xe9   : > { %2590 = vmatmul.mubr.bf16.gmra.mrb[40].mxu1 %v1919_v0  ;;  %v1815_v30 = vsel %vm1780_vm2, %v5731_v23, %v746_v24  ;;  %v1667_v27 = vpop.permute.xlu1 %1666  ;;  %v1750_v24 = vrot.slane %v3511_v63, 1  ;;  %v3369_v23 = vld [vmem:[%s4257_s30 + $0x78] sm:$0xe] }
  0xea   : > { %v1979_v12 = vsel %vm1780_vm2, %v5732_v43, %v1667_v27  ;;  %v3512_v43 = vcombine.low %v3368_v2, %v4186_v46  ;;  %v3513_v7 = vcombine.low %v3369_v23, %v4187_v38 }
  0xeb   : > { %2469 = vmatmul.mubr.bf16.gmra.mrb[44].mxu0 %v1815_v30  ;;  %2597 = vmatprep.mubr.bf16.mxu1 %v1979_v12 }
  0xec   : > { %3893 = vmatprep.mubr.msk.bf16.mxu0 %vm1780_vm2, %v1734_v14  ;;  %v1669_v51 = vpop.permute.xlu0 %1668  ;;  %v4185_v14 = vld [vmem:[%s4257_s30 + $0x68] ss:$0 sps:$4 sm:$0x11]   ;;  %v1753_v55 = vrot.slane %v3512_v43, 1 }
  0xed   : > { %v1315_v60 = vpop.permute.xlu1 %1314  ;;  %v1982_v37 = vsel %vm1780_vm2, %v5733_v34, %v1669_v51  ;;  %v1751_v59 = vrot.slane %v4185_v14, 1  ;;  %v1754_v51 = vrot.slane %v4188_v18, 1  ;;  %v5740_v14 = vld [vmem:[#allocation24_spill] sm:$0xff] }
  0xee   : > { %v1923_v25 = vsel %vm1780_vm2, %v5061_v33, %v1315_v60  ;;  %v1744_v33 = vrot.slane %v3509_v3, 1  ;;  %v1756_v60 = vrot.slane %v3513_v7, 1  ;;  %v4190_v3 = vld [vmem:[%s4257_s30 + $0x88] sm:$0xf] }
  0xef   : > { %v1752_v12 = vsel %vm803_vm1, %v1750_v24, %v1751_v59 }
  0xf0   : > { %v1671_v42 = vpop.permute.xlu0 %1670  ;;  %v1746_v6 = vsel %vm803_vm1, %v1744_v33, %v1745_v44  ;;  %v4192_v33 = vld [vmem:[%s4257_s30 + $0x8c] ss:$0 sps:$4 sm:$0x11]  }
  0xf1   : > { %2598 = vmatmul.mubr.bf16.gmra.mrb[44].mxu1 %v1923_v25  ;;  %v1317_v54 = vpop.permute.xlu1 %1316  ;;  %v1985_v61 = vsel %vm1780_vm2, %v5734_v21, %v1671_v42  ;;  %v1755_v25 = vsel %vm803_vm1, %v1753_v55, %v1754_v51  ;;  %v1760_v28 = vrot.slane %v4192_v33, 1 }
  0xf2   : > { %2605 = vmatprep.mubr.bf16.mxu1 %v1982_v37  ;;  %v1927_v17 = vsel %vm1780_vm2, %v5075_v52, %v1317_v54  ;;  %v3370_v37 = vld [vmem:[%s4257_s30 + $0x84] sm:$0xe] }
  0xf3   : > { %3894 = vmatmul.mubr.msk.bf16.vlgmr.msra.gmra.mrb[48].mxu0 %vm1780_vm2, %v1737_v40  ;;  %v4189_v40 = vld [vmem:[%s4257_s30 + $0x80] ss:$0 sps:$4 sm:$0x11]   ;;  %v3514_v54 = vcombine.low %v3370_v37, %v4190_v3 }
  0xf4   : > { %3897 = vmatprep.mubr.msk.bf16.mxu0 %vm1780_vm2, %v1740_v1  ;;  %v1673_v0 = vpop.permute.xlu0 %1672  ;;  %v1757_v34 = vrot.slane %v4189_v40, 1  ;;  %v5736_v1 = vld [vmem:[#allocation17_spill] sm:$0xff] }
  0xf5   : > { %v1319_v52 = vpop.permute.xlu1 %1318  ;;  %v1988_v27 = vsel %vm1780_vm2, %v5735_v15, %v1673_v0  ;;  %v5739_v0 = vld [vmem:[#allocation22_spill] sm:$0xff] }
  0xf6   : > { %v1931_v30 = vsel %vm1780_vm2, %v5087_v9, %v1319_v52  ;;  %v1758_v20 = vsel %vm803_vm1, %v1756_v60, %v1757_v34  ;;  %v5738_v52 = vld [vmem:[#allocation20_spill] sm:$0xff] }
  0xf9   : > { %2606 = vmatmul.mubr.bf16.gmra.mrb[48].mxu1 %v1927_v17  ;;  %v1321_v9 = vpop.permute.xlu1 %1320  ;;  %v1763_v17 = vrot.slane %v4193_v62, 1 }
  0xfa   : > { %2613 = vmatprep.mubr.bf16.mxu1 %v1985_v61  ;;  %v1935_v29 = vsel %vm1780_vm2, %v5101_v47, %v1321_v9  ;;  %v1759_v47 = vrot.slane %v3514_v54, 1  ;;  %v5737_v61 = vld [vmem:[#allocation18_spill] sm:$0xff] }
  0xfb   : > { %3898 = vmatmul.mubr.msk.bf16.gmra.mrb[52].mxu0 %vm1780_vm2, %v1743_v5  ;;  %v1764_v8 = vsel %vm803_vm1, %v1762_v10, %v1763_v17 }
  0xfc   : > { %3901 = vmatprep.mubr.msk.bf16.mxu0 %vm1780_vm2, %v1746_v6  ;;  %v1761_v21 = vsel %vm803_vm1, %v1759_v47, %v1760_v28 }
  0xfd   : > { %v1675_v53 = vpop.permute.xlu0 %1674 }
  0xfe   : > { %v1991_v49 = vsel %vm1780_vm2, %v5736_v1, %v1675_v53 }
  0xff   : > { %v1323_v42 = vpop.permute.xlu1 %1322 }
 0x100   : > { %v1939_v5 = vsel %vm1780_vm2, %v5129_v57, %v1323_v42 }
 0x101   : > { %2614 = vmatmul.mubr.bf16.gmra.mrb[52].mxu1 %v1931_v30 }
 0x102   : > { %2621 = vmatprep.mubr.bf16.mxu1 %v1988_v27 }
 0x103   : > { %3902 = vmatmul.mubr.msk.bf16.gmra.mrb[56].mxu0 %vm1780_vm2, %v1749_v13 }
 0x104   : > { %3905 = vmatprep.mubr.msk.bf16.mxu0 %vm1780_vm2, %v1752_v12 }
 0x107   : > { %v1325_v6 = vpop.permute.xlu1 %1324 }
 0x108   : > { %v1943_v63 = vsel %vm1780_vm2, %v5140_v39, %v1325_v6 }
 0x109   : > { %2622 = vmatmul.mubr.bf16.gmra.mrb[56].mxu1 %v1935_v29  ;;  %v1677_v44 = vpop.permute.xlu0 %1676 }
 0x10a   : > { %2629 = vmatprep.mubr.bf16.mxu1 %v1991_v49  ;;  %v1994_v19 = vsel %vm1780_vm2, %v5737_v61, %v1677_v44 }
 0x10b   : > { %3906 = vmatmul.mubr.msk.bf16.gmra.mrb[60].mxu0 %vm1780_vm2, %v1755_v25 }
 0x10c   : > { %3909 = vmatprep.mubr.msk.bf16.mxu0 %vm1780_vm2, %v1758_v20 }
 0x110   : > { %v1327_v56 = vpop.permute.xlu1 %1326 }
 0x111   : > { %2630 = vmatmul.mubr.bf16.gmra.mrb[60].mxu1 %v1939_v5  ;;  %v1679_v11 = vpop.permute.xlu0 %1678  ;;  %v1947_v32 = vsel %vm1780_vm2, %v5160_v48, %v1327_v56 }
 0x112   : > { %2637 = vmatprep.mubr.bf16.mxu1 %v1994_v19  ;;  %v1997_v57 = vsel %vm1780_vm2, %v5738_v52, %v1679_v11 }
 0x113   : > { %3910 = vmatmul.mubr.msk.bf16.gmra.mrb[64].mxu0 %vm1780_vm2, %v1761_v21 }
 0x114   : > { %3913 = vmatprep.mubr.msk.bf16.mxu0 %vm1780_vm2, %v1764_v8 }
 0x118   : > { %v1329_v39 = vpop.permute.xlu1 %1328 }
 0x119   : > { %2638 = vmatmul.mubr.bf16.gmra.mrb[64].mxu1 %v1943_v63 }
 0x11a   : > { %2645 = vmatprep.mubr.bf16.mxu1 %v1997_v57  ;;  %v1681_v45 = vpop.permute.xlu0 %1680 }
 0x11b   : > { %3914 = vmatmul.mubr.msk.bf16.gmra.mrb[68].mxu0 %vm1780_vm2, %v5154_v50  ;;  %v2000_v24 = vsel %vm1780_vm2, %v5739_v0, %v1681_v45 }
 0x11c   : > { %3917 = vmatprep.mubr.msk.bf16.mxu0 %vm1780_vm2, %v5163_v16  ;;  %v1951_v16 = vsel %vm1780_vm2, %v5178_v26, %v1329_v39  ;;  %v1331_v48 = vpop.permute.xlu1 %1330 }
 0x11f   : > { %v1683_v50 = vpop.permute.xlu0 %1682 }
 0x120   : > { %v2003_v59 = vsel %vm1780_vm2, %v5740_v14, %v1683_v50 }
 0x121   : > { %2646 = vmatmul.mubr.bf16.gmra.mrb[68].mxu1 %v1947_v32  ;;  %v5373_v32 = vld [vmem:[%s5652_s2] ss:$0 sm:$0xff] }
 0x122   : > { %2653 = vmatprep.mubr.bf16.mxu1 %v2000_v24 }
 0x123   : > { %3918 = vmatmul.mubr.msk.bf16.gmra.mrb[72].mxu0 %vm1780_vm2, %v5171_v41  ;;  %v1955_v41 = vsel %vm1780_vm2, %v5198_v36, %v1331_v48 }
 0x124   : > { %3921 = vmatprep.mubr.msk.bf16.mxu0 %vm1780_vm2, %v5181_v31 }
 0x129   : > { %2654 = vmatmul.mubr.bf16.gmra.mrb[72].mxu1 %v1951_v16 }
 0x12a   : > { %2661 = vmatprep.mubr.bf16.mxu1 %v2003_v59 }
 0x12b   : > { %3922 = vmatmul.mubr.msk.bf16.gmra.mrb[76].mxu0 %vm1780_vm2, %v5188_v58 }
 0x131   : > { %2662 = vmatmul.mubr.bf16.gmra.mrb[76].mxu1 %v1955_v41 }
 0x166   : > { %v3657_v2 = vpop.f32.mrb[0].mxu0 }
 0x167   : > { %v3658_v23 = vpop.f32.mrb[1].mxu0 }
 0x168   : > { %v3659_v31 = vadd.f32 %v3658_v23, %v3657_v2  ;;  %v3660_v30 = vpop.f32.mrb[2].mxu0 }
 0x169   : > { %v3661_v13 = vpop.f32.mrb[3].mxu0 }
 0x16a   : > { %v3662_v15 = vadd.f32 %v3661_v13, %v3660_v30  ;;  %v3729_v26 = vpop.f32.mrb[0].mxu1  ;;  %v2383_v50 = vadd.f32 %v3659_v31, %v5373_v32 }
 0x16b   : > { %v3730_v27 = vpop.f32.mrb[1].mxu1 }
 0x16c   : > { %v5340_v46 = vadd.f32 %v3730_v27, %v3729_v26  ;;  %v3732_v43 = vpop.f32.mrb[2].mxu1  ;;  %v2386_v23 = vadd.f32 %v3662_v15, %v5373_v32 }
 0x16d   : > { %v3733_v12 = vpop.f32.mrb[3].mxu1 }
 0x16e   : > { %v5342_v38 = vadd.f32 %v3733_v12, %v3732_v43  ;;  %v3663_v58 = vpop.f32.mrb[4].mxu0 }
 0x16f   : > { %v3664_v7 = vpop.f32.mrb[5].mxu0 }
 0x170   : > { %v3665_v9 = vadd.f32 %v3664_v7, %v3663_v58  ;;  %v3666_v55 = vpop.f32.mrb[6].mxu0 }
 0x171   : > { %v3667_v36 = vpop.f32.mrb[7].mxu0 }
 0x172   : > { %v5344_v18 = vadd.f32 %v3667_v36, %v3666_v55  ;;  %v3735_v51 = vpop.f32.mrb[4].mxu1  ;;  %v2391_v7 = vadd.f32 %v3665_v9, %v5373_v32 }
 0x173   : > { %v3736_v53 = vpop.f32.mrb[5].mxu1 }
 0x174   : > { %v5346_v60 = vadd.f32 %v3736_v53, %v3735_v51  ;;  %v3738_v40 = vpop.f32.mrb[6].mxu1 }
 0x175   : > { %v3739_v34 = vpop.f32.mrb[7].mxu1 }
 0x176   : > { %v5348_v37 = vadd.f32 %v3739_v34, %v3738_v40  ;;  %v3669_v22 = vpop.f32.mrb[8].mxu0  ;;  %v2394_v34 = vadd.f32 %v5344_v18, %v5373_v32 }
 0x177   : > { %v3670_v29 = vpop.f32.mrb[9].mxu0 }
 0x178   : > { %v5350_v25 = vadd.f32 %v3670_v29, %v3669_v22  ;;  %v3672_v1 = vpop.f32.mrb[10].mxu0 }
 0x179   : > { %v3673_v49 = vpop.f32.mrb[11].mxu0 }
 0x17a   : > { %v5352_v3 = vadd.f32 %v3673_v49, %v3672_v1  ;;  %v3741_v54 = vpop.f32.mrb[8].mxu1 }
 0x17b   : > { %v3742_v20 = vpop.f32.mrb[9].mxu1 }
 0x17c   : > { %v5354_v4 = vadd.f32 %v3742_v20, %v3741_v54  ;;  %v3744_v35 = vpop.f32.mrb[10].mxu1 }
 0x17d   : > { %v3745_v47 = vpop.f32.mrb[11].mxu1 }
 0x17e   : > { %v3675_v42 = vpop.f32.mrb[12].mxu0  ;;  %v5356_v28 = vadd.f32 %v3745_v47, %v3744_v35 }
 0x17f   : > { %v3676_v33 = vpop.f32.mrb[13].mxu0 }
 0x180   : > { %v5358_v44 = vadd.f32 %v3676_v33, %v3675_v42  ;;  %v3678_v10 = vpop.f32.mrb[14].mxu0  ;;  %v2399_v42 = vadd.f32 %v5350_v25, %v5373_v32 }
 0x181   : > { %v3679_v62 = vpop.f32.mrb[15].mxu0 }
 0x182   : > { %v5360_v17 = vadd.f32 %v3679_v62, %v3678_v10  ;;  %v3747_v5 = vpop.f32.mrb[12].mxu1 }
 0x183   : > { %v3748_v21 = vpop.f32.mrb[13].mxu1 }
 0x184   : > { %v5362_v61 = vadd.f32 %v3748_v21, %v3747_v5  ;;  %v3750_v19 = vpop.f32.mrb[14].mxu1  ;;  %v2402_v21 = vadd.f32 %v5352_v3, %v5373_v32 }
 0x185   : > { %v3751_v8 = vpop.f32.mrb[15].mxu1 }
 0x186   : > { %v3681_v6 = vpop.f32.mrb[16].mxu0  ;;  %v5364_v11 = vadd.f32 %v3751_v8, %v3750_v19 }
 0x187   : > { %v3682_v63 = vpop.f32.mrb[17].mxu0 }
 0x188   : > { %v5366_v52 = vadd.f32 %v3682_v63, %v3681_v6  ;;  %v3684_v57 = vpop.f32.mrb[18].mxu0 }
 0x189   : > { %v3685_v56 = vpop.f32.mrb[19].mxu0 }
 0x18a   : > { %v5368_v45 = vadd.f32 %v3685_v56, %v3684_v57 }
 0x18b   : > { %v3769_v0 = vpop.f32.mrb[16].mxu1 }
 0x18c   : > { %v3770_v24 = vpop.f32.mrb[17].mxu1 }
 0x18d   : > { %v3771_v16 = vadd.f32 %v3770_v24, %v3769_v0  ;;  %v3772_v14 = vpop.f32.mrb[18].mxu1  ;;  %v2407_v24 = vadd.f32 %v5358_v44, %v5373_v32 }
 0x18e   : > { %v3687_v39 = vpop.f32.mrb[20].mxu0  ;;  %v3773_v48 = vpop.f32.mrb[19].mxu1 }
 0x18f   : > { %v3688_v59 = vpop.f32.mrb[21].mxu0  ;;  %v3774_v30 = vadd.f32 %v3773_v48, %v3772_v14  ;;  %v5379_v26 = vadd.f32 %v3771_v16, %v2383_v50  ;;  %v2410_v48 = vadd.f32 %v5360_v17, %v5373_v32 }
 0x190   : > { %v5376_v41 = vadd.f32 %v3688_v59, %v3687_v39  ;;  %v3690_v2 = vpop.f32.mrb[22].mxu0 }
 0x191   : > { %v3691_v13 = vpop.f32.mrb[23].mxu0  ;;  %v5383_v43 = vadd.f32 %v3774_v30, %v2386_v23 }
 0x192   : > { %v5381_v27 = vadd.f32 %v3691_v13, %v3690_v2 }
 0x194   : > { %v3775_v12 = vpop.f32.mrb[20].mxu1 }
 0x195   : > { %v3776_v58 = vpop.f32.mrb[21].mxu1 }
 0x196   : > { %v3693_v31 = vpop.f32.mrb[24].mxu0  ;;  %v3777_v55 = vadd.f32 %v3776_v58, %v3775_v12  ;;  %v3778_v36 = vpop.f32.mrb[22].mxu1 }
 0x197   : > { %v3694_v51 = vpop.f32.mrb[25].mxu0  ;;  %v3779_v53 = vpop.f32.mrb[23].mxu1 }
 0x198   : > { %v5386_v40 = vadd.f32 %v3694_v51, %v3693_v31  ;;  %v3696_v15 = vpop.f32.mrb[26].mxu0  ;;  %v3780_v22 = vadd.f32 %v3779_v53, %v3778_v36  ;;  %v5390_v1 = vadd.f32 %v3777_v55, %v2391_v7  ;;  %v2415_v7 = vadd.f32 %v5366_v52, %v5373_v32 }
 0x199   : > { %v3697_v29 = vpop.f32.mrb[27].mxu0 }
 0x19a   : > { %v5392_v49 = vadd.f32 %v3697_v29, %v3696_v15  ;;  %v5394_v54 = vadd.f32 %v3780_v22, %v2394_v34  ;;  %v2418_v34 = vadd.f32 %v5368_v45, %v5373_v32 }
 0x19c   : > { %v3781_v20 = vpop.f32.mrb[24].mxu1 }
 0x19d   : > { %v3782_v9 = vpop.f32.mrb[25].mxu1 }
 0x19e   : > { %v3699_v35 = vpop.f32.mrb[28].mxu0  ;;  %v3783_v47 = vadd.f32 %v3782_v9, %v3781_v20  ;;  %v3784_v33 = vpop.f32.mrb[26].mxu1 }
 0x19f   : > { %v3700_v10 = vpop.f32.mrb[29].mxu0  ;;  %v3785_v62 = vpop.f32.mrb[27].mxu1 }
 0x1a0   : > { %v5398_v5 = vadd.f32 %v3700_v10, %v3699_v35  ;;  %v3702_v18 = vpop.f32.mrb[30].mxu0  ;;  %v3786_v19 = vadd.f32 %v3785_v62, %v3784_v33  ;;  %v5402_v6 = vadd.f32 %v3783_v47, %v2399_v42  ;;  %v2423_v33 = vadd.f32 %v5376_v41, %v5373_v32 }
 0x1a1   : > { %v3703_v8 = vpop.f32.mrb[31].mxu0 }
 0x1a2   : > { %v5404_v63 = vadd.f32 %v3703_v8, %v3702_v18  ;;  %v5406_v57 = vadd.f32 %v3786_v19, %v2402_v21  ;;  %v2426_v8 = vadd.f32 %v5381_v27, %v5373_v32 }
 0x1a4   : > { %v3787_v56 = vpop.f32.mrb[28].mxu1 }
 0x1a5   : > { %v3788_v25 = vpop.f32.mrb[29].mxu1 }
 0x1a6   : > { %v3705_v0 = vpop.f32.mrb[32].mxu0  ;;  %v3789_v39 = vadd.f32 %v3788_v25, %v3787_v56  ;;  %v3790_v50 = vpop.f32.mrb[30].mxu1 }
 0x1a7   : > { %v3706_v16 = vpop.f32.mrb[33].mxu0  ;;  %v3791_v14 = vpop.f32.mrb[31].mxu1 }
 0x1a8   : > { %v5410_v59 = vadd.f32 %v3706_v16, %v3705_v0  ;;  %v3708_v3 = vpop.f32.mrb[34].mxu0  ;;  %v3792_v2 = vadd.f32 %v3791_v14, %v3790_v50  ;;  %v5414_v30 = vadd.f32 %v3789_v39, %v2407_v24  ;;  %v2431_v14 = vadd.f32 %v5386_v40, %v5373_v32 }
 0x1a9   : > { %v3709_v23 = vpop.f32.mrb[35].mxu0 }
 0x1aa   : > { %v5416_v13 = vadd.f32 %v3709_v23, %v3708_v3  ;;  %v5418_v12 = vadd.f32 %v3792_v2, %v2410_v48 }
 0x1ac   : > { %v3793_v58 = vpop.f32.mrb[32].mxu1 }
 0x1ad   : > { %v3794_v44 = vpop.f32.mrb[33].mxu1 }
 0x1ae   : > { %v3711_v31 = vpop.f32.mrb[36].mxu0  ;;  %v3795_v55 = vadd.f32 %v3794_v44, %v3793_v58  ;;  %v3796_v36 = vpop.f32.mrb[34].mxu1  ;;  %v2434_v44 = vadd.f32 %v5392_v49, %v5373_v32  ;;  %v2439_v49 = vadd.f32 %v5398_v5, %v5373_v32 }
 0x1af   : > { %v3712_v51 = vpop.f32.mrb[37].mxu0  ;;  %v3797_v53 = vpop.f32.mrb[35].mxu1 }
 0x1b0   : > { %v5422_v15 = vadd.f32 %v3712_v51, %v3711_v31  ;;  %v3714_v17 = vpop.f32.mrb[38].mxu0  ;;  %v3798_v22 = vadd.f32 %v3797_v53, %v3796_v36  ;;  %v5426_v20 = vadd.f32 %v3795_v55, %v2415_v7 }
 0x1b1   : > { %v3715_v29 = vpop.f32.mrb[39].mxu0 }
 0x1b2   : > { %v5428_v9 = vadd.f32 %v3715_v29, %v3714_v17  ;;  %v5430_v35 = vadd.f32 %v3798_v22, %v2418_v34 }
 0x1b4   : > { %v3799_v42 = vpop.f32.mrb[36].mxu1 }
 0x1b5   : > { %v3800_v52 = vpop.f32.mrb[37].mxu1 }
 0x1b6   : > { %v3717_v47 = vpop.f32.mrb[40].mxu0  ;;  %v3801_v10 = vadd.f32 %v3800_v52, %v3799_v42  ;;  %v3802_v62 = vpop.f32.mrb[38].mxu1  ;;  %v2442_v52 = vadd.f32 %v5404_v63, %v5373_v32 }
 0x1b7   : > { %v3718_v18 = vpop.f32.mrb[41].mxu0  ;;  %v3803_v21 = vpop.f32.mrb[39].mxu1 }
 0x1b8   : > { %v5434_v19 = vadd.f32 %v3718_v18, %v3717_v47  ;;  %v3720_v45 = vpop.f32.mrb[42].mxu0  ;;  %v3804_v56 = vadd.f32 %v3803_v21, %v3802_v62  ;;  %v5438_v0 = vadd.f32 %v3801_v10, %v2423_v33 }
 0x1b9   : > { %v3721_v25 = vpop.f32.mrb[43].mxu0 }
 0x1ba   : > { %v5440_v24 = vadd.f32 %v3721_v25, %v3720_v45  ;;  %v5442_v39 = vadd.f32 %v3804_v56, %v2426_v8 }
 0x1bc   : > { %v3805_v50 = vpop.f32.mrb[40].mxu1 }
 0x1bd   : > { %v3806_v41 = vpop.f32.mrb[41].mxu1 }
 0x1be   : > { %v3723_v16 = vpop.f32.mrb[44].mxu0  ;;  %v3807_v3 = vadd.f32 %v3806_v41, %v3805_v50  ;;  %v3808_v48 = vpop.f32.mrb[42].mxu1 }
 0x1bf   : > { %v3724_v2 = vpop.f32.mrb[45].mxu0  ;;  %v3809_v23 = vpop.f32.mrb[43].mxu1 }
 0x1c0   : > { %v5446_v58 = vadd.f32 %v3724_v2, %v3723_v16  ;;  %v3726_v27 = vpop.f32.mrb[46].mxu0  ;;  %v3810_v31 = vadd.f32 %v3809_v23, %v3808_v48  ;;  %v5450_v55 = vadd.f32 %v3807_v3, %v2431_v14  ;;  %v5476_v14 = vadd.f32 %v5340_v46, %v5373_v32 }
 0x1c1   : > { %v3727_v7 = vpop.f32.mrb[47].mxu0  ;;  %v2447_v3 = vadd.f32 %v5410_v59, %v5373_v32  ;;  %v2450_v48 = vadd.f32 %v5416_v13, %v5373_v32 }
 0x1c2   : > { %v5452_v36 = vadd.f32 %v3727_v7, %v3726_v27  ;;  %v5454_v51 = vadd.f32 %v3810_v31, %v2434_v44 }
 0x1c4   : > { %v3811_v40 = vpop.f32.mrb[44].mxu1 }
 0x1c5   : > { %v3812_v53 = vpop.f32.mrb[45].mxu1 }
 0x1c6   : > { %v3895_v17 = vpop.f32.mrb[48].mxu0  ;;  %v3813_v34 = vadd.f32 %v3812_v53, %v3811_v40  ;;  %v3814_v22 = vpop.f32.mrb[46].mxu1 }
 0x1c7   : > { %v2713_v29 = vadd.f32 %v3895_v17, %v5390_v1  ;;  %v2704_v42 = vpop.f32.mrb[49].mxu0  ;;  %v3815_v47 = vpop.f32.mrb[47].mxu1 }
 0x1c8   : > { %v2705_v33 = vadd.f32 %v2704_v42, %v5379_v26  ;;  %v3896_v10 = vpop.f32.mrb[50].mxu0  ;;  %v3816_v62 = vadd.f32 %v3815_v47, %v3814_v22  ;;  %v5465_v5 = vadd.f32 %v3813_v34, %v2439_v49 }
 0x1c9   : > { %vm2833_vm4 = vcmp.ge.f32.partialorder %v2713_v29, 0.0  ;;  %v2865_v18 = vmul.f32 0.2, %v2713_v29  ;;  %v2716_v21 = vadd.f32 %v3896_v10, %v5394_v54  ;;  %v2707_v45 = vpop.f32.mrb[51].mxu0 }
 0x1ca   : > { %vm2831_vm5 = vcmp.ge.f32.partialorder %v2705_v33, 0.0  ;;  %v2863_v1 = vmul.f32 0.2, %v2705_v33  ;;  %v2708_v8 = vadd.f32 %v2707_v45, %v5383_v43  ;;  %v5472_v56 = vadd.f32 %v3816_v62, %v2442_v52 }
 0x1cb   : > { %v2897_v26 = vsel %vm2833_vm4, %v2713_v29, %v2865_v18  ;;  %vm2834_vm6 = vcmp.ge.f32.partialorder %v2716_v21, 0.0  ;;  %v2866_v63 = vmul.f32 0.2, %v2716_v21 }
 0x1cc   : > { %v3611_v54 = vpack.c.bf16 %v2897_v26, %v2897_v26  ;;  %v2895_v25 = vsel %vm2831_vm5, %v2705_v33, %v2863_v1  ;;  %vm2832_vm7 = vcmp.ge.f32.partialorder %v2708_v8, 0.0  ;;  %v2864_v43 = vmul.f32 0.2, %v2708_v8  ;;  %v3817_v16 = vpop.f32.mrb[48].mxu1 }
 0x1cd   : > { %v3609_v50 = vpack.c.bf16 %v2895_v25, %v2895_v25  ;;  %v2898_v41 = vsel %vm2834_vm6, %v2716_v21, %v2866_v63  ;;  %v3818_v23 = vpop.f32.mrb[49].mxu1  ;;  %v3091_v44 = vsel %vm1780_vm2, %v2897_v26, 0.0  ;;  %v3088_v59 = vsel %vm1780_vm2, %v2895_v25, 0.0 }
 0x1ce   : > { %3058 = vst.msk [vmem:[%s5470_s29 + $0x8] sm:$0xf] %vm3055_vm3, %v3611_v54  ;;  %v3612_v2 = vpack.c.bf16 %v2898_v41, %v2898_v41  ;;  %v3899_v27 = vpop.f32.mrb[52].mxu0  ;;  %v2896_v31 = vsel %vm2832_vm7, %v2708_v8, %v2864_v43  ;;  %v3819_v7 = vadd.f32 %v3818_v23, %v3817_v16  ;;  %v3820_v46 = vpop.f32.mrb[50].mxu1  ;;  %v3093_v45 = vsel %vm1780_vm2, %v2898_v41, 0.0 }
 0x1cf   : > { %3056 = vst.msk [vmem:[%s5470_s29] sm:$0xf] %vm3055_vm3, %v3609_v50  ;;  %v2729_v40 = vadd.f32 %v3899_v27, %v5414_v30  ;;  %v2720_v53 = vpop.f32.mrb[53].mxu0  ;;  %v3610_v13 = vpack.c.bf16 %v2896_v31, %v2896_v31  ;;  %v3089_v17 = vsel %vm1780_vm2, %v2896_v31, 0.0  ;;  %v3821_v34 = vpop.f32.mrb[51].mxu1  ;;  %v2458_v50 = vadd.f32 %v5428_v9, %v5373_v32 }
 0x1d0   : > { %3059 = vst.msk [vmem:[%s5470_s29 + $0xc] sm:$0xf] %vm3055_vm3, %v3612_v2  ;;  %v2721_v22 = vadd.f32 %v2720_v53, %v5402_v6  ;;  %v3900_v29 = vpop.f32.mrb[54].mxu0  ;;  %v3090_v42 = vadd.f32 %v3089_v17, %v3088_v59  ;;  %v3822_v49 = vadd.f32 %v3821_v34, %v3820_v46  ;;  %v5497_v21 = vadd.f32 %v3819_v7, %v2447_v3 }
 0x1d1   : > { %vm2837_vm8 = vcmp.ge.f32.partialorder %v2729_v40, 0.0  ;;  %v2869_v52 = vmul.f32 0.2, %v2729_v40  ;;  %v2723_v47 = vpop.f32.mrb[55].mxu0  ;;  %3057 = vst.msk [vmem:[%s5470_s29 + $0x4] sm:$0xf] %vm3055_vm3, %v3610_v13  ;;  %v2732_v33 = vadd.f32 %v3900_v29, %v5418_v12 }
 0x1d2   : > { %vm2835_vm9 = vcmp.ge.f32.partialorder %v2721_v22, 0.0  ;;  %v2867_v30 = vmul.f32 0.2, %v2721_v22  ;;  %v2724_v10 = vadd.f32 %v2723_v47, %v5406_v57  ;;  %v3092_v62 = vadd.f32 %v3091_v44, %v3090_v42 }
 0x1d3   : > { %v2901_v18 = vsel %vm2837_vm8, %v2729_v40, %v2869_v52  ;;  %v5499_v6 = vadd.f32 %v3822_v49, %v2450_v48  ;;  %vm2838_vm10 = vcmp.ge.f32.partialorder %v2732_v33, 0.0  ;;  %v2870_v12 = vmul.f32 0.2, %v2732_v33 }
 0x1d4   : > { %v3615_v1 = vpack.c.bf16 %v2901_v18, %v2901_v18  ;;  %v2899_v8 = vsel %vm2835_vm9, %v2721_v22, %v2867_v30  ;;  %v3094_v63 = vadd.f32 %v3093_v45, %v3092_v62  ;;  %v3823_v25 = vpop.f32.mrb[52].mxu1  ;;  %v2455_v57 = vadd.f32 %v5422_v15, %v5373_v32 }
 0x1d5   : > { %v3613_v26 = vpack.c.bf16 %v2899_v8, %v2899_v8  ;;  %v3095_v54 = vsel %vm1780_vm2, %v2899_v8, 0.0  ;;  %vm2836_vm11 = vcmp.ge.f32.partialorder %v2724_v10, 0.0  ;;  %v2868_v41 = vmul.f32 0.2, %v2724_v10  ;;  %v3824_v43 = vpop.f32.mrb[53].mxu1 }
 0x1d6   : > { %3062 = vst.msk [vmem:[%s5470_s29 + $0x18] sm:$0xf] %vm3055_vm3, %v3615_v1  ;;  %v3903_v16 = vpop.f32.mrb[56].mxu0  ;;  %v3096_v3 = vadd.f32 %v3095_v54, %v3094_v63  ;;  %v2902_v48 = vsel %vm2838_vm10, %v2732_v33, %v2870_v12  ;;  %v3825_v2 = vadd.f32 %v3824_v43, %v3823_v25  ;;  %v3826_v23 = vpop.f32.mrb[54].mxu1  ;;  %v3099_v15 = vsel %vm1780_vm2, %v2901_v18, 0.0 }
 0x1d7   : > { %3060 = vst.msk [vmem:[%s5470_s29 + $0x10] sm:$0xf] %vm3055_vm3, %v3613_v26  ;;  %v2745_v27 = vadd.f32 %v3903_v16, %v5438_v0  ;;  %v2736_v44 = vpop.f32.mrb[57].mxu0  ;;  %v3616_v9 = vpack.c.bf16 %v2902_v48, %v2902_v48  ;;  %v2900_v31 = vsel %vm2836_vm11, %v2724_v10, %v2868_v41  ;;  %v3827_v7 = vpop.f32.mrb[55].mxu1  ;;  %v2463_v52 = vadd.f32 %v5434_v19, %v5373_v32 }
 0x1d8   : > { %v2737_v46 = vadd.f32 %v2736_v44, %v5426_v20  ;;  %v3904_v40 = vpop.f32.mrb[58].mxu0  ;;  %v3614_v53 = vpack.c.bf16 %v2900_v31, %v2900_v31  ;;  %v3097_v59 = vsel %vm1780_vm2, %v2900_v31, 0.0  ;;  %v3828_v13 = vadd.f32 %v3827_v7, %v3826_v23 }
 0x1d9   : > { %vm2841_vm12 = vcmp.ge.f32.partialorder %v2745_v27, 0.0  ;;  %v2739_v17 = vpop.f32.mrb[59].mxu0  ;;  %3063 = vst.msk [vmem:[%s5470_s29 + $0x1c] sm:$0xf] %vm3055_vm3, %v3616_v9  ;;  %v3098_v34 = vadd.f32 %v3097_v59, %v3096_v3  ;;  %v2873_v0 = vmul.f32 0.2, %v2745_v27  ;;  %v2748_v29 = vadd.f32 %v3904_v40, %v5442_v39 }
 0x1da   : > { %vm2839_vm13 = vcmp.ge.f32.partialorder %v2737_v46, 0.0  ;;  %v2871_v22 = vmul.f32 0.2, %v2737_v46  ;;  %3061 = vst.msk [vmem:[%s5470_s29 + $0x14] sm:$0xf] %vm3055_vm3, %v3614_v53  ;;  %v2740_v42 = vadd.f32 %v2739_v17, %v5430_v35  ;;  %v5521_v20 = vadd.f32 %v3825_v2, %v2455_v57 }
 0x1db   : > { %v5523_v49 = vadd.f32 %v3828_v13, %v2458_v50  ;;  %v3100_v47 = vadd.f32 %v3099_v15, %v3098_v34  ;;  %v2905_v30 = vsel %vm2841_vm12, %v2745_v27, %v2873_v0  ;;  %v3101_v10 = vsel %vm1780_vm2, %v2902_v48, 0.0 }
 0x1dc   : > { %v2903_v33 = vsel %vm2839_vm13, %v2737_v46, %v2871_v22  ;;  %v3619_v62 = vpack.c.bf16 %v2905_v30, %v2905_v30  ;;  %v3829_v45 = vpop.f32.mrb[56].mxu1  ;;  %vm2842_vm14 = vcmp.ge.f32.partialorder %v2748_v29, 0.0  ;;  %v2874_v1 = vmul.f32 0.2, %v2748_v29 }
 0x1dd   : > { %v3617_v18 = vpack.c.bf16 %v2903_v33, %v2903_v33  ;;  %v3103_v39 = vsel %vm1780_vm2, %v2903_v33, 0.0  ;;  %v3102_v35 = vadd.f32 %v3101_v10, %v3100_v47  ;;  %vm2840_vm15 = vcmp.ge.f32.partialorder %v2740_v42, 0.0  ;;  %v3830_v8 = vpop.f32.mrb[57].mxu1 }
 0x1de   : > { %v3907_v26 = vpop.f32.mrb[60].mxu0  ;;  %v2466_v19 = vadd.f32 %v5440_v24, %v5373_v32  ;;  %3066 = vst.msk [vmem:[%s5470_s29 + $0x28] sm:$0xf] %vm3055_vm3, %v3619_v62  ;;  %v2872_v63 = vmul.f32 0.2, %v2740_v42  ;;  %v3831_v54 = vadd.f32 %v3830_v8, %v3829_v45  ;;  %v3832_v12 = vpop.f32.mrb[58].mxu1  ;;  %v5538_v50 = vadd.f32 %v5446_v58, %v5373_v32 }
 0x1df   : > { %3064 = vst.msk [vmem:[%s5470_s29 + $0x20] sm:$0xf] %vm3055_vm3, %v3617_v18  ;;  %v2761_v25 = vadd.f32 %v3907_v26, %v5465_v5  ;;  %v2752_v57 = vpop.f32.mrb[61].mxu0  ;;  %v3104_v41 = vadd.f32 %v3103_v39, %v3102_v35  ;;  %v2906_v43 = vsel %vm2842_vm14, %v2748_v29, %v2874_v1  ;;  %v3833_v16 = vpop.f32.mrb[59].mxu1  ;;  %v3107_v48 = vsel %vm1780_vm2, %v2905_v30, 0.0 }
 0x1e0   : > { %v2753_v24 = vadd.f32 %v2752_v57, %v5450_v55  ;;  %v3908_v3 = vpop.f32.mrb[62].mxu0  ;;  %v3620_v2 = vpack.c.bf16 %v2906_v43, %v2906_v43  ;;  %v2904_v23 = vsel %vm2840_vm15, %v2740_v42, %v2872_v63  ;;  %v3834_v27 = vadd.f32 %v3833_v16, %v3832_v12 }
 0x1e1   : > { %v2755_v5 = vpop.f32.mrb[63].mxu0  ;;  %v3618_v44 = vpack.c.bf16 %v2904_v23, %v2904_v23  ;;  %v3105_v15 = vsel %vm1780_vm2, %v2904_v23, 0.0  ;;  %vm2845_vm0 = vcmp.ge.f32.partialorder %v2761_v25, 0.0  ;;  %v2877_v58 = vmul.f32 0.2, %v2761_v25 }
 0x1e2   : > { %3067 = vst.msk [vmem:[%s5470_s29 + $0x2c] sm:$0xf] %vm3055_vm3, %v3620_v2  ;;  %v3106_v9 = vadd.f32 %v3105_v15, %v3104_v41  ;;  %vm2843_vm1 = vcmp.ge.f32.partialorder %v2753_v24, 0.0  ;;  %v2875_v31 = vmul.f32 0.2, %v2753_v24  ;;  %v2764_v55 = vadd.f32 %v3908_v3, %v5472_v56 }
 0x1e3   : > { %3065 = vst.msk [vmem:[%s5470_s29 + $0x24] sm:$0xf] %vm3055_vm3, %v3618_v44  ;;  %v2909_v7 = vsel %vm2845_vm0, %v2761_v25, %v2877_v58  ;;  %v2756_v46 = vadd.f32 %v2755_v5, %v5454_v51  ;;  %v5550_v40 = vadd.f32 %v3831_v54, %v2463_v52  ;;  %v5552_v53 = vadd.f32 %v3834_v27, %v2466_v19 }
 0x1e4   : > { %v3109_v59 = vsel %vm1780_vm2, %v2906_v43, 0.0  ;;  %v3108_v13 = vadd.f32 %v3107_v48, %v3106_v9  ;;  %v3623_v17 = vpack.c.bf16 %v2909_v7, %v2909_v7  ;;  %v2907_v34 = vsel %vm2843_vm1, %v2753_v24, %v2875_v31  ;;  %v3835_v0 = vpop.f32.mrb[60].mxu1 }
 0x1e5   : > { %v3621_v22 = vpack.c.bf16 %v2907_v34, %v2907_v34  ;;  %v3111_v56 = vsel %vm1780_vm2, %v2907_v34, 0.0  ;;  %vm2846_vm4 = vcmp.ge.f32.partialorder %v2764_v55, 0.0  ;;  %v2878_v29 = vmul.f32 0.2, %v2764_v55  ;;  %v3836_v42 = vpop.f32.mrb[61].mxu1 }
 0x1e6   : > { %v3911_v47 = vpop.f32.mrb[64].mxu0  ;;  %3070 = vst.msk [vmem:[%s5470_s29 + $0x38] sm:$0xf] %vm3055_vm3, %v3623_v17  ;;  %v3110_v51 = vadd.f32 %v3109_v59, %v3108_v13  ;;  %vm2844_vm5 = vcmp.ge.f32.partialorder %v2756_v46, 0.0  ;;  %v2876_v52 = vmul.f32 0.2, %v2756_v46  ;;  %v3837_v30 = vadd.f32 %v3836_v42, %v3835_v0 }
 0x1e7   : > { %v3838_v33 = vpop.f32.mrb[62].mxu1  ;;  %v2768_v10 = vpop.f32.mrb[65].mxu0  ;;  %v2474_v62 = vadd.f32 %v5452_v36, %v5373_v32  ;;  %3068 = vst.msk [vmem:[%s5470_s29 + $0x30] sm:$0xf] %vm3055_vm3, %v3621_v22  ;;  %v2910_v18 = vsel %vm2846_vm4, %v2764_v55, %v2878_v29  ;;  %v2777_v45 = vadd.f32 %v3911_v47, %v5521_v20  ;;  %v3115_v8 = vsel %vm1780_vm2, %v2909_v7, 0.0 }
 0x1e8   : > { %v3839_v39 = vpop.f32.mrb[63].mxu1  ;;  %v2769_v35 = vadd.f32 %v2768_v10, %v5497_v21  ;;  %v3912_v1 = vpop.f32.mrb[66].mxu0  ;;  %v3112_v26 = vadd.f32 %v3111_v56, %v3110_v51  ;;  %v3624_v19 = vpack.c.bf16 %v2910_v18, %v2910_v18  ;;  %v2908_v63 = vsel %vm2844_vm5, %v2756_v46, %v2876_v52 }
 0x1e9   : > { %v2771_v54 = vpop.f32.mrb[67].mxu0  ;;  %v3622_v12 = vpack.c.bf16 %v2908_v63, %v2908_v63  ;;  %v3113_v36 = vsel %vm1780_vm2, %v2908_v63, 0.0  ;;  %v3840_v25 = vadd.f32 %v3839_v39, %v3838_v33  ;;  %vm2849_vm6 = vcmp.ge.f32.partialorder %v2777_v45, 0.0 }
 0x1ea   : > { %3071 = vst.msk [vmem:[%s5470_s29 + $0x3c] sm:$0xf] %vm3055_vm3, %v3624_v19  ;;  %v3114_v57 = vadd.f32 %v3113_v36, %v3112_v26  ;;  %v2881_v41 = vmul.f32 0.2, %v2777_v45  ;;  %vm2847_vm7 = vcmp.ge.f32.partialorder %v2769_v35, 0.0  ;;  %v2780_v21 = vadd.f32 %v3912_v1, %v5523_v49 }
 0x1eb   : > { %v2879_v20 = vmul.f32 0.2, %v2769_v35  ;;  %3069 = vst.msk [vmem:[%s5470_s29 + $0x34] sm:$0xf] %vm3055_vm3, %v3622_v12  ;;  %v2772_v43 = vadd.f32 %v2771_v54, %v5499_v6  ;;  %v2632_v16 = vadd.f32 %v3837_v30, %v5538_v50  ;;  %v2635_v24 = vadd.f32 %v3840_v25, %v2474_v62 }
 0x1ec   : > { %v2482_v3 = vadd.f32 %v5342_v38, %v5373_v32  ;;  %v3116_v48 = vadd.f32 %v3115_v8, %v3114_v57  ;;  %v2913_v2 = vsel %vm2849_vm6, %v2777_v45, %v2881_v41  ;;  %v3841_v27 = vpop.f32.mrb[64].mxu1  ;;  %v3117_v5 = vsel %vm1780_vm2, %v2910_v18, 0.0 }
 0x1ed   : > { %v2911_v23 = vsel %vm2847_vm7, %v2769_v35, %v2879_v20  ;;  %v3627_v44 = vpack.c.bf16 %v2913_v2, %v2913_v2  ;;  %v3842_v58 = vpop.f32.mrb[65].mxu1  ;;  %vm2850_vm8 = vcmp.ge.f32.partialorder %v2780_v21, 0.0  ;;  %v2882_v50 = vmul.f32 0.2, %v2780_v21 }
 0x1ee   : > { %v3625_v15 = vpack.c.bf16 %v2911_v23, %v2911_v23  ;;  %v3119_v49 = vsel %vm1780_vm2, %v2911_v23, 0.0  ;;  %v3915_v6 = vpop.f32.mrb[68].mxu0  ;;  %v3118_v9 = vadd.f32 %v3117_v5, %v3116_v48  ;;  %vm2848_vm9 = vcmp.ge.f32.partialorder %v2772_v43, 0.0  ;;  %v3844_v31 = vpop.f32.mrb[66].mxu1 }
 0x1ef   : > { %v2784_v38 = vpop.f32.mrb[69].mxu0  ;;  %3074 = vst.msk [vmem:[%s5470_s29 + $0x48] sm:$0xf] %vm3055_vm3, %v3627_v44  ;;  %v2880_v55 = vmul.f32 0.2, %v2772_v43  ;;  %v3843_v7 = vadd.f32 %v3842_v58, %v3841_v27  ;;  %v3845_v46 = vpop.f32.mrb[67].mxu1  ;;  %v2793_v59 = vadd.f32 %v3915_v6, %v2632_v16  ;;  %v2914_v0 = vsel %vm2850_vm8, %v2780_v21, %v2882_v50 }
 0x1f0   : > { %3072 = vst.msk [vmem:[%s5470_s29 + $0x40] sm:$0xf] %vm3055_vm3, %v3625_v15  ;;  %v2785_v13 = vadd.f32 %v2784_v38, %v5550_v40  ;;  %v3916_v17 = vpop.f32.mrb[70].mxu0  ;;  %v3120_v34 = vadd.f32 %v3119_v49, %v3118_v9  ;;  %v3846_v22 = vadd.f32 %v3845_v46, %v3844_v31  ;;  %v3123_v42 = vsel %vm1780_vm2, %v2913_v2, 0.0 }
 0x1f1   : > { %v2796_v56 = vadd.f32 %v3916_v17, %v2635_v24  ;;  %v2787_v29 = vpop.f32.mrb[71].mxu0  ;;  %v3628_v47 = vpack.c.bf16 %v2914_v0, %v2914_v0  ;;  %v2912_v51 = vsel %vm2848_vm9, %v2772_v43, %v2880_v55  ;;  %vm2853_vm10 = vcmp.ge.f32.partialorder %v2793_v59, 0.0 }
 0x1f2   : > { %v3626_v52 = vpack.c.bf16 %v2912_v51, %v2912_v51  ;;  %v3121_v30 = vsel %vm1780_vm2, %v2912_v51, 0.0  ;;  %v2885_v33 = vmul.f32 0.2, %v2793_v59  ;;  %vm2851_vm11 = vcmp.ge.f32.partialorder %v2785_v13, 0.0 }
 0x1f3   : > { %3075 = vst.msk [vmem:[%s5470_s29 + $0x4c] sm:$0xf] %vm3055_vm3, %v3628_v47  ;;  %v3122_v40 = vadd.f32 %v3121_v30, %v3120_v34  ;;  %v2883_v10 = vmul.f32 0.2, %v2785_v13  ;;  %vm2854_vm12 = vcmp.ge.f32.partialorder %v2796_v56, 0.0  ;;  %v2788_v39 = vadd.f32 %v2787_v29, %v5552_v53 }
 0x1f4   : > { %v2886_v62 = vmul.f32 0.2, %v2796_v56  ;;  %3073 = vst.msk [vmem:[%s5470_s29 + $0x44] sm:$0xf] %vm3055_vm3, %v3626_v52  ;;  %v2917_v18 = vsel %vm2853_vm10, %v2793_v59, %v2885_v33  ;;  %v3847_v45 = vpop.f32.mrb[68].mxu1  ;;  %v2640_v35 = vadd.f32 %v3843_v7, %v5476_v14  ;;  %v2643_v1 = vadd.f32 %v3846_v22, %v2482_v3 }
 0x1f5   : > { %v3125_v8 = vsel %vm1780_vm2, %v2914_v0, 0.0  ;;  %v3124_v26 = vadd.f32 %v3123_v42, %v3122_v40  ;;  %v3631_v19 = vpack.c.bf16 %v2917_v18, %v2917_v18  ;;  %v2915_v63 = vsel %vm2851_vm11, %v2785_v13, %v2883_v10  ;;  %v3848_v54 = vpop.f32.mrb[69].mxu1 }
 0x1f6   : > { %v3919_v12 = vpop.f32.mrb[72].mxu0  ;;  %v3629_v36 = vpack.c.bf16 %v2915_v63, %v2915_v63  ;;  %v3127_v25 = vsel %vm1780_vm2, %v2915_v63, 0.0  ;;  %v2918_v57 = vsel %vm2854_vm12, %v2796_v56, %v2886_v62  ;;  %vm2852_vm13 = vcmp.ge.f32.partialorder %v2788_v39, 0.0  ;;  %v3850_v53 = vpop.f32.mrb[70].mxu1 }
 0x1f7   : > { %v2800_v41 = vpop.f32.mrb[73].mxu0  ;;  %3078 = vst.msk [vmem:[%s5470_s29 + $0x58] sm:$0xf] %vm3055_vm3, %v3631_v19  ;;  %v3126_v14 = vadd.f32 %v3125_v8, %v3124_v26  ;;  %v3632_v20 = vpack.c.bf16 %v2918_v57, %v2918_v57  ;;  %v2884_v21 = vmul.f32 0.2, %v2788_v39  ;;  %v3851_v43 = vpop.f32.mrb[71].mxu1  ;;  %v2487_v24 = vadd.f32 %v5346_v60, %v5373_v32 }
 0x1f8   : > { %v3920_v16 = vpop.f32.mrb[74].mxu0  ;;  %3076 = vst.msk [vmem:[%s5470_s29 + $0x50] sm:$0xf] %vm3055_vm3, %v3629_v36  ;;  %v3849_v3 = vadd.f32 %v3848_v54, %v3847_v45  ;;  %v3852_v48 = vadd.f32 %v3851_v43, %v3850_v53  ;;  %v2801_v2 = vadd.f32 %v2800_v41, %v2640_v35  ;;  %v2490_v27 = vadd.f32 %v5348_v37, %v5373_v32 }
 0x1f9   : > { %v2803_v23 = vpop.f32.mrb[75].mxu0  ;;  %v3128_v5 = vadd.f32 %v3127_v25, %v3126_v14  ;;  %3079 = vst.msk [vmem:[%s5470_s29 + $0x5c] sm:$0xf] %vm3055_vm3, %v3632_v20  ;;  %v2916_v44 = vsel %vm2852_vm13, %v2788_v39, %v2884_v21  ;;  %v2495_v6 = vadd.f32 %v5354_v4, %v5373_v32  ;;  %v3131_v38 = vsel %vm1780_vm2, %v2917_v18, 0.0 }
 0x1fa   : > { %v2804_v15 = vadd.f32 %v2803_v23, %v2643_v1  ;;  %v3630_v49 = vpack.c.bf16 %v2916_v44, %v2916_v44  ;;  %v3129_v58 = vsel %vm1780_vm2, %v2916_v44, 0.0  ;;  %v2648_v60 = vadd.f32 %v3849_v3, %v2487_v24 }
 0x1fb   : > { %vm2855_vm14 = vcmp.ge.f32.partialorder %v2801_v2, 0.0  ;;  %v3130_v9 = vadd.f32 %v3129_v58, %v3128_v5  ;;  %v2887_v50 = vmul.f32 0.2, %v2801_v2  ;;  %v2651_v31 = vadd.f32 %v3852_v48, %v2490_v27 }
 0x1fc   : > { %3077 = vst.msk [vmem:[%s5470_s29 + $0x54] sm:$0xf] %vm3055_vm3, %v3630_v49  ;;  %v2809_v37 = vadd.f32 %v3919_v12, %v2648_v60  ;;  %vm2856_vm15 = vcmp.ge.f32.partialorder %v2804_v15, 0.0  ;;  %v2888_v55 = vmul.f32 0.2, %v2804_v15  ;;  %v3853_v7 = vpop.f32.mrb[72].mxu1  ;;  %v2498_v8 = vadd.f32 %v5356_v28, %v5373_v32 }
 0x1fd   : > { %v3133_v46 = vsel %vm1780_vm2, %v2918_v57, 0.0  ;;  %v3132_v59 = vadd.f32 %v3131_v38, %v3130_v9  ;;  %v2919_v13 = vsel %vm2855_vm14, %v2801_v2, %v2887_v50  ;;  %v2812_v17 = vadd.f32 %v3920_v16, %v2651_v31  ;;  %v3854_v34 = vpop.f32.mrb[73].mxu1 }
 0x1fe   : > { %v3923_v0 = vpop.f32.mrb[76].mxu0  ;;  %vm2857_vm0 = vcmp.ge.f32.partialorder %v2809_v37, 0.0  ;;  %v2889_v4 = vmul.f32 0.2, %v2809_v37  ;;  %v3633_v22 = vpack.c.bf16 %v2919_v13, %v2919_v13  ;;  %v3135_v56 = vsel %vm1780_vm2, %v2919_v13, 0.0  ;;  %v3856_v29 = vpop.f32.mrb[74].mxu1 }
 0x1ff   : > { %v2816_v42 = vpop.f32.mrb[77].mxu0  ;;  %v3134_v47 = vadd.f32 %v3133_v46, %v3132_v59  ;;  %vm2858_vm1 = vcmp.ge.f32.partialorder %v2812_v17, 0.0  ;;  %v2890_v51 = vmul.f32 0.2, %v2812_v17  ;;  %v2920_v52 = vsel %vm2856_vm15, %v2804_v15, %v2888_v55  ;;  %v3857_v30 = vpop.f32.mrb[75].mxu1 }
 0x200   : > { %v3924_v33 = vpop.f32.mrb[78].mxu0  ;;  %v2921_v40 = vsel %vm2857_vm0, %v2809_v37, %v2889_v4  ;;  %3080 = vst.msk [vmem:[%s5470_s29 + $0x60] sm:$0xf] %vm3055_vm3, %v3633_v22  ;;  %v3634_v10 = vpack.c.bf16 %v2920_v52, %v2920_v52  ;;  %v3137_v62 = vsel %vm1780_vm2, %v2920_v52, 0.0  ;;  %v3855_v18 = vadd.f32 %v3854_v34, %v3853_v7 }
 0x201   : > { %v2819_v39 = vpop.f32.mrb[79].mxu0  ;;  %v3635_v45 = vpack.c.bf16 %v2921_v40, %v2921_v40  ;;  %v3136_v35 = vadd.f32 %v3135_v56, %v3134_v47  ;;  %v2922_v1 = vsel %vm2858_vm1, %v2812_v17, %v2890_v51  ;;  %v3858_v19 = vadd.f32 %v3857_v30, %v3856_v29 }
 0x202   : > { %v3636_v26 = vpack.c.bf16 %v2922_v1, %v2922_v1  ;;  %3081 = vst.msk [vmem:[%s5470_s29 + $0x64] sm:$0xf] %vm3055_vm3, %v3634_v10  ;;  %v2656_v63 = vadd.f32 %v3855_v18, %v2495_v6  ;;  %v3139_v12 = vsel %vm1780_vm2, %v2921_v40, 0.0  ;;  %v2503_v53 = vadd.f32 %v5362_v61, %v5373_v32 }
 0x203   : > { %3082 = vst.msk [vmem:[%s5470_s29 + $0x68] sm:$0xf] %vm3055_vm3, %v3635_v45  ;;  %v3138_v54 = vadd.f32 %v3137_v62, %v3136_v35  ;;  %v2659_v25 = vadd.f32 %v3858_v19, %v2498_v8  ;;  %v3141_v28 = vsel %vm1780_vm2, %v2922_v1, 0.0  ;;  %v2506_v61 = vadd.f32 %v5364_v11, %v5373_v32 }
 0x204   : > { %3083 = vst.msk [vmem:[%s5470_s29 + $0x6c] sm:$0xf] %vm3055_vm3, %v3636_v26  ;;  %v2817_v36 = vadd.f32 %v2816_v42, %v2656_v63  ;;  %v3859_v57 = vpop.f32.mrb[76].mxu1  ;;  %vm3159_vm8 = vcmask 516096  }
 0x205   : > { %v3140_v41 = vadd.f32 %v3139_v12, %v3138_v54  ;;  %v3860_v14 = vpop.f32.mrb[77].mxu1  ;;  %v2820_v21 = vadd.f32 %v2819_v39, %v2659_v25 }
 0x206   : > { %vm2859_vm4 = vcmp.ge.f32.partialorder %v2817_v36, 0.0  ;;  %v2891_v20 = vmul.f32 0.2, %v2817_v36  ;;  %v3861_v43 = vadd.f32 %v3860_v14, %v3859_v57  ;;  %v3862_v16 = vpop.f32.mrb[78].mxu1 }
 0x207   : > { %v3142_v24 = vadd.f32 %v3141_v28, %v3140_v41  ;;  %v3863_v3 = vpop.f32.mrb[79].mxu1  ;;  %vm2860_vm5 = vcmp.ge.f32.partialorder %v2820_v21, 0.0  ;;  %v2892_v2 = vmul.f32 0.2, %v2820_v21 }
 0x208   : > { %v2923_v48 = vsel %vm2859_vm4, %v2817_v36, %v2891_v20  ;;  %v2664_v23 = vadd.f32 %v3861_v43, %v2503_v53  ;;  %v3864_v44 = vadd.f32 %v3863_v3, %v3862_v16 }
 0x209   : > { %v3637_v27 = vpack.c.bf16 %v2923_v48, %v2923_v48  ;;  %v3143_v5 = vsel %vm1780_vm2, %v2923_v48, 0.0  ;;  %v2924_v49 = vsel %vm2860_vm5, %v2820_v21, %v2892_v2 }
 0x20a   : > { %v3144_v15 = vadd.f32 %v3143_v5, %v3142_v24  ;;  %v2825_v58 = vadd.f32 %v3923_v0, %v2664_v23  ;;  %v3638_v60 = vpack.c.bf16 %v2924_v49, %v2924_v49  ;;  %v3145_v6 = vsel %vm1780_vm2, %v2924_v49, 0.0 }
 0x20b   : > { %3084 = vst.msk [vmem:[%s5470_s29 + $0x70] sm:$0xf] %vm3055_vm3, %v3637_v27  ;;  %v2667_v9 = vadd.f32 %v3864_v44, %v2506_v61 }
 0x20c   : > { %v3146_v50 = vadd.f32 %v3145_v6, %v3144_v15  ;;  %vm2861_vm6 = vcmp.ge.f32.partialorder %v2825_v58, 0.0  ;;  %v2893_v31 = vmul.f32 0.2, %v2825_v58  ;;  %3085 = vst.msk [vmem:[%s5470_s29 + $0x74] sm:$0xf] %vm3055_vm3, %v3638_v60 }
 0x20d   : > { %v2828_v11 = vadd.f32 %v3924_v33, %v2667_v9 }
 0x20e   : > { %v2925_v32 = vsel %vm2861_vm6, %v2825_v58, %v2893_v31 }
 0x20f   : > { %v3639_v38 = vpack.c.bf16 %v2925_v32, %v2925_v32  ;;  %v3147_v37 = vsel %vm1780_vm2, %v2925_v32, 0.0  ;;  %vm2862_vm7 = vcmp.ge.f32.partialorder %v2828_v11, 0.0  ;;  %v2894_v55 = vmul.f32 0.2, %v2828_v11 }
 0x210   : > { %v3148_v7 = vadd.f32 %v3147_v37, %v3146_v50 }
 0x211   : > { %3086 = vst.msk [vmem:[%s5470_s29 + $0x78] sm:$0xf] %vm3055_vm3, %v3639_v38  ;;  %v2926_v46 = vsel %vm2862_vm7, %v2828_v11, %v2894_v55 }
 0x212   : > { %v3640_v59 = vpack.c.bf16 %v2926_v46, %v2926_v46  ;;  %v3149_v13 = vsel %vm1780_vm2, %v2926_v46, 0.0 }
 0x213   : > { %v3150_v17 = vadd.f32 %v3149_v13, %v3148_v7 }
 0x214   : > { %3087 = vst.msk [vmem:[%s5470_s29 + $0x7c] sm:$0xf] %vm3055_vm3, %v3640_v59 }
 0x215   : > { %v3151_v34 = vrot.slane %v3150_v17, 4 }
 0x217   : > { %v3152_v0 = vadd.f32 %v3151_v34, %v3150_v17 }
 0x219   : > { %v3153_v4 = vrot.slane %v3152_v0, 2 }
 0x21b   : > { %v3154_v22 = vadd.f32 %v3153_v4, %v3152_v0 }
 0x21d   : > { %v3155_v56 = vrot.slane %v3154_v22, 1 }
 0x21f   : > { %v3156_v29 = vadd.f32 %v3155_v56, %v3154_v22 }
 0x221   : > { %v3158_v42 = vmul.f32 0.00390625, %v3156_v29 }
 0x223   : > { %3160 = vst.msk [vmem:[%s206_s8] sm:$0x1] %vm3159_vm8, %v3158_v42 }
 0x224 PF: > { %s15_s15 = sadd.s32 1, %s4200_s15  }
 0x225   : > { %p12_p4 = scmp.ge.s32.totalorder %s15_s15, 4  }
 0x227   :  { %14 = sbr.rel (!%p12_p4) target bundleno = 1 (0x1), region = 76 }

// kernel: att_conv_forward.6
= control target key start
LH: loop header
LB: loop body
LE: loop exit
PB: predicated region body
PF: predicated region fallthrough
CT: control target
= control target key end

     0   :  { %s3327_s27 = smov 0   ;;  %s3877_s0 = inlined_call_operand.vmem [shape: f32[2,1,64], index: 0, kind: input, shape index: {}]   ;;  %s3878_s1 = inlined_call_operand.vmem [shape: f32[2,3,256], index: 1, kind: input, shape index: {}]   ;;  %s3879_s2 = inlined_call_operand.vmem [shape: f32[2,16,32], index: 2, kind: input, shape index: {}]   ;;  %s3880_s3 = inlined_call_operand.vmem [shape: bf16[2,16,2304], index: 3, kind: input, shape index: {}]   ;;  %s3881_s4 = inlined_call_operand.vmem [shape: bf16[2304,64], index: 4, kind: input, shape index: {}]   ;;  %s3882_s5 = inlined_call_operand.vmem [shape: f32[1,64], index: 5, kind: input, shape index: {}]   ;;  %s3883_s6 = inlined_call_operand.vmem [shape: f32[3,64], index: 6, kind: input, shape index: {}]   ;;  %s3884_s7 = inlined_call_operand.vmem [shape: f32[32,64], index: 7, kind: input, shape index: {}]   ;;  %s3885_s8 = inlined_call_operand.vmem [shape: f32[1,64], index: 8, kind: input, shape index: {}]   ;;  %s3886_s9 = inlined_call_operand.vmem [shape: f32[64,4], index: 9, kind: input, shape index: {}]   ;;  %s3887_s10 = inlined_call_operand.vmem [shape: f32[4,64], index: 10, kind: input, shape index: {}]   ;;  %s3888_s11 = inlined_call_operand.<no memory space> [shape: f32[1,1], index: 11, kind: input, shape index: {}]   ;;  %s3889_s12 = inlined_call_operand.vmem [shape: f32[2,1,256], index: 12, kind: output, shape index: {0}]   ;;  %s3890_s13 = inlined_call_operand.vmem [shape: f32[2,1,64], index: 13, kind: output, shape index: {1}]  }
   0x1   :  { %v19_v0 = vstv %s3888_s11 }
   0x2   :  { %20 = vst [vmem:[#allocation2] sm:$0x1] %v19_v0 }
   0x3 LB: > { %s2597_s28 = sadd.s32 4294967295, %s3247_s27   ;;  %p2601_p0 = scmp.ge.s32.totalorder %s3247_s27, 1  ;;  %s3247_s27 = sphi %s3327_s27, %s26_s27  }
   0x4   : > { %p420_p1 = scmp.lt.s32.totalorder %s3247_s27, 3 }
   0x6   : > { %p421_p2 = pnand %p2601_p0, %p420_p1 }
   0x7   : > { %v3065_v1 = vld [vmem:[%s3881_s4 + $0x40] sm:$0xff] (!%p421_p2)   ;;  %v3069_v5 = vld [vmem:[%s3881_s4 + $0x48] sm:$0xff] (!%p421_p2)   ;;  %v3073_v9 = vld [vmem:[%s3881_s4 + $0x50] sm:$0xff] (!%p421_p2)   ;;  %p479_p3 = scmp.lt.s32.totalorder (!%p421_p2), %s2597_s28, 1  ;;  %vm2207_vm0 = vcmask (!%p421_p2), 523264   ;;  %vm3250_vm1 = vmmov (!%p421_p2), 0  }
   0x8   : > { %424 = sbr.rel (%p421_p2) target bundleno = 1217 (0x4c1), region = 68  ;;  %v3066_v2 = vld [vmem:[%s3881_s4] sm:$0xff] (!%p421_p2)   ;;  %2782 = vmatprep.subr.bf16.mxu0 (!%p421_p2), %v3065_v1  ;;  %v3070_v6 = vld [vmem:[%s3881_s4 + $0x8] sm:$0xff] (!%p421_p2)   ;;  %v3074_v10 = vld [vmem:[%s3881_s4 + $0x10] sm:$0xff] (!%p421_p2)   ;;  %vm2218_vm2 = vcmask (!%p421_p2), 261120   ;;  %vm2404_vm3 = vcmask (!%p421_p2), 1043456  }
   0x9   : > { %v3067_v3 = vld [vmem:[%s3881_s4 + $0xc0] sm:$0xff] (!%p421_p2)   ;;  %2783 = vmatpush3.bf16.msra.mxu0 (!%p421_p2), %v3066_v2  ;;  %v3071_v7 = vld [vmem:[%s3881_s4 + $0xc8] sm:$0xff] (!%p421_p2)   ;;  %v3075_v11 = vld [vmem:[%s3881_s4 + $0xd0] sm:$0xff] (!%p421_p2)   ;;  %vm514_vm4 = vcmask (!%p421_p2), 518144   ;;  %vm2400_vm6 = vcmask (!%p421_p2), 31744   ;;  %vm524_vm7 = vcmask (!%p421_p2), 1042432  }
   0xa   : > { %v3068_v4 = vld [vmem:[%s3881_s4 + $0x80] sm:$0xff] (!%p421_p2)   ;;  %2804 = vmatprep.subr.bf16.mxu1 (!%p421_p2), %v3067_v3  ;;  %2784 = vmatprep.subr.bf16.mxu0 (!%p421_p2), %v3069_v5  ;;  %v3072_v8 = vld [vmem:[%s3881_s4 + $0x88] sm:$0xff] (!%p421_p2)   ;;  %v3076_v12 = vld [vmem:[%s3881_s4 + $0x90] sm:$0xff] (!%p421_p2)   ;;  %vm2484_vm9 = vcmask (!%p421_p2), 516096  }
   0xb   : > { %2805 = vmatpush3.bf16.msra.mxu1 (!%p421_p2), %v3068_v4  ;;  %v3077_v13 = vld [vmem:[%s3881_s4 + $0x58] sm:$0xff] (!%p421_p2)   ;;  %v3081_v17 = vld [vmem:[%s3881_s4 + $0x60] sm:$0xff] (!%p421_p2)   ;;  %v3085_v21 = vld [vmem:[%s3881_s4 + $0x68] sm:$0xff] (!%p421_p2)  }
   0xc   : > { %2806 = vmatprep.subr.bf16.mxu1 (!%p421_p2), %v3071_v7  ;;  %v3078_v14 = vld [vmem:[%s3881_s4 + $0x18] sm:$0xff] (!%p421_p2)   ;;  %v3082_v18 = vld [vmem:[%s3881_s4 + $0x20] sm:$0xff] (!%p421_p2)   ;;  %v3086_v22 = vld [vmem:[%s3881_s4 + $0x28] sm:$0xff] (!%p421_p2)  }
   0xd   : > { %2785 = vmatpush3.bf16.msra.mxu0 (!%p421_p2), %v3070_v6  ;;  %v3079_v15 = vld [vmem:[%s3881_s4 + $0xd8] sm:$0xff] (!%p421_p2)   ;;  %v3083_v19 = vld [vmem:[%s3881_s4 + $0xe0] sm:$0xff] (!%p421_p2)   ;;  %v3087_v23 = vld [vmem:[%s3881_s4 + $0xe8] sm:$0xff] (!%p421_p2)  }
   0xe   : > { %2786 = vmatprep.subr.bf16.mxu0 (!%p421_p2), %v3073_v9  ;;  %v3080_v16 = vld [vmem:[%s3881_s4 + $0x98] sm:$0xff] (!%p421_p2)   ;;  %v3084_v20 = vld [vmem:[%s3881_s4 + $0xa0] sm:$0xff] (!%p421_p2)   ;;  %v3088_v24 = vld [vmem:[%s3881_s4 + $0xa8] sm:$0xff] (!%p421_p2)  }
   0xf   : > { %2807 = vmatpush3.bf16.msra.mxu1 %v3072_v8  ;;  %s3892_s28 = smov (!%p479_p3, %s2597_s28), 1  ;;  %v3089_v25 = vld [vmem:[%s3881_s4 + $0x70] sm:$0xff]   ;;  %v3093_v29 = vld [vmem:[%s3881_s4 + $0x78] sm:$0xff]   ;;  %v3100_v35 = vld [vmem:[%s3881_s4 + $0x140] sm:$0xff]  }
  0x10   : > { %2808 = vmatprep.subr.bf16.mxu1 %v3075_v11  ;;  %s3049_s11 = smul.u32 144, %s3892_s28  ;;  %v3090_v26 = vld [vmem:[%s3881_s4 + $0x30] sm:$0xff]   ;;  %v3094_v30 = vld [vmem:[%s3881_s4 + $0x38] sm:$0xff]   ;;  %v3104_v38 = vld [vmem:[%s3881_s4 + $0x100] sm:$0xff]   ;;  %s2781_s26 = sshll.u32 %s3892_s28, 4 }
  0x11   : > { %2787 = vmatpush3.bf16.msra.mxu0 %v3074_v10  ;;  %v3091_v27 = vld [vmem:[%s3881_s4 + $0xf0] sm:$0xff]   ;;  %v3095_v31 = vld [vmem:[%s3881_s4 + $0xf8] sm:$0xff]   ;;  %v3105_v39 = vld [vmem:[%s3881_s4 + $0x1c0] sm:$0xff]   ;;  %s481_s17 = scalar_lea.vmem %s3877_s0, %s3892_s28  ;;  %s2780_s20 = sshll.u32 %s3892_s28, 3 }
  0x12   : > { %2788 = vmatprep.subr.bf16.mxu0 %v3077_v13  ;;  %v3092_v28 = vld [vmem:[%s3881_s4 + $0xb0] sm:$0xff]   ;;  %s3432_s24 = scalar_lea.vmem %s3880_s3, %s3049_s11  ;;  %v3099_v34 = vld [vmem:[%s3881_s4 + $0xb8] sm:$0xff]   ;;  %v3106_v40 = vld [vmem:[%s3881_s4 + $0x180] sm:$0xff]   ;;  %s491_s11 = scalar_lea.vmem %s3879_s2, %s2781_s26 }
  0x13   : > { %2809 = vmatpush3.bf16.msra.mxu1 %v3076_v12  ;;  %v3096_v32 = vld [vmem:[%s3432_s24] ss:$72 sps:$4 sm:$0xff]   ;;  %v3098_v33 = vld [vmem:[%s3432_s24 + $0x4] ss:$72 sps:$4 sm:$0xff]   ;;  %v3111_v45 = vld [vmem:[%s3881_s4 + $0x150] sm:$0xff]   ;;  %s486_s23 = scalar_lea.vmem %s3878_s1, %s2780_s20  ;;  %s2607_s25 = sshll.u32 %s3892_s28, 1 }
  0x14   : > { %2810 = vmatprep.subr.bf16.mxu1 %v3079_v15  ;;  %1861 = vmatprep.mubr.bf16.mxu0 %v3098_v33  ;;  %v3101_v36 = vld [vmem:[%s3432_s24 + $0x8] ss:$72 sps:$4 sm:$0xff]   ;;  %v3103_v37 = vld [vmem:[%s3432_s24 + $0xc] ss:$72 sps:$4 sm:$0xff]   ;;  %v3115_v49 = vld [vmem:[%s3881_s4 + $0x158] sm:$0xff]   ;;  %s500_s30 = scalar_lea.vmem %s3889_s12, %s2607_s25  ;;  %s503_s15 = scalar_lea.vmem %s3890_s13, %s3892_s28 }
  0x15   : > { %2789 = vmatpush3.bf16.msra.mxu0 %v3078_v14  ;;  %1902 = vmatprep.mubr.bf16.mxu1 %v3103_v37  ;;  %v3107_v41 = vld [vmem:[%s3881_s4 + $0x148] sm:$0xff]   ;;  %v3112_v46 = vld [vmem:[%s3881_s4 + $0x110] sm:$0xff]   ;;  %v3116_v50 = vld [vmem:[%s3881_s4 + $0x118] sm:$0xff]  }
  0x16   : > { %2790 = vmatprep.subr.bf16.mxu0 %v3081_v17  ;;  %v3108_v42 = vld [vmem:[%s3881_s4 + $0x108] sm:$0xff]   ;;  %v3113_v47 = vld [vmem:[%s3881_s4 + $0x1d0] sm:$0xff]   ;;  %v3117_v51 = vld [vmem:[%s3881_s4 + $0x1d8] sm:$0xff]  }
  0x17   : > { %2811 = vmatpush3.bf16.msra.mxu1 %v3080_v16  ;;  %v3109_v43 = vld [vmem:[%s3881_s4 + $0x1c8] sm:$0xff]   ;;  %v3114_v48 = vld [vmem:[%s3881_s4 + $0x190] sm:$0xff]   ;;  %v3118_v52 = vld [vmem:[%s3881_s4 + $0x198] sm:$0xff]  }
  0x18   : > { %2812 = vmatprep.subr.bf16.mxu1 %v3083_v19  ;;  %v3110_v44 = vld [vmem:[%s3881_s4 + $0x188] sm:$0xff]   ;;  %v3119_v53 = vld [vmem:[%s3881_s4 + $0x160] sm:$0xff]   ;;  %v3127_v61 = vld [vmem:[%s3881_s4 + $0x170] sm:$0xff]  }
  0x19   : > { %2791 = vmatpush3.bf16.msra.mxu0 %v3082_v18  ;;  %v3120_v54 = vld [vmem:[%s3881_s4 + $0x120] sm:$0xff]   ;;  %v3123_v57 = vld [vmem:[%s3881_s4 + $0x168] sm:$0xff]   ;;  %v3128_v62 = vld [vmem:[%s3881_s4 + $0x130] sm:$0xff]  }
  0x1a   : > { %2792 = vmatprep.subr.bf16.mxu0 %v3085_v21  ;;  %v3121_v55 = vld [vmem:[%s3881_s4 + $0x1e0] sm:$0xff]   ;;  %v3124_v58 = vld [vmem:[%s3881_s4 + $0x128] sm:$0xff]   ;;  %v3129_v63 = vld [vmem:[%s3881_s4 + $0x1f0] sm:$0xff]  }
  0x1b   : > { %2813 = vmatpush3.bf16.msra.mxu1 %v3084_v20  ;;  %v3122_v56 = vld [vmem:[%s3881_s4 + $0x1a0] sm:$0xff]   ;;  %v3125_v59 = vld [vmem:[%s3881_s4 + $0x1e8] sm:$0xff]   ;;  %v3130_v0 = vld [vmem:[%s3881_s4 + $0x1b0] sm:$0xff]  }
  0x1c   : > { %2814 = vmatprep.subr.bf16.mxu1 %v3087_v23  ;;  %v3126_v60 = vld [vmem:[%s3881_s4 + $0x1a8] sm:$0xff]   ;;  %v3131_v1 = vld [vmem:[%s3881_s4 + $0x178] sm:$0xff]   ;;  %v3138_v7 = vld [vmem:[%s3881_s4 + $0x240] sm:$0xff]  }
  0x1d   : > { %2793 = vmatpush3.bf16.msra.mxu0 %v3086_v22  ;;  %v3132_v2 = vld [vmem:[%s3881_s4 + $0x138] sm:$0xff]   ;;  %v3142_v10 = vld [vmem:[%s3881_s4 + $0x200] sm:$0xff]   ;;  %v3145_v13 = vld [vmem:[%s3881_s4 + $0x248] sm:$0xff]  }
  0x1e   : > { %2794 = vmatprep.subr.bf16.mxu0 %v3089_v25  ;;  %v3133_v3 = vld [vmem:[%s3881_s4 + $0x1f8] sm:$0xff]   ;;  %v3143_v11 = vld [vmem:[%s3881_s4 + $0x2c0] sm:$0xff]   ;;  %v3146_v14 = vld [vmem:[%s3881_s4 + $0x208] sm:$0xff]  }
  0x1f   : > { %2815 = vmatpush3.bf16.msra.mxu1 %v3088_v24  ;;  %v3134_v4 = vld [vmem:[%s3432_s24 + $0x10] ss:$72 sps:$4 sm:$0xff]   ;;  %v3136_v5 = vld [vmem:[%s3432_s24 + $0x14] ss:$72 sps:$4 sm:$0xff]   ;;  %v3144_v12 = vld [vmem:[%s3881_s4 + $0x280] sm:$0xff]  }
  0x20   : > { %2816 = vmatprep.subr.bf16.mxu1 %v3091_v27  ;;  %v3137_v6 = vld [vmem:[%s3881_s4 + $0x1b8] sm:$0xff]   ;;  %v3147_v15 = vld [vmem:[%s3881_s4 + $0x2c8] sm:$0xff]   ;;  %v3149_v17 = vld [vmem:[%s3881_s4 + $0x250] sm:$0xff]  }
  0x21   : > { %2795 = vmatpush3.bf16.msra.mxu0 %v3090_v26  ;;  %v3139_v8 = vld [vmem:[%s3432_s24 + $0x18] ss:$72 sps:$4 sm:$0xff]   ;;  %v3141_v9 = vld [vmem:[%s3432_s24 + $0x1c] ss:$72 sps:$4 sm:$0xff]   ;;  %v3148_v16 = vld [vmem:[%s3881_s4 + $0x288] sm:$0xff]  }
  0x22   : > { %2796 = vmatprep.subr.bf16.mxu0 %v3093_v29  ;;  %v3150_v18 = vld [vmem:[%s3881_s4 + $0x210] sm:$0xff]   ;;  %v3153_v21 = vld [vmem:[%s3881_s4 + $0x258] sm:$0xff]   ;;  %v3157_v25 = vld [vmem:[%s3881_s4 + $0x260] sm:$0xff]  }
  0x23   : > { %2817 = vmatpush3.bf16.msra.mxu1 %v3092_v28  ;;  %v3151_v19 = vld [vmem:[%s3881_s4 + $0x2d0] sm:$0xff]   ;;  %v3154_v22 = vld [vmem:[%s3881_s4 + $0x218] sm:$0xff]   ;;  %v3158_v26 = vld [vmem:[%s3881_s4 + $0x220] sm:$0xff]  }
  0x24   : > { %2818 = vmatprep.subr.bf16.mxu1 %v3095_v31  ;;  %v3152_v20 = vld [vmem:[%s3881_s4 + $0x290] sm:$0xff]   ;;  %v3155_v23 = vld [vmem:[%s3881_s4 + $0x2d8] sm:$0xff]   ;;  %v3159_v27 = vld [vmem:[%s3881_s4 + $0x2e0] sm:$0xff]  }
  0x25   : > { %2797 = vmatpush3.bf16.msra.mxu0 %v3094_v30  ;;  %v3156_v24 = vld [vmem:[%s3881_s4 + $0x298] sm:$0xff]   ;;  %v3160_v28 = vld [vmem:[%s3881_s4 + $0x2a0] sm:$0xff]   ;;  %v3161_v29 = vld [vmem:[%s3881_s4 + $0x268] sm:$0xff]  }
  0x26   : > { %2826 = vmatprep.subr.bf16.mxu0 %v3100_v35  ;;  %v3162_v30 = vld [vmem:[%s3881_s4 + $0x228] sm:$0xff]   ;;  %v3165_v33 = vld [vmem:[%s3881_s4 + $0x270] sm:$0xff]   ;;  %v3169_v37 = vld [vmem:[%s3881_s4 + $0x278] sm:$0xff]  }
  0x27   : > { %2819 = vmatpush3.bf16.msra.mxu1 %v3099_v34  ;;  %v3163_v31 = vld [vmem:[%s3881_s4 + $0x2e8] sm:$0xff]   ;;  %v3166_v34 = vld [vmem:[%s3881_s4 + $0x230] sm:$0xff]  }
  0x28   : > { %1862 = vmatmul.mubr.bf16.vlgmr.msra.gmra.mrb[0].mxu0 %v3096_v32  ;;  %2848 = vmatprep.subr.bf16.mxu1 %v3105_v39  ;;  %v3164_v32 = vld [vmem:[%s3881_s4 + $0x2a8] sm:$0xff]   ;;  %v3167_v35 = vld [vmem:[%s3881_s4 + $0x2f0] sm:$0xff]   ;;  %v3171_v39 = vld [vmem:[%s3881_s4 + $0x2f8] sm:$0xff]  }
  0x29   : > { %2827 = vmatpush3.bf16.msra.mxu0 %v3104_v38  ;;  %1943 = vmatprep.mubr.bf16.mxu0 %v3136_v5  ;;  %v3170_v38 = vld [vmem:[%s3881_s4 + $0x238] sm:$0xff]   ;;  %v3203_v5 = vld [vmem:[%s3881_s4 + $0x370] sm:$0xff]  }
  0x2a   : > { %1903 = vmatmul.mubr.bf16.vlgmr.msra.gmra.mrb[0].mxu1 %v3101_v36  ;;  %2828 = vmatprep.subr.bf16.mxu0 %v3107_v41  ;;  %v3168_v36 = vld [vmem:[%s3881_s4 + $0x2b0] sm:$0xff]   ;;  %v3174_v41 = vld [vmem:[%s3432_s24 + $0x24] ss:$72 sps:$4 sm:$0xff]  }
  0x2b   : > { %2849 = vmatpush3.bf16.msra.mxu1 %v3106_v40  ;;  %1984 = vmatprep.mubr.bf16.mxu1 %v3141_v9  ;;  %v3172_v40 = vld [vmem:[%s3432_s24 + $0x20] ss:$72 sps:$4 sm:$0xff]   ;;  %v3207_v9 = vld [vmem:[%s3881_s4 + $0x378] sm:$0xff]  }
  0x2c   : > { %2850 = vmatprep.subr.bf16.mxu1 %v3109_v43  ;;  %v3176_v43 = vld [vmem:[%s3881_s4 + $0x340] sm:$0xff]  }
  0x2d   : > { %2829 = vmatpush3.bf16.msra.mxu0 %v3108_v42  ;;  %v3175_v42 = vld [vmem:[%s3881_s4 + $0x2b8] sm:$0xff]  }
  0x2e   : > { %2830 = vmatprep.subr.bf16.mxu0 %v3111_v45  ;;  %v3179_v45 = vld [vmem:[%s3432_s24 + $0x2c] ss:$72 sps:$4 sm:$0xff]  }
  0x2f   : > { %2851 = vmatpush3.bf16.msra.mxu1 %v3110_v44  ;;  %v3177_v44 = vld [vmem:[%s3432_s24 + $0x28] ss:$72 sps:$4 sm:$0xff]  }
  0x30   : > { %2852 = vmatprep.subr.bf16.mxu1 %v3113_v47  ;;  %v3181_v47 = vld [vmem:[%s3881_s4 + $0x3c0] sm:$0xff]  }
  0x31   : > { %2831 = vmatpush3.bf16.msra.mxu0 %v3112_v46  ;;  %v3180_v46 = vld [vmem:[%s3881_s4 + $0x300] sm:$0xff]  }
  0x32   : > { %2832 = vmatprep.subr.bf16.mxu0 %v3115_v49  ;;  %v3183_v49 = vld [vmem:[%s3881_s4 + $0x348] sm:$0xff]  }
  0x33   : > { %2853 = vmatpush3.bf16.msra.mxu1 %v3114_v48  ;;  %v3182_v48 = vld [vmem:[%s3881_s4 + $0x380] sm:$0xff]  }
  0x34   : > { %2854 = vmatprep.subr.bf16.mxu1 %v3117_v51  ;;  %v3185_v51 = vld [vmem:[%s3881_s4 + $0x3c8] sm:$0xff]  }
  0x35   : > { %2833 = vmatpush3.bf16.msra.mxu0 %v3116_v50  ;;  %v3184_v50 = vld [vmem:[%s3881_s4 + $0x308] sm:$0xff]  }
  0x36   : > { %2834 = vmatprep.subr.bf16.mxu0 %v3119_v53  ;;  %v3187_v53 = vld [vmem:[%s3881_s4 + $0x350] sm:$0xff]  }
  0x37   : > { %2855 = vmatpush3.bf16.msra.mxu1 %v3118_v52  ;;  %v3186_v52 = vld [vmem:[%s3881_s4 + $0x388] sm:$0xff]  }
  0x38   : > { %2856 = vmatprep.subr.bf16.mxu1 %v3121_v55  ;;  %v3189_v55 = vld [vmem:[%s3881_s4 + $0x3d0] sm:$0xff]  }
  0x39   : > { %2835 = vmatpush3.bf16.msra.mxu0 %v3120_v54  ;;  %v3188_v54 = vld [vmem:[%s3881_s4 + $0x310] sm:$0xff]  }
  0x3a   : > { %2836 = vmatprep.subr.bf16.mxu0 %v3123_v57  ;;  %v3191_v57 = vld [vmem:[%s3881_s4 + $0x358] sm:$0xff]  }
  0x3b   : > { %2857 = vmatpush3.bf16.msra.mxu1 %v3122_v56  ;;  %v3190_v56 = vld [vmem:[%s3881_s4 + $0x390] sm:$0xff]  }
  0x3c   : > { %2858 = vmatprep.subr.bf16.mxu1 %v3125_v59  ;;  %v3193_v59 = vld [vmem:[%s3881_s4 + $0x3d8] sm:$0xff]  }
  0x3d   : > { %2837 = vmatpush3.bf16.msra.mxu0 %v3124_v58  ;;  %v3192_v58 = vld [vmem:[%s3881_s4 + $0x318] sm:$0xff]  }
  0x3e   : > { %2838 = vmatprep.subr.bf16.mxu0 %v3127_v61  ;;  %v3195_v61 = vld [vmem:[%s3881_s4 + $0x360] sm:$0xff]  }
  0x3f   : > { %2859 = vmatpush3.bf16.msra.mxu1 %v3126_v60  ;;  %v3194_v60 = vld [vmem:[%s3881_s4 + $0x398] sm:$0xff]  }
  0x40   : > { %2860 = vmatprep.subr.bf16.mxu1 %v3129_v63  ;;  %v3197_v63 = vld [vmem:[%s3881_s4 + $0x3e0] sm:$0xff]  }
  0x41   : > { %2839 = vmatpush3.bf16.msra.mxu0 %v3128_v62  ;;  %v3196_v62 = vld [vmem:[%s3881_s4 + $0x320] sm:$0xff]  }
  0x42   : > { %2840 = vmatprep.subr.bf16.mxu0 %v3131_v1  ;;  %v3199_v1 = vld [vmem:[%s3881_s4 + $0x368] sm:$0xff]  }
  0x43   : > { %2861 = vmatpush3.bf16.msra.mxu1 %v3130_v0  ;;  %v3198_v0 = vld [vmem:[%s3881_s4 + $0x3a0] sm:$0xff]  }
  0x44   : > { %2862 = vmatprep.subr.bf16.mxu1 %v3133_v3  ;;  %v3201_v3 = vld [vmem:[%s3881_s4 + $0x3e8] sm:$0xff]  }
  0x45   : > { %2841 = vmatpush3.bf16.msra.mxu0 %v3132_v2  ;;  %v3200_v2 = vld [vmem:[%s3881_s4 + $0x328] sm:$0xff]  }
  0x46   : > { %2870 = vmatprep.subr.bf16.mxu0 %v3138_v7  ;;  %v3205_v7 = vld [vmem:[%s3881_s4 + $0x3f0] sm:$0xff]  }
  0x47   : > { %2863 = vmatpush3.bf16.msra.mxu1 %v3137_v6  ;;  %v3204_v6 = vld [vmem:[%s3881_s4 + $0x330] sm:$0xff]  }
  0x48   : > { %1944 = vmatmul.mubr.bf16.vlgmr.msra.gmra.mrb[4].mxu0 %v3134_v4  ;;  %2892 = vmatprep.subr.bf16.mxu1 %v3143_v11  ;;  %v3202_v4 = vld [vmem:[%s3881_s4 + $0x3a8] sm:$0xff]   ;;  %v3209_v11 = vld [vmem:[%s3881_s4 + $0x3f8] sm:$0xff]  }
  0x49   : > { %2871 = vmatpush3.bf16.msra.mxu0 %v3142_v10  ;;  %2025 = vmatprep.mubr.bf16.mxu0 %v3174_v41  ;;  %v3208_v10 = vld [vmem:[%s3881_s4 + $0x338] sm:$0xff]  }
  0x4a   : > { %1985 = vmatmul.mubr.bf16.vlgmr.msra.gmra.mrb[4].mxu1 %v3139_v8  ;;  %2872 = vmatprep.subr.bf16.mxu0 %v3145_v13  ;;  %v3206_v8 = vld [vmem:[%s3881_s4 + $0x3b0] sm:$0xff]  }
  0x4b   : > { %2893 = vmatpush3.bf16.msra.mxu1 %v3144_v12  ;;  %2066 = vmatprep.mubr.bf16.mxu1 %v3179_v45  ;;  %v3210_v12 = vld [vmem:[%s3432_s24 + $0x30] ss:$72 sps:$4 sm:$0xff]   ;;  %v3212_v13 = vld [vmem:[%s3432_s24 + $0x34] ss:$72 sps:$4 sm:$0xff]  }
  0x4c   : > { %2894 = vmatprep.subr.bf16.mxu1 %v3147_v15  ;;  %v3214_v15 = vld [vmem:[%s3881_s4 + $0x440] sm:$0xff]  }
  0x4d   : > { %2873 = vmatpush3.bf16.msra.mxu0 %v3146_v14  ;;  %v3213_v14 = vld [vmem:[%s3881_s4 + $0x3b8] sm:$0xff]  }
  0x4e   : > { %2874 = vmatprep.subr.bf16.mxu0 %v3149_v17  ;;  %v3217_v17 = vld [vmem:[%s3432_s24 + $0x3c] ss:$72 sps:$4 sm:$0xff]  }
  0x4f   : > { %2895 = vmatpush3.bf16.msra.mxu1 %v3148_v16  ;;  %v3215_v16 = vld [vmem:[%s3432_s24 + $0x38] ss:$72 sps:$4 sm:$0xff]  }
  0x50   : > { %2896 = vmatprep.subr.bf16.mxu1 %v3151_v19  ;;  %v3219_v19 = vld [vmem:[%s3881_s4 + $0x448] sm:$0xff]  }
  0x51   : > { %2875 = vmatpush3.bf16.msra.mxu0 %v3150_v18  ;;  %v3218_v18 = vld [vmem:[%s3881_s4 + $0x400] sm:$0xff]  }
  0x52   : > { %2876 = vmatprep.subr.bf16.mxu0 %v3153_v21  ;;  %v3221_v21 = vld [vmem:[%s3881_s4 + $0x450] sm:$0xff]  }
  0x53   : > { %2897 = vmatpush3.bf16.msra.mxu1 %v3152_v20  ;;  %v3220_v20 = vld [vmem:[%s3881_s4 + $0x408] sm:$0xff]  }
  0x54   : > { %2898 = vmatprep.subr.bf16.mxu1 %v3155_v23  ;;  %v3223_v23 = vld [vmem:[%s3881_s4 + $0x458] sm:$0xff]  }
  0x55   : > { %2877 = vmatpush3.bf16.msra.mxu0 %v3154_v22  ;;  %v3222_v22 = vld [vmem:[%s3881_s4 + $0x410] sm:$0xff]  }
  0x56   : > { %2878 = vmatprep.subr.bf16.mxu0 %v3157_v25  ;;  %v3225_v25 = vld [vmem:[%s3881_s4 + $0x460] sm:$0xff]  }
  0x57   : > { %2899 = vmatpush3.bf16.msra.mxu1 %v3156_v24  ;;  %v3224_v24 = vld [vmem:[%s3881_s4 + $0x418] sm:$0xff]  }
  0x58   : > { %2900 = vmatprep.subr.bf16.mxu1 %v3159_v27  ;;  %v3227_v27 = vld [vmem:[%s3881_s4 + $0x468] sm:$0xff]  }
  0x59   : > { %2879 = vmatpush3.bf16.msra.mxu0 %v3158_v26  ;;  %v3226_v26 = vld [vmem:[%s3881_s4 + $0x420] sm:$0xff]  }
  0x5a   : > { %2880 = vmatprep.subr.bf16.mxu0 %v3161_v29  ;;  %v3228_v29 = vld [vmem:[%s3881_s4 + $0x428] sm:$0xff]  }
  0x5b   : > { %2901 = vmatpush3.bf16.msra.mxu1 %v3160_v28  ;;  %v3235_v28 = vld [vmem:[%s3432_s24 + $0x44] ss:$72 sps:$4 sm:$0xff]  }
  0x5c   : > { %2902 = vmatprep.subr.bf16.mxu1 %v3163_v31  ;;  %v3230_v31 = vld [vmem:[%s3881_s4 + $0x430] sm:$0xff]  }
  0x5d   : > { %2881 = vmatpush3.bf16.msra.mxu0 %v3162_v30  ;;  %v3229_v30 = vld [vmem:[%s3881_s4 + $0x470] sm:$0xff]  }
  0x5e   : > { %2882 = vmatprep.subr.bf16.mxu0 %v3165_v33  ;;  %v3232_v33 = vld [vmem:[%s3881_s4 + $0x438] sm:$0xff]  }
  0x5f   : > { %2903 = vmatpush3.bf16.msra.mxu1 %v3164_v32  ;;  %v3231_v32 = vld [vmem:[%s3881_s4 + $0x478] sm:$0xff]  }
  0x60   : > { %2904 = vmatprep.subr.bf16.mxu1 %v3167_v35 }
  0x61   : > { %2883 = vmatpush3.bf16.msra.mxu0 %v3166_v34  ;;  %v3233_v34 = vld [vmem:[%s3432_s24 + $0x40] ss:$72 sps:$4 sm:$0xff]  }
  0x62   : > { %2884 = vmatprep.subr.bf16.mxu0 %v3169_v37 }
  0x63   : > { %2905 = vmatpush3.bf16.msra.mxu1 %v3168_v36  ;;  %v2609_v36 = vld [vmem:[%s3882_s5] ss:$0 sm:$0xff] }
  0x64   : > { %2906 = vmatprep.subr.bf16.mxu1 %v3171_v39 }
  0x65   : > { %2885 = vmatpush3.bf16.msra.mxu0 %v3170_v38 }
  0x66   : > { %2914 = vmatprep.subr.bf16.mxu0 %v3176_v43 }
  0x67   : > { %2907 = vmatpush3.bf16.msra.mxu1 %v3175_v42 }
  0x68   : > { %2026 = vmatmul.mubr.bf16.vlgmr.msra.gmra.mrb[8].mxu0 %v3172_v40  ;;  %2936 = vmatprep.subr.bf16.mxu1 %v3181_v47 }
  0x69   : > { %2915 = vmatpush3.bf16.msra.mxu0 %v3180_v46  ;;  %2107 = vmatprep.mubr.bf16.mxu0 %v3212_v13 }
  0x6a   : > { %2067 = vmatmul.mubr.bf16.vlgmr.msra.gmra.mrb[8].mxu1 %v3177_v44  ;;  %2916 = vmatprep.subr.bf16.mxu0 %v3183_v49 }
  0x6b   : > { %2937 = vmatpush3.bf16.msra.mxu1 %v3182_v48  ;;  %2148 = vmatprep.mubr.bf16.mxu1 %v3217_v17 }
  0x6c   : > { %2938 = vmatprep.subr.bf16.mxu1 %v3185_v51 }
  0x6d   : > { %2917 = vmatpush3.bf16.msra.mxu0 %v3184_v50 }
  0x6e   : > { %2918 = vmatprep.subr.bf16.mxu0 %v3187_v53 }
  0x6f   : > { %2939 = vmatpush3.bf16.msra.mxu1 %v3186_v52 }
  0x70   : > { %2940 = vmatprep.subr.bf16.mxu1 %v3189_v55 }
  0x71   : > { %2919 = vmatpush3.bf16.msra.mxu0 %v3188_v54 }
  0x72   : > { %2920 = vmatprep.subr.bf16.mxu0 %v3191_v57 }
  0x73   : > { %2941 = vmatpush3.bf16.msra.mxu1 %v3190_v56 }
  0x74   : > { %2942 = vmatprep.subr.bf16.mxu1 %v3193_v59 }
  0x75   : > { %2921 = vmatpush3.bf16.msra.mxu0 %v3192_v58 }
  0x76   : > { %2922 = vmatprep.subr.bf16.mxu0 %v3195_v61 }
  0x77   : > { %2943 = vmatpush3.bf16.msra.mxu1 %v3194_v60 }
  0x78   : > { %2944 = vmatprep.subr.bf16.mxu1 %v3197_v63 }
  0x79   : > { %2923 = vmatpush3.bf16.msra.mxu0 %v3196_v62 }
  0x7a   : > { %2924 = vmatprep.subr.bf16.mxu0 %v3199_v1 }
  0x7b   : > { %2945 = vmatpush3.bf16.msra.mxu1 %v3198_v0 }
  0x7c   : > { %2946 = vmatprep.subr.bf16.mxu1 %v3201_v3 }
  0x7d   : > { %2925 = vmatpush3.bf16.msra.mxu0 %v3200_v2 }
  0x7e   : > { %2926 = vmatprep.subr.bf16.mxu0 %v3203_v5 }
  0x7f   : > { %2947 = vmatpush3.bf16.msra.mxu1 %v3202_v4 }
  0x80   : > { %2948 = vmatprep.subr.bf16.mxu1 %v3205_v7 }
  0x81   : > { %2927 = vmatpush3.bf16.msra.mxu0 %v3204_v6 }
  0x82   : > { %2928 = vmatprep.subr.bf16.mxu0 %v3207_v9 }
  0x83   : > { %2949 = vmatpush3.bf16.msra.mxu1 %v3206_v8 }
  0x84   : > { %2950 = vmatprep.subr.bf16.mxu1 %v3209_v11 }
  0x85   : > { %2929 = vmatpush3.bf16.msra.mxu0 %v3208_v10 }
  0x86   : > { %2958 = vmatprep.subr.bf16.mxu0 %v3214_v15 }
  0x87   : > { %2951 = vmatpush3.bf16.msra.mxu1 %v3213_v14 }
  0x88   : > { %2108 = vmatmul.mubr.bf16.vlgmr.msra.gmra.mrb[12].mxu0 %v3210_v12 }
  0x89   : > { %2959 = vmatpush3.bf16.msra.mxu0 %v3218_v18  ;;  %2189 = vmatprep.mubr.bf16.mxu0 %v3235_v28 }
  0x8a   : > { %2149 = vmatmul.mubr.bf16.vlgmr.msra.gmra.mrb[12].mxu1 %v3215_v16  ;;  %2960 = vmatprep.subr.bf16.mxu0 %v3219_v19 }
  0x8d   : > { %2961 = vmatpush3.bf16.msra.mxu0 %v3220_v20 }
  0x8e   : > { %2962 = vmatprep.subr.bf16.mxu0 %v3221_v21 }
  0x91   : > { %2963 = vmatpush3.bf16.msra.mxu0 %v3222_v22 }
  0x92   : > { %2964 = vmatprep.subr.bf16.mxu0 %v3223_v23 }
  0x95   : > { %2965 = vmatpush3.bf16.msra.mxu0 %v3224_v24 }
  0x96   : > { %2966 = vmatprep.subr.bf16.mxu0 %v3225_v25 }
  0x99   : > { %2967 = vmatpush3.bf16.msra.mxu0 %v3226_v26 }
  0x9a   : > { %2968 = vmatprep.subr.bf16.mxu0 %v3227_v27 }
  0x9d   : > { %2969 = vmatpush3.bf16.msra.mxu0 %v3228_v29 }
  0x9e   : > { %2970 = vmatprep.subr.bf16.mxu0 %v3229_v30 }
  0xa1   : > { %2971 = vmatpush3.bf16.msra.mxu0 %v3230_v31 }
  0xa2   : > { %2972 = vmatprep.subr.bf16.mxu0 %v3231_v32 }
  0xa5   : > { %2973 = vmatpush3.bf16.msra.mxu0 %v3232_v33 }
  0xa8   : > { %2190 = vmatmul.mubr.bf16.vlgmr.msra.gmra.mrb[16].mxu0 %v3233_v34 }
  0xfb   : > { %v2798_v35 = vpop.f32.mrb[0].mxu0 }
  0xfc   : > { %v2799_v37 = vpop.f32.mrb[1].mxu0 }
  0xfd   : > { %v2800_v38 = vadd.f32 %v2799_v37, %v2798_v35  ;;  %v2801_v39 = vpop.f32.mrb[2].mxu0  ;;  %v2820_v40 = vpop.f32.mrb[0].mxu1 }
  0xfe   : > { %v2802_v41 = vpop.f32.mrb[3].mxu0  ;;  %v2821_v44 = vpop.f32.mrb[1].mxu1 }
  0xff   : > { %v1864_v42 = vadd.f32 %v2800_v38, %v2609_v36  ;;  %v2803_v43 = vadd.f32 %v2802_v41, %v2801_v39  ;;  %v2822_v45 = vadd.f32 %v2821_v44, %v2820_v40  ;;  %v2823_v46 = vpop.f32.mrb[2].mxu1  ;;  %v2772_v41 = vld [vmem:[%s3885_s8] ss:$0 sm:$0xff] }
 0x100   : > { %v2824_v48 = vpop.f32.mrb[3].mxu1 }
 0x101   : > { %v1867_v47 = vadd.f32 %v2803_v43, %v2609_v36  ;;  %v1905_v49 = vadd.f32 %v2822_v45, %v1864_v42  ;;  %v2825_v50 = vadd.f32 %v2824_v48, %v2823_v46 }
 0x103   : > { %v1908_v51 = vadd.f32 %v2825_v50, %v1867_v47  ;;  %v2229_v50 = vld [vmem:[%s3884_s7 + $0x8] sm:$0xff] }
 0x11b   : > { %v2842_v52 = vpop.f32.mrb[4].mxu0 }
 0x11c   : > { %v2843_v53 = vpop.f32.mrb[5].mxu0 }
 0x11d   : > { %v2844_v54 = vadd.f32 %v2843_v53, %v2842_v52  ;;  %v2845_v55 = vpop.f32.mrb[6].mxu0  ;;  %v2864_v58 = vpop.f32.mrb[4].mxu1  ;;  %v3249_v52 = vmov 0.0|0.0   ;;  %v2230_v53 = vld [vmem:[%s3884_s7 + $0x10] sm:$0xff] }
 0x11e   : > { %v2846_v56 = vpop.f32.mrb[7].mxu0  ;;  %v2865_v60 = vpop.f32.mrb[5].mxu1  ;;  %3031 = vmatprep.subr.bf16.mxu1 %v3249_v52 }
 0x11f   : > { %v1946_v57 = vadd.f32 %v2844_v54, %v1905_v49  ;;  %v2847_v59 = vadd.f32 %v2846_v56, %v2845_v55  ;;  %v2866_v62 = vadd.f32 %v2865_v60, %v2864_v58  ;;  %v2867_v63 = vpop.f32.mrb[6].mxu1  ;;  %v2228_v49 = vld [vmem:[%s3884_s7] sm:$0xff]  ;;  %v2231_v54 = vld [vmem:[%s3884_s7 + $0x18] sm:$0xff]  ;;  %v3251_v56 = vmov 0.0  }
 0x120   : > { %v2868_v0 = vpop.f32.mrb[7].mxu1  ;;  %v3035_v55 = vpack.c.bf16 %v2231_v54, %v2230_v53  ;;  %3004 = vmatprep.mubr.msk.f32.mxu1 %vm3250_vm1, %v3251_v56  ;;  %v2214_v58 = vld [vmem:[%s491_s11] sm:$0xff] }
 0x121   : > { %v1949_v61 = vadd.f32 %v2847_v59, %v1908_v51  ;;  %v1987_v1 = vadd.f32 %v2866_v62, %v1946_v57  ;;  %v2869_v2 = vadd.f32 %v2868_v0, %v2867_v63  ;;  %v3032_v51 = vpack.c.bf16 %v2229_v50, %v2228_v49  ;;  %v2215_v59 = vld [vmem:[%s491_s11 + $0x8] sm:$0xff] }
 0x123   : > { %v1990_v3 = vadd.f32 %v2869_v2, %v1949_v61  ;;  %3033 = vmatpush3.bf16.msra.mxu1 %v3032_v51 }
 0x124   : > { %3034 = vmatprep.subr.bf16.mxu1 %v3249_v52 }
 0x127   : > { %3036 = vmatpush3.bf16.msra.mxu1 %v3035_v55 }
 0x128   : > { %3037 = vmatprep.subr.bf16.mxu1 %v3249_v52 }
 0x13b   : > { %v2886_v4 = vpop.f32.mrb[8].mxu0 }
 0x13c   : > { %v2887_v5 = vpop.f32.mrb[9].mxu0 }
 0x13d   : > { %v2888_v6 = vadd.f32 %v2887_v5, %v2886_v4  ;;  %v2889_v7 = vpop.f32.mrb[10].mxu0  ;;  %v2908_v8 = vpop.f32.mrb[8].mxu1 }
 0x13e   : > { %v2890_v9 = vpop.f32.mrb[11].mxu0  ;;  %v2909_v12 = vpop.f32.mrb[9].mxu1 }
 0x13f   : > { %v2028_v10 = vadd.f32 %v2888_v6, %v1987_v1  ;;  %v2891_v11 = vadd.f32 %v2890_v9, %v2889_v7  ;;  %v2910_v13 = vadd.f32 %v2909_v12, %v2908_v8  ;;  %v2911_v14 = vpop.f32.mrb[10].mxu1  ;;  %v2305_v6 = vld [vmem:[%s3886_s9] sm:$0xff]  ;;  %v2306_v7 = vld [vmem:[%s3886_s9 + $0x8] sm:$0xff]  ;;  %v2308_v12 = vld [vmem:[%s3886_s9 + $0x18] sm:$0xff] }
 0x140   : > { %v2912_v16 = vpop.f32.mrb[11].mxu1  ;;  %v3038_v9 = vpack.c.bf16 %v2306_v7, %v2305_v6 }
 0x141   : > { %v2031_v15 = vadd.f32 %v2891_v11, %v1990_v3  ;;  %v2069_v17 = vadd.f32 %v2910_v13, %v2028_v10  ;;  %v2913_v18 = vadd.f32 %v2912_v16, %v2911_v14  ;;  %v2307_v11 = vld [vmem:[%s3886_s9 + $0x10] sm:$0xff]  ;;  %v2309_v14 = vld [vmem:[%s3886_s9 + $0x20] sm:$0xff] }
 0x142   : > { %v3041_v13 = vpack.c.bf16 %v2308_v12, %v2307_v11 }
 0x143   : > { %v2072_v19 = vadd.f32 %v2913_v18, %v2031_v15  ;;  %v2310_v15 = vld [vmem:[%s3886_s9 + $0x28] sm:$0xff]  ;;  %v2312_v18 = vld [vmem:[%s3886_s9 + $0x38] sm:$0xff] }
 0x144   : > { %v3044_v16 = vpack.c.bf16 %v2310_v15, %v2309_v14 }
 0x15b   : > { %v2930_v20 = vpop.f32.mrb[12].mxu0 }
 0x15c   : > { %v2931_v21 = vpop.f32.mrb[13].mxu0 }
 0x15d   : > { %v2932_v22 = vadd.f32 %v2931_v21, %v2930_v20  ;;  %v2933_v23 = vpop.f32.mrb[14].mxu0  ;;  %v2952_v24 = vpop.f32.mrb[12].mxu1  ;;  %v2387_v20 = vld [vmem:[#allocation2] sm:$0x1]  ;;  %v3252_v21 = vmov 0  }
 0x15e   : > { %v2934_v25 = vpop.f32.mrb[15].mxu0  ;;  %v2953_v28 = vpop.f32.mrb[13].mxu1  ;;  %3063 = vset.pattern.permute.xlu1 %v3252_v21  ;;  %3064 = vset.pattern.permute.xlu0 %v3252_v21 }
 0x15f   : > { %v2110_v26 = vadd.f32 %v2932_v22, %v2069_v17  ;;  %v2935_v27 = vadd.f32 %v2934_v25, %v2933_v23  ;;  %v2954_v29 = vadd.f32 %v2953_v28, %v2952_v24  ;;  %v2955_v30 = vpop.f32.mrb[14].mxu1  ;;  %v2311_v17 = vld [vmem:[%s3886_s9 + $0x30] sm:$0xff]  ;;  %2390 = vperm.xlu1 %3063, %v2387_v20   ;;  %v2399_v24 = vld [vmem:[%s3887_s10] sm:$0xf] }
 0x160   : > { %v2956_v32 = vpop.f32.mrb[15].mxu1  ;;  %v506_v25 = vld [vmem:[%s3883_s6] sm:$0x7] }
 0x161   : > { %v2113_v31 = vadd.f32 %v2935_v27, %v2072_v19  ;;  %v2151_v33 = vadd.f32 %v2954_v29, %v2110_v26  ;;  %v2957_v34 = vadd.f32 %v2956_v32, %v2955_v30  ;;  %v3047_v19 = vpack.c.bf16 %v2312_v18, %v2311_v17  ;;  %v2608_v26 = vld [vmem:[%s481_s17] ss:$0 sm:$0xff] }
 0x162   : > { %v513_v27 = vmul.f32 %v2608_v26, %v506_v25  ;;  %v545_v29 = vlaneseq }
 0x163   : > { %v2154_v35 = vadd.f32 %v2957_v34, %v2113_v31 }
 0x164   : > { %v515_v28 = vsel %vm514_vm4, %v513_v27, 0.0  ;;  %v546_v30 = vshrl.u32 %v545_v29, 7  ;;  %vm559_vm8 = vcmp.lt.s32.totalorder %v545_v29, 256 }
 0x166   : > { %v2395_v31 = vsub.s32 0, %v546_v30 }
 0x17b   : > { %v2974_v36 = vpop.f32.mrb[16].mxu0 }
 0x17c   : > { %v2975_v37 = vpop.f32.mrb[17].mxu0 }
 0x17d   : > { %v2976_v38 = vadd.f32 %v2975_v37, %v2974_v36  ;;  %v2977_v39 = vpop.f32.mrb[18].mxu0 }
 0x17e   : > { %v2978_v40 = vpop.f32.mrb[19].mxu0 }
 0x17f   : > { %v2192_v42 = vadd.f32 %v2976_v38, %v2151_v33  ;;  %v2979_v43 = vadd.f32 %v2978_v40, %v2977_v39  ;;  %v518_v38 = vld [vmem:[%s486_s23] sm:$0x77] }
 0x180   : > { %v520_v39 = vcombine.high %v518_v38, %v518_v38 }
 0x181   : > { %v2195_v44 = vadd.f32 %v2979_v43, %v2154_v35  ;;  %v2205_v45 = vmul.f32 %v2772_v41, %v2192_v42 }
 0x183   : > { %v2208_v46 = vsel %vm2207_vm0, %v2205_v45, 0.0  ;;  %v2206_v47 = vmul.f32 %v2772_v41, %v2195_v44  ;;  %516 = vadd.xlane.f32.xlu1 %v515_v28 }
 0x184   : > { %2209 = vadd.xlane.f32.xlu0 %v2208_v46 }
 0x185   : > { %v2211_v48 = vsel %vm2207_vm0, %v2206_v47, 0.0  ;;  %v3253_v47 = vmov 1966171168  }
 0x188   : > { %2212 = vadd.xlane.f32.xlu0 %v2211_v48  ;;  %v543_v48 = vunpack.c.l.s4 %v3253_v47 }
 0x18a   : > { %v544_v53 = vunpack.c.0.s8 %v543_v48 }
 0x1de   : > { %v2391_v32 = vpop.permute.xlu1 %2390 }
 0x1df   : > { %v2396_v33 = vrot.slane %v2391_v32, %v2395_v31 }
 0x210   : > { %v517_v40 = vpop.xlane.xlu1 %516 }
 0x211   : > { %v2210_v57 = vpop.xlane.xlu0 %2209  ;;  %v522_v41 = vmul.f32 %v518_v38, %v517_v40  ;;  %v523_v42 = vmul.f32 %v520_v39, %v517_v40 }
 0x212   : > { %v2216_v60 = vmul.f32 %v2214_v58, %v2210_v57  ;;  %v547_v58 = vsub.s32 %v544_v53, %v546_v30 }
 0x213   : > { %v525_v43 = vsel %vm524_vm7, %v522_v41, 0.0  ;;  %v532_v44 = vsel %vm524_vm7, %v523_v42, 0.0 }
 0x214   : > { %v2219_v63 = vsel %vm2218_vm2, %v2216_v60, 0.0  ;;  %v526_v45 = vrot.slane %v525_v43, 4  ;;  %v533_v46 = vrot.slane %v532_v44, 4 }
 0x215   : > { %v2213_v61 = vpop.xlane.xlu0 %2212 }
 0x216   : > { %v2217_v62 = vmul.f32 %v2215_v59, %v2213_v61  ;;  %v527_v49 = vadd.f32 %v526_v45, %v525_v43  ;;  %v534_v50 = vadd.f32 %v533_v46, %v532_v44 }
 0x218   : > { %v2220_v0 = vsel %vm2218_vm2, %v2217_v62, 0.0  ;;  %v528_v51 = vrot.slane %v527_v49, 2 }
 0x219   : > { %v2221_v1 = vadd.f32 %v2220_v0, %v2219_v63 }
 0x21a   : > { %v529_v54 = vadd.f32 %v528_v51, %v527_v49 }
 0x21b   : > { %v2222_v2 = vrot.slane %v2221_v1, 4 }
 0x21d   : > { %v2223_v3 = vadd.f32 %v2222_v2, %v2221_v1 }
 0x21f   : > { %v2224_v4 = vrot.slane %v2223_v3, 2 }
 0x221   : > { %v2225_v5 = vadd.f32 %v2224_v4, %v2223_v3 }
 0x223   : > { %v2226_v8 = vrot.slane %v2225_v5, 1 }
 0x225   : > { %v2227_v10 = vadd.f32 %v2226_v8, %v2225_v5 }
 0x227   : > { %3005 = vmatmul.mubr.msk.f32.vlgmr.msra.gmra.mrb[16].mxu1 %vm2218_vm2, %v2227_v10 }
 0x228   : > { %3039 = vmatpush3.bf16.msra.mxu1 %v3038_v9  ;;  %3023 = vmatprep.mubr.msk.f32.mxu1 %vm3250_vm1, %v3251_v56 }
 0x229   : > { %3040 = vmatprep.subr.bf16.mxu1 %v3249_v52 }
 0x22c   : > { %3042 = vmatpush3.bf16.msra.mxu1 %v3041_v13 }
 0x22d   : > { %3043 = vmatprep.subr.bf16.mxu1 %v3249_v52 }
 0x230   : > { %3045 = vmatpush3.bf16.msra.mxu1 %v3044_v16 }
 0x231   : > { %3046 = vmatprep.subr.bf16.mxu1 %v3249_v52  ;;  %v535_v52 = vrot.slane %v534_v50, 2 }
 0x233   : > { %v536_v55 = vadd.f32 %v535_v52, %v534_v50 }
 0x234   : > { %3048 = vmatpush3.bf16.msra.mxu1 %v3047_v19 }
 0x235   : > { %3026 = vmatprep.subr.mxu1 %v3251_v56  ;;  %v537_v57 = vrot.slane %v536_v55, 1 }
 0x237   : > { %v538_v60 = vadd.f32 %v537_v57, %v536_v55 }
 0x2fa   : > { %v2301_v22 = vpop.f32.mrb[16].mxu1 }
 0x2fb   : > { %v3006_v23 = vpop.f32.mrb[17].mxu1  ;;  %3024 = vmatmul.mubr.msk.f32.vlgmr.msra.gmra.mrb[18].mxu1 %vm2207_vm0, %v2301_v22 }
 0x2fc   : > { %3028 = vmatprep.mubr.msk.f32.mxu1 %vm3250_vm1, %v3251_v56  ;;  %3027 = vmatpush3.msk.msra.mxu1 %vm2404_vm3, %v2399_v24  ;;  %v530_v56 = vrot.slane %v529_v54, 1 }
 0x2fe   : > { %v531_v59 = vadd.f32 %v530_v56, %v529_v54 }
 0x300   : > { %v541_v61 = vcombine.low %v531_v59, %v538_v60 }
 0x302   : > { %v548_v62 = vrot.slane %v541_v61, %v547_v58 }
 0x304   : > { %v555_v63 = vrot.slane %v548_v62, %v547_v58 }
 0x306   : > { %561 = vst.msk [vmem:[%s500_s30] sm:$0x3] %vm559_vm8, %v555_v63 }
 0x3ce   : > { %v2382_v34 = vpop.f32.mrb[18].mxu1 }
 0x3cf   : > { %vm2386_vm5 = vcmp.ge.f32.partialorder %v2382_v34, 0.0  ;;  %v2397_v35 = vmul.f32 %v2396_v33, %v2382_v34  ;;  %v3025_v36 = vpop.f32.mrb[19].mxu1 }
 0x3d1   : > { %v2398_v37 = vsel %vm2386_vm5, %v2382_v34, %v2397_v35 }
 0x3d2   : > { %3029 = vmatmul.mubr.msk.f32.vlgmr.msra.gmra.mrb[20].mxu1 %vm2400_vm6, %v2398_v37 }
 0x4a5   : > { %v2474_v0 = vpop.f32.mrb[20].mxu1 }
 0x4a6   : > { %v2777_v1 = vmul.f32 -1.442695, %v2474_v0  ;;  %v3030_v2 = vpop.f32.mrb[21].mxu1 }
 0x4a8   : > { %3237 = vpow2.f32 %v2777_v1 }
 0x4b2   : > { %v3238_v3 = vpop.eup %3237 }
 0x4b3   : > { %v2481_v4 = vadd.f32 1.0, %v3238_v3 }
 0x4b5   : > { %3239 = vrcp.f32 %v2481_v4 }
 0x4bf   : > { %v3240_v5 = vpop.eup %3239 }
 0x4c0   : > { %2485 = vst.msk [vmem:[%s503_s15] sm:$0x1] %vm2484_vm9, %v3240_v5 }
 0x4c1 PF: > { %s26_s27 = sadd.s32 1, %s3247_s27  }
 0x4c2   : > { %p23_p4 = scmp.ge.s32.totalorder %s26_s27, 4  }
 0x4c4   :  { %25 = sbr.rel (!%p23_p4) target bundleno = 3 (0x3), region = 119 }

// kernel: att_conv_forward.7
= control target key start
LH: loop header
LB: loop body
LE: loop exit
PB: predicated region body
PF: predicated region fallthrough
CT: control target
= control target key end

     0   :  { %12 = vsyncpa [#allocation4], 0  ;;  %s7952_s0 = inlined_call_operand.vmem [shape: bf16[2,18,18,64], index: 0, kind: input, shape index: {}]   ;;  %s7953_s1 = inlined_call_operand.vmem [shape: f32[2,20,20,1], index: 1, kind: input, shape index: {}]   ;;  %s7954_s2 = inlined_call_operand.vmem [shape: f32[2,1,64], index: 2, kind: input, shape index: {}]   ;;  %s7955_s3 = inlined_call_operand.vmem [shape: f32[2,256,64], index: 3, kind: input, shape index: {}]   ;;  %s7956_s4 = inlined_call_operand.vmem [shape: bf16[576,64], index: 4, kind: input, shape index: {}]   ;;  %s7957_s5 = inlined_call_operand.vmem [shape: f32[1,64], index: 5, kind: input, shape index: {}]   ;;  %s7958_s6 = inlined_call_operand.vmem [shape: f32[9], index: 6, kind: input, shape index: {}]   ;;  %s7959_s7 = inlined_call_operand.hbm [shape: f32[2,256,64], index: 7, kind: output, shape index: {}]  }
   0x1   :  { %13 = vsyncpa [#allocation3], 0 }
   0x2   :  { %15 = vsyncpa [#allocation3 + $0x1], 0  ;;  %s5516_s24 = smov 0   ;;  %s5518_s25 = smov 0  }
   0x3   :  { %s5520_s26 = smov 0   ;;  %s5522_s27 = smov 0  }
   0x4 LB: > { %s5537_s28 = sadd.s32 4294967295, %s5468_s27   ;;  %s4275_s29 = sadd.s32 4294967294, %s5468_s27   ;;  %s5468_s27 = sphi %s5522_s27, %s7981_s27   ;;  %s5464_s26 = sphi %s5520_s26, %s7980_s26   ;;  %s5460_s25 = sphi %s5518_s25, %s7979_s25   ;;  %s5456_s24 = sphi %s5516_s24, %s7978_s24  }
   0x5   : > { %s5541_s30 = sadd.s32 1, %s5468_s27   ;;  %s195_s8 = sadd.s32 1, %s5464_s26 }
   0x6   : > { %s192_s9 = ssub.s32 %s5468_s27, %s5541_s30  ;;  %p205_p0 = scmp.ne.s32.totalorder %s5464_s26, %s5460_s25 }
   0x7   : > { %p193_p1 = scmp.eq.s32.totalorder %s192_s9, 0  ;;  %p206_p2 = scmp.eq.s32.totalorder %s5537_s28, 1 }
   0x8   : > { %p211_p3 = scmp.ne.s32.totalorder %s5460_s25, %s5456_s24  ;;  %p212_p4 = scmp.eq.s32.totalorder %s4275_s29, 1 }
   0x9   : > { %s5552_s10 = scalar_select %p193_p1, %s5464_s26, %s195_s8  }
   0xa   : > { %p5554_p5 = por %p206_p2, %p205_p0  ;;  %p5558_p6 = por %p212_p4, %p211_p3 }
   0xb   : > { %p4276_p7 = scmp.ge.s32.totalorder %s5468_s27, 1  ;;  %p219_p8 = scmp.lt.s32.totalorder %s5468_s27, 3 }
   0xc   : > { %p5093_p9 = scmp.eq.s32.totalorder %s5537_s28, 0  ;;  %s238_s16 = sshll.u32 %s7958_s6, 4  ;;  %s239_s16 = int_to_ptr.vmem [resolvable:$true] %s238_s16 }
   0xd   : > { %p5565_p10 = pnand %p4276_p7, %p219_p8  ;;  %s5387_s17 = scalar_lea.vmem %s239_s16, 16 }
   0xe   : > { %p5388_p13 = scmp.ne.s32.totalorder %s239_s16, %s5387_s17  ;;  %p5395_p3 = scmp.lt.s32.totalorder %s239_s16, %s239_s16 }
   0xf   : > { %p5085_p11 = pneg %p5565_p10  ;;  %p5396_p4 = scmp.lt.s32.totalorder %s5387_s17, %s5387_s17 }
  0x11   : > { %p5086_p12 = pnand %p5093_p9, %p5085_p11  ;;  %p5397_p7 = por %p5396_p4, %p5395_p3 }
  0x13   : > { %p5389_p0 = pneg %p5086_p12 }
  0x15   : > { %p5390_p1 = pnand %p5389_p0, %p5388_p13 }
  0x17   : > { %p5391_p2 = pneg %p5390_p1 }
  0x19   : > { %p5398_p8 = pnand %p5397_p7, %p5391_p2 }
  0x1b   : > { %5401 = shalt.err (!%p5398_p8)
}
  0x1c   : > { %s5470_s18 = smov [#allocation2]   ;;  %281 = sbr.rel (%p5565_p10) target bundleno = 951 (0x3b7), region = 48 }
  0x1d   : > { %5088 = dma.vmem_to_smem (!%p5086_p12), %s239_s16, 16, %s5470_s18, [#allocation4]  }
  0x23   : > { %5447 = dma.done.wait (%p5093_p9), [#allocation4], 16  }
  0x24   : > { %5449 = vsyncadd (%p5093_p9), [#allocation4], 4294967280 }
  0x25   : > { %287 = sfence }
  0x26   : > { %p327_p11 = scmp.lt.s32.totalorder %s5537_s28, 1  ;;  %s346_s19 = sld [smem:[#allocation2]]  ;;  %v5471_v0 = vmov 0   ;;  %vm2616_vm0 = vsmask.f32 7424  ;;  %vm2873_vm1 = vcmask 1046528  }
  0x27   : > { %5134 = vset.pattern.permute.xlu1 %v5471_v0  ;;  %5133 = vset.pattern.permute.xlu0 %v5471_v0  ;;  %s4286_s20 = sld [smem:[#allocation2 + $0x1]]  ;;  %s4287_s21 = sld [smem:[#allocation2 + $0x2]]  ;;  %vm3024_vm2 = vcmask 523264  }
  0x28   : > { %s5584_s22 = scalar_select %p327_p11, %s5537_s28, 1 }
  0x29   : > { %s4288_s23 = sld [smem:[#allocation2 + $0x3]]  ;;  %s4343_s29 = sld [smem:[#allocation2 + $0x4]] }
  0x2a   : > { %s5078_s8 = smul.u32 480, %s5584_s22  ;;  %s4398_s9 = sld [smem:[#allocation2 + $0x5]] }
  0x2b   : > { %s4453_s13 = sld [smem:[#allocation2 + $0x6]]  ;;  %s4508_s14 = sld [smem:[#allocation2 + $0x7]] }
  0x2c   : > { %s5590_s17 = scalar_lea.vmem %s7953_s1, %s5078_s8  ;;  %v5592_v1 = vstv %s346_s19  ;;  %s4563_s18 = sld [smem:[#allocation2 + $0x8]] }
  0x2d   : > { %v385_v2 = vld [vmem:[%s5590_s17 + $0x130] sm:$0x3]  ;;  %v5596_v4 = vstv %s4286_s20  ;;  %v713_v5 = vld [vmem:[%s5590_s17 + $0x132] sm:$0x3]  ;;  %v5601_v8 = vstv %s4287_s21  ;;  %s5077_s19 = smul.u32 216, %s5584_s22  ;;  %s4731_s20 = sshll.u32 %s5584_s22, 8 }
  0x2e   : > { %v549_v3 = vld [vmem:[%s5590_s17 + $0x131] sm:$0x3]  ;;  %v440_v6 = vmul.f32 %v5592_v1, %v385_v2  ;;  %v4327_v9 = vld [vmem:[%s5590_s17 + $0x148] sm:$0x3]  ;;  %v4437_v11 = vld [vmem:[%s5590_s17 + $0x14a] sm:$0x3]  ;;  %v768_v12 = vmul.f32 %v5601_v8, %v713_v5  ;;  %s7697_s16 = scalar_lea.vmem %s7955_s3, %s4731_s20 }
  0x2f   : > { %v604_v7 = vmul.f32 %v5596_v4, %v549_v3  ;;  %v4382_v10 = vld [vmem:[%s5590_s17 + $0x149] sm:$0x3]  ;;  %v5607_v13 = vstv %s4288_s23  ;;  %v5609_v14 = vstv %s4343_s29  ;;  %v4492_v15 = vld [vmem:[%s5590_s17 + $0x160] sm:$0x3]  ;;  %s6761_s23 = scalar_lea.vmem %s7952_s0, %s5077_s19  ;;  %s5472_s29 = smov 64  }
  0x30   : > { %v4547_v16 = vld [vmem:[%s5590_s17 + $0x161] sm:$0x3]  ;;  %v933_v18 = vmul.f32 %v4327_v9, %v5607_v13  ;;  %v5614_v19 = vstv %s4398_s9  ;;  %v5626_v27 = vld [vmem:[%s5590_s17 + $0x138] sm:$0xff]  ;;  %v1097_v29 = vmul.f32 %v4382_v10, %v5609_v14  ;;  %v5638_v33 = vld [vmem:[%s5590_s17 + $0x150] sm:$0xff]  ;;  %s339_s9 = scalar_lea.vmem %s7954_s2, %s5584_s22  ;;  %s5473_s8 = smov [#allocation5]  }
  0x31   : > { %v658_v17 = vadd.f32 %v604_v7, %v440_v6  ;;  %v4602_v20 = vld [vmem:[%s5590_s17 + $0x162] sm:$0x3]  ;;  %v5619_v23 = vstv %s4453_s13  ;;  %v5621_v24 = vstv %s4508_s14  ;;  %v5632_v31 = vld [vmem:[%s5590_s17 + $0x139] sm:$0xff]  ;;  %v1261_v34 = vmul.f32 %v4437_v11, %v5614_v19  ;;  %s324_s13 = sand.u32 1, %s5460_s25  }
  0x32   : > { %v383_v21 = vld [vmem:[%s5590_s17 + $0x120] sm:$0xff]  ;;  %v5629_v30 = vstv %s4563_s18  ;;  %v1426_v35 = vmul.f32 %v4492_v15, %v5619_v23  ;;  %v5645_v38 = vld [vmem:[%s5590_s17 + $0x151] sm:$0xff]  ;;  %v384_v40 = vld [vmem:[%s5590_s17 + $0x128] sm:$0xff]  ;;  %v1590_v42 = vmul.f32 %v4547_v16, %v5621_v24  ;;  %v931_v44 = vmul.f32 %v5626_v27, %v5607_v13  ;;  %s4281_s22 = sshll.u32 %s324_s13, 8  ;;  %s4732_s18 = sshll.u32 %s5537_s28, 12 }
  0x33   : > { %v547_v22 = vld [vmem:[%s5590_s17 + $0x121] sm:$0xff]  ;;  %v438_v25 = vmul.f32 %v5592_v1, %v383_v21  ;;  %v822_v28 = vadd.f32 %v768_v12, %v658_v17  ;;  %v5648_v39 = vld [vmem:[%s5590_s17 + $0x152] sm:$0xff]  ;;  %v1754_v43 = vmul.f32 %v4602_v20, %v5629_v30  ;;  %v548_v45 = vld [vmem:[%s5590_s17 + $0x129] sm:$0xff]  ;;  %v1095_v49 = vmul.f32 %v5632_v31, %v5609_v14  ;;  %s7901_s20 = scalar_lea.hbm %s7959_s7, %s4732_s18  ;;  %s7911_s28 = scalar_lea.sflag [#allocation3], %s324_s13 }
  0x34   : > { %v711_v26 = vld [vmem:[%s5590_s17 + $0x122] sm:$0xff]  ;;  %v5635_v32 = vld [vmem:[%s5590_s17 + $0x13a] sm:$0xff]  ;;  %v602_v36 = vmul.f32 %v5596_v4, %v547_v22  ;;  %v712_v46 = vld [vmem:[%s5590_s17 + $0x12a] sm:$0xff]  ;;  %v439_v51 = vmul.f32 %v5592_v1, %v384_v40  ;;  %v1424_v55 = vmul.f32 %v5638_v33, %v5619_v23  ;;  %v603_v56 = vmul.f32 %v5596_v4, %v548_v45 }
  0x35   : > { %v766_v37 = vmul.f32 %v5601_v8, %v711_v26  ;;  %v987_v41 = vadd.f32 %v933_v18, %v822_v28  ;;  %v5658_v47 = vld [vmem:[%s5590_s17 + $0x140] sm:$0xff]  ;;  %v1259_v50 = vmul.f32 %v5635_v32, %v5614_v19  ;;  %v767_v57 = vmul.f32 %v5601_v8, %v712_v46  ;;  %v5676_v58 = vld [vmem:[%s5590_s17 + $0x158] sm:$0xff]  ;;  %v348_v28 = vld [vmem:[%s5590_s17 + $0x8] sm:$0xff] }
  0x36   : > { %v656_v48 = vadd.f32 %v602_v36, %v438_v25  ;;  %v5666_v52 = vld [vmem:[%s5590_s17 + $0x141] sm:$0xff]  ;;  %v1588_v61 = vmul.f32 %v5645_v38, %v5621_v24  ;;  %v5683_v62 = vmul.f32 %v5648_v39, %v5629_v30  ;;  %v932_v63 = vmul.f32 %v5658_v47, %v5607_v13  ;;  %v5688_v0 = vld [vmem:[%s5590_s17 + $0x159] sm:$0xff]  ;;  %v5722_v40 = vld [vmem:[%s5590_s17 + $0x30] sm:$0xff] }
  0x37   : > { %v5669_v53 = vld [vmem:[%s5590_s17 + $0x142] sm:$0xff]  ;;  %v1151_v54 = vadd.f32 %v1097_v29, %v987_v41  ;;  %v657_v6 = vadd.f32 %v603_v56, %v439_v51  ;;  %v1096_v7 = vmul.f32 %v5666_v52, %v5609_v14  ;;  %v5697_v10 = vld [vmem:[%s5590_s17 + $0x15a] sm:$0xff]  ;;  %v1425_v25 = vmul.f32 %v5676_v58, %v5619_v23  ;;  %v676_v41 = vld [vmem:[%s5590_s17 + $0xa] sm:$0xff] }
  0x38   : > { %v347_v59 = vld [vmem:[%s5590_s17] sm:$0xff]  ;;  %v820_v60 = vadd.f32 %v766_v37, %v656_v48  ;;  %v1260_v9 = vmul.f32 %v5669_v53, %v5614_v19  ;;  %v5700_v11 = vld [vmem:[%s5590_s17 + $0x18] sm:$0xff]  ;;  %v1589_v26 = vmul.f32 %v5688_v0, %v5621_v24  ;;  %v512_v29 = vld [vmem:[%s5590_s17 + $0x9] sm:$0xff]  ;;  %v1753_v36 = vmul.f32 %v5697_v10, %v5629_v30 }
  0x39   : > { %v511_v2 = vld [vmem:[%s5590_s17 + $0x1] sm:$0xff]  ;;  %v1315_v5 = vadd.f32 %v1261_v34, %v1151_v54  ;;  %v402_v15 = vmul.f32 %v5592_v1, %v347_v59  ;;  %v5706_v18 = vld [vmem:[%s5590_s17 + $0x19] sm:$0xff]  ;;  %v821_v22 = vadd.f32 %v767_v57, %v657_v6  ;;  %v5733_v56 = vld [vmem:[%s5590_s17 + $0x31] sm:$0xff]  ;;  %v403_v59 = vmul.f32 %v5592_v1, %v348_v28 }
  0x3a   : > { %v675_v3 = vld [vmem:[%s5590_s17 + $0x2] sm:$0xff]  ;;  %v985_v12 = vadd.f32 %v931_v44, %v820_v60  ;;  %v566_v16 = vmul.f32 %v5596_v4, %v511_v2  ;;  %v5709_v20 = vld [vmem:[%s5590_s17 + $0x1a] sm:$0xff]  ;;  %v1059_v46 = vmul.f32 %v5706_v18, %v5609_v14  ;;  %v5736_v57 = vld [vmem:[%s5590_s17 + $0x32] sm:$0xff]  ;;  %v1388_v2 = vmul.f32 %v5722_v40, %v5619_v23 }
  0x3b   : > { %v730_v17 = vmul.f32 %v5601_v8, %v675_v3  ;;  %v1480_v21 = vadd.f32 %v1426_v35, %v1315_v5  ;;  %v895_v35 = vmul.f32 %v5700_v11, %v5607_v13  ;;  %v986_v45 = vadd.f32 %v932_v63, %v821_v22  ;;  %v5744_v5 = vld [vmem:[%s5590_s17 + $0x21] sm:$0xff] }
  0x3c   : > { %v1149_v34 = vadd.f32 %v1095_v49, %v985_v12  ;;  %v620_v37 = vadd.f32 %v566_v16, %v402_v15  ;;  %v1223_v48 = vmul.f32 %v5709_v20, %v5614_v19  ;;  %v5730_v49 = vld [vmem:[%s5590_s17 + $0x20] sm:$0xff]  ;;  %v731_v3 = vmul.f32 %v5601_v8, %v676_v41  ;;  %v677_v41 = vld [vmem:[%s5590_s17 + $0x12] sm:$0x3] }
  0x3d   : > { %v1644_v44 = vadd.f32 %v1590_v42, %v1480_v21  ;;  %v567_v42 = vmul.f32 %v5596_v4, %v512_v29  ;;  %v1150_v63 = vadd.f32 %v1096_v7, %v986_v45  ;;  %v896_v15 = vmul.f32 %v5730_v49, %v5607_v13  ;;  %v5749_v16 = vld [vmem:[%s5590_s17 + $0x22] sm:$0xff] }
  0x3e   : > { %v1313_v51 = vadd.f32 %v1259_v50, %v1149_v34  ;;  %v784_v54 = vadd.f32 %v730_v17, %v620_v37  ;;  %v1552_v21 = vmul.f32 %v5733_v56, %v5621_v24  ;;  %v1716_v22 = vmul.f32 %v5736_v57, %v5629_v30 }
  0x3f   : > { %v1808_v60 = vadd.f32 %v1754_v43, %v1644_v44  ;;  %v621_v12 = vadd.f32 %v567_v42, %v403_v59  ;;  %v349_v43 = vld [vmem:[%s5590_s17 + $0x10] sm:$0x3]  ;;  %v1314_v17 = vadd.f32 %v1260_v9, %v1150_v63  ;;  %v1060_v37 = vmul.f32 %v5744_v5, %v5609_v14  ;;  %v4291_v9 = vld [vmem:[%s5590_s17 + $0x28] sm:$0x3]  ;;  %v5769_v59 = vld [vmem:[%s5590_s17 + $0x39] sm:$0xff] }
  0x40   : > { %v1478_v50 = vadd.f32 %v1424_v55, %v1313_v51  ;;  %v949_v6 = vadd.f32 %v895_v35, %v784_v54  ;;  %v513_v55 = vld [vmem:[%s5590_s17 + $0x11] sm:$0x3]  ;;  %v5760_v35 = vld [vmem:[%s5590_s17 + $0x38] sm:$0xff]  ;;  %v1224_v45 = vmul.f32 %v5749_v16, %v5614_v19  ;;  %v404_v51 = vmul.f32 %v5592_v1, %v349_v43  ;;  %v4346_v63 = vld [vmem:[%s5590_s17 + $0x29] sm:$0x3] }
  0x41   : > { %v4656_v7 = vmul.f32 -1.442695, %v1808_v60  ;;  %v785_v34 = vadd.f32 %v731_v3, %v621_v12  ;;  %v1479_v44 = vadd.f32 %v1425_v25, %v1314_v17  ;;  %v5772_v42 = vld [vmem:[%s5590_s17 + $0x3a] sm:$0xff]  ;;  %v568_v60 = vmul.f32 %v5596_v4, %v513_v55  ;;  %v4401_v43 = vld [vmem:[%s5590_s17 + $0x2a] sm:$0x3] }
  0x42   : > { %v1642_v28 = vadd.f32 %v1588_v61, %v1478_v50  ;;  %v1113_v29 = vadd.f32 %v1059_v46, %v949_v6  ;;  %v1389_v25 = vmul.f32 %v5760_v35, %v5619_v23  ;;  %v732_v50 = vmul.f32 %v5601_v8, %v677_v41 }
  0x43   : > { %5171 = vpow2.f32 %v4656_v7  ;;  %v950_v54 = vadd.f32 %v896_v15, %v785_v34  ;;  %v1643_v3 = vadd.f32 %v1589_v26, %v1479_v44  ;;  %v897_v6 = vmul.f32 %v4291_v9, %v5607_v13 }
  0x44   : > { %v1806_v61 = vadd.f32 %v5683_v62, %v1642_v28  ;;  %v1277_v46 = vadd.f32 %v1223_v48, %v1113_v29  ;;  %v622_v15 = vadd.f32 %v568_v60, %v404_v51  ;;  %v1553_v17 = vmul.f32 %v5769_v59, %v5621_v24 }
  0x45   : > { %v1114_v48 = vadd.f32 %v1060_v37, %v950_v54  ;;  %v1807_v7 = vadd.f32 %v1753_v36, %v1643_v3  ;;  %v1717_v26 = vmul.f32 %v5772_v42, %v5629_v30  ;;  %v1061_v55 = vmul.f32 %v4346_v63, %v5609_v14  ;;  %v4456_v37 = vld [vmem:[%s5590_s17 + $0x40] sm:$0x3] }
  0x46   : > { %v4654_v12 = vmul.f32 -1.442695, %v1806_v61  ;;  %v1442_v62 = vadd.f32 %v1388_v2, %v1277_v46  ;;  %v786_v34 = vadd.f32 %v732_v50, %v622_v15  ;;  %v1225_v2 = vmul.f32 %v4401_v43, %v5614_v19  ;;  %v4511_v46 = vld [vmem:[%s5590_s17 + $0x41] sm:$0x3]  ;;  %v5805_v15 = vld [vmem:[%s5590_s17 + $0x168] sm:$0xff] }
  0x47   : > { %v1278_v29 = vadd.f32 %v1224_v45, %v1114_v48  ;;  %v4655_v41 = vmul.f32 -1.442695, %v1807_v7  ;;  %v441_v36 = vmul.f32 %v5626_v27, %v5592_v1  ;;  %v605_v9 = vmul.f32 %v5632_v31, %v5596_v4  ;;  %v5808_v7 = vld [vmem:[%s5590_s17 + $0x169] sm:$0xff] }
  0x48   : > { %5173 = vpow2.f32 %v4654_v12  ;;  %v1606_v28 = vadd.f32 %v1552_v21, %v1442_v62  ;;  %v951_v61 = vadd.f32 %v897_v6, %v786_v34  ;;  %v769_v21 = vmul.f32 %v5635_v32, %v5601_v8 }
  0x49   : > { %v1443_v51 = vadd.f32 %v1389_v25, %v1278_v29  ;;  %5175 = vpow2.f32 %v4655_v41  ;;  %v659_v45 = vadd.f32 %v605_v9, %v441_v36  ;;  %v934_v54 = vmul.f32 %v5638_v33, %v5607_v13  ;;  %v4566_v25 = vld [vmem:[%s5590_s17 + $0x42] sm:$0x3] }
  0x4a   : > { %v1770_v44 = vadd.f32 %v1716_v22, %v1606_v28  ;;  %v1115_v63 = vadd.f32 %v1061_v55, %v951_v61  ;;  %v1390_v31 = vmul.f32 %v4456_v37, %v5619_v23  ;;  %v1554_v3 = vmul.f32 %v4511_v46, %v5621_v24 }
  0x4b   : > { %v1607_v27 = vadd.f32 %v1553_v17, %v1443_v51  ;;  %v823_v50 = vadd.f32 %v769_v21, %v659_v45  ;;  %v1098_v32 = vmul.f32 %v5645_v38, %v5609_v14  ;;  %v1262_v6 = vmul.f32 %v5648_v39, %v5614_v19  ;;  %v5811_v17 = vld [vmem:[%s5590_s17 + $0x16a] sm:$0xff] }
  0x4c   : > { %v4618_v60 = vmul.f32 -1.442695, %v1770_v44  ;;  %v1279_v48 = vadd.f32 %v1225_v2, %v1115_v63  ;;  %v442_v55 = vmul.f32 %v5658_v47, %v5592_v1  ;;  %v606_v28 = vmul.f32 %v5666_v52, %v5596_v4 }
  0x4d   : > { %v5172_v22 = vpop.eup %5171  ;;  %v1771_v62 = vadd.f32 %v1717_v26, %v1607_v27  ;;  %v988_v43 = vadd.f32 %v934_v54, %v823_v50  ;;  %v770_v29 = vmul.f32 %v5669_v53, %v5601_v8  ;;  %v1718_v41 = vmul.f32 %v4566_v25, %v5629_v30  ;;  %v5831_v54 = vld [vmem:[%s5590_s17 + $0x170] sm:$0xff] }
  0x4e   : > { %v2024_v12 = vadd.f32 1.0, %v5172_v22  ;;  %5177 = vpow2.f32 %v4618_v60  ;;  %v1444_v26 = vadd.f32 %v1390_v31, %v1279_v48  ;;  %v1427_v37 = vmul.f32 %v5805_v15, %v5619_v23  ;;  %v5834_v60 = vld [vmem:[%s5590_s17 + $0x171] sm:$0xff] }
  0x4f   : > { %v4619_v34 = vmul.f32 -1.442695, %v1771_v62  ;;  %v1152_v2 = vadd.f32 %v1098_v32, %v988_v43  ;;  %v660_v36 = vadd.f32 %v606_v28, %v442_v55  ;;  %v935_v47 = vmul.f32 %v5676_v58, %v5607_v13  ;;  %v5851_v55 = vld [vmem:[%s5590_s17 + $0x172] sm:$0xff] }
  0x50   : > { %5179 = vrcp.f32 %v2024_v12  ;;  %v1608_v52 = vadd.f32 %v1554_v3, %v1444_v26  ;;  %v1591_v53 = vmul.f32 %v5808_v7, %v5621_v24  ;;  %v1755_v44 = vmul.f32 %v5811_v17, %v5629_v30 }
  0x51   : > { %5181 = vpow2.f32 %v4619_v34  ;;  %v1316_v61 = vadd.f32 %v1262_v6, %v1152_v2  ;;  %v824_v46 = vadd.f32 %v770_v29, %v660_v36  ;;  %v1099_v21 = vmul.f32 %v5688_v0, %v5609_v14 }
  0x52   : > { %v5174_v9 = vpop.eup %5173  ;;  %v1772_v45 = vadd.f32 %v1718_v41, %v1608_v52  ;;  %v405_v27 = vmul.f32 %v5700_v11, %v5592_v1  ;;  %v569_v63 = vmul.f32 %v5706_v18, %v5596_v4  ;;  %v733_v31 = vmul.f32 %v5709_v20, %v5601_v8 }
  0x53   : > { %v2022_v51 = vadd.f32 1.0, %v5174_v9  ;;  %v5176_v22 = vpop.eup %5175  ;;  %v1481_v3 = vadd.f32 %v1427_v37, %v1316_v61  ;;  %v989_v25 = vadd.f32 %v935_v47, %v824_v46  ;;  %v1263_v50 = vmul.f32 %v5697_v10, %v5614_v19  ;;  %v5858_v37 = vld [vmem:[%s5590_s17 + $0x48] sm:$0xff] }
  0x54   : > { %v2023_v32 = vadd.f32 1.0, %v5176_v22  ;;  %v4620_v6 = vmul.f32 -1.442695, %v1772_v45  ;;  %v623_v12 = vadd.f32 %v569_v63, %v405_v27  ;;  %v898_v11 = vmul.f32 %v5722_v40, %v5607_v13  ;;  %v5861_v9 = vld [vmem:[%s5590_s17 + $0x49] sm:$0xff] }
  0x55   : > { %5183 = vrcp.f32 %v2022_v51  ;;  %v1645_v62 = vadd.f32 %v1591_v53, %v1481_v3  ;;  %v1153_v18 = vadd.f32 %v1099_v21, %v989_v25  ;;  %v1428_v20 = vmul.f32 %v5831_v54, %v5619_v23  ;;  %v5872_v21 = vld [vmem:[%s5590_s17 + $0x4a] sm:$0xff]  ;;  %v388_v63 = vld [vmem:[%s5590_s17 + $0x148] sm:$0x3] }
  0x56   : > { %v1592_v48 = vmul.f32 %v5834_v60, %v5621_v24  ;;  %5185 = vrcp.f32 %v2023_v32  ;;  %v787_v28 = vadd.f32 %v733_v31, %v623_v12  ;;  %v1062_v29 = vmul.f32 %v5733_v56, %v5609_v14  ;;  %v552_v31 = vld [vmem:[%s5590_s17 + $0x149] sm:$0x3] }
  0x57   : > { %v1226_v34 = vmul.f32 %v5736_v57, %v5614_v19  ;;  %5187 = vpow2.f32 %v4620_v6  ;;  %v1809_v41 = vadd.f32 %v1755_v44, %v1645_v62  ;;  %v1317_v2 = vadd.f32 %v1263_v50, %v1153_v18  ;;  %v716_v50 = vld [vmem:[%s5590_s17 + $0x14a] sm:$0x3]  ;;  %v5888_v62 = vld [vmem:[%s5590_s17 + $0x50] sm:$0xff]  ;;  %v4330_v18 = vld [vmem:[%s5590_s17 + $0x160] sm:$0x3] }
  0x58   : > { %v5178_v43 = vpop.eup %5177  ;;  %v952_v47 = vadd.f32 %v898_v11, %v787_v28  ;;  %v406_v52 = vmul.f32 %v5730_v49, %v5592_v1  ;;  %v570_v53 = vmul.f32 %v5744_v5, %v5596_v4  ;;  %v734_v51 = vmul.f32 %v5749_v16, %v5601_v8  ;;  %v5895_v28 = vld [vmem:[%s5590_s17 + $0x52] sm:$0xff] }
  0x59   : > { %v1986_v26 = vadd.f32 1.0, %v5178_v43  ;;  %v4657_v44 = vmul.f32 -1.442695, %v1809_v41  ;;  %v1482_v61 = vadd.f32 %v1428_v20, %v1317_v2  ;;  %v1756_v46 = vmul.f32 %v5851_v55, %v5629_v30  ;;  %v5892_v43 = vld [vmem:[%s5590_s17 + $0x51] sm:$0xff]  ;;  %7968 = vst [vmem:[#allocation8_spill] sm:$0xff] %v5895_v28 }
  0x5a   : > { %v5180_v36 = vpop.eup %5179  ;;  %v1116_v27 = vadd.f32 %v1062_v29, %v952_v47  ;;  %v1391_v49 = vmul.f32 %v5858_v37, %v5619_v23  ;;  %v624_v5 = vadd.f32 %v570_v53, %v406_v52  ;;  %v899_v16 = vmul.f32 %v5760_v35, %v5607_v13  ;;  %v4385_v47 = vld [vmem:[%s5590_s17 + $0x161] sm:$0x3]  ;;  %v352_v52 = vld [vmem:[%s5590_s17 + $0x28] sm:$0x3] }
  0x5b   : > { %2448 = vperm.xlu1 %5134, %v5180_v36   ;;  %5189 = vrcp.f32 %v1986_v26  ;;  %v5182_v45 = vpop.eup %5181  ;;  %v1646_v3 = vadd.f32 %v1592_v48, %v1482_v61  ;;  %v1555_v25 = vmul.f32 %v5861_v9, %v5621_v24  ;;  %v1719_v6 = vmul.f32 %v5872_v21, %v5629_v30 }
  0x5c   : > { %v1987_v22 = vadd.f32 1.0, %v5182_v45  ;;  %5191 = vpow2.f32 %v4657_v44  ;;  %v1280_v32 = vadd.f32 %v1226_v34, %v1116_v27  ;;  %v788_v12 = vadd.f32 %v734_v51, %v624_v5 }
  0x5d   : > { %v1063_v11 = vmul.f32 %v5769_v59, %v5609_v14  ;;  %v1810_v48 = vadd.f32 %v1756_v46, %v1646_v3  ;;  %v443_v29 = vmul.f32 %v5592_v1, %v388_v63  ;;  %v607_v34 = vmul.f32 %v5596_v4, %v552_v31  ;;  %v516_v46 = vld [vmem:[%s5590_s17 + $0x29] sm:$0x3]  ;;  %v4440_v63 = vld [vmem:[%s5590_s17 + $0x162] sm:$0x3] }
  0x5e   : > { %5193 = vrcp.f32 %v1987_v22  ;;  %v1445_v26 = vadd.f32 %v1391_v49, %v1280_v32  ;;  %v953_v41 = vadd.f32 %v899_v16, %v788_v12  ;;  %v1227_v2 = vmul.f32 %v5772_v42, %v5614_v19  ;;  %v680_v31 = vld [vmem:[%s5590_s17 + $0x2a] sm:$0x3]  ;;  %v4294_v22 = vld [vmem:[%s5590_s17 + $0x40] sm:$0x3]  ;;  %v4495_v12 = vld [vmem:[%s5590_s17 + $0x178] sm:$0x3] }
  0x5f   : > { %v5184_v20 = vpop.eup %5183  ;;  %v771_v36 = vmul.f32 %v5601_v8, %v716_v50  ;;  %v4658_v53 = vmul.f32 -1.442695, %v1810_v48  ;;  %v1392_v51 = vmul.f32 %v5888_v62, %v5619_v23  ;;  %v661_v44 = vadd.f32 %v607_v34, %v443_v29  ;;  %v4550_v48 = vld [vmem:[%s5590_s17 + $0x179] sm:$0x3]  ;;  %v4349_v34 = vld [vmem:[%s5590_s17 + $0x41] sm:$0x3] }
  0x60   : > { %2438 = vperm.xlu0 %5133, %v5184_v20   ;;  %v936_v61 = vmul.f32 %v4330_v18, %v5607_v13  ;;  %v5186_v45 = vpop.eup %5185  ;;  %v1609_v27 = vadd.f32 %v1555_v25, %v1445_v26  ;;  %v1117_v49 = vadd.f32 %v1063_v11, %v953_v41  ;;  %v1556_v5 = vmul.f32 %v5892_v43, %v5621_v24 }
  0x61   : > { %v1720_v16 = vmul.f32 %v5895_v28, %v5629_v30  ;;  %v5188_v3 = vpop.eup %5187  ;;  %5195 = vpow2.f32 %v4658_v53  ;;  %v825_v50 = vadd.f32 %v771_v36, %v661_v44  ;;  %v1100_v32 = vmul.f32 %v4385_v47, %v5609_v14 }
  0x62   : > { %v407_v25 = vmul.f32 %v5592_v1, %v352_v52  ;;  %v1988_v11 = vadd.f32 1.0, %v5188_v3  ;;  %v1773_v18 = vadd.f32 %v1719_v6, %v1609_v27  ;;  %v1281_v20 = vadd.f32 %v1227_v2, %v1117_v49  ;;  %v4404_v2 = vld [vmem:[%s5590_s17 + $0x42] sm:$0x3] }
  0x63   : > { %v571_v29 = vmul.f32 %v5596_v4, %v516_v46  ;;  %v990_v41 = vadd.f32 %v936_v61, %v825_v50  ;;  %v1264_v28 = vmul.f32 %v4440_v63, %v5614_v19  ;;  %v735_v36 = vmul.f32 %v5601_v8, %v680_v31  ;;  %v4605_v31 = vld [vmem:[%s5590_s17 + $0x17a] sm:$0x3] }
  0x64   : > { %2443 = vperm.xlu0 %5133, %v5186_v45   ;;  %v900_v47 = vmul.f32 %v4294_v22, %v5607_v13  ;;  %5197 = vrcp.f32 %v1988_v11  ;;  %v4621_v52 = vmul.f32 -1.442695, %v1773_v18  ;;  %v1446_v53 = vadd.f32 %v1392_v51, %v1281_v20  ;;  %v4514_v11 = vld [vmem:[%s5590_s17 + $0x59] sm:$0x3] }
  0x65   : > { %v5190_v26 = vpop.eup %5189  ;;  %v625_v6 = vadd.f32 %v571_v29, %v407_v25  ;;  %v1154_v46 = vadd.f32 %v1100_v32, %v990_v41  ;;  %v1429_v45 = vmul.f32 %v4495_v12, %v5619_v23  ;;  %v1593_v61 = vmul.f32 %v4550_v48, %v5621_v24  ;;  %v4459_v25 = vld [vmem:[%s5590_s17 + $0x58] sm:$0x3] }
  0x66   : > { %2258 = vperm.xlu1 %5134, %v5190_v26   ;;  %v5192_v44 = vpop.eup %5191  ;;  %v1064_v27 = vmul.f32 %v4349_v34, %v5609_v14  ;;  %5199 = vpow2.f32 %v4621_v52  ;;  %v1610_v63 = vadd.f32 %v1556_v5, %v1446_v53  ;;  %v1228_v51 = vmul.f32 %v4404_v2, %v5614_v19 }
  0x67   : > { %v2025_v49 = vadd.f32 1.0, %v5192_v44  ;;  %v789_v22 = vadd.f32 %v735_v36, %v625_v6  ;;  %v1318_v50 = vadd.f32 %v1264_v28, %v1154_v46  ;;  %v444_v32 = vmul.f32 %v5638_v33, %v5592_v1  ;;  %v5949_v6 = vld [vmem:[%s5590_s17 + $0x180] sm:$0xff] }
  0x68   : > { %v5194_v3 = vpop.eup %5193  ;;  %v608_v12 = vmul.f32 %v5645_v38, %v5596_v4  ;;  %v1774_v18 = vadd.f32 %v1720_v16, %v1610_v63  ;;  %v772_v5 = vmul.f32 %v5648_v39, %v5601_v8  ;;  %v1757_v48 = vmul.f32 %v4605_v31, %v5629_v30 }
  0x69   : > { %2263 = vperm.xlu0 %5133, %v5194_v3   ;;  %5201 = vrcp.f32 %v2025_v49  ;;  %v954_v20 = vadd.f32 %v900_v47, %v789_v22  ;;  %v1483_v28 = vadd.f32 %v1429_v45, %v1318_v50  ;;  %v937_v34 = vmul.f32 %v5805_v15, %v5607_v13  ;;  %v4569_v47 = vld [vmem:[%s5590_s17 + $0x5a] sm:$0x3]  ;;  %v5954_v49 = vld [vmem:[%s5590_s17 + $0x181] sm:$0xff] }
  0x6a   : > { %v662_v29 = vadd.f32 %v608_v12, %v444_v32  ;;  %v4622_v33 = vmul.f32 -1.442695, %v1774_v18  ;;  %v1393_v38 = vmul.f32 %v4459_v25, %v5619_v23  ;;  %v1557_v16 = vmul.f32 %v4514_v11, %v5621_v24 }
  0x6b   : > { %v1118_v26 = vadd.f32 %v1064_v27, %v954_v20  ;;  %v5196_v41 = vpop.eup %5195  ;;  %v1647_v36 = vadd.f32 %v1593_v61, %v1483_v28  ;;  %v1101_v39 = vmul.f32 %v5808_v7, %v5609_v14  ;;  %v1265_v53 = vmul.f32 %v5811_v17, %v5614_v19  ;;  %v5957_v61 = vld [vmem:[%s5590_s17 + $0x182] sm:$0xff] }
  0x6c   : > { %v826_v52 = vadd.f32 %v772_v5, %v662_v29  ;;  %v2026_v2 = vadd.f32 1.0, %v5196_v41  ;;  %5203 = vpow2.f32 %v4622_v33  ;;  %v445_v46 = vmul.f32 %v5676_v58, %v5592_v1  ;;  %v5975_v29 = vld [vmem:[%s5590_s17 + $0x188] sm:$0xff] }
  0x6d   : > { %v1282_v44 = vadd.f32 %v1228_v51, %v1118_v26  ;;  %v1811_v45 = vadd.f32 %v1757_v48, %v1647_v36  ;;  %v609_v63 = vmul.f32 %v5688_v0, %v5596_v4  ;;  %v773_v31 = vmul.f32 %v5697_v10, %v5601_v8  ;;  %v5978_v26 = vld [vmem:[%s5590_s17 + $0x189] sm:$0xff] }
  0x6e   : > { %v991_v27 = vadd.f32 %v937_v34, %v826_v52  ;;  %v5198_v22 = vpop.eup %5197  ;;  %5205 = vrcp.f32 %v2026_v2  ;;  %v1721_v50 = vmul.f32 %v4569_v47, %v5629_v30  ;;  %v1430_v58 = vmul.f32 %v5949_v6, %v5619_v23 }
  0x6f   : > { %v1447_v3 = vadd.f32 %v1393_v38, %v1282_v44  ;;  %2268 = vperm.xlu1 %5134, %v5198_v22   ;;  %v4659_v51 = vmul.f32 -1.442695, %v1811_v45  ;;  %v663_v11 = vadd.f32 %v609_v63, %v445_v46  ;;  %v938_v0 = vmul.f32 %v5831_v54, %v5607_v13  ;;  %v5981_v38 = vld [vmem:[%s5590_s17 + $0x18a] sm:$0xff] }
  0x70   : > { %v1155_v25 = vadd.f32 %v1101_v39, %v991_v27  ;;  %v5200_v32 = vpop.eup %5199  ;;  %v1594_v12 = vmul.f32 %v5954_v49, %v5621_v24  ;;  %v1758_v18 = vmul.f32 %v5957_v61, %v5629_v30  ;;  %v1102_v20 = vmul.f32 %v5834_v60, %v5609_v14  ;;  %v6000_v27 = vld [vmem:[%s5590_s17 + $0x60] sm:$0xff] }
  0x71   : > { %v1611_v10 = vadd.f32 %v1557_v16, %v1447_v3  ;;  %v1989_v5 = vadd.f32 1.0, %v5200_v32  ;;  %5207 = vpow2.f32 %v4659_v51  ;;  %v827_v48 = vadd.f32 %v773_v31, %v663_v11  ;;  %v6005_v3 = vld [vmem:[%s5590_s17 + $0x61] sm:$0xff] }
  0x72   : > { %v1319_v28 = vadd.f32 %v1265_v53, %v1155_v25  ;;  %v408_v16 = vmul.f32 %v5722_v40, %v5592_v1  ;;  %v572_v41 = vmul.f32 %v5733_v56, %v5596_v4  ;;  %v736_v36 = vmul.f32 %v5736_v57, %v5601_v8  ;;  %v6010_v11 = vld [vmem:[%s5590_s17 + $0x62] sm:$0xff] }
  0x73   : > { %v5202_v34 = vpop.eup %5201  ;;  %v1775_v33 = vadd.f32 %v1721_v50, %v1611_v10  ;;  %5209 = vrcp.f32 %v1989_v5  ;;  %v992_v52 = vadd.f32 %v938_v0, %v827_v48  ;;  %v1266_v39 = vmul.f32 %v5851_v55, %v5614_v19  ;;  %v555_v5 = vld [vmem:[%s5590_s17 + $0x161] sm:$0x3] }
  0x74   : > { %2453 = vperm.xlu0 %5133, %v5202_v34   ;;  %v1484_v47 = vadd.f32 %v1430_v58, %v1319_v28  ;;  %v1431_v2 = vmul.f32 %v5975_v29, %v5619_v23  ;;  %v626_v40 = vadd.f32 %v572_v41, %v408_v16  ;;  %v901_v56 = vmul.f32 %v5858_v37, %v5607_v13  ;;  %v719_v34 = vld [vmem:[%s5590_s17 + $0x162] sm:$0x3] }
  0x75   : > { %v4623_v53 = vmul.f32 -1.442695, %v1775_v33  ;;  %v1156_v46 = vadd.f32 %v1102_v20, %v992_v52  ;;  %v1595_v57 = vmul.f32 %v5978_v26, %v5621_v24  ;;  %v1759_v45 = vmul.f32 %v5981_v38, %v5629_v30  ;;  %v4333_v33 = vld [vmem:[%s5590_s17 + $0x178] sm:$0x3] }
  0x76   : > { %v1648_v44 = vadd.f32 %v1594_v12, %v1484_v47  ;;  %v5204_v63 = vpop.eup %5203  ;;  %v790_v31 = vadd.f32 %v736_v36, %v626_v40  ;;  %v1065_v22 = vmul.f32 %v5861_v9, %v5609_v14  ;;  %v409_v50 = vmul.f32 %v5760_v35, %v5592_v1  ;;  %v6031_v47 = vld [vmem:[%s5590_s17 + $0x68] sm:$0xff]  ;;  %v4388_v40 = vld [vmem:[%s5590_s17 + $0x179] sm:$0x3] }
  0x77   : > { %5211 = vpow2.f32 %v4623_v53  ;;  %v1990_v58 = vadd.f32 1.0, %v5204_v63  ;;  %v1320_v25 = vadd.f32 %v1266_v39, %v1156_v46  ;;  %v573_v0 = vmul.f32 %v5769_v59, %v5596_v4  ;;  %v6038_v63 = vld [vmem:[%s5590_s17 + $0x69] sm:$0xff] }
  0x78   : > { %v1812_v51 = vadd.f32 %v1758_v18, %v1648_v44  ;;  %v5206_v32 = vpop.eup %5205  ;;  %v955_v10 = vadd.f32 %v901_v56, %v790_v31  ;;  %v1229_v12 = vmul.f32 %v5872_v21, %v5614_v19  ;;  %v737_v20 = vmul.f32 %v5772_v42, %v5601_v8  ;;  %v391_v18 = vld [vmem:[%s5590_s17 + $0x160] sm:$0x3]  ;;  %v4443_v56 = vld [vmem:[%s5590_s17 + $0x17a] sm:$0x3] }
  0x79   : > { %v902_v35 = vmul.f32 %v5888_v62, %v5607_v13  ;;  %2458 = vperm.xlu1 %5134, %v5206_v32   ;;  %5213 = vrcp.f32 %v1990_v58  ;;  %v1485_v59 = vadd.f32 %v1431_v2, %v1320_v25  ;;  %v627_v48 = vadd.f32 %v573_v0, %v409_v50  ;;  %v355_v32 = vld [vmem:[%s5590_s17 + $0x40] sm:$0x3] }
  0x7a   : > { %v4660_v28 = vmul.f32 -1.442695, %v1812_v51  ;;  %v1119_v16 = vadd.f32 %v1065_v22, %v955_v10  ;;  %v1394_v41 = vmul.f32 %v6000_v27, %v5619_v23  ;;  %v1558_v42 = vmul.f32 %v6005_v3, %v5621_v24  ;;  %v7969_v51 = vld [vmem:[#allocation8_spill] sm:$0xff] }
  0x7b   : > { %v1722_v36 = vmul.f32 %v6010_v11, %v5629_v30  ;;  %v5208_v52 = vpop.eup %5207  ;;  %v1649_v39 = vadd.f32 %v1595_v57, %v1485_v59  ;;  %v791_v53 = vadd.f32 %v737_v20, %v627_v48  ;;  %v1066_v2 = vmul.f32 %v5892_v43, %v5609_v14 }
  0x7c   : > { %5215 = vpow2.f32 %v4660_v28  ;;  %v2027_v44 = vadd.f32 1.0, %v5208_v52  ;;  %v1283_v46 = vadd.f32 %v1229_v12, %v1119_v16  ;;  %v446_v31 = vmul.f32 %v5592_v1, %v391_v18  ;;  %v6047_v12 = vld [vmem:[%s5590_s17 + $0x6a] sm:$0xff] }
  0x7d   : > { %v610_v22 = vmul.f32 %v5596_v4, %v555_v5  ;;  %v5210_v50 = vpop.eup %5209  ;;  %v1813_v58 = vadd.f32 %v1759_v45, %v1649_v39  ;;  %v956_v57 = vadd.f32 %v902_v35, %v791_v53  ;;  %v1230_v25 = vmul.f32 %v7969_v51, %v5614_v19  ;;  %v4498_v5 = vld [vmem:[%s5590_s17 + $0x190] sm:$0x3]  ;;  %v519_v45 = vld [vmem:[%s5590_s17 + $0x41] sm:$0x3] }
  0x7e   : > { %v774_v0 = vmul.f32 %v5601_v8, %v719_v34  ;;  %2273 = vperm.xlu0 %5133, %v5210_v50   ;;  %5217 = vrcp.f32 %v2027_v44  ;;  %v1448_v10 = vadd.f32 %v1394_v41, %v1283_v46  ;;  %v939_v18 = vmul.f32 %v4333_v33, %v5607_v13  ;;  %v683_v34 = vld [vmem:[%s5590_s17 + $0x42] sm:$0x3]  ;;  %v4553_v53 = vld [vmem:[%s5590_s17 + $0x191] sm:$0x3] }
  0x7f   : > { %v664_v20 = vadd.f32 %v610_v22, %v446_v31  ;;  %v4661_v35 = vmul.f32 -1.442695, %v1813_v58  ;;  %v1120_v28 = vadd.f32 %v1066_v2, %v956_v57  ;;  %v1395_v59 = vmul.f32 %v6031_v47, %v5619_v23  ;;  %v4608_v44 = vld [vmem:[%s5590_s17 + $0x192] sm:$0x3]  ;;  %v4297_v22 = vld [vmem:[%s5590_s17 + $0x58] sm:$0x3] }
  0x80   : > { %v1559_v48 = vmul.f32 %v6038_v63, %v5621_v24  ;;  %v1612_v41 = vadd.f32 %v1558_v42, %v1448_v10  ;;  %v1103_v39 = vmul.f32 %v4388_v40, %v5609_v14  ;;  %v1267_v33 = vmul.f32 %v4443_v56, %v5614_v19 }
  0x81   : > { %v5212_v16 = vpop.eup %5211  ;;  %v828_v52 = vadd.f32 %v774_v0, %v664_v20  ;;  %5219 = vpow2.f32 %v4661_v35  ;;  %v1284_v2 = vadd.f32 %v1230_v25, %v1120_v28  ;;  %v410_v31 = vmul.f32 %v5592_v1, %v355_v32  ;;  %v4352_v0 = vld [vmem:[%s5590_s17 + $0x59] sm:$0x3]  ;;  %v4462_v35 = vld [vmem:[%s5590_s17 + $0x70] sm:$0x3] }
  0x82   : > { %v1991_v46 = vadd.f32 1.0, %v5212_v16  ;;  %v1776_v50 = vadd.f32 %v1722_v36, %v1612_v41  ;;  %v574_v57 = vmul.f32 %v5596_v4, %v519_v45  ;;  %v738_v42 = vmul.f32 %v5601_v8, %v683_v34  ;;  %v4407_v20 = vld [vmem:[%s5590_s17 + $0x5a] sm:$0x3] }
  0x83   : > { %v993_v58 = vadd.f32 %v939_v18, %v828_v52  ;;  %v5214_v40 = vpop.eup %5213  ;;  %v1449_v56 = vadd.f32 %v1395_v59, %v1284_v2  ;;  %v1723_v10 = vmul.f32 %v6047_v12, %v5629_v30  ;;  %v1432_v25 = vmul.f32 %v4498_v5, %v5619_v23  ;;  %v4517_v52 = vld [vmem:[%s5590_s17 + $0x71] sm:$0x3] }
  0x84   : > { %5221 = vrcp.f32 %v1991_v46  ;;  %2278 = vperm.xlu1 %5134, %v5214_v40   ;;  %v4624_v32 = vmul.f32 -1.442695, %v1776_v50  ;;  %v628_v18 = vadd.f32 %v574_v57, %v410_v31  ;;  %v903_v45 = vmul.f32 %v4297_v22, %v5607_v13  ;;  %v4572_v40 = vld [vmem:[%s5590_s17 + $0x72] sm:$0x3] }
  0x85   : > { %v1157_v36 = vadd.f32 %v1103_v39, %v993_v58  ;;  %v1613_v34 = vadd.f32 %v1559_v48, %v1449_v56  ;;  %v1596_v16 = vmul.f32 %v4553_v53, %v5621_v24  ;;  %v1760_v59 = vmul.f32 %v4608_v44, %v5629_v30 }
  0x86   : > { %v5216_v28 = vpop.eup %5215  ;;  %v1067_v41 = vmul.f32 %v4352_v0, %v5609_v14  ;;  %5223 = vpow2.f32 %v4624_v32  ;;  %v792_v2 = vadd.f32 %v738_v42, %v628_v18  ;;  %v447_v39 = vmul.f32 %v5805_v15, %v5592_v1  ;;  %v6092_v32 = vld [vmem:[%s5590_s17 + $0x198] sm:$0xff] }
  0x87   : > { %v2028_v46 = vadd.f32 1.0, %v5216_v28  ;;  %v1321_v5 = vadd.f32 %v1267_v33, %v1157_v36  ;;  %v1777_v50 = vadd.f32 %v1723_v10, %v1613_v34  ;;  %v611_v31 = vmul.f32 %v5808_v7, %v5596_v4  ;;  %v6095_v36 = vld [vmem:[%s5590_s17 + $0x199] sm:$0xff] }
  0x88   : > { %v775_v48 = vmul.f32 %v5811_v17, %v5601_v8  ;;  %v5218_v53 = vpop.eup %5217  ;;  %v957_v22 = vadd.f32 %v903_v45, %v792_v2  ;;  %v1231_v33 = vmul.f32 %v4407_v20, %v5614_v19  ;;  %v1396_v57 = vmul.f32 %v4462_v35, %v5619_v23  ;;  %v6100_v34 = vld [vmem:[%s5590_s17 + $0x19a] sm:$0xff] }
  0x89   : > { %5225 = vrcp.f32 %v2028_v46  ;;  %v1486_v44 = vadd.f32 %v1432_v25, %v1321_v5  ;;  %2463 = vperm.xlu0 %5133, %v5218_v53   ;;  %v4625_v58 = vmul.f32 -1.442695, %v1777_v50  ;;  %v665_v42 = vadd.f32 %v611_v31, %v447_v39 }
  0x8a   : > { %v940_v15 = vmul.f32 %v5949_v6, %v5607_v13  ;;  %v1121_v0 = vadd.f32 %v1067_v41, %v957_v22  ;;  %v1560_v17 = vmul.f32 %v4517_v52, %v5621_v24  ;;  %v1724_v56 = vmul.f32 %v4572_v40, %v5629_v30 }
  0x8b   : > { %v1650_v7 = vadd.f32 %v1596_v16, %v1486_v44  ;;  %v5220_v10 = vpop.eup %5219  ;;  %5227 = vpow2.f32 %v4625_v58  ;;  %v829_v25 = vadd.f32 %v775_v48, %v665_v42  ;;  %v1104_v20 = vmul.f32 %v5954_v49, %v5609_v14  ;;  %v6119_v58 = vld [vmem:[%s5590_s17 + $0x1a0] sm:$0xff] }
  0x8c   : > { %v448_v18 = vmul.f32 %v5831_v54, %v5592_v1  ;;  %v2029_v45 = vadd.f32 1.0, %v5220_v10  ;;  %v1285_v28 = vadd.f32 %v1231_v33, %v1121_v0  ;;  %v612_v16 = vmul.f32 %v5834_v60, %v5596_v4 }
  0x8d   : > { %v1814_v35 = vadd.f32 %v1760_v59, %v1650_v7  ;;  %v994_v52 = vadd.f32 %v940_v15, %v829_v25  ;;  %v1268_v46 = vmul.f32 %v5957_v61, %v5614_v19  ;;  %v776_v5 = vmul.f32 %v5851_v55, %v5601_v8 }
  0x8e   : > { %v5222_v41 = vpop.eup %5221  ;;  %v941_v2 = vmul.f32 %v5975_v29, %v5607_v13  ;;  %5229 = vrcp.f32 %v2029_v45  ;;  %v1450_v59 = vadd.f32 %v1396_v57, %v1285_v28  ;;  %v666_v50 = vadd.f32 %v612_v16, %v448_v18  ;;  %v6122_v57 = vld [vmem:[%s5590_s17 + $0x1a1] sm:$0xff] }
  0x8f   : > { %2283 = vperm.xlu1 %5134, %v5222_v41   ;;  %v4662_v54 = vmul.f32 -1.442695, %v1814_v35  ;;  %v1158_v40 = vadd.f32 %v1104_v20, %v994_v52  ;;  %v1433_v60 = vmul.f32 %v6092_v32, %v5619_v23  ;;  %v1597_v39 = vmul.f32 %v6095_v36, %v5621_v24  ;;  %v6133_v18 = vld [vmem:[%s5590_s17 + $0x1a2] sm:$0xff] }
  0x90   : > { %v1761_v55 = vmul.f32 %v6100_v34, %v5629_v30  ;;  %v5224_v31 = vpop.eup %5223  ;;  %v1614_v48 = vadd.f32 %v1560_v17, %v1450_v59  ;;  %v830_v53 = vadd.f32 %v776_v5, %v666_v50  ;;  %v1105_v44 = vmul.f32 %v5978_v26, %v5609_v14  ;;  %v6146_v5 = vld [vmem:[%s5590_s17 + $0x78] sm:$0xff] }
  0x91   : > { %5231 = vpow2.f32 %v4662_v54  ;;  %v1992_v22 = vadd.f32 1.0, %v5224_v31  ;;  %v1322_v33 = vadd.f32 %v1268_v46, %v1158_v40  ;;  %v411_v42 = vmul.f32 %v5858_v37, %v5592_v1 }
  0x92   : > { %v575_v15 = vmul.f32 %v5861_v9, %v5596_v4  ;;  %v1778_v0 = vadd.f32 %v1724_v56, %v1614_v48  ;;  %v995_v17 = vadd.f32 %v941_v2, %v830_v53  ;;  %v1269_v10 = vmul.f32 %v5981_v38, %v5614_v19 }
  0x93   : > { %v5226_v7 = vpop.eup %5225  ;;  %v739_v25 = vmul.f32 %v5872_v21, %v5601_v8  ;;  %5233 = vrcp.f32 %v1992_v22  ;;  %v1487_v20 = vadd.f32 %v1433_v60, %v1322_v33  ;;  %v904_v37 = vmul.f32 %v6000_v27, %v5607_v13  ;;  %v6151_v60 = vld [vmem:[%s5590_s17 + $0x79] sm:$0xff] }
  0x94   : > { %2468 = vperm.xlu0 %5133, %v5226_v7   ;;  %v629_v45 = vadd.f32 %v575_v15, %v411_v42  ;;  %v4626_v9 = vmul.f32 -1.442695, %v1778_v0  ;;  %v1159_v56 = vadd.f32 %v1105_v44, %v995_v17  ;;  %v1434_v35 = vmul.f32 %v6119_v58, %v5619_v23  ;;  %v394_v22 = vld [vmem:[%s5590_s17 + $0x178] sm:$0x3]  ;;  %v722_v7 = vld [vmem:[%s5590_s17 + $0x17a] sm:$0x3] }
  0x95   : > { %v1598_v21 = vmul.f32 %v6122_v57, %v5621_v24  ;;  %v5228_v28 = vpop.eup %5227  ;;  %v1651_v16 = vadd.f32 %v1597_v39, %v1487_v20  ;;  %v1068_v52 = vmul.f32 %v6005_v3, %v5609_v14  ;;  %v1232_v46 = vmul.f32 %v6010_v11, %v5614_v19  ;;  %v6154_v39 = vld [vmem:[%s5590_s17 + $0x7a] sm:$0xff] }
  0x96   : > { %v793_v41 = vadd.f32 %v739_v25, %v629_v45  ;;  %v1993_v2 = vadd.f32 1.0, %v5228_v28  ;;  %5235 = vpow2.f32 %v4626_v9  ;;  %v1323_v54 = vadd.f32 %v1269_v10, %v1159_v56  ;;  %v6176_v56 = vld [vmem:[%s5590_s17 + $0x80] sm:$0xff] }
  0x97   : > { %v412_v59 = vmul.f32 %v5888_v62, %v5592_v1  ;;  %v1815_v50 = vadd.f32 %v1761_v55, %v1651_v16  ;;  %v576_v31 = vmul.f32 %v5892_v43, %v5596_v4  ;;  %v740_v48 = vmul.f32 %v7969_v51, %v5601_v8  ;;  %v558_v51 = vld [vmem:[%s5590_s17 + $0x179] sm:$0x3]  ;;  %v6183_v16 = vld [vmem:[%s5590_s17 + $0x82] sm:$0xff] }
  0x98   : > { %v958_v40 = vadd.f32 %v904_v37, %v793_v41  ;;  %v5230_v53 = vpop.eup %5229  ;;  %5237 = vrcp.f32 %v1993_v2  ;;  %v1488_v44 = vadd.f32 %v1434_v35, %v1323_v54  ;;  %v1762_v62 = vmul.f32 %v6133_v18, %v5629_v30  ;;  %v4336_v35 = vld [vmem:[%s5590_s17 + $0x190] sm:$0x3] }
  0x99   : > { %v1397_v55 = vmul.f32 %v6146_v5, %v5619_v23  ;;  %2473 = vperm.xlu1 %5134, %v5230_v53   ;;  %v4663_v33 = vmul.f32 -1.442695, %v1815_v50  ;;  %v630_v15 = vadd.f32 %v576_v31, %v412_v59  ;;  %v905_v43 = vmul.f32 %v6031_v47, %v5607_v13  ;;  %v358_v31 = vld [vmem:[%s5590_s17 + $0x58] sm:$0x3] }
  0x9a   : > { %v1122_v42 = vadd.f32 %v1068_v52, %v958_v40  ;;  %v1652_v17 = vadd.f32 %v1598_v21, %v1488_v44  ;;  %v1561_v10 = vmul.f32 %v6151_v60, %v5621_v24  ;;  %v1725_v25 = vmul.f32 %v6154_v39, %v5629_v30  ;;  %v6180_v21 = vld [vmem:[%s5590_s17 + $0x81] sm:$0xff]  ;;  %v4391_v40 = vld [vmem:[%s5590_s17 + $0x191] sm:$0x3] }
  0x9b   : > { %v5232_v0 = vpop.eup %5231  ;;  %v1069_v20 = vmul.f32 %v6038_v63, %v5609_v14  ;;  %5239 = vpow2.f32 %v4663_v33  ;;  %v794_v9 = vadd.f32 %v740_v48, %v630_v15  ;;  %v449_v41 = vmul.f32 %v5592_v1, %v394_v22  ;;  %v522_v22 = vld [vmem:[%s5590_s17 + $0x59] sm:$0x3] }
  0x9c   : > { %v2030_v45 = vadd.f32 1.0, %v5232_v0  ;;  %v1286_v37 = vadd.f32 %v1232_v46, %v1122_v42  ;;  %v1816_v28 = vadd.f32 %v1762_v62, %v1652_v17  ;;  %v613_v52 = vmul.f32 %v5596_v4, %v558_v51  ;;  %v686_v51 = vld [vmem:[%s5590_s17 + $0x5a] sm:$0x3] }
  0x9d   : > { %v777_v2 = vmul.f32 %v5601_v8, %v722_v7  ;;  %v5234_v54 = vpop.eup %5233  ;;  %v959_v59 = vadd.f32 %v905_v43, %v794_v9  ;;  %v1233_v50 = vmul.f32 %v6047_v12, %v5614_v19  ;;  %v1398_v53 = vmul.f32 %v6176_v56, %v5619_v23  ;;  %v4446_v43 = vld [vmem:[%s5590_s17 + $0x192] sm:$0x3]  ;;  %v4300_v7 = vld [vmem:[%s5590_s17 + $0x70] sm:$0x3] }
  0x9e   : > { %5241 = vrcp.f32 %v2030_v45  ;;  %v1451_v46 = vadd.f32 %v1397_v55, %v1286_v37  ;;  %2288 = vperm.xlu0 %5133, %v5234_v54   ;;  %v4664_v48 = vmul.f32 -1.442695, %v1816_v28  ;;  %v667_v44 = vadd.f32 %v613_v52, %v449_v41  ;;  %v4501_v37 = vld [vmem:[%s5590_s17 + $0x1a8] sm:$0x3]  ;;  %v4611_v41 = vld [vmem:[%s5590_s17 + $0x1aa] sm:$0x3] }
  0x9f   : > { %v942_v62 = vmul.f32 %v4336_v35, %v5607_v13  ;;  %v1123_v55 = vadd.f32 %v1069_v20, %v959_v59  ;;  %v1562_v42 = vmul.f32 %v6180_v21, %v5621_v24  ;;  %v1726_v15 = vmul.f32 %v6183_v16, %v5629_v30  ;;  %v4556_v28 = vld [vmem:[%s5590_s17 + $0x1a9] sm:$0x3] }
  0xa0   : > { %v1615_v33 = vadd.f32 %v1561_v10, %v1451_v46  ;;  %v5236_v0 = vpop.eup %5235  ;;  %5243 = vpow2.f32 %v4664_v48  ;;  %v831_v17 = vadd.f32 %v777_v2, %v667_v44  ;;  %v1106_v45 = vmul.f32 %v4391_v40, %v5609_v14  ;;  %v4355_v40 = vld [vmem:[%s5590_s17 + $0x71] sm:$0x3] }
  0xa1   : > { %v413_v10 = vmul.f32 %v5592_v1, %v358_v31  ;;  %v1994_v20 = vadd.f32 1.0, %v5236_v0  ;;  %v1287_v35 = vadd.f32 %v1233_v50, %v1123_v55  ;;  %v577_v52 = vmul.f32 %v5596_v4, %v522_v22  ;;  %v4410_v55 = vld [vmem:[%s5590_s17 + $0x72] sm:$0x3] }
  0xa2   : > { %v1779_v9 = vadd.f32 %v1725_v25, %v1615_v33  ;;  %v5238_v54 = vpop.eup %5237  ;;  %v996_v46 = vadd.f32 %v942_v62, %v831_v17  ;;  %v1270_v59 = vmul.f32 %v4446_v43, %v5614_v19  ;;  %v741_v48 = vmul.f32 %v5601_v8, %v686_v51 }
  0xa3   : > { %v906_v2 = vmul.f32 %v4300_v7, %v5607_v13  ;;  %2293 = vperm.xlu1 %5134, %v5238_v54   ;;  %5245 = vrcp.f32 %v1994_v20  ;;  %v1452_v25 = vadd.f32 %v1398_v53, %v1287_v35  ;;  %v631_v50 = vadd.f32 %v577_v52, %v413_v10  ;;  %v4520_v54 = vld [vmem:[%s5590_s17 + $0x89] sm:$0x3] }
  0xa4   : > { %v4627_v31 = vmul.f32 -1.442695, %v1779_v9  ;;  %v1160_v44 = vadd.f32 %v1106_v45, %v996_v46  ;;  %v1435_v22 = vmul.f32 %v4501_v37, %v5619_v23  ;;  %v1599_v33 = vmul.f32 %v4556_v28, %v5621_v24  ;;  %v4465_v9 = vld [vmem:[%s5590_s17 + $0x88] sm:$0x3] }
  0xa5   : > { %v1763_v62 = vmul.f32 %v4611_v41, %v5629_v30  ;;  %v5240_v43 = vpop.eup %5239  ;;  %v1616_v51 = vadd.f32 %v1562_v42, %v1452_v25  ;;  %v795_v7 = vadd.f32 %v741_v48, %v631_v50  ;;  %v1070_v0 = vmul.f32 %v4355_v40, %v5609_v14  ;;  %v4575_v40 = vld [vmem:[%s5590_s17 + $0x8a] sm:$0x3]  ;;  %v4502_v50 = vld [vmem:[%s5590_s17 + $0x1b0] sm:$0xff] }
  0xa6   : > { %5247 = vpow2.f32 %v4627_v31  ;;  %v2031_v17 = vadd.f32 1.0, %v5240_v43  ;;  %v1324_v20 = vadd.f32 %v1270_v59, %v1160_v44  ;;  %v450_v53 = vmul.f32 %v5949_v6, %v5592_v1 }
  0xa7   : > { %v614_v45 = vmul.f32 %v5954_v49, %v5596_v4  ;;  %v1780_v10 = vadd.f32 %v1726_v15, %v1616_v51  ;;  %v960_v35 = vadd.f32 %v906_v2, %v795_v7  ;;  %v1234_v28 = vmul.f32 %v4410_v55, %v5614_v19  ;;  %v4557_v51 = vld [vmem:[%s5590_s17 + $0x1b1] sm:$0xff] }
  0xa8   : > { %v5242_v37 = vpop.eup %5241  ;;  %v778_v42 = vmul.f32 %v5957_v61, %v5601_v8  ;;  %5249 = vrcp.f32 %v2031_v17  ;;  %v1489_v41 = vadd.f32 %v1435_v22, %v1324_v20  ;;  %v943_v6 = vmul.f32 %v6092_v32, %v5607_v13  ;;  %v4612_v7 = vld [vmem:[%s5590_s17 + $0x1b2] sm:$0xff] }
  0xa9   : > { %2478 = vperm.xlu0 %5133, %v5242_v37   ;;  %v668_v52 = vadd.f32 %v614_v45, %v450_v53  ;;  %v4628_v46 = vmul.f32 -1.442695, %v1780_v10  ;;  %v1124_v59 = vadd.f32 %v1070_v0, %v960_v35  ;;  %v1399_v49 = vmul.f32 %v4465_v9, %v5619_v23 }
  0xaa   : > { %v1563_v15 = vmul.f32 %v4520_v54, %v5621_v24  ;;  %v5244_v48 = vpop.eup %5243  ;;  %v1653_v2 = vadd.f32 %v1599_v33, %v1489_v41  ;;  %v1107_v31 = vmul.f32 %v6095_v36, %v5609_v14  ;;  %v1271_v25 = vmul.f32 %v6100_v34, %v5614_v19 }
  0xab   : > { %v832_v61 = vadd.f32 %v778_v42, %v668_v52  ;;  %v2032_v32 = vadd.f32 1.0, %v5244_v48  ;;  %5251 = vpow2.f32 %v4628_v46  ;;  %v1288_v44 = vadd.f32 %v1234_v28, %v1124_v59  ;;  %v4503_v42 = vld [vmem:[%s5590_s17 + $0x1b8] sm:$0xff] }
  0xac   : > { %v451_v22 = vmul.f32 %v5975_v29, %v5592_v1  ;;  %v1817_v55 = vadd.f32 %v1763_v62, %v1653_v2  ;;  %v615_v33 = vmul.f32 %v5978_v26, %v5596_v4  ;;  %v779_v36 = vmul.f32 %v5981_v38, %v5601_v8  ;;  %v4558_v52 = vld [vmem:[%s5590_s17 + $0x1b9] sm:$0xff] }
  0xad   : > { %v997_v43 = vadd.f32 %v943_v6, %v832_v61  ;;  %v5246_v0 = vpop.eup %5245  ;;  %5253 = vrcp.f32 %v2032_v32  ;;  %v1453_v34 = vadd.f32 %v1399_v49, %v1288_v44  ;;  %v1727_v17 = vmul.f32 %v4575_v40, %v5629_v30  ;;  %v4613_v6 = vld [vmem:[%s5590_s17 + $0x1ba] sm:$0xff] }
  0xae   : > { %v1436_v20 = vmul.f32 %v4502_v50, %v5619_v23  ;;  %2298 = vperm.xlu1 %5134, %v5246_v0   ;;  %v4665_v29 = vmul.f32 -1.442695, %v1817_v55  ;;  %v669_v9 = vadd.f32 %v615_v33, %v451_v22  ;;  %v944_v26 = vmul.f32 %v6119_v58, %v5607_v13  ;;  %v6278_v0 = vld [vmem:[%s5590_s17 + $0x90] sm:$0xff] }
  0xaf   : > { %v1161_v62 = vadd.f32 %v1107_v31, %v997_v43  ;;  %v1617_v53 = vadd.f32 %v1563_v15, %v1453_v34  ;;  %v1600_v38 = vmul.f32 %v4557_v51, %v5621_v24  ;;  %v1764_v45 = vmul.f32 %v4612_v7, %v5629_v30  ;;  %v6281_v34 = vld [vmem:[%s5590_s17 + $0x91] sm:$0xff] }
  0xb0   : > { %v5248_v54 = vpop.eup %5247  ;;  %v1108_v37 = vmul.f32 %v6122_v57, %v5609_v14  ;;  %5255 = vpow2.f32 %v4665_v29  ;;  %v833_v28 = vadd.f32 %v779_v36, %v669_v9  ;;  %v414_v58 = vmul.f32 %v6000_v27, %v5592_v1  ;;  %v361_v9 = vld [vmem:[%s5590_s17 + $0x70] sm:$0x3] }
  0xb1   : > { %v1995_v10 = vadd.f32 1.0, %v5248_v54  ;;  %v1325_v35 = vadd.f32 %v1271_v25, %v1161_v62  ;;  %v1781_v41 = vadd.f32 %v1727_v17, %v1617_v53  ;;  %v578_v46 = vmul.f32 %v6005_v3, %v5596_v4  ;;  %v6284_v17 = vld [vmem:[%s5590_s17 + $0x92] sm:$0xff] }
  0xb2   : > { %v742_v59 = vmul.f32 %v6010_v11, %v5601_v8  ;;  %v5250_v49 = vpop.eup %5249  ;;  %v998_v15 = vadd.f32 %v944_v26, %v833_v28  ;;  %v1272_v48 = vmul.f32 %v6133_v18, %v5614_v19  ;;  %v1437_v40 = vmul.f32 %v4503_v42, %v5619_v23  ;;  %v525_v26 = vld [vmem:[%s5590_s17 + $0x71] sm:$0x3]  ;;  %v4303_v42 = vld [vmem:[%s5590_s17 + $0x88] sm:$0x3] }
  0xb3   : > { %5257 = vrcp.f32 %v1995_v10  ;;  %v1490_v57 = vadd.f32 %v1436_v20, %v1325_v35  ;;  %2483 = vperm.xlu0 %5133, %v5250_v49   ;;  %v4629_v2 = vmul.f32 -1.442695, %v1781_v41  ;;  %v632_v61 = vadd.f32 %v578_v46, %v414_v58  ;;  %v6306_v58 = vld [vmem:[%s5590_s17 + $0x99] sm:$0xff] }
  0xb4   : > { %v907_v27 = vmul.f32 %v6146_v5, %v5607_v13  ;;  %v1162_v3 = vadd.f32 %v1108_v37, %v998_v15  ;;  %v1601_v11 = vmul.f32 %v4558_v52, %v5621_v24  ;;  %v1765_v25 = vmul.f32 %v4613_v6, %v5629_v30  ;;  %v6303_v6 = vld [vmem:[%s5590_s17 + $0x98] sm:$0xff] }
  0xb5   : > { %v1654_v31 = vadd.f32 %v1600_v38, %v1490_v57  ;;  %v5252_v50 = vpop.eup %5251  ;;  %5259 = vpow2.f32 %v4629_v2  ;;  %v796_v18 = vadd.f32 %v742_v59, %v632_v61  ;;  %v1071_v32 = vmul.f32 %v6151_v60, %v5609_v14  ;;  %v4413_v61 = vld [vmem:[%s5590_s17 + $0x8a] sm:$0x3] }
  0xb6   : > { %v415_v44 = vmul.f32 %v6031_v47, %v5592_v1  ;;  %v1996_v22 = vadd.f32 1.0, %v5252_v50  ;;  %v1326_v43 = vadd.f32 %v1272_v48, %v1162_v3  ;;  %v579_v51 = vmul.f32 %v6038_v63, %v5596_v4 }
  0xb7   : > { %v1818_v55 = vadd.f32 %v1764_v45, %v1654_v31  ;;  %v5254_v7 = vpop.eup %5253  ;;  %v961_v33 = vadd.f32 %v907_v27, %v796_v18  ;;  %v1235_v36 = vmul.f32 %v6154_v39, %v5614_v19  ;;  %v743_v47 = vmul.f32 %v6047_v12, %v5601_v8  ;;  %v689_v45 = vld [vmem:[%s5590_s17 + $0x72] sm:$0x3] }
  0xb8   : > { %v908_v20 = vmul.f32 %v6176_v56, %v5607_v13  ;;  %2488 = vperm.xlu1 %5134, %v5254_v7   ;;  %5261 = vrcp.f32 %v1996_v22  ;;  %v1491_v29 = vadd.f32 %v1437_v40, %v1326_v43  ;;  %v633_v62 = vadd.f32 %v579_v51, %v415_v44  ;;  %v4358_v40 = vld [vmem:[%s5590_s17 + $0x89] sm:$0x3]  ;;  %v6321_v22 = vld [vmem:[%s5590_s17 + $0x9a] sm:$0xff] }
  0xb9   : > { %v4666_v63 = vmul.f32 -1.442695, %v1818_v55  ;;  %v1125_v54 = vadd.f32 %v1071_v32, %v961_v33  ;;  %v1400_v53 = vmul.f32 %v6278_v0, %v5619_v23  ;;  %v1564_v12 = vmul.f32 %v6281_v34, %v5621_v24  ;;  %v4468_v7 = vld [vmem:[%s5590_s17 + $0xa0] sm:$0x3] }
  0xba   : > { %v1728_v38 = vmul.f32 %v6284_v17, %v5629_v30  ;;  %v5256_v37 = vpop.eup %5255  ;;  %v1655_v10 = vadd.f32 %v1601_v11, %v1491_v29  ;;  %v797_v35 = vadd.f32 %v743_v47, %v633_v62  ;;  %v1072_v28 = vmul.f32 %v6180_v21, %v5609_v14  ;;  %v4523_v29 = vld [vmem:[%s5590_s17 + $0xa1] sm:$0x3] }
  0xbb   : > { %5263 = vpow2.f32 %v4666_v63  ;;  %v2033_v41 = vadd.f32 1.0, %v5256_v37  ;;  %v1289_v52 = vadd.f32 %v1235_v36, %v1125_v54  ;;  %v416_v46 = vmul.f32 %v5592_v1, %v361_v9  ;;  %v4578_v62 = vld [vmem:[%s5590_s17 + $0xa2] sm:$0x3] }
  0xbc   : > { %v580_v59 = vmul.f32 %v5596_v4, %v525_v26  ;;  %v1819_v57 = vadd.f32 %v1765_v25, %v1655_v10  ;;  %v962_v15 = vadd.f32 %v908_v20, %v797_v35  ;;  %v1236_v48 = vmul.f32 %v6183_v16, %v5614_v19 }
  0xbd   : > { %v5258_v49 = vpop.eup %5257  ;;  %v744_v2 = vmul.f32 %v5601_v8, %v689_v45  ;;  %5265 = vrcp.f32 %v2033_v41  ;;  %v1454_v27 = vadd.f32 %v1400_v53, %v1289_v52  ;;  %v909_v3 = vmul.f32 %v4303_v42, %v5607_v13 }
  0xbe   : > { %2303 = vperm.xlu0 %5133, %v5258_v49   ;;  %v634_v31 = vadd.f32 %v580_v59, %v416_v46  ;;  %v4667_v11 = vmul.f32 -1.442695, %v1819_v57  ;;  %v1126_v50 = vadd.f32 %v1072_v28, %v962_v15  ;;  %v1401_v25 = vmul.f32 %v6303_v6, %v5619_v23  ;;  %v6344_v59 = vld [vmem:[%s5590_s17 + $0xa8] sm:$0xff] }
  0xbf   : > { %v1565_v18 = vmul.f32 %v6306_v58, %v5621_v24  ;;  %v5260_v32 = vpop.eup %5259  ;;  %v1618_v44 = vadd.f32 %v1564_v12, %v1454_v27  ;;  %v1073_v43 = vmul.f32 %v4358_v40, %v5609_v14  ;;  %v1237_v51 = vmul.f32 %v4413_v61, %v5614_v19  ;;  %v6347_v57 = vld [vmem:[%s5590_s17 + $0xa9] sm:$0xff] }
  0xc0   : > { %v798_v55 = vadd.f32 %v744_v2, %v634_v31  ;;  %v1997_v33 = vadd.f32 1.0, %v5260_v32  ;;  %5267 = vpow2.f32 %v4667_v11  ;;  %v1290_v36 = vadd.f32 %v1236_v48, %v1126_v50  ;;  %v6350_v15 = vld [vmem:[%s5590_s17 + $0xaa] sm:$0xff]  ;;  %v364_v11 = vld [vmem:[%s5590_s17 + $0x88] sm:$0x3] }
  0xc1   : > { %v417_v47 = vmul.f32 %v6146_v5, %v5592_v1  ;;  %v1782_v20 = vadd.f32 %v1728_v38, %v1618_v44  ;;  %v581_v9 = vmul.f32 %v6151_v60, %v5596_v4  ;;  %v745_v26 = vmul.f32 %v6154_v39, %v5601_v8 }
  0xc2   : > { %v963_v63 = vadd.f32 %v909_v3, %v798_v55  ;;  %v5262_v54 = vpop.eup %5261  ;;  %5269 = vrcp.f32 %v1997_v33  ;;  %v1455_v53 = vadd.f32 %v1401_v25, %v1290_v36  ;;  %v1729_v12 = vmul.f32 %v6321_v22, %v5629_v30 }
  0xc3   : > { %v1402_v45 = vmul.f32 %v4468_v7, %v5619_v23  ;;  %2308 = vperm.xlu1 %5134, %v5262_v54   ;;  %v4630_v5 = vmul.f32 -1.442695, %v1782_v20  ;;  %v635_v37 = vadd.f32 %v581_v9, %v417_v47  ;;  %v910_v60 = vmul.f32 %v6278_v0, %v5607_v13 }
  0xc4   : > { %v1127_v38 = vadd.f32 %v1073_v43, %v963_v63  ;;  %v1619_v39 = vadd.f32 %v1565_v18, %v1455_v53  ;;  %v1566_v35 = vmul.f32 %v4523_v29, %v5621_v24  ;;  %v1730_v28 = vmul.f32 %v4578_v62, %v5629_v30  ;;  %v692_v43 = vld [vmem:[%s5590_s17 + $0x8a] sm:$0x3] }
  0xc5   : > { %v5264_v10 = vpop.eup %5263  ;;  %v1074_v42 = vmul.f32 %v6281_v34, %v5609_v14  ;;  %5271 = vpow2.f32 %v4630_v5  ;;  %v799_v46 = vadd.f32 %v745_v26, %v635_v37  ;;  %v418_v48 = vmul.f32 %v6176_v56, %v5592_v1  ;;  %v6382_v37 = vld [vmem:[%s5590_s17 + $0xb0] sm:$0xff] }
  0xc6   : > { %v2034_v41 = vadd.f32 1.0, %v5264_v10  ;;  %v1291_v52 = vadd.f32 %v1237_v51, %v1127_v38  ;;  %v1783_v49 = vadd.f32 %v1729_v12, %v1619_v39  ;;  %v582_v2 = vmul.f32 %v6180_v21, %v5596_v4  ;;  %v4306_v51 = vld [vmem:[%s5590_s17 + $0xa0] sm:$0x3]  ;;  %v6388_v10 = vld [vmem:[%s5590_s17 + $0xb2] sm:$0xff] }
  0xc7   : > { %v746_v40 = vmul.f32 %v6183_v16, %v5601_v8  ;;  %v5266_v61 = vpop.eup %5265  ;;  %v964_v31 = vadd.f32 %v910_v60, %v799_v46  ;;  %v1238_v3 = vmul.f32 %v6284_v17, %v5614_v19  ;;  %v1403_v56 = vmul.f32 %v6344_v59, %v5619_v23  ;;  %v528_v16 = vld [vmem:[%s5590_s17 + $0x89] sm:$0x3]  ;;  %v6385_v60 = vld [vmem:[%s5590_s17 + $0xb1] sm:$0xff] }
  0xc8   : > { %5273 = vrcp.f32 %v2034_v41  ;;  %v1456_v27 = vadd.f32 %v1402_v45, %v1291_v52  ;;  %2493 = vperm.xlu0 %5133, %v5266_v61   ;;  %v4631_v50 = vmul.f32 -1.442695, %v1783_v49  ;;  %v636_v25 = vadd.f32 %v582_v2, %v418_v48  ;;  %v4361_v45 = vld [vmem:[%s5590_s17 + $0xa1] sm:$0x3] }
  0xc9   : > { %v911_v21 = vmul.f32 %v6303_v6, %v5607_v13  ;;  %v1128_v32 = vadd.f32 %v1074_v42, %v964_v31  ;;  %v1567_v44 = vmul.f32 %v6347_v57, %v5621_v24  ;;  %v1731_v55 = vmul.f32 %v6350_v15, %v5629_v30  ;;  %v4416_v52 = vld [vmem:[%s5590_s17 + $0xa2] sm:$0x3]  ;;  %v4526_v31 = vld [vmem:[%s5590_s17 + $0xb9] sm:$0x3] }
  0xca   : > { %v1620_v18 = vadd.f32 %v1566_v35, %v1456_v27  ;;  %v5268_v7 = vpop.eup %5267  ;;  %5275 = vpow2.f32 %v4631_v50  ;;  %v800_v33 = vadd.f32 %v746_v40, %v636_v25  ;;  %v1075_v36 = vmul.f32 %v6306_v58, %v5609_v14  ;;  %v4471_v27 = vld [vmem:[%s5590_s17 + $0xb8] sm:$0x3] }
  0xcb   : > { %v419_v47 = vmul.f32 %v5592_v1, %v364_v11  ;;  %v2035_v20 = vadd.f32 1.0, %v5268_v7  ;;  %v1292_v29 = vadd.f32 %v1238_v3, %v1128_v32  ;;  %v583_v62 = vmul.f32 %v5596_v4, %v528_v16 }
  0xcc   : > { %v1784_v63 = vadd.f32 %v1730_v28, %v1620_v18  ;;  %v5270_v9 = vpop.eup %5269  ;;  %v965_v26 = vadd.f32 %v911_v21, %v800_v33  ;;  %v1239_v54 = vmul.f32 %v6321_v22, %v5614_v19  ;;  %v747_v53 = vmul.f32 %v5601_v8, %v692_v43  ;;  %v4581_v33 = vld [vmem:[%s5590_s17 + $0xba] sm:$0x3] }
  0xcd   : > { %v912_v12 = vmul.f32 %v4306_v51, %v5607_v13  ;;  %2313 = vperm.xlu1 %5134, %v5270_v9   ;;  %5277 = vrcp.f32 %v2035_v20  ;;  %v1457_v38 = vadd.f32 %v1403_v56, %v1292_v29  ;;  %v637_v39 = vadd.f32 %v583_v62, %v419_v47 }
  0xce   : > { %v4632_v5 = vmul.f32 -1.442695, %v1784_v63  ;;  %v1129_v35 = vadd.f32 %v1075_v36, %v965_v26  ;;  %v1404_v28 = vmul.f32 %v6382_v37, %v5619_v23  ;;  %v1568_v42 = vmul.f32 %v6385_v60, %v5621_v24  ;;  %v6419_v26 = vld [vmem:[%s5590_s17 + $0xc0] sm:$0xff] }
  0xcf   : > { %v1732_v41 = vmul.f32 %v6388_v10, %v5629_v30  ;;  %v5272_v46 = vpop.eup %5271  ;;  %v1621_v49 = vadd.f32 %v1567_v44, %v1457_v38  ;;  %v801_v48 = vadd.f32 %v747_v53, %v637_v39  ;;  %v1076_v2 = vmul.f32 %v4361_v45, %v5609_v14  ;;  %v6429_v38 = vld [vmem:[%s5590_s17 + $0xc1] sm:$0xff] }
  0xd0   : > { %5279 = vpow2.f32 %v4632_v5  ;;  %v1998_v40 = vadd.f32 1.0, %v5272_v46  ;;  %v1293_v61 = vadd.f32 %v1239_v54, %v1129_v35  ;;  %v420_v3 = vmul.f32 %v6278_v0, %v5592_v1  ;;  %v6432_v39 = vld [vmem:[%s5590_s17 + $0xc2] sm:$0xff]  ;;  %v367_v35 = vld [vmem:[%s5590_s17 + $0xa0] sm:$0x3] }
  0xd1   : > { %v584_v11 = vmul.f32 %v6281_v34, %v5596_v4  ;;  %v1785_v56 = vadd.f32 %v1731_v55, %v1621_v49  ;;  %v966_v25 = vadd.f32 %v912_v12, %v801_v48  ;;  %v1240_v21 = vmul.f32 %v4416_v52, %v5614_v19  ;;  %v695_v52 = vld [vmem:[%s5590_s17 + $0xa2] sm:$0x3] }
  0xd2   : > { %v5274_v50 = vpop.eup %5273  ;;  %v748_v16 = vmul.f32 %v6284_v17, %v5601_v8  ;;  %5281 = vrcp.f32 %v1998_v40  ;;  %v1458_v18 = vadd.f32 %v1404_v28, %v1293_v61  ;;  %v913_v44 = vmul.f32 %v6344_v59, %v5607_v13 }
  0xd3   : > { %2498 = vperm.xlu0 %5133, %v5274_v50   ;;  %v638_v32 = vadd.f32 %v584_v11, %v420_v3  ;;  %v4633_v0 = vmul.f32 -1.442695, %v1785_v56  ;;  %v1130_v43 = vadd.f32 %v1076_v2, %v966_v25  ;;  %v1405_v34 = vmul.f32 %v4471_v27, %v5619_v23  ;;  %v6446_v3 = vld [vmem:[%s5590_s17 + $0xc8] sm:$0xff]  ;;  %v4309_v11 = vld [vmem:[%s5590_s17 + $0xb8] sm:$0x3] }
  0xd4   : > { %v1569_v55 = vmul.f32 %v4526_v31, %v5621_v24  ;;  %v5276_v51 = vpop.eup %5275  ;;  %v1622_v7 = vadd.f32 %v1568_v42, %v1458_v18  ;;  %v1077_v17 = vmul.f32 %v6347_v57, %v5609_v14  ;;  %v1241_v47 = vmul.f32 %v6350_v15, %v5614_v19  ;;  %v6450_v56 = vld [vmem:[%s5590_s17 + $0xc9] sm:$0xff] }
  0xd5   : > { %v802_v36 = vadd.f32 %v748_v16, %v638_v32  ;;  %v1999_v20 = vadd.f32 1.0, %v5276_v51  ;;  %5283 = vpow2.f32 %v4633_v0  ;;  %v1294_v63 = vadd.f32 %v1240_v21, %v1130_v43  ;;  %v6453_v25 = vld [vmem:[%s5590_s17 + $0xca] sm:$0xff] }
  0xd6   : > { %v421_v29 = vmul.f32 %v6303_v6, %v5592_v1  ;;  %v1786_v62 = vadd.f32 %v1732_v41, %v1622_v7  ;;  %v585_v54 = vmul.f32 %v6306_v58, %v5596_v4  ;;  %v749_v53 = vmul.f32 %v6321_v22, %v5601_v8  ;;  %v531_v41 = vld [vmem:[%s5590_s17 + $0xa1] sm:$0x3] }
  0xd7   : > { %v967_v9 = vadd.f32 %v913_v44, %v802_v36  ;;  %v5278_v12 = vpop.eup %5277  ;;  %5285 = vrcp.f32 %v1999_v20  ;;  %v1459_v45 = vadd.f32 %v1405_v34, %v1294_v63  ;;  %v1733_v5 = vmul.f32 %v4581_v33, %v5629_v30  ;;  %v4364_v34 = vld [vmem:[%s5590_s17 + $0xb9] sm:$0x3] }
  0xd8   : > { %v1406_v6 = vmul.f32 %v6419_v26, %v5619_v23  ;;  %2503 = vperm.xlu1 %5134, %v5278_v12   ;;  %v4634_v58 = vmul.f32 -1.442695, %v1786_v62  ;;  %v639_v42 = vadd.f32 %v585_v54, %v421_v29  ;;  %v914_v22 = vmul.f32 %v6382_v37, %v5607_v13  ;;  %v4419_v63 = vld [vmem:[%s5590_s17 + $0xba] sm:$0x3]  ;;  %v4474_v54 = vld [vmem:[%s5590_s17 + $0xd0] sm:$0x3] }
  0xd9   : > { %v1131_v28 = vadd.f32 %v1077_v17, %v967_v9  ;;  %v1623_v49 = vadd.f32 %v1569_v55, %v1459_v45  ;;  %v1570_v48 = vmul.f32 %v6429_v38, %v5621_v24  ;;  %v1734_v2 = vmul.f32 %v6432_v39, %v5629_v30 }
  0xda   : > { %v5280_v46 = vpop.eup %5279  ;;  %v1078_v40 = vmul.f32 %v6385_v60, %v5609_v14  ;;  %5287 = vpow2.f32 %v4634_v58  ;;  %v803_v31 = vadd.f32 %v749_v53, %v639_v42  ;;  %v422_v21 = vmul.f32 %v5592_v1, %v367_v35  ;;  %v4584_v35 = vld [vmem:[%s5590_s17 + $0xd2] sm:$0x3] }
  0xdb   : > { %v2000_v61 = vadd.f32 1.0, %v5280_v46  ;;  %v1295_v27 = vadd.f32 %v1241_v47, %v1131_v28  ;;  %v1787_v50 = vadd.f32 %v1733_v5, %v1623_v49  ;;  %v586_v16 = vmul.f32 %v5596_v4, %v531_v41 }
  0xdc   : > { %v750_v18 = vmul.f32 %v5601_v8, %v695_v52  ;;  %v5282_v32 = vpop.eup %5281  ;;  %v968_v0 = vadd.f32 %v914_v22, %v803_v31  ;;  %v1242_v43 = vmul.f32 %v6388_v10, %v5614_v19  ;;  %v1407_v51 = vmul.f32 %v6446_v3, %v5619_v23 }
  0xdd   : > { %5289 = vrcp.f32 %v2000_v61  ;;  %v1460_v44 = vadd.f32 %v1406_v6, %v1295_v27  ;;  %2318 = vperm.xlu0 %5133, %v5282_v32   ;;  %v4635_v55 = vmul.f32 -1.442695, %v1787_v50  ;;  %v640_v7 = vadd.f32 %v586_v16, %v422_v21  ;;  %v4529_v6 = vld [vmem:[%s5590_s17 + $0xd1] sm:$0x3]  ;;  %v6488_v21 = vld [vmem:[%s5590_s17 + $0xd8] sm:$0xff] }
  0xde   : > { %v915_v33 = vmul.f32 %v4309_v11, %v5607_v13  ;;  %v1132_v17 = vadd.f32 %v1078_v40, %v968_v0  ;;  %v1571_v47 = vmul.f32 %v6450_v56, %v5621_v24  ;;  %v1735_v20 = vmul.f32 %v6453_v25, %v5629_v30  ;;  %v6491_v16 = vld [vmem:[%s5590_s17 + $0xd9] sm:$0xff] }
  0xdf   : > { %v1624_v36 = vadd.f32 %v1570_v48, %v1460_v44  ;;  %v5284_v29 = vpop.eup %5283  ;;  %5291 = vpow2.f32 %v4635_v55  ;;  %v804_v62 = vadd.f32 %v750_v18, %v640_v7  ;;  %v1079_v9 = vmul.f32 %v4364_v34, %v5609_v14 }
  0xe0   : > { %v423_v53 = vmul.f32 %v6344_v59, %v5592_v1  ;;  %v2001_v12 = vadd.f32 1.0, %v5284_v29  ;;  %v1296_v5 = vadd.f32 %v1242_v43, %v1132_v17  ;;  %v587_v58 = vmul.f32 %v6347_v57, %v5596_v4 }
  0xe1   : > { %v1788_v45 = vadd.f32 %v1734_v2, %v1624_v36  ;;  %v5286_v28 = vpop.eup %5285  ;;  %v969_v42 = vadd.f32 %v915_v33, %v804_v62  ;;  %v1243_v22 = vmul.f32 %v4419_v63, %v5614_v19  ;;  %v751_v41 = vmul.f32 %v6350_v15, %v5601_v8  ;;  %v6511_v62 = vld [vmem:[%s5590_s17 + $0xda] sm:$0xff] }
  0xe2   : > { %v916_v52 = vmul.f32 %v6419_v26, %v5607_v13  ;;  %2323 = vperm.xlu1 %5134, %v5286_v28   ;;  %5293 = vrcp.f32 %v2001_v12  ;;  %v1461_v46 = vadd.f32 %v1407_v51, %v1296_v5  ;;  %v641_v49 = vadd.f32 %v587_v58, %v423_v53  ;;  %v6520_v28 = vld [vmem:[%s5590_s17 + $0xe0] sm:$0xff] }
  0xe3   : > { %v4636_v59 = vmul.f32 -1.442695, %v1788_v45  ;;  %v1133_v48 = vadd.f32 %v1079_v9, %v969_v42  ;;  %v1408_v57 = vmul.f32 %v4474_v54, %v5619_v23  ;;  %v1572_v2 = vmul.f32 %v4529_v6, %v5621_v24  ;;  %v4312_v6 = vld [vmem:[%s5590_s17 + $0xd0] sm:$0x3] }
  0xe4   : > { %v1736_v40 = vmul.f32 %v4584_v35, %v5629_v30  ;;  %v5288_v61 = vpop.eup %5287  ;;  %v1625_v15 = vadd.f32 %v1571_v47, %v1461_v46  ;;  %v805_v27 = vadd.f32 %v751_v41, %v641_v49  ;;  %v1080_v31 = vmul.f32 %v6429_v38, %v5609_v14  ;;  %v4367_v41 = vld [vmem:[%s5590_s17 + $0xd1] sm:$0x3] }
  0xe5   : > { %5295 = vpow2.f32 %v4636_v59  ;;  %v2002_v11 = vadd.f32 1.0, %v5288_v61  ;;  %v1297_v50 = vadd.f32 %v1243_v22, %v1133_v48  ;;  %v424_v18 = vmul.f32 %v6382_v37, %v5592_v1 }
  0xe6   : > { %v588_v32 = vmul.f32 %v6385_v60, %v5596_v4  ;;  %v1789_v0 = vadd.f32 %v1735_v20, %v1625_v15  ;;  %v970_v43 = vadd.f32 %v916_v52, %v805_v27  ;;  %v1244_v34 = vmul.f32 %v6432_v39, %v5614_v19  ;;  %v370_v60 = vld [vmem:[%s5590_s17 + $0xb8] sm:$0x3] }
  0xe7   : > { %v5290_v44 = vpop.eup %5289  ;;  %v752_v55 = vmul.f32 %v6388_v10, %v5601_v8  ;;  %5297 = vrcp.f32 %v2002_v11  ;;  %v1462_v51 = vadd.f32 %v1408_v57, %v1297_v50  ;;  %v917_v37 = vmul.f32 %v6446_v3, %v5607_v13  ;;  %v534_v20 = vld [vmem:[%s5590_s17 + $0xb9] sm:$0x3] }
  0xe8   : > { %2328 = vperm.xlu0 %5133, %v5290_v44   ;;  %v642_v7 = vadd.f32 %v588_v32, %v424_v18  ;;  %v4637_v33 = vmul.f32 -1.442695, %v1789_v0  ;;  %v1134_v36 = vadd.f32 %v1080_v31, %v970_v43  ;;  %v1409_v17 = vmul.f32 %v6488_v21, %v5619_v23  ;;  %v698_v10 = vld [vmem:[%s5590_s17 + $0xba] sm:$0x3]  ;;  %v4422_v32 = vld [vmem:[%s5590_s17 + $0xd2] sm:$0x3] }
  0xe9   : > { %v1573_v47 = vmul.f32 %v6491_v16, %v5621_v24  ;;  %v5292_v63 = vpop.eup %5291  ;;  %v1626_v29 = vadd.f32 %v1572_v2, %v1462_v51  ;;  %v1081_v54 = vmul.f32 %v6450_v56, %v5609_v14  ;;  %v1245_v53 = vmul.f32 %v6453_v25, %v5614_v19  ;;  %v6530_v2 = vld [vmem:[%s5590_s17 + $0xe1] sm:$0xff]  ;;  %v4532_v51 = vld [vmem:[%s5590_s17 + $0xe9] sm:$0x3] }
  0xea   : > { %v806_v9 = vadd.f32 %v752_v55, %v642_v7  ;;  %v2003_v12 = vadd.f32 1.0, %v5292_v63  ;;  %5299 = vpow2.f32 %v4637_v33  ;;  %v1298_v45 = vadd.f32 %v1244_v34, %v1134_v36  ;;  %v4477_v34 = vld [vmem:[%s5590_s17 + $0xe8] sm:$0x3]  ;;  %v4587_v7 = vld [vmem:[%s5590_s17 + $0xea] sm:$0x3] }
  0xeb   : > { %v425_v5 = vmul.f32 %v5592_v1, %v370_v60  ;;  %v1790_v35 = vadd.f32 %v1736_v40, %v1626_v29  ;;  %v589_v42 = vmul.f32 %v5596_v4, %v534_v20  ;;  %v753_v22 = vmul.f32 %v5601_v8, %v698_v10  ;;  %v6533_v40 = vld [vmem:[%s5590_s17 + $0xe2] sm:$0xff] }
  0xec   : > { %v971_v58 = vadd.f32 %v917_v37, %v806_v9  ;;  %v5294_v52 = vpop.eup %5293  ;;  %5301 = vrcp.f32 %v2003_v12  ;;  %v1463_v59 = vadd.f32 %v1409_v17, %v1298_v45  ;;  %v1737_v46 = vmul.f32 %v6511_v62, %v5629_v30 }
  0xed   : > { %v1410_v49 = vmul.f32 %v6520_v28, %v5619_v23  ;;  %2333 = vperm.xlu1 %5134, %v5294_v52   ;;  %v4638_v48 = vmul.f32 -1.442695, %v1790_v35  ;;  %v643_v61 = vadd.f32 %v589_v42, %v425_v5  ;;  %v918_v15 = vmul.f32 %v4312_v6, %v5607_v13 }
  0xee   : > { %v1135_v57 = vadd.f32 %v1081_v54, %v971_v58  ;;  %v1627_v31 = vadd.f32 %v1573_v47, %v1463_v59  ;;  %v1574_v11 = vmul.f32 %v6530_v2, %v5621_v24  ;;  %v1738_v50 = vmul.f32 %v6533_v40, %v5629_v30  ;;  %v6566_v59 = vld [vmem:[%s5590_s17 + $0xf0] sm:$0xff] }
  0xef   : > { %v5296_v27 = vpop.eup %5295  ;;  %v1082_v18 = vmul.f32 %v4367_v41, %v5609_v14  ;;  %5303 = vpow2.f32 %v4638_v48  ;;  %v807_v43 = vadd.f32 %v753_v22, %v643_v61  ;;  %v426_v37 = vmul.f32 %v6419_v26, %v5592_v1  ;;  %v6577_v61 = vld [vmem:[%s5590_s17 + $0xf2] sm:$0xff] }
  0xf0   : > { %v2004_v44 = vadd.f32 1.0, %v5296_v27  ;;  %v1299_v0 = vadd.f32 %v1245_v53, %v1135_v57  ;;  %v1791_v55 = vadd.f32 %v1737_v46, %v1627_v31  ;;  %v590_v60 = vmul.f32 %v6429_v38, %v5596_v4  ;;  %v6574_v57 = vld [vmem:[%s5590_s17 + $0xf1] sm:$0xff] }
  0xf1   : > { %v754_v33 = vmul.f32 %v6432_v39, %v5601_v8  ;;  %v5298_v36 = vpop.eup %5297  ;;  %v972_v47 = vadd.f32 %v918_v15, %v807_v43  ;;  %v1246_v20 = vmul.f32 %v4422_v32, %v5614_v19  ;;  %v1411_v63 = vmul.f32 %v4477_v34, %v5619_v23  ;;  %v537_v27 = vld [vmem:[%s5590_s17 + $0xd1] sm:$0x3]  ;;  %v4315_v34 = vld [vmem:[%s5590_s17 + $0xe8] sm:$0x3] }
  0xf2   : > { %5305 = vrcp.f32 %v2004_v44  ;;  %v1464_v17 = vadd.f32 %v1410_v49, %v1299_v0  ;;  %2338 = vperm.xlu0 %5133, %v5298_v36   ;;  %v4639_v10 = vmul.f32 -1.442695, %v1791_v55  ;;  %v644_v29 = vadd.f32 %v590_v60, %v426_v37  ;;  %v373_v49 = vld [vmem:[%s5590_s17 + $0xd0] sm:$0x3]  ;;  %v6594_v37 = vld [vmem:[%s5590_s17 + $0xf9] sm:$0xff] }
  0xf3   : > { %v919_v26 = vmul.f32 %v6488_v21, %v5607_v13  ;;  %v1136_v38 = vadd.f32 %v1082_v18, %v972_v47  ;;  %v1575_v54 = vmul.f32 %v4532_v51, %v5621_v24  ;;  %v1739_v39 = vmul.f32 %v4587_v7, %v5629_v30  ;;  %v701_v18 = vld [vmem:[%s5590_s17 + $0xd2] sm:$0x3]  ;;  %v6591_v7 = vld [vmem:[%s5590_s17 + $0xf8] sm:$0xff] }
  0xf4   : > { %v1628_v9 = vadd.f32 %v1574_v11, %v1464_v17  ;;  %v5300_v53 = vpop.eup %5299  ;;  %5307 = vpow2.f32 %v4639_v10  ;;  %v808_v12 = vadd.f32 %v754_v33, %v644_v29  ;;  %v1083_v45 = vmul.f32 %v6491_v16, %v5609_v14  ;;  %v4425_v29 = vld [vmem:[%s5590_s17 + $0xea] sm:$0x3] }
  0xf5   : > { %v427_v5 = vmul.f32 %v6446_v3, %v5592_v1  ;;  %v2005_v6 = vadd.f32 1.0, %v5300_v53  ;;  %v1300_v58 = vadd.f32 %v1246_v20, %v1136_v38  ;;  %v591_v42 = vmul.f32 %v6450_v56, %v5596_v4 }
  0xf6   : > { %v1792_v35 = vadd.f32 %v1738_v50, %v1628_v9  ;;  %v5302_v22 = vpop.eup %5301  ;;  %v973_v41 = vadd.f32 %v919_v26, %v808_v12  ;;  %v1247_v52 = vmul.f32 %v6511_v62, %v5614_v19  ;;  %v755_v3 = vmul.f32 %v6453_v25, %v5601_v8 }
  0xf7   : > { %v920_v46 = vmul.f32 %v6520_v28, %v5607_v13  ;;  %2343 = vperm.xlu1 %5134, %v5302_v22   ;;  %5309 = vrcp.f32 %v2005_v6  ;;  %v1465_v56 = vadd.f32 %v1411_v63, %v1300_v58  ;;  %v645_v15 = vadd.f32 %v591_v42, %v427_v5  ;;  %v4370_v63 = vld [vmem:[%s5590_s17 + $0xe9] sm:$0x3]  ;;  %v6609_v6 = vld [vmem:[%s5590_s17 + $0xfa] sm:$0xff] }
  0xf8   : > { %v4640_v48 = vmul.f32 -1.442695, %v1792_v35  ;;  %v1137_v31 = vadd.f32 %v1083_v45, %v973_v41  ;;  %v1412_v25 = vmul.f32 %v6566_v59, %v5619_v23  ;;  %v1576_v11 = vmul.f32 %v6574_v57, %v5621_v24  ;;  %v4480_v22 = vld [vmem:[%s5590_s17 + $0x100] sm:$0x3] }
  0xf9   : > { %v1740_v50 = vmul.f32 %v6577_v61, %v5629_v30  ;;  %v5304_v32 = vpop.eup %5303  ;;  %v1629_v44 = vadd.f32 %v1575_v54, %v1465_v56  ;;  %v809_v0 = vadd.f32 %v755_v3, %v645_v15  ;;  %v1084_v43 = vmul.f32 %v6530_v2, %v5609_v14  ;;  %v4590_v56 = vld [vmem:[%s5590_s17 + $0x102] sm:$0x3] }
  0xfa   : > { %5311 = vpow2.f32 %v4640_v48  ;;  %v2006_v55 = vadd.f32 1.0, %v5304_v32  ;;  %v1301_v51 = vadd.f32 %v1247_v52, %v1137_v31  ;;  %v428_v60 = vmul.f32 %v5592_v1, %v373_v49  ;;  %v4535_v48 = vld [vmem:[%s5590_s17 + $0x101] sm:$0x3] }
  0xfb   : > { %v592_v33 = vmul.f32 %v5596_v4, %v537_v27  ;;  %v1793_v17 = vadd.f32 %v1739_v39, %v1629_v44  ;;  %v974_v47 = vadd.f32 %v920_v46, %v809_v0  ;;  %v1248_v20 = vmul.f32 %v6533_v40, %v5614_v19 }
  0xfc   : > { %v5306_v36 = vpop.eup %5305  ;;  %v756_v10 = vmul.f32 %v5601_v8, %v701_v18  ;;  %5313 = vrcp.f32 %v2006_v55  ;;  %v1466_v26 = vadd.f32 %v1412_v25, %v1301_v51  ;;  %v921_v38 = vmul.f32 %v4315_v34, %v5607_v13 }
  0xfd   : > { %2348 = vperm.xlu0 %5133, %v5306_v36   ;;  %v646_v9 = vadd.f32 %v592_v33, %v428_v60  ;;  %v4641_v54 = vmul.f32 -1.442695, %v1793_v17  ;;  %v1138_v53 = vadd.f32 %v1084_v43, %v974_v47  ;;  %v1413_v39 = vmul.f32 %v6591_v7, %v5619_v23  ;;  %v6632_v33 = vld [vmem:[%s5590_s17 + $0x108] sm:$0xff] }
  0xfe   : > { %v1577_v12 = vmul.f32 %v6594_v37, %v5621_v24  ;;  %v5308_v45 = vpop.eup %5307  ;;  %v1630_v5 = vadd.f32 %v1576_v11, %v1466_v26  ;;  %v1085_v58 = vmul.f32 %v4370_v63, %v5609_v14  ;;  %v1249_v42 = vmul.f32 %v4425_v29, %v5614_v19  ;;  %v6635_v17 = vld [vmem:[%s5590_s17 + $0x109] sm:$0xff] }
  0xff   : > { %v810_v35 = vadd.f32 %v756_v10, %v646_v9  ;;  %v2007_v41 = vadd.f32 1.0, %v5308_v45  ;;  %5315 = vpow2.f32 %v4641_v54  ;;  %v1302_v52 = vadd.f32 %v1248_v20, %v1138_v53  ;;  %v6638_v47 = vld [vmem:[%s5590_s17 + $0x10a] sm:$0xff]  ;;  %v376_v54 = vld [vmem:[%s5590_s17 + $0xe8] sm:$0x3] }
 0x100   : > { %v429_v3 = vmul.f32 %v6488_v21, %v5592_v1  ;;  %v1794_v46 = vadd.f32 %v1740_v50, %v1630_v5  ;;  %v593_v15 = vmul.f32 %v6491_v16, %v5596_v4  ;;  %v757_v27 = vmul.f32 %v6511_v62, %v5601_v8 }
 0x101   : > { %v975_v49 = vadd.f32 %v921_v38, %v810_v35  ;;  %v5310_v31 = vpop.eup %5309  ;;  %5317 = vrcp.f32 %v2007_v41  ;;  %v1467_v25 = vadd.f32 %v1413_v39, %v1302_v52  ;;  %v1741_v11 = vmul.f32 %v6609_v6, %v5629_v30 }
 0x102   : > { %v1414_v18 = vmul.f32 %v4480_v22, %v5619_v23  ;;  %2353 = vperm.xlu1 %5134, %v5310_v31   ;;  %v4642_v21 = vmul.f32 -1.442695, %v1794_v46  ;;  %v647_v32 = vadd.f32 %v593_v15, %v429_v3  ;;  %v922_v16 = vmul.f32 %v6566_v59, %v5607_v13 }
 0x103   : > { %v1139_v50 = vadd.f32 %v1085_v58, %v975_v49  ;;  %v1631_v62 = vadd.f32 %v1577_v12, %v1467_v25  ;;  %v1578_v0 = vmul.f32 %v4535_v48, %v5621_v24  ;;  %v1742_v43 = vmul.f32 %v4590_v56, %v5629_v30  ;;  %v704_v58 = vld [vmem:[%s5590_s17 + $0xea] sm:$0x3] }
 0x104   : > { %v5312_v44 = vpop.eup %5311  ;;  %v1086_v34 = vmul.f32 %v6574_v57, %v5609_v14  ;;  %5319 = vpow2.f32 %v4642_v21  ;;  %v811_v60 = vadd.f32 %v757_v27, %v647_v32  ;;  %v430_v20 = vmul.f32 %v6520_v28, %v5592_v1  ;;  %v6670_v32 = vld [vmem:[%s5590_s17 + $0x110] sm:$0xff] }
 0x105   : > { %v2008_v55 = vadd.f32 1.0, %v5312_v44  ;;  %v1303_v51 = vadd.f32 %v1249_v42, %v1139_v50  ;;  %v1795_v36 = vadd.f32 %v1741_v11, %v1631_v62  ;;  %v594_v10 = vmul.f32 %v6530_v2, %v5596_v4  ;;  %v4318_v42 = vld [vmem:[%s5590_s17 + $0x100] sm:$0x3]  ;;  %v6676_v44 = vld [vmem:[%s5590_s17 + $0x112] sm:$0xff] }
 0x106   : > { %v758_v63 = vmul.f32 %v6533_v40, %v5601_v8  ;;  %v5314_v29 = vpop.eup %5313  ;;  %v976_v9 = vadd.f32 %v922_v16, %v811_v60  ;;  %v1250_v38 = vmul.f32 %v6577_v61, %v5614_v19  ;;  %v1415_v28 = vmul.f32 %v6632_v33, %v5619_v23  ;;  %v540_v40 = vld [vmem:[%s5590_s17 + $0xe9] sm:$0x3]  ;;  %v6673_v16 = vld [vmem:[%s5590_s17 + $0x111] sm:$0xff] }
 0x107   : > { %5321 = vrcp.f32 %v2008_v55  ;;  %v1468_v26 = vadd.f32 %v1414_v18, %v1303_v51  ;;  %2358 = vperm.xlu0 %5133, %v5314_v29   ;;  %v4643_v53 = vmul.f32 -1.442695, %v1795_v36  ;;  %v648_v39 = vadd.f32 %v594_v10, %v430_v20  ;;  %v4373_v18 = vld [vmem:[%s5590_s17 + $0x101] sm:$0x3] }
 0x108   : > { %v923_v2 = vmul.f32 %v6591_v7, %v5607_v13  ;;  %v1140_v45 = vadd.f32 %v1086_v34, %v976_v9  ;;  %v1579_v5 = vmul.f32 %v6635_v17, %v5621_v24  ;;  %v1743_v35 = vmul.f32 %v6638_v47, %v5629_v30  ;;  %v4428_v51 = vld [vmem:[%s5590_s17 + $0x102] sm:$0x3]  ;;  %v4538_v9 = vld [vmem:[%s5590_s17 + $0x119] sm:$0x3] }
 0x109   : > { %v1632_v12 = vadd.f32 %v1578_v0, %v1468_v26  ;;  %v5316_v22 = vpop.eup %5315  ;;  %5323 = vpow2.f32 %v4643_v53  ;;  %v812_v41 = vadd.f32 %v758_v63, %v648_v39  ;;  %v1087_v52 = vmul.f32 %v6594_v37, %v5609_v14  ;;  %v4483_v26 = vld [vmem:[%s5590_s17 + $0x118] sm:$0x3] }
 0x10a   : > { %v431_v3 = vmul.f32 %v5592_v1, %v376_v54  ;;  %v2009_v46 = vadd.f32 1.0, %v5316_v22  ;;  %v1304_v48 = vadd.f32 %v1250_v38, %v1140_v45  ;;  %v595_v56 = vmul.f32 %v5596_v4, %v540_v40 }
 0x10b   : > { %v1796_v49 = vadd.f32 %v1742_v43, %v1632_v12  ;;  %v5318_v15 = vpop.eup %5317  ;;  %v977_v27 = vadd.f32 %v923_v2, %v812_v41  ;;  %v1251_v31 = vmul.f32 %v6609_v6, %v5614_v19  ;;  %v759_v25 = vmul.f32 %v5601_v8, %v704_v58  ;;  %v4593_v41 = vld [vmem:[%s5590_s17 + $0x11a] sm:$0x3] }
 0x10c   : > { %v924_v11 = vmul.f32 %v4318_v42, %v5607_v13  ;;  %2363 = vperm.xlu1 %5134, %v5318_v15   ;;  %5325 = vrcp.f32 %v2009_v46  ;;  %v1469_v50 = vadd.f32 %v1415_v28, %v1304_v48  ;;  %v649_v62 = vadd.f32 %v595_v56, %v431_v3  ;;  %v6705_v46 = vld [vmem:[%s5590_s17 + $0x120] sm:$0xff]  ;;  %v6709_v15 = vpop.permute.xlu1 %2448 }
 0x10d   : > { %v4644_v21 = vmul.f32 -1.442695, %v1796_v49  ;;  %v1141_v0 = vadd.f32 %v1087_v52, %v977_v27  ;;  %v1416_v43 = vmul.f32 %v6670_v32, %v5619_v23  ;;  %v1580_v34 = vmul.f32 %v6673_v16, %v5621_v24  ;;  %v6711_v27 = vpop.permute.xlu0 %2438 }
 0x10e   : > { %v1744_v55 = vmul.f32 %v6676_v44, %v5629_v30  ;;  %v5320_v60 = vpop.eup %5319  ;;  %v1633_v36 = vadd.f32 %v1579_v5, %v1469_v50  ;;  %v813_v20 = vadd.f32 %v759_v25, %v649_v62  ;;  %v1088_v10 = vmul.f32 %v4373_v18, %v5609_v14 }
 0x10f   : > { %5327 = vpow2.f32 %v4644_v21  ;;  %v2010_v63 = vadd.f32 1.0, %v5320_v60  ;;  %v1305_v29 = vadd.f32 %v1251_v31, %v1141_v0  ;;  %v432_v38 = vmul.f32 %v6566_v59, %v5592_v1 }
 0x110   : > { %v596_v54 = vmul.f32 %v6574_v57, %v5596_v4  ;;  %v1797_v28 = vadd.f32 %v1743_v35, %v1633_v36  ;;  %v978_v39 = vadd.f32 %v924_v11, %v813_v20  ;;  %v1252_v2 = vmul.f32 %v4428_v51, %v5614_v19  ;;  %v6714_v11 = vld [vmem:[%s5590_s17 + $0x121] sm:$0xff] }
 0x111   : > { %v5322_v53 = vpop.eup %5321  ;;  %v760_v40 = vmul.f32 %v6577_v61, %v5601_v8  ;;  %5329 = vrcp.f32 %v2010_v63  ;;  %v1470_v12 = vadd.f32 %v1416_v43, %v1305_v29  ;;  %v925_v59 = vmul.f32 %v6632_v33, %v5607_v13 }
 0x112   : > { %2368 = vperm.xlu0 %5133, %v5322_v53   ;;  %v650_v45 = vadd.f32 %v596_v54, %v432_v38  ;;  %v4645_v5 = vmul.f32 -1.442695, %v1797_v28  ;;  %v1142_v58 = vadd.f32 %v1088_v10, %v978_v39  ;;  %v1417_v57 = vmul.f32 %v4483_v26, %v5619_v23  ;;  %v6735_v38 = vld [vmem:[%s5590_s17 + $0x128] sm:$0xff]  ;;  %v2444_v54 = vpop.permute.xlu0 %2443  ;;  %v6737_v53 = vpop.permute.xlu1 %2258 }
 0x113   : > { %v1581_v35 = vmul.f32 %v4538_v9, %v5621_v24  ;;  %v5324_v42 = vpop.eup %5323  ;;  %v1634_v22 = vadd.f32 %v1580_v34, %v1470_v12  ;;  %v1089_v61 = vmul.f32 %v6635_v17, %v5609_v14  ;;  %v1253_v3 = vmul.f32 %v6638_v47, %v5614_v19 }
 0x114   : > { %v814_v52 = vadd.f32 %v760_v40, %v650_v45  ;;  %v2011_v49 = vadd.f32 1.0, %v5324_v42  ;;  %5331 = vpow2.f32 %v4645_v5  ;;  %v1306_v48 = vadd.f32 %v1252_v2, %v1142_v58  ;;  %v6742_v45 = vld [vmem:[%s5590_s17 + $0x129] sm:$0xff] }
 0x115   : > { %v433_v56 = vmul.f32 %v6591_v7, %v5592_v1  ;;  %v1798_v31 = vadd.f32 %v1744_v55, %v1634_v22  ;;  %v597_v18 = vmul.f32 %v6594_v37, %v5596_v4  ;;  %v761_v21 = vmul.f32 %v6609_v6, %v5601_v8  ;;  %v6724_v55 = vld [vmem:[%s5590_s17 + $0x122] sm:$0xff] }
 0x116   : > { %v979_v25 = vadd.f32 %v925_v59, %v814_v52  ;;  %v5326_v50 = vpop.eup %5325  ;;  %5333 = vrcp.f32 %v2011_v49  ;;  %v1471_v62 = vadd.f32 %v1417_v57, %v1306_v48  ;;  %v1745_v7 = vmul.f32 %v4593_v41, %v5629_v30  ;;  %v6754_v49 = vpop.permute.xlu1 %2268 }
 0x117   : > { %v1418_v0 = vmul.f32 %v6705_v46, %v5619_v23  ;;  %2373 = vperm.xlu1 %5134, %v5326_v50   ;;  %v4646_v43 = vmul.f32 -1.442695, %v1798_v31  ;;  %v651_v51 = vadd.f32 %v597_v18, %v433_v56  ;;  %v926_v37 = vmul.f32 %v6670_v32, %v5607_v13 }
 0x118   : > { %v1143_v34 = vadd.f32 %v1089_v61, %v979_v25  ;;  %v1635_v6 = vadd.f32 %v1581_v35, %v1471_v62  ;;  %v1582_v36 = vmul.f32 %v6714_v11, %v5621_v24  ;;  %v1090_v20 = vmul.f32 %v6673_v16, %v5609_v14  ;;  %v6747_v35 = vld [vmem:[%s5590_s17 + $0x12a] sm:$0xff] }
 0x119   : > { %v5328_v60 = vpop.eup %5327  ;;  %5335 = vpow2.f32 %v4646_v43  ;;  %v815_v29 = vadd.f32 %v761_v21, %v651_v51  ;;  %v1746_v9 = vmul.f32 %v6724_v55, %v5629_v30  ;;  %v1254_v40 = vmul.f32 %v6676_v44, %v5614_v19 }
 0x11a   : > { %v2012_v10 = vadd.f32 1.0, %v5328_v60  ;;  %v1307_v63 = vadd.f32 %v1253_v3, %v1143_v34  ;;  %v1799_v26 = vadd.f32 %v1745_v7, %v1635_v6  ;;  %v1419_v58 = vmul.f32 %v6735_v38, %v5619_v23  ;;  %v6752_v3 = vpop.permute.xlu0 %2263  ;;  %v2186_v7 = vld [vmem:[%s6761_s23 + $0x98] sm:$0x1]  ;;  %v6764_v43 = vpop.permute.xlu1 %2458  ;;  %v4774_v6 = vld [vmem:[%s6761_s23 + $0x90] sm:$0xff]  }
 0x11b   : > { %v5330_v28 = vpop.eup %5329  ;;  %v980_v2 = vadd.f32 %v926_v37, %v815_v29  ;;  %v1583_v52 = vmul.f32 %v6742_v45, %v5621_v24  ;;  %v1747_v31 = vmul.f32 %v6747_v35, %v5629_v30  ;;  %v2240_v37 = vunpack.c.l.bf16 %v2186_v7 }
 0x11c   : > { %5337 = vrcp.f32 %v2012_v10  ;;  %v1472_v39 = vadd.f32 %v1418_v0, %v1307_v63  ;;  %2378 = vperm.xlu0 %5133, %v5330_v28   ;;  %v4647_v12 = vmul.f32 -1.442695, %v1799_v26 }
 0x11d   : > { %v1144_v5 = vadd.f32 %v1090_v20, %v980_v2  ;;  %v4760_v20 = vunpack.c.h.bf16 %v4774_v6  ;;  %v2564_v10 = vmul.f32 %v6709_v15, %v2240_v37  ;;  %v599_v15 = vmul.f32 %v6635_v17, %v5596_v4  ;;  %v4487_v37 = vld [vmem:[%s5590_s17 + $0x138] sm:$0xff] }
 0x11e   : > { %v1636_v59 = vadd.f32 %v1582_v36, %v1472_v39  ;;  %v5332_v57 = vpop.eup %5331  ;;  %5339 = vpow2.f32 %v4647_v12  ;;  %v2454_v0 = vpop.permute.xlu0 %2453  ;;  %v2151_v39 = vld [vmem:[%s6761_s23 + $0xc] sm:$0xff]  }
 0x11f   : > { %v2013_v42 = vadd.f32 1.0, %v5332_v57  ;;  %v1308_v41 = vadd.f32 %v1254_v40, %v1144_v5  ;;  %v2279_v29 = vpop.permute.xlu1 %2278  ;;  %v2563_v2 = vmul.f32 %v4760_v20, %v2444_v54  ;;  %v6769_v12 = vpack.c.bf16 %v2564_v10, %v2564_v10 }
 0x120   : > { %v1800_v22 = vadd.f32 %v1746_v9, %v1636_v59  ;;  %v5334_v61 = vpop.eup %5333  ;;  %v4759_v9 = vunpack.c.l.bf16 %v4774_v6  ;;  %v2187_v59 = vld [vmem:[%s6761_s23 + $0x9c] sm:$0xff]   ;;  %v435_v5 = vmul.f32 %v6632_v33, %v5592_v1  ;;  %v2205_v57 = vunpack.c.l.bf16 %v2151_v39 }
 0x121   : > { %2383 = vperm.xlu1 %5134, %v5334_v61   ;;  %5341 = vrcp.f32 %v2013_v42  ;;  %v1473_v56 = vadd.f32 %v1419_v58, %v1308_v41  ;;  %v2206_v42 = vunpack.c.h.bf16 %v2151_v39  ;;  %v763_v54 = vmul.f32 %v6638_v47, %v5601_v8 }
 0x122   : > { %v4648_v48 = vmul.f32 -1.442695, %v1800_v22  ;;  %v2274_v63 = vpop.permute.xlu0 %2273  ;;  %v2562_v58 = vmul.f32 %v4759_v9, %v6711_v27  ;;  %v928_v33 = vmul.f32 %v6705_v46, %v5607_v13  ;;  %v2241_v27 = vunpack.c.l.bf16 %v2187_v59 }
 0x123   : > { %v5336_v25 = vpop.eup %5335  ;;  %v1637_v18 = vadd.f32 %v1583_v52, %v1473_v56  ;;  %v6781_v41 = vpop.permute.xlu1 %2283  ;;  %v653_v52 = vadd.f32 %v599_v15, %v435_v5  ;;  %v543_v56 = vld [vmem:[%s5590_s17 + $0x101] sm:$0x3]  ;;  %v2769_v47 = vshll.u32 %v6769_v12, 16  ;;  %v2242_v46 = vunpack.c.h.bf16 %v2187_v59 }
 0x124   : > { %5343 = vpow2.f32 %v4648_v48  ;;  %v2014_v21 = vadd.f32 1.0, %v5336_v25  ;;  %v6785_v17 = vpack.c.bf16 %v2563_v2, %v2562_v58  ;;  %v379_v48 = vld [vmem:[%s5590_s17 + $0x100] sm:$0x3]  ;;  %v4775_v25 = vld [vmem:[%s6761_s23 + $0xa8] sm:$0xff]   ;;  %v2529_v7 = vmul.f32 %v2274_v63, %v2205_v57 }
 0x125   : > { %v1801_v62 = vadd.f32 %v1747_v31, %v1637_v18  ;;  %v817_v18 = vadd.f32 %v763_v54, %v653_v52  ;;  %v434_v20 = vmul.f32 %v5592_v1, %v379_v48  ;;  %v598_v10 = vmul.f32 %v5596_v4, %v543_v56  ;;  %v4597_v57 = vld [vmem:[%s5590_s17 + $0x13a] sm:$0xff] }
 0x126   : > { %v5338_v50 = vpop.eup %5337  ;;  %5345 = vrcp.f32 %v2014_v21  ;;  %v6779_v22 = vpop.permute.xlu0 %2463  ;;  %v1092_v21 = vmul.f32 %v6714_v11, %v5609_v14  ;;  %v2565_v11 = vmul.f32 %v2454_v0, %v2241_v27  ;;  %v4764_v9 = vunpack.c.h.bf16 %v4775_v25  ;;  %v4769_v52 = vld [vmem:[%s6761_s23 + $0x18] sm:$0xff]  }
 0x127   : > { %2388 = vperm.xlu0 %5133, %v5338_v50   ;;  %v4649_v34 = vmul.f32 -1.442695, %v1801_v62  ;;  %v707_v50 = vld [vmem:[%s5590_s17 + $0x102] sm:$0x3]  ;;  %v982_v6 = vadd.f32 %v928_v33, %v817_v18  ;;  %v1421_v2 = vmul.f32 %v4487_v37, %v5619_v23  ;;  %v2566_v5 = vmul.f32 %v6764_v43, %v2242_v46 }
 0x128   : > { %v5340_v51 = vpop.eup %5339  ;;  %v762_v63 = vmul.f32 %v5601_v8, %v707_v50  ;;  %v2764_v0 = vshll.u32 %v6785_v17, 16  ;;  %v436_v48 = vmul.f32 %v6670_v32, %v5592_v1  ;;  %v764_v18 = vmul.f32 %v6676_v44, %v5601_v8  ;;  %v4541_v32 = vld [vmem:[%s5590_s17 + $0x131] sm:$0x3] }
 0x129   : > { %v2015_v60 = vadd.f32 1.0, %v5340_v51  ;;  %5347 = vpow2.f32 %v4649_v34  ;;  %v2530_v34 = vmul.f32 %v2279_v29, %v2206_v42  ;;  %v1256_v51 = vmul.f32 %v6724_v55, %v5614_v19  ;;  %v4376_v29 = vld [vmem:[%s5590_s17 + $0x119] sm:$0x3] }
 0x12a   : > { %v2469_v55 = vpop.permute.xlu0 %2468  ;;  %v1146_v39 = vadd.f32 %v1092_v21, %v982_v6  ;;  %v4431_v42 = vld [vmem:[%s5590_s17 + $0x11a] sm:$0x3]  ;;  %v1091_v27 = vmul.f32 %v4376_v29, %v5609_v14  ;;  %v1749_v50 = vmul.f32 %v4597_v57, %v5629_v30  ;;  %v929_v37 = vmul.f32 %v6735_v38, %v5607_v13 }
 0x12b   : > { %v5342_v36 = vpop.eup %5341  ;;  %5349 = vrcp.f32 %v2015_v60  ;;  %v4321_v60 = vld [vmem:[%s5590_s17 + $0x118] sm:$0x3]  ;;  %v6806_v15 = vpack.c.bf16 %v2530_v34, %v2529_v7  ;;  %v1255_v46 = vmul.f32 %v4431_v42, %v5614_v19  ;;  %v4739_v7 = vunpack.c.l.bf16 %v4769_v52 }
 0x12c   : > { %2393 = vperm.xlu1 %5134, %v5342_v36   ;;  %v4542_v36 = vld [vmem:[%s5590_s17 + $0x139] sm:$0xff]  ;;  %v927_v59 = vmul.f32 %v4321_v60, %v5607_v13  ;;  %v1310_v33 = vadd.f32 %v1256_v51, %v1146_v39  ;;  %v4740_v34 = vunpack.c.h.bf16 %v4769_v52  ;;  %v1093_v38 = vmul.f32 %v6742_v45, %v5609_v14 }
 0x12d   : > { %v1585_v58 = vmul.f32 %v4542_v36, %v5621_v24 }
 0x12e   : > { %v5344_v26 = vpop.eup %5343  ;;  %v1475_v21 = vadd.f32 %v1421_v2, %v1310_v33  ;;  %v2289_v60 = vpop.permute.xlu0 %2288  ;;  %v4488_v2 = vld [vmem:[%s5590_s17 + $0x140] sm:$0xff] }
 0x12f   : > { %v2016_v28 = vadd.f32 1.0, %v5344_v26  ;;  %v4763_v26 = vunpack.c.l.bf16 %v4775_v25  ;;  %v600_v25 = vmul.f32 %v6673_v16, %v5596_v4  ;;  %v2766_v16 = vrot.slane %v2764_v0, 1 }
 0x130   : > { %v5346_v40 = vpop.eup %5345  ;;  %v1639_v36 = vadd.f32 %v1585_v58, %v1475_v21  ;;  %v1257_v0 = vmul.f32 %v6747_v35, %v5614_v19  ;;  %v1422_v33 = vmul.f32 %v4488_v2, %v5619_v23  ;;  %v2189_v2 = vld [vmem:[%s6761_s23 + $0xa4] sm:$0x1] }
 0x131   : > { %5351 = vrcp.f32 %v2016_v28  ;;  %2398 = vperm.xlu0 %5133, %v5346_v40   ;;  %v2474_v28 = vpop.permute.xlu1 %2473  ;;  %v652_v40 = vadd.f32 %v598_v10, %v434_v20  ;;  %v2568_v43 = vmul.f32 %v4763_v26, %v2469_v55  ;;  %v654_v51 = vadd.f32 %v600_v25, %v436_v48  ;;  %v382_v48 = vld [vmem:[%s5590_s17 + $0x118] sm:$0x3] }
 0x132   : > { %v2569_v56 = vmul.f32 %v4764_v9, %v2474_v28  ;;  %v6827_v10 = vpack.c.bf16 %v2566_v5, %v2565_v11  ;;  %v4596_v9 = vld [vmem:[%s5590_s17 + $0x132] sm:$0x3]  ;;  %v2762_v55 = vshrl.u32 %v6785_v17, 16  ;;  %v1803_v28 = vadd.f32 %v1749_v50, %v1639_v36  ;;  %v546_v25 = vld [vmem:[%s5590_s17 + $0x119] sm:$0x3] }
 0x133   : > { %v5348_v61 = vpop.eup %5347  ;;  %v1584_v11 = vmul.f32 %v4541_v32, %v5621_v24  ;;  %v1748_v42 = vmul.f32 %v4596_v9, %v5629_v30  ;;  %v710_v50 = vld [vmem:[%s5590_s17 + $0x11a] sm:$0x3]  ;;  %v4324_v32 = vld [vmem:[%s5590_s17 + $0x130] sm:$0x3]  ;;  %v5137_v9 = vld [vmem:[%s7956_s4 + $0x48] sm:$0xff]  }
 0x134   : > { %v2017_v31 = vadd.f32 1.0, %v5348_v61  ;;  %v816_v61 = vadd.f32 %v762_v63, %v652_v40  ;;  %v6831_v26 = vpack.c.bf16 %v2569_v56, %v2568_v43  ;;  %v818_v63 = vadd.f32 %v764_v18, %v654_v51  ;;  %v4734_v18 = vld [vmem:[%s6761_s23] sm:$0xff]  }
 0x135   : > { %v5350_v62 = vpop.eup %5349  ;;  %v2294_v6 = vpop.permute.xlu1 %2293  ;;  %v2532_v40 = vmul.f32 %v4739_v7, %v2289_v60  ;;  %v2767_v58 = vor.u32 %v2766_v16, %v2762_v55  ;;  %v4651_v45 = vmul.f32 -1.442695, %v1803_v28  ;;  %v4379_v60 = vld [vmem:[%s5590_s17 + $0x131] sm:$0x3]  ;;  %v765_v36 = vmul.f32 %v5601_v8, %v710_v50  ;;  %v5141_v50 = vld [vmem:[%s7956_s4 + $0x58] sm:$0xff]  }
 0x136   : > { %2403 = vperm.xlu1 %5134, %v5350_v62   ;;  %5353 = vrcp.f32 %v2017_v31  ;;  %v4486_v31 = vld [vmem:[%s5590_s17 + $0x130] sm:$0x3]  ;;  %v981_v62 = vadd.f32 %v927_v59, %v816_v61  ;;  %v2533_v59 = vmul.f32 %v4740_v34, %v2294_v6  ;;  %v983_v5 = vadd.f32 %v929_v37, %v818_v63  ;;  %v2150_v63 = vld [vmem:[%s6761_s23 + $0x8] sm:$0x1]  ;;  %v6883_v28 = vpop.permute.xlu0 %2478 }
 0x137   : > { %v1420_v20 = vmul.f32 %v4486_v31, %v5619_v23  ;;  %v2771_v61 = vrot.slane %v2769_v47, 1  ;;  %5355 = vpow2.f32 %v4651_v45  ;;  %v437_v34 = vmul.f32 %v5592_v1, %v382_v48  ;;  %v4489_v45 = vld [vmem:[%s5590_s17 + $0x148] sm:$0x3] }
 0x138   : > { %v1145_v44 = vadd.f32 %v1091_v27, %v981_v62  ;;  %v1147_v52 = vadd.f32 %v1093_v38, %v983_v5  ;;  %v4598_v27 = vld [vmem:[%s5590_s17 + $0x142] sm:$0xff]  ;;  %v6852_v43 = vpack.c.bf16 %v2533_v59, %v2532_v40  ;;  %v4736_v62 = vunpack.c.h.bf16 %v4734_v18 }
 0x139   : > { %v6858_v21 = vsel %vm2616_vm0, %v2767_v58, %v2771_v61  ;;  %v1750_v7 = vmul.f32 %v4598_v27, %v5629_v30  ;;  %v601_v37 = vmul.f32 %v5596_v4, %v546_v25  ;;  %v4735_v6 = vunpack.c.l.bf16 %v4734_v18  ;;  %v5138_v5 = vld [vmem:[%s7956_s4 + $0x8] sm:$0xff]  }
 0x13a   : > { %v1309_v39 = vadd.f32 %v1255_v46, %v1145_v44  ;;  %v1311_v56 = vadd.f32 %v1257_v0, %v1147_v52  ;;  %v5135_v44 = vld [vmem:[%s7956_s4 + $0x40] sm:$0xff]   ;;  %v2527_v55 = vmul.f32 %v4736_v62, %v6752_v3  ;;  %v1094_v59 = vmul.f32 %v4379_v60, %v5609_v14  ;;  %v4544_v27 = vld [vmem:[%s5590_s17 + $0x149] sm:$0x3]  ;;  %v6907_v18 = vpop.permute.xlu0 %2483  ;;  %v5142_v60 = vld [vmem:[%s7956_s4 + $0x18] sm:$0xff]  }
 0x13b   : > { %v5352_v54 = vpop.eup %5351  ;;  %v655_v38 = vadd.f32 %v601_v37, %v437_v34  ;;  %5061 = vmatprep.subr.bf16.mxu1 %v5135_v44  ;;  %4777 = vmatprep.subr.bf16.mxu0 %v5135_v44  ;;  %v2526_v0 = vmul.f32 %v4735_v6, %v6737_v53  ;;  %v2204_v58 = vunpack.c.l.bf16 %v2150_v63  ;;  %v2243_v61 = vunpack.c.l.bf16 %v2189_v2  ;;  %v6899_v53 = vpop.permute.xlu1 %2298  ;;  %v2153_v34 = vld [vmem:[%s6761_s23 + $0x14] sm:$0x1] }
 0x13c   : > { %2408 = vperm.xlu0 %5133, %v5352_v54   ;;  %v1474_v57 = vadd.f32 %v1420_v20, %v1309_v39  ;;  %v4543_v54 = vld [vmem:[%s5590_s17 + $0x141] sm:$0xff]  ;;  %v1476_v46 = vadd.f32 %v1422_v33, %v1311_v56  ;;  %v1423_v56 = vmul.f32 %v4489_v45, %v5619_v23  ;;  %v2207_v44 = vunpack.c.l.bf16 %v2153_v34 }
 0x13d   : > { %v1586_v31 = vmul.f32 %v4543_v54, %v5621_v24  ;;  %v5136_v20 = vld [vmem:[%s7956_s4] sm:$0xff]   ;;  %v819_v40 = vadd.f32 %v765_v36, %v655_v38  ;;  %v6897_v33 = vpack.c.bf16 %v2527_v55, %v2526_v0  ;;  %v2528_v25 = vmul.f32 %v6754_v49, %v2204_v58  ;;  %v5145_v0 = vld [vmem:[%s7956_s4 + $0x68] sm:$0xff]  }
 0x13e   : > { %v1638_v35 = vadd.f32 %v1584_v11, %v1474_v57  ;;  %v4434_v11 = vld [vmem:[%s5590_s17 + $0x132] sm:$0x3]  ;;  %5069 = vmatpush3.bf16.msra.mxu1 %v5136_v20  ;;  %4778 = vmatpush3.bf16.msra.mxu0 %v5136_v20  ;;  %v2192_v20 = vld [vmem:[%s6761_s23 + $0xb0] sm:$0x1]  ;;  %v6931_v38 = vpop.permute.xlu0 %2303  ;;  %v2531_v58 = vmul.f32 %v6781_v41, %v2207_v44 }
 0x13f   : > { %v1640_v16 = vadd.f32 %v1586_v31, %v1476_v46  ;;  %5062 = vmatprep.subr.bf16.mxu1 %v5137_v9  ;;  %v5139_v57 = vld [vmem:[%s7956_s4 + $0x50] sm:$0xff]   ;;  %v1258_v52 = vmul.f32 %v4434_v11, %v5614_v19  ;;  %4779 = vmatprep.subr.bf16.mxu0 %v5137_v9  ;;  %v1587_v46 = vmul.f32 %v4544_v27, %v5621_v24  ;;  %v2620_v49 = vshll.u32 %v6897_v33, 16  ;;  %v2195_v27 = vld [vmem:[%s6761_s23 + $0xbc] sm:$0x1] }
 0x140   : > { %2923 = vrot.lane.b32.xlu0 %v6806_v15, %s5472_s29  ;;  %v5354_v29 = vpop.eup %5353  ;;  %v1802_v47 = vadd.f32 %v1748_v42, %v1638_v35  ;;  %v5140_v31 = vld [vmem:[%s7956_s4 + $0x10] sm:$0xff]   ;;  %v6921_v6 = vpack.c.bf16 %v2528_v25, %v2528_v25  ;;  %v5146_v25 = vld [vmem:[%s7956_s4 + $0x28] sm:$0xff]  }
 0x141   : > { %2413 = vperm.xlu1 %5134, %v5354_v29   ;;  %v930_v29 = vmul.f32 %v4324_v32, %v5607_v13  ;;  %v1804_v39 = vadd.f32 %v1750_v7, %v1640_v16  ;;  %v5356_v42 = vpop.eup %5355  ;;  %v2567_v7 = vmul.f32 %v6779_v22, %v2243_v61  ;;  %v6923_v16 = vpop.permute.xlu1 %2488  ;;  %v5143_v22 = vld [vmem:[%s7956_s4 + $0x60] sm:$0xff]   ;;  %v5148_v44 = vld [vmem:[%s7956_s4 + $0x30] sm:$0xff]  }
 0x142   : > { %v4650_v51 = vmul.f32 -1.442695, %v1802_v47  ;;  %v2019_v35 = vadd.f32 1.0, %v5356_v42  ;;  %5070 = vmatpush3.bf16.msra.mxu1 %v5138_v5  ;;  %v4599_v47 = vld [vmem:[%s5590_s17 + $0x14a] sm:$0x3]  ;;  %4780 = vmatpush3.bf16.msra.mxu0 %v5138_v5  ;;  %v2625_v2 = vshll.u32 %v6921_v6, 16 }
 0x143   : > { %v4652_v3 = vmul.f32 -1.442695, %v1804_v39  ;;  %v984_v54 = vadd.f32 %v930_v29, %v819_v40  ;;  %5063 = vmatprep.subr.bf16.mxu1 %v5139_v57  ;;  %4781 = vmatprep.subr.bf16.mxu0 %v5139_v57  ;;  %v1751_v37 = vmul.f32 %v4599_v47, %v5629_v30  ;;  %v6929_v63 = vpack.c.bf16 %v2567_v7, %v2567_v7  ;;  %v5144_v39 = vld [vmem:[%s7956_s4 + $0x20] sm:$0xff]  }
 0x144   : > { %2949 = vrot.lane.b32.xlu0 %v6831_v26, %s5472_s29  ;;  %5357 = vpow2.f32 %v4650_v51  ;;  %v2622_v29 = vrot.slane %v2620_v49, 1  ;;  %v2246_v40 = vunpack.c.l.bf16 %v2192_v20  ;;  %v2776_v5 = vshll.u32 %v6827_v10, 16 }
 0x145   : > { %2947 = vrot.lane.b32.xlu1 %v6827_v10, %s5472_s29  ;;  %5359 = vpow2.f32 %v4652_v3  ;;  %v1148_v48 = vadd.f32 %v1094_v59, %v984_v54  ;;  %v2618_v59 = vshrl.u32 %v6897_v33, 16  ;;  %v2781_v42 = vshll.u32 %v6929_v63, 16  ;;  %v2156_v54 = vld [vmem:[%s6761_s23 + $0x20] sm:$0x1]  ;;  %v6946_v61 = vpop.permute.xlu1 %2308 }
 0x146   : > { %5361 = vrcp.f32 %v2019_v35  ;;  %5071 = vmatpush3.bf16.msra.mxu1 %v5140_v31  ;;  %4782 = vmatpush3.bf16.msra.mxu0 %v5140_v31  ;;  %v2778_v41 = vrot.slane %v2776_v5, 1  ;;  %v6953_v47 = vpack.c.bf16 %v2531_v58, %v2531_v58  ;;  %v2249_v49 = vunpack.c.l.bf16 %v2195_v27  ;;  %v2159_v5 = vld [vmem:[%s6761_s23 + $0x2c] sm:$0x1] }
 0x147   : > { %v1312_v62 = vadd.f32 %v1258_v52, %v1148_v48  ;;  %5064 = vmatprep.subr.bf16.mxu1 %v5141_v50  ;;  %4783 = vmatprep.subr.bf16.mxu0 %v5141_v50  ;;  %v2193_v52 = vld [vmem:[%s6761_s23 + $0xb4] sm:$0xff]   ;;  %v2623_v35 = vor.u32 %v2622_v29, %v2618_v59  ;;  %v2627_v48 = vrot.slane %v2625_v2, 1  ;;  %v2494_v31 = vpop.permute.xlu0 %2493  ;;  %v2210_v50 = vunpack.c.l.bf16 %v2156_v54  ;;  %v2157_v59 = vld [vmem:[%s6761_s23 + $0x24] sm:$0xff]  }
 0x148   : > { %2833 = vrot.lane.b32.xlu0 %v6858_v21, %s5472_s29  ;;  %v2783_v7 = vrot.slane %v2781_v42, 1  ;;  %v2637_v20 = vshll.u32 %v6953_v47, 16  ;;  %v2630_v42 = vshrl.u32 %v6806_v15, 16 }
 0x149   : > { %2925 = vrot.lane.b32.xlu1 %v6852_v43, %s5472_s29  ;;  %v1477_v51 = vadd.f32 %v1423_v56, %v1312_v62  ;;  %v2570_v56 = vmul.f32 %v6883_v28, %v2246_v40  ;;  %v2247_v62 = vunpack.c.l.bf16 %v2193_v52  ;;  %v2628_v34 = vsel %vm2616_vm0, %v2623_v35, %v2627_v48 }
 0x14a   : > { %5072 = vmatpush3.bf16.msra.mxu1 %v5142_v60  ;;  %4784 = vmatpush3.bf16.msra.mxu0 %v5142_v60  ;;  %v2774_v28 = vshrl.u32 %v6827_v10, 16  ;;  %v2212_v35 = vunpack.c.h.bf16 %v2157_v59  ;;  %v2213_v48 = vunpack.c.l.bf16 %v2159_v5 }
 0x14b   : > { %v1641_v9 = vadd.f32 %v1587_v46, %v1477_v51  ;;  %5065 = vmatprep.subr.bf16.mxu1 %v5143_v22  ;;  %4785 = vmatprep.subr.bf16.mxu0 %v5143_v22  ;;  %v2248_v46 = vunpack.c.h.bf16 %v2193_v52  ;;  %v2632_v51 = vshll.u32 %v6806_v15, 16  ;;  %v6962_v60 = vpack.c.bf16 %v2570_v56, %v2570_v56 }
 0x14c   : > { %v2779_v22 = vor.u32 %v2778_v41, %v2774_v28  ;;  %v2571_v29 = vmul.f32 %v6907_v18, %v2247_v62  ;;  %v2211_v52 = vunpack.c.l.bf16 %v2157_v59  ;;  %v4776_v28 = vld [vmem:[%s6761_s23 + $0xc0] sm:$0xff]  }
 0x14d   : > { %v1805_v55 = vadd.f32 %v1751_v37, %v1641_v9  ;;  %v2534_v9 = vmul.f32 %v6899_v53, %v2210_v50  ;;  %v2788_v53 = vshll.u32 %v6831_v26, 16  ;;  %v2793_v18 = vshll.u32 %v6962_v60, 16 }
 0x14e   : > { %v5358_v32 = vpop.eup %5357  ;;  %5073 = vmatpush3.bf16.msra.mxu1 %v5144_v39  ;;  %4786 = vmatpush3.bf16.msra.mxu0 %v5144_v39  ;;  %v5149_v39 = vld [vmem:[%s7956_s4 + $0x78] sm:$0xff]   ;;  %v6975_v2 = vsel %vm2616_vm0, %v2779_v22, %v2783_v7  ;;  %v4770_v7 = vld [vmem:[%s6761_s23 + $0x30] sm:$0xff]   ;;  %v4767_v59 = vunpack.c.l.bf16 %v4776_v28 }
 0x14f   : > { %v2018_v36 = vadd.f32 1.0, %v5358_v32  ;;  %v5360_v11 = vpop.eup %5359  ;;  %v4653_v45 = vmul.f32 -1.442695, %v1805_v55  ;;  %5066 = vmatprep.subr.bf16.mxu1 %v5145_v0  ;;  %4787 = vmatprep.subr.bf16.mxu0 %v5145_v0  ;;  %v5147_v32 = vld [vmem:[%s7956_s4 + $0x70] sm:$0xff]   ;;  %v2572_v55 = vmul.f32 %v6923_v16, %v2248_v46  ;;  %7970 = vst [vmem:[#allocation8_spill] sm:$0xff] %v6975_v2  ;;  %v2634_v0 = vrot.slane %v2632_v51, 1 }
 0x150   : > { %v2020_v3 = vadd.f32 1.0, %v5360_v11  ;;  %v5362_v57 = vpop.eup %5361  ;;  %v2573_v11 = vmul.f32 %v2494_v31, %v2249_v49  ;;  %v5150_v16 = vld [vmem:[%s7956_s4 + $0x38] sm:$0xff]   ;;  %v2790_v41 = vrot.slane %v2788_v53, 1  ;;  %v2795_v62 = vrot.slane %v2793_v18, 1  ;;  %v561_v18 = vld [vmem:[%s5590_s17 + $0x191] sm:$0x3] }
 0x151   : > { %5363 = vrcp.f32 %v2018_v36  ;;  %2423 = vperm.xlu1 %5134, %v5362_v57   ;;  %v2314_v36 = vpop.permute.xlu1 %2313  ;;  %v6990_v57 = vpack.c.bf16 %v2572_v55, %v2571_v29  ;;  %v2635_v31 = vor.u32 %v2634_v0, %v2630_v42  ;;  %v2786_v51 = vshrl.u32 %v6831_v26, 16 }
 0x152   : > { %5365 = vrcp.f32 %v2020_v3  ;;  %5074 = vmatpush3.bf16.msra.mxu1 %v5146_v25  ;;  %v6977_v40 = vpop.permute.xlu0 %2498  ;;  %v2639_v3 = vrot.slane %v2637_v20, 1  ;;  %4788 = vmatpush3.bf16.msra.mxu0 %v5146_v25  ;;  %v6993_v27 = vpack.c.bf16 %v2573_v11, %v2573_v11  ;;  %v5151_v25 = vld [vmem:[%s7956_s4 + $0xc0] sm:$0xff]   ;;  %v2537_v20 = vmul.f32 %v2314_v36, %v2213_v48 }
 0x153   : > { %5367 = vpow2.f32 %v4653_v45  ;;  %5067 = vmatprep.subr.bf16.mxu1 %v5147_v32  ;;  %v6988_v45 = vpack.c.bf16 %v2534_v9, %v2534_v9  ;;  %4789 = vmatprep.subr.bf16.mxu0 %v5147_v32  ;;  %v2535_v32 = vmul.f32 %v6931_v38, %v2211_v52  ;;  %v2162_v9 = vld [vmem:[%s6761_s23 + $0x38] sm:$0x1]  ;;  %v2791_v29 = vor.u32 %v2790_v41, %v2786_v51  ;;  %v7014_v38 = vld [vmem:[%s6761_s23 + $0x3c] sm:$0xff]  }
 0x154   : > { %v7003_v49 = vsel %vm2616_vm0, %v2635_v31, %v2639_v3  ;;  %v2805_v22 = vshll.u32 %v6993_v27, 16  ;;  %v4743_v55 = vunpack.c.l.bf16 %v4770_v7  ;;  %v4744_v11 = vunpack.c.h.bf16 %v4770_v7  ;;  %v563_v48 = vld [vmem:[%s5590_s17 + $0x1a1] sm:$0xff] }
 0x155   : > { %2809 = vrot.lane.b32.xlu1 %v2628_v34, %s5472_s29  ;;  %v2649_v34 = vshll.u32 %v6988_v45, 16  ;;  %v7018_v36 = vsel %vm2616_vm0, %v2791_v29, %v2795_v62  ;;  %v2216_v0 = vunpack.c.l.bf16 %v2162_v9  ;;  %v2644_v53 = vshll.u32 %v6852_v43, 16 }
 0x156   : > { %5075 = vmatpush3.bf16.msra.mxu1 %v5148_v44  ;;  %4790 = vmatpush3.bf16.msra.mxu0 %v5148_v44  ;;  %v4768_v44 = vunpack.c.h.bf16 %v4776_v28  ;;  %7971 = vst [vmem:[#allocation9_spill] sm:$0xff] %v7018_v36  ;;  %v7025_v42 = vrot.slane %v2805_v22, 1  ;;  %v2574_v62 = vmul.f32 %v4767_v59, %v6977_v40  ;;  %v616_v51 = vmul.f32 %v5596_v4, %v561_v18 }
 0x157   : > { %5068 = vmatprep.subr.bf16.mxu1 %v5149_v39  ;;  %v2504_v56 = vpop.permute.xlu1 %2503  ;;  %4791 = vmatprep.subr.bf16.mxu0 %v5149_v39  ;;  %v397_v39 = vld [vmem:[%s5590_s17 + $0x190] sm:$0x3]  ;;  %v2642_v40 = vshrl.u32 %v6852_v43, 16 }
 0x158   : > { %v2575_v7 = vmul.f32 %v4768_v44, %v2504_v56  ;;  %v452_v28 = vmul.f32 %v5592_v1, %v397_v39  ;;  %v2218_v56 = vunpack.c.h.bf16 %v7014_v38  ;;  %v2798_v44 = vshrl.u32 %v6990_v57, 16  ;;  %v562_v39 = vld [vmem:[%s5590_s17 + $0x199] sm:$0xff] }
 0x159   : > { %2835 = vrot.lane.b32.xlu1 %v6975_v2, %s5472_s29 }
 0x15a   : > { %5076 = vmatpush3.bf16.msra.mxu1 %v5150_v16  ;;  %4792 = vmatpush3.bf16.msra.mxu0 %v5150_v16  ;;  %v7035_v16 = vld [vmem:[%s6761_s23 + $0x44] sm:$0x1]  ;;  %v7060_v18 = vpack.c.bf16 %v2575_v7, %v2574_v62  ;;  %v4341_v7 = vld [vmem:[%s5590_s17 + $0x1b8] sm:$0xff] }
 0x15b   : > { %v5364_v37 = vpop.eup %5363  ;;  %4889 = vmatprep.subr.bf16.mxu1 %v5151_v25  ;;  %v2800_v25 = vshll.u32 %v6990_v57, 16  ;;  %v2219_v29 = vunpack.c.l.bf16 %v7035_v16 }
 0x15c   : > { %2418 = vperm.xlu0 %5133, %v5364_v37   ;;  %v5366_v58 = vpop.eup %5365  ;;  %v2319_v46 = vpop.permute.xlu0 %2318  ;;  %v2536_v37 = vmul.f32 %v6946_v61, %v2212_v35  ;;  %v399_v35 = vld [vmem:[%s5590_s17 + $0x1a0] sm:$0xff] }
 0x15d   : > { %v5368_v54 = vpop.eup %5367  ;;  %2951 = vrot.lane.b32.xlu1 %v6990_v57, %s5472_s29  ;;  %v2538_v31 = vmul.f32 %v4743_v55, %v2319_v46  ;;  %v2646_v46 = vrot.slane %v2644_v53, 1  ;;  %v454_v22 = vmul.f32 %v5592_v1, %v399_v35  ;;  %v727_v55 = vld [vmem:[%s5590_s17 + $0x1a2] sm:$0xff]  ;;  %v398_v53 = vld [vmem:[%s5590_s17 + $0x198] sm:$0xff] }
 0x15e   : > { %v2021_v50 = vadd.f32 1.0, %v5368_v54  ;;  %v7023_v3 = vpack.c.bf16 %v2536_v37, %v2535_v32  ;;  %v7027_v54 = vpack.c.bf16 %v2537_v20, %v2537_v20  ;;  %v725_v37 = vld [vmem:[%s5590_s17 + $0x192] sm:$0x3]  ;;  %v618_v20 = vmul.f32 %v5596_v4, %v563_v48 }
 0x15f   : > { %v670_v48 = vadd.f32 %v616_v51, %v452_v28  ;;  %v780_v16 = vmul.f32 %v5601_v8, %v725_v37  ;;  %v453_v28 = vmul.f32 %v5592_v1, %v398_v53  ;;  %v617_v51 = vmul.f32 %v5596_v4, %v562_v39 }
 0x160   : > { %2428 = vperm.xlu0 %5133, %v5366_v58   ;;  %5369 = vrcp.f32 %v2021_v50  ;;  %v2651_v58 = vrot.slane %v2649_v34, 1  ;;  %v2217_v50 = vunpack.c.l.bf16 %v7014_v38  ;;  %v7040_v34 = vld [vmem:[%s6761_s23 + $0x48] sm:$0xff]   ;;  %v2661_v9 = vshll.u32 %v7027_v54, 16 }
 0x161   : > { %v2324_v5 = vpop.permute.xlu1 %2323  ;;  %v2656_v35 = vshll.u32 %v7023_v3, 16  ;;  %v672_v61 = vadd.f32 %v618_v20, %v454_v22  ;;  %v4748_v62 = vunpack.c.h.bf16 %v7040_v34  ;;  %v2877_v37 = vrot.slane %v6806_v15, 1  ;;  %v726_v20 = vld [vmem:[%s5590_s17 + $0x19a] sm:$0xff] }
 0x162   : > { %v2539_v41 = vmul.f32 %v4744_v11, %v2324_v5  ;;  %v2802_v5 = vrot.slane %v2800_v25, 1  ;;  %v4339_v25 = vld [vmem:[%s5590_s17 + $0x1a8] sm:$0x3] }
 0x164   : > { %2811 = vrot.lane.b32.xlu0 %v7003_v49, %s5472_s29  ;;  %v7054_v59 = vpack.c.bf16 %v2539_v41, %v2538_v31  ;;  %v2647_v41 = vor.u32 %v2646_v46, %v2642_v40  ;;  %v2658_v40 = vrot.slane %v2656_v35, 1  ;;  %v781_v35 = vmul.f32 %v5601_v8, %v726_v20  ;;  %v4449_v20 = vld [vmem:[%s5590_s17 + $0x1aa] sm:$0x3] }
 0x166   : > { %v2668_v22 = vshll.u32 %v7054_v59, 16 }
 0x167   : > { %v2329_v52 = vpop.permute.xlu0 %2328 }
 0x168   : > { %2837 = vrot.lane.b32.xlu0 %v7018_v36, %s5472_s29  ;;  %v2540_v32 = vmul.f32 %v2329_v52, %v2216_v0  ;;  %v782_v0 = vmul.f32 %v5601_v8, %v727_v55  ;;  %v2663_v36 = vrot.slane %v2661_v9, 1  ;;  %v2803_v9 = vor.u32 %v2802_v5, %v2798_v44 }
 0x169   : > { %v834_v55 = vadd.f32 %v780_v16, %v670_v48  ;;  %v2654_v44 = vshrl.u32 %v7023_v3, 16  ;;  %v671_v5 = vadd.f32 %v617_v51, %v453_v28  ;;  %v4340_v16 = vld [vmem:[%s5590_s17 + $0x1b0] sm:$0xff] }
 0x16a   : > { %v5370_v11 = vpop.eup %5369  ;;  %v7064_v31 = vpack.c.bf16 %v2540_v32, %v2540_v32  ;;  %v7075_v32 = vsel %vm2616_vm0, %v2647_v41, %v2651_v58  ;;  %v4394_v58 = vld [vmem:[%s5590_s17 + $0x1a9] sm:$0x3]  ;;  %v836_v41 = vadd.f32 %v782_v0, %v672_v61  ;;  %v7095_v61 = vsel %vm2616_vm0, %v2803_v9, %v7025_v42  ;;  %v4451_v9 = vld [vmem:[%s5590_s17 + $0x1ba] sm:$0xff] }
 0x16b   : > { %2433 = vperm.xlu1 %5134, %v5370_v11   ;;  %v945_v11 = vmul.f32 %v4339_v25, %v5607_v13  ;;  %7972 = vst [vmem:[#allocation10_spill] sm:$0xff] %v7095_v61  ;;  %v2659_v25 = vor.u32 %v2658_v40, %v2654_v44  ;;  %v1109_v28 = vmul.f32 %v4394_v58, %v5609_v14  ;;  %v564_v58 = vld [vmem:[%s5590_s17 + $0x1a9] sm:$0x3] }
 0x16c   : > { %2927 = vrot.lane.b32.xlu0 %v7023_v3, %s5472_s29  ;;  %v2334_v52 = vpop.permute.xlu1 %2333  ;;  %v2673_v53 = vshll.u32 %v7064_v31, 16  ;;  %v835_v40 = vadd.f32 %v781_v35, %v671_v5  ;;  %v1273_v5 = vmul.f32 %v4449_v20, %v5614_v19  ;;  %v4450_v20 = vld [vmem:[%s5590_s17 + $0x1b2] sm:$0xff] }
 0x16d   : > { %v2541_v39 = vmul.f32 %v2334_v52, %v2217_v50  ;;  %v7973_v50 = vrot.slane %v6953_v47, 1  ;;  %v2670_v52 = vrot.slane %v2668_v22, 1 }
 0x16e   : > { %v2675_v42 = vrot.slane %v2673_v53, 1 }
 0x16f   : > { %2813 = vrot.lane.b32.xlu1 %v7075_v32, %s5472_s29  ;;  %v7100_v0 = vsel %vm2873_vm1, %v2877_v37, %v7973_v50  ;;  %v2666_v37 = vshrl.u32 %v7054_v59, 16 }
 0x170   : > { %2953 = vrot.lane.b32.xlu0 %v7060_v18, %s5472_s29 }
 0x171   : > { %v2339_v38 = vpop.permute.xlu0 %2338 }
 0x172   : > { %v2542_v46 = vmul.f32 %v2339_v38, %v2218_v56  ;;  %v947_v56 = vmul.f32 %v4341_v7, %v5607_v13  ;;  %v4396_v38 = vld [vmem:[%s5590_s17 + $0x1b9] sm:$0xff]  ;;  %v999_v7 = vadd.f32 %v945_v11, %v834_v55  ;;  %v946_v55 = vmul.f32 %v4340_v16, %v5607_v13 }
 0x173   : > { %2839 = vrot.lane.b32.xlu1 %v7095_v61, %s5472_s29  ;;  %v1111_v51 = vmul.f32 %v4396_v38, %v5609_v14  ;;  %v7114_v11 = vsel %vm2616_vm0, %v2659_v25, %v2663_v36  ;;  %v1275_v36 = vmul.f32 %v4451_v9, %v5614_v19  ;;  %v4504_v16 = vld [vmem:[%s5590_s17 + $0x1c0] sm:$0x3]  ;;  %v4506_v25 = vld [vmem:[%s5590_s17 + $0x1d0] sm:$0xff]  ;;  %v2880_v9 = vrot.slane %v6852_v43, 1 }
 0x174   : > { %2929 = vrot.lane.b32.xlu0 %v7054_v59, %s5472_s29  ;;  %v7091_v48 = vpack.c.bf16 %v2542_v46, %v2541_v39  ;;  %v1001_v22 = vadd.f32 %v947_v56, %v836_v41  ;;  %v2671_v39 = vor.u32 %v2670_v52, %v2666_v37  ;;  %v7974_v41 = vunpack.c.l.bf16 %v7040_v34 }
 0x175   : > { %v1163_v44 = vadd.f32 %v1109_v28, %v999_v7  ;;  %v619_v37 = vmul.f32 %v5596_v4, %v564_v58 }
 0x176   : > { %v2344_v2 = vpop.permute.xlu1 %2343  ;;  %v2680_v53 = vshll.u32 %v7091_v48, 16  ;;  %v7129_v52 = vsel %vm2616_vm0, %v2671_v39, %v2675_v42  ;;  %v1165_v34 = vadd.f32 %v1111_v51, %v1001_v22  ;;  %v728_v51 = vld [vmem:[%s5590_s17 + $0x1aa] sm:$0x3]  ;;  %v1440_v39 = vmul.f32 %v4506_v25, %v5619_v23 }
 0x177   : > { %v2543_v46 = vmul.f32 %v2344_v2, %v2219_v29  ;;  %v4395_v2 = vld [vmem:[%s5590_s17 + $0x1b1] sm:$0xff]  ;;  %v400_v29 = vld [vmem:[%s5590_s17 + $0x1a8] sm:$0x3]  ;;  %2815 = vrot.lane.b32.xlu1 %v7114_v11, %s5472_s29 }
 0x178   : > { %2971 = vrot.lane.b32.xlu0 %v7100_v0, %s5472_s29  ;;  %v1110_v7 = vmul.f32 %v4395_v2, %v5609_v14  ;;  %v455_v28 = vmul.f32 %v5592_v1, %v400_v29  ;;  %v2682_v42 = vrot.slane %v2680_v53, 1  ;;  %v1438_v1 = vmul.f32 %v4504_v16, %v5619_v23  ;;  %v4561_v53 = vld [vmem:[%s5590_s17 + $0x1d1] sm:$0xff] }
 0x179   : > { %v7126_v35 = vpack.c.bf16 %v2543_v46, %v2543_v46  ;;  %v2881_v46 = vrot.slane %v6988_v45, 1  ;;  %v2678_v45 = vshrl.u32 %v7091_v48, 16  ;;  %v1274_v29 = vmul.f32 %v4450_v20, %v5614_v19 }
 0x17a   : > { %v673_v58 = vadd.f32 %v619_v37, %v455_v28  ;;  %v1604_v37 = vmul.f32 %v4561_v53, %v5621_v24 }
 0x17b   : > { %2931 = vrot.lane.b32.xlu1 %v7091_v48, %s5472_s29  ;;  %v2685_v4 = vshll.u32 %v7126_v35, 16 }
 0x17c   : > { %v2349_v47 = vpop.permute.xlu0 %2348  ;;  %2817 = vrot.lane.b32.xlu0 %v7129_v52, %s5472_s29 }
 0x17d   : > { %v2544_v56 = vmul.f32 %v7974_v41, %v2349_v47  ;;  %v1000_v47 = vadd.f32 %v946_v55, %v835_v40  ;;  %v1327_v40 = vadd.f32 %v1273_v5, %v1163_v44  ;;  %v1329_v55 = vadd.f32 %v1275_v36, %v1165_v34  ;;  %v4505_v5 = vld [vmem:[%s5590_s17 + $0x1c8] sm:$0xff]  ;;  %v4342_v36 = vld [vmem:[%s5590_s17 + $0x1c0] sm:$0x3] }
 0x17e   : > { %v783_v41 = vmul.f32 %v5601_v8, %v728_v51  ;;  %v2683_v44 = vor.u32 %v2682_v42, %v2678_v45  ;;  %v2687_v34 = vrot.slane %v2685_v4, 1  ;;  %v2169_v8 = vld [vmem:[%s6761_s23 + $0x54] sm:$0xff]   ;;  %v1439_v20 = vmul.f32 %v4505_v5, %v5619_v23 }
 0x17f   : > { %v1164_v2 = vadd.f32 %v1110_v7, %v1000_v47  ;;  %v4614_v7 = vld [vmem:[%s5590_s17 + $0x1c2] sm:$0x3]  ;;  %v1494_v28 = vadd.f32 %v1440_v39, %v1329_v55  ;;  %v2223_v4 = vunpack.c.l.bf16 %v2169_v8  ;;  %v2224_v45 = vunpack.c.h.bf16 %v2169_v8 }
 0x180   : > { %v837_v51 = vadd.f32 %v783_v41, %v673_v58  ;;  %v1766_v55 = vmul.f32 %v4614_v7, %v5629_v30  ;;  %v4615_v41 = vld [vmem:[%s5590_s17 + $0x1ca] sm:$0xff] }
 0x181   : > { %v2354_v38 = vpop.permute.xlu1 %2353  ;;  %v1328_v42 = vadd.f32 %v1274_v29, %v1164_v2  ;;  %v1658_v53 = vadd.f32 %v1604_v37, %v1494_v28  ;;  %v1767_v28 = vmul.f32 %v4615_v41, %v5629_v30 }
 0x182   : > { %v2545_v50 = vmul.f32 %v4748_v62, %v2354_v38  ;;  %v2884_v62 = vrot.slane %v7027_v54, 1  ;;  %v4559_v54 = vld [vmem:[%s5590_s17 + $0x1c1] sm:$0x3]  ;;  %v2883_v38 = vrot.slane %v7023_v3, 1 }
 0x183   : > { %v1602_v16 = vmul.f32 %v4559_v54, %v5621_v24  ;;  %v1493_v29 = vadd.f32 %v1439_v20, %v1328_v42 }
 0x184   : > { %v7142_v22 = vpack.c.bf16 %v2545_v50, %v2544_v56  ;;  %v7158_v56 = vsel %vm2873_vm1, %v2880_v9, %v2881_v46  ;;  %v1492_v50 = vadd.f32 %v1438_v1, %v1327_v40  ;;  %v7168_v47 = vsel %vm2873_vm1, %v2883_v38, %v2884_v62  ;;  %v4616_v46 = vld [vmem:[%s5590_s17 + $0x1d2] sm:$0xff]  ;;  %v4560_v62 = vld [vmem:[%s5590_s17 + $0x1c9] sm:$0xff]  ;;  %v4397_v1 = vld [vmem:[%s5590_s17 + $0x1c1] sm:$0x3] }
 0x185   : > { %2973 = vrot.lane.b32.xlu1 %v7158_v56, %s5472_s29  ;;  %v948_v9 = vmul.f32 %v4342_v36, %v5607_v13  ;;  %v7178_v40 = vsel %vm2616_vm0, %v2683_v44, %v2687_v34  ;;  %v1768_v2 = vmul.f32 %v4616_v46, %v5629_v30  ;;  %v2171_v13 = vld [vmem:[%s6761_s23 + $0x5c] sm:$0x1]  ;;  %v1603_v58 = vmul.f32 %v4560_v62, %v5621_v24  ;;  %v4452_v36 = vld [vmem:[%s5590_s17 + $0x1c2] sm:$0x3]  ;;  %v2168_v34 = vld [vmem:[%s6761_s23 + $0x50] sm:$0x1] }
 0x186   : > { %2933 = vrot.lane.b32.xlu0 %v7142_v22, %s5472_s29  ;;  %v2359_v25 = vpop.permute.xlu0 %2358  ;;  %v1656_v54 = vadd.f32 %v1602_v16, %v1492_v50  ;;  %v1112_v44 = vmul.f32 %v4397_v1, %v5609_v14  ;;  %v2225_v7 = vunpack.c.l.bf16 %v2171_v13  ;;  %v1276_v20 = vmul.f32 %v4452_v36, %v5614_v19 }
 0x187   : > { %v1002_v38 = vadd.f32 %v948_v9, %v837_v51  ;;  %v1822_v61 = vadd.f32 %v1768_v2, %v1658_v53  ;;  %v1657_v46 = vadd.f32 %v1603_v58, %v1493_v29  ;;  %v4507_v51 = vld [vmem:[%s5590_s17 + $0x1d8] sm:$0x3]  ;;  %v2887_v14 = vrot.slane %v7064_v31, 1  ;;  %v4772_v53 = vld [vmem:[%s6761_s23 + $0x60] sm:$0xff]  }
 0x188   : > { %v1820_v16 = vadd.f32 %v1766_v55, %v1656_v54  ;;  %v2222_v9 = vunpack.c.l.bf16 %v2168_v34  ;;  %v1441_v55 = vmul.f32 %v4507_v51, %v5619_v23  ;;  %v4562_v31 = vld [vmem:[%s5590_s17 + $0x1d9] sm:$0x3]  ;;  %v4751_v23 = vunpack.c.l.bf16 %v4772_v53 }
 0x189   : > { %2819 = vrot.lane.b32.xlu1 %v7178_v40, %s5472_s29  ;;  %v1166_v42 = vadd.f32 %v1112_v44, %v1002_v38  ;;  %v4670_v54 = vmul.f32 -1.442695, %v1822_v61  ;;  %v1821_v2 = vadd.f32 %v1767_v28, %v1657_v46  ;;  %v1605_v38 = vmul.f32 %v4562_v31, %v5621_v24  ;;  %v4617_v34 = vld [vmem:[%s5590_s17 + $0x1da] sm:$0x3]  ;;  %s7722_s17 = scalar_lea.vmem [#allocation5], %s4281_s22 }
 0x18a   : > { %2975 = vrot.lane.b32.xlu0 %v7168_v47, %s5472_s29  ;;  %v4668_v1 = vmul.f32 -1.442695, %v1820_v16  ;;  %v2546_v29 = vmul.f32 %v2359_v25, %v2222_v9  ;;  %v2692_v28 = vshll.u32 %v7142_v22, 16  ;;  %v1769_v46 = vmul.f32 %v4617_v34, %v5629_v30  ;;  %v2175_v34 = vld [vmem:[%s6761_s23 + $0x6c] sm:$0xff]   ;;  %s4168_s19 = sshll.u32 %s7722_s17, 4  ;;  %s7903_s19 = int_to_ptr.vmem [resolvable:$true] %s4168_s19 }
 0x18b   : > { %v2364_v39 = vpop.permute.xlu1 %2363  ;;  %v1330_v13 = vadd.f32 %v1276_v20, %v1166_v42  ;;  %v4669_v25 = vmul.f32 -1.442695, %v1821_v2  ;;  %v2174_v20 = vld [vmem:[%s6761_s23 + $0x68] sm:$0x1]  ;;  %s5402_s21 = scalar_lea.vmem %s7903_s19, 4096 }
 0x18c   : > { %v2547_v8 = vmul.f32 %v2364_v39, %v2223_v4  ;;  %5371 = vpow2.f32 %v4668_v1  ;;  %v2228_v30 = vunpack.c.l.bf16 %v2174_v20  ;;  %p5403_p9 = scmp.ne.s32.totalorder %s7903_s19, %s5402_s21 }
 0x18d   : > { %5373 = vpow2.f32 %v4670_v54  ;;  %v1495_v36 = vadd.f32 %v1441_v55, %v1330_v13 }
 0x18e   : > { %5375 = vpow2.f32 %v4669_v25  ;;  %p5404_p10 = pnand %p5403_p9, %p5554_p5 }
 0x18f   : > { %v1659_v24 = vadd.f32 %v1605_v38, %v1495_v36 }
 0x190   : > { %p5405_p12 = pneg %p5404_p10 }
 0x191   : > { %v2369_v5 = vpop.permute.xlu0 %2368  ;;  %v1823_v55 = vadd.f32 %v1769_v46, %v1659_v24  ;;  %v2229_v46 = vunpack.c.l.bf16 %v2175_v34  ;;  %v2892_v24 = vrot.slane %v7142_v22, 1 }
 0x192   : > { %v2548_v50 = vmul.f32 %v2369_v5, %v2224_v45  ;;  %v2886_v45 = vrot.slane %v7054_v59, 1 }
 0x193   : > { %v4671_v38 = vmul.f32 -1.442695, %v1823_v55 }
 0x194   : > { %v7193_v37 = vpack.c.bf16 %v2548_v50, %v2547_v8  ;;  %v7206_v58 = vsel %vm2873_vm1, %v2886_v45, %v2887_v14  ;;  %v2593_v8 = vpack.c.bf16 %v2546_v29, %v2546_v29  ;;  %v7225_v14 = vld [vmem:[%s7956_s4 + $0x100] sm:$0xff]  }
 0x195   : > { %5021 = vmatprep.subr.bf16.mxu0 %v7225_v14 }
 0x196   : > { %2935 = vrot.lane.b32.xlu1 %v7193_v37, %s5472_s29  ;;  %v2704_v62 = vshll.u32 %v7193_v37, 16  ;;  %v2374_v4 = vpop.permute.xlu1 %2373  ;;  %v2702_v61 = vshrl.u32 %v7193_v37, 16  ;;  %v2697_v9 = vshll.u32 %v2593_v8, 16  ;;  %v5372_v45 = vpop.eup %5371 }
 0x197   : > { %v2549_v39 = vmul.f32 %v2374_v4, %v2225_v7  ;;  %v4752_v7 = vunpack.c.h.bf16 %v4772_v53  ;;  %v2694_v4 = vrot.slane %v2692_v28, 1  ;;  %v2036_v29 = vadd.f32 1.0, %v5372_v45 }
 0x198   : > { %v2706_v19 = vrot.slane %v2704_v62, 1  ;;  %v2699_v53 = vrot.slane %v2697_v9, 1 }
 0x199   : > { %v7208_v41 = vpack.c.bf16 %v2549_v39, %v2549_v39  ;;  %v5374_v39 = vpop.eup %5373  ;;  %5377 = vrcp.f32 %v2036_v29 }
 0x19a   : > { %2977 = vrot.lane.b32.xlu1 %v7206_v58, %s5472_s29  ;;  %v2707_v5 = vor.u32 %v2706_v19, %v2702_v61  ;;  %v2690_v19 = vshrl.u32 %v7142_v22, 16  ;;  %v2890_v61 = vrot.slane %v7126_v35, 1  ;;  %v2038_v25 = vadd.f32 1.0, %v5374_v39  ;;  %v5376_v36 = vpop.eup %5375 }
 0x19b   : > { %v2709_v44 = vshll.u32 %v7208_v41, 16  ;;  %v2379_v50 = vpop.permute.xlu0 %2378  ;;  %5379 = vpow2.f32 %v4671_v38  ;;  %v2037_v28 = vadd.f32 1.0, %v5376_v36 }
 0x19c   : > { %v2550_v42 = vmul.f32 %v4751_v23, %v2379_v50  ;;  %v2695_v31 = vor.u32 %v2694_v4, %v2690_v19  ;;  %v2889_v23 = vrot.slane %v7091_v48, 1  ;;  %5381 = vrcp.f32 %v2038_v25 }
 0x19d   : > { %v2711_v16 = vrot.slane %v2709_v44, 1  ;;  %5383 = vrcp.f32 %v2037_v28  ;;  %v2875_v28 = vrot.slane %v6921_v6, 1 }
 0x19e   : > { %v7247_v35 = vsel %vm2873_vm1, %v2889_v23, %v2890_v61 }
 0x19f   : > { %v7220_v51 = vsel %vm2616_vm0, %v2707_v5, %v2711_v16  ;;  %v7240_v5 = vsel %vm2616_vm0, %v2695_v31, %v2699_v53  ;;  %v2893_v16 = vrot.slane %v2593_v8, 1 }
 0x1a0   : > { %v2384_v62 = vpop.permute.xlu1 %2383  ;;  %2823 = vrot.lane.b32.xlu1 %v7220_v51, %s5472_s29 }
 0x1a1   : > { %v2551_v1 = vmul.f32 %v4752_v7, %v2384_v62  ;;  %v2177_v62 = vld [vmem:[%s6761_s23 + $0x74] sm:$0x1]  ;;  %v7255_v4 = vsel %vm2873_vm1, %v2892_v24, %v2893_v16  ;;  %v2874_v24 = vrot.slane %v6897_v33, 1 }
 0x1a2   : > { %v2231_v39 = vunpack.c.l.bf16 %v2177_v62 }
 0x1a3   : > { %v7230_v54 = vpack.c.bf16 %v2551_v1, %v2550_v42  ;;  %v2230_v42 = vunpack.c.h.bf16 %v2175_v34  ;;  %v4773_v34 = vld [vmem:[%s6761_s23 + $0x78] sm:$0xff]  }
 0x1a5   : > { %2937 = vrot.lane.b32.xlu0 %v7230_v54, %s5472_s29  ;;  %v2716_v50 = vshll.u32 %v7230_v54, 16  ;;  %v2714_v8 = vshrl.u32 %v7230_v54, 16 }
 0x1a6   : > { %v2389_v2 = vpop.permute.xlu0 %2388 }
 0x1a7   : > { %v2552_v13 = vmul.f32 %v2389_v2, %v2228_v30  ;;  %v2718_v9 = vrot.slane %v2716_v50, 1  ;;  %v5378_v2 = vpop.eup %5377 }
 0x1a8   : > { %v5380_v31 = vpop.eup %5379 }
 0x1a9   : > { %v7237_v44 = vpack.c.bf16 %v2552_v13, %v2552_v13  ;;  %2821 = vrot.lane.b32.xlu0 %v7240_v5, %s5472_s29  ;;  %v2719_v53 = vor.u32 %v2718_v9, %v2714_v8  ;;  %v5382_v23 = vpop.eup %5381  ;;  %v2039_v16 = vadd.f32 1.0, %v5380_v31  ;;  %v4755_v9 = vunpack.c.l.bf16 %v4773_v34 }
 0x1aa   : > { %v2910_v31 = vrot.slane %v6785_v17, 1 }
 0x1ab   : > { %v2721_v7 = vshll.u32 %v7237_v44, 16  ;;  %v2394_v20 = vpop.permute.xlu1 %2393  ;;  %5385 = vrcp.f32 %v2039_v16  ;;  %v2913_v16 = vrot.slane %v6827_v10, 1 }
 0x1ac   : > { %v2553_v45 = vmul.f32 %v2394_v20, %v2229_v46 }
 0x1ad   : > { %2979 = vrot.lane.b32.xlu0 %v7247_v35, %s5472_s29  ;;  %v2723_v1 = vrot.slane %v2721_v7, 1  ;;  %v5384_v7 = vpop.eup %5383 }
 0x1af   : > { %v7263_v13 = vsel %vm2616_vm0, %v2719_v53, %v2723_v1  ;;  %v4756_v1 = vunpack.c.h.bf16 %v4773_v34 }
 0x1b0   : > { %v2399_v30 = vpop.permute.xlu0 %2398 }
 0x1b1   : > { %v2554_v55 = vmul.f32 %v2399_v30, %v2230_v42  ;;  %2981 = vrot.lane.b32.xlu0 %v7255_v4, %s5472_s29  ;;  %v2896_v30 = vrot.slane %v7208_v41, 1  ;;  %v2911_v41 = vrot.slane %v6769_v12, 1 }
 0x1b3   : > { %v7260_v19 = vpack.c.bf16 %v2554_v55, %v2553_v45  ;;  %v2895_v45 = vrot.slane %v7193_v37, 1  ;;  %v2876_v55 = vsel %vm2873_vm1, %v2874_v24, %v2875_v28  ;;  %v5152_v28 = vld [vmem:[%s7956_s4 + $0x80] sm:$0xff]  }
 0x1b5   : > { %v2404_v29 = vpop.permute.xlu1 %2403  ;;  %2939 = vrot.lane.b32.xlu1 %v7260_v19, %s5472_s29  ;;  %2825 = vrot.lane.b32.xlu0 %v7263_v13, %s5472_s29  ;;  %v2728_v61 = vshll.u32 %v7260_v19, 16  ;;  %v2726_v50 = vshrl.u32 %v7260_v19, 16 }
 0x1b6   : > { %v2555_v38 = vmul.f32 %v2404_v29, %v2231_v39 }
 0x1b7   : > { %v2730_v25 = vrot.slane %v2728_v61, 1  ;;  %v7289_v61 = vsel %vm2873_vm1, %v2895_v45, %v2896_v30  ;;  %v5157_v30 = vld [vmem:[%s7956_s4 + $0xd8] sm:$0xff]  }
 0x1b8   : > { %v7270_v36 = vpack.c.bf16 %v2555_v38, %v2555_v38  ;;  %v2914_v38 = vrot.slane %v6929_v63, 1  ;;  %v5158_v45 = vld [vmem:[%s7956_s4 + $0x98] sm:$0xff]  }
 0x1b9   : > { %2508 = vperm.xlu1 %5134, %v5378_v2   ;;  %2518 = vperm.xlu0 %5133, %v5382_v23   ;;  %v2731_v20 = vor.u32 %v2730_v25, %v2726_v50  ;;  %v7297_v50 = vsel %vm2873_vm1, %v2910_v31, %v2911_v41  ;;  %v5163_v41 = vld [vmem:[%s7956_s4 + $0xf0] sm:$0xff]  }
 0x1ba   : > { %v2733_v46 = vshll.u32 %v7270_v36, 16 }
 0x1bb   : > { %v2409_v42 = vpop.permute.xlu0 %2408 }
 0x1bc   : > { %v2735_v62 = vrot.slane %v2733_v46, 1  ;;  %v2556_v39 = vmul.f32 %v4755_v9, %v2409_v42  ;;  %v7312_v42 = vsel %vm2873_vm1, %v2913_v16, %v2914_v38  ;;  %v5154_v9 = vld [vmem:[%s7956_s4 + $0x88] sm:$0xff]   ;;  %v5164_v38 = vld [vmem:[%s7956_s4 + $0xb0] sm:$0xff]  }
 0x1bd   : > { %2513 = vperm.xlu1 %5134, %v5384_v7   ;;  %v5386_v7 = vpop.eup %5385  ;;  %v2181_v16 = vld [vmem:[%s6761_s23 + $0x84] sm:$0xff]  }
 0x1be   : > { %v7279_v8 = vsel %vm2616_vm0, %v2731_v20, %v2735_v62  ;;  %v5153_v20 = vld [vmem:[%s7956_s4 + $0xc8] sm:$0xff]   ;;  %v5155_v62 = vld [vmem:[%s7956_s4 + $0xd0] sm:$0xff]  }
 0x1bf   : > { %v2924_v6 = vpop.permute.xlu0 %2923  ;;  %2827 = vrot.lane.b32.xlu0 %v7279_v8, %s5472_s29 }
 0x1c0   : > { %v3075_v53 = vsel %vm3024_vm2, %v2876_v55, %v2924_v6  ;;  %v2414_v2 = vpop.permute.xlu1 %2413  ;;  %v5159_v6 = vld [vmem:[%s7956_s4 + $0xe0] sm:$0xff]  }
 0x1c1   : > { %3568 = vmatprep.mubr.bf16.mxu0 %v3075_v53  ;;  %v2557_v29 = vmul.f32 %v4756_v1, %v2414_v2  ;;  %v5156_v1 = vld [vmem:[%s7956_s4 + $0x90] sm:$0xff]   ;;  %v5160_v55 = vld [vmem:[%s7956_s4 + $0xa0] sm:$0xff]   ;;  %v5161_v53 = vld [vmem:[%s7956_s4 + $0xe8] sm:$0xff]  }
 0x1c2   : > { %v5162_v2 = vld [vmem:[%s7956_s4 + $0xa8] sm:$0xff]  }
 0x1c3   : > { %v2950_v23 = vpop.permute.xlu0 %2949  ;;  %v7292_v25 = vpack.c.bf16 %v2557_v29, %v2556_v39  ;;  %2983 = vrot.lane.b32.xlu0 %v7289_v61, %s5472_s29  ;;  %v2180_v29 = vld [vmem:[%s6761_s23 + $0x80] sm:$0x1] }
 0x1c4   : > { %v2948_v34 = vpop.permute.xlu1 %2947  ;;  %v3127_v24 = vsel %vm3024_vm2, %v7312_v42, %v2950_v23  ;;  %v2234_v23 = vunpack.c.l.bf16 %v2180_v29 }
 0x1c5   : > { %2941 = vrot.lane.b32.xlu1 %v7292_v25, %s5472_s29  ;;  %v3123_v12 = vsel %vm3024_vm2, %v7297_v50, %v2948_v34 }
 0x1c6   : > { %3664 = vmatprep.mubr.bf16.mxu1 %v3123_v12  ;;  %v5165_v12 = vld [vmem:[%s7956_s4 + $0xf8] sm:$0xff]  }
 0x1c7   : > { %v2834_v63 = vpop.permute.xlu0 %2833 }
 0x1c8   : > { %v7309_v46 = vsel %vm3024_vm2, %v6785_v17, %v2834_v63  ;;  %v2926_v39 = vpop.permute.xlu1 %2925  ;;  %v2740_v63 = vshll.u32 %v7292_v25, 16 }
 0x1c9   : > { %3665 = vmatmul.mubr.bf16.vlgmr.msra.gmra.mrb[0].mxu1 %v7309_v46  ;;  %2523 = vperm.xlu1 %5134, %v5386_v7  }
 0x1ca   : > { %3672 = vmatprep.mubr.bf16.mxu1 %v3127_v24  ;;  %4890 = vmatpush3.bf16.msra.mxu1 %v5152_v28  ;;  %v5168_v28 = vld [vmem:[%s7956_s4 + $0x108] sm:$0xff]   ;;  %v3079_v24 = vsel %vm3024_vm2, %v7100_v0, %v2926_v39  ;;  %v5169_v39 = vld [vmem:[%s7956_s4 + $0x110] sm:$0xff]  }
 0x1cb   : > { %4891 = vmatprep.subr.bf16.mxu1 %v5153_v20 }
 0x1ce   : > { %4892 = vmatpush3.bf16.msra.mxu1 %v5154_v9 }
 0x1cf   : > { %4893 = vmatprep.subr.bf16.mxu1 %v5155_v62  ;;  %v5166_v62 = vld [vmem:[%s7956_s4 + $0xb8] sm:$0xff]  }
 0x1d0   : > { %v2424_v31 = vpop.permute.xlu1 %2423 }
 0x1d2   : > { %4894 = vmatpush3.bf16.msra.mxu1 %v5156_v1  ;;  %v2235_v1 = vunpack.c.l.bf16 %v2181_v16 }
 0x1d3   : > { %4895 = vmatprep.subr.bf16.mxu1 %v5157_v30  ;;  %v2236_v30 = vunpack.c.h.bf16 %v2181_v16 }
 0x1d4   : > { %v2810_v34 = vpop.permute.xlu1 %2809  ;;  %v2559_v29 = vmul.f32 %v2424_v31, %v2235_v1  ;;  %v2901_v1 = vrot.slane %v7260_v19, 1 }
 0x1d5   : > { %v3026_v7 = vsel %vm3024_vm2, %v6897_v33, %v2810_v34  ;;  %v2917_v33 = vrot.slane %v6962_v60, 1  ;;  %v2916_v60 = vrot.slane %v6831_v26, 1 }
 0x1d6   : > { %4896 = vmatpush3.bf16.msra.mxu1 %v5158_v45  ;;  %3569 = vmatmul.mubr.bf16.vlgmr.msra.gmra.mrb[0].mxu0 %v3026_v7  ;;  %v2899_v7 = vrot.slane %v7237_v44, 1  ;;  %v2902_v44 = vrot.slane %v7270_v36, 1 }
 0x1d7   : > { %4897 = vmatprep.subr.bf16.mxu1 %v5159_v6  ;;  %3576 = vmatprep.mubr.bf16.mxu0 %v3079_v24  ;;  %v2898_v24 = vrot.slane %v7230_v54, 1 }
 0x1d8   : > { %v2836_v45 = vpop.permute.xlu1 %2835  ;;  %5022 = vmatpush3.bf16.msra.mxu0 %v7225_v14  ;;  %v2738_v14 = vshrl.u32 %v7292_v25, 16 }
 0x1d9   : > { %v7375_v0 = vsel %vm3024_vm2, %v6827_v10, %v2836_v45  ;;  %5023 = vmatprep.subr.bf16.mxu0 %v5168_v28  ;;  %v7385_v10 = vsel %vm2873_vm1, %v2916_v60, %v2917_v33  ;;  %v2183_v33 = vld [vmem:[%s6761_s23 + $0x8c] sm:$0x1]  ;;  %v2919_v60 = vrot.slane %v6990_v57, 1 }
 0x1da   : > { %4898 = vmatpush3.bf16.msra.mxu1 %v5160_v55  ;;  %v2742_v55 = vrot.slane %v2740_v63, 1  ;;  %v2237_v36 = vunpack.c.l.bf16 %v2183_v33 }
 0x1db   : > { %4899 = vmatprep.subr.bf16.mxu1 %v5161_v53  ;;  %v2419_v20 = vpop.permute.xlu0 %2418  ;;  %3673 = vmatmul.mubr.bf16.gmra.mrb[4].mxu1 %v7375_v0 }
 0x1dc   : > { %v2558_v9 = vmul.f32 %v2419_v20, %v2234_v23  ;;  %v2952_v23 = vpop.permute.xlu1 %2951  ;;  %5024 = vmatpush3.bf16.msra.mxu0 %v5168_v28  ;;  %v2743_v34 = vor.u32 %v2742_v55, %v2738_v14  ;;  %v5170_v28 = vld [vmem:[%s7956_s4 + $0x118] sm:$0xff]   ;;  %v7422_v55 = vsel %vm2873_vm1, %v2901_v1, %v2902_v44 }
 0x1dd   : > { %5025 = vmatprep.subr.bf16.mxu0 %v5169_v39 }
 0x1de   : > { %4900 = vmatpush3.bf16.msra.mxu1 %v5162_v2  ;;  %v7371_v6 = vpack.c.bf16 %v2558_v9, %v2558_v9 }
 0x1df   : > { %4901 = vmatprep.subr.bf16.mxu1 %v5163_v41  ;;  %v2429_v2 = vpop.permute.xlu0 %2428 }
 0x1e0   : > { %v2745_v53 = vshll.u32 %v7371_v6, 16  ;;  %v2560_v41 = vmul.f32 %v2429_v2, %v2236_v30  ;;  %5026 = vmatpush3.bf16.msra.mxu0 %v5169_v39  ;;  %v2920_v30 = vrot.slane %v6993_v27, 1  ;;  %v2905_v1 = vrot.slane %v7371_v6, 1 }
 0x1e1   : > { %5027 = vmatprep.subr.bf16.mxu0 %v5170_v28 }
 0x1e2   : > { %4902 = vmatpush3.bf16.msra.mxu1 %v5164_v38  ;;  %v2747_v38 = vrot.slane %v2745_v53, 1  ;;  %v7389_v16 = vpack.c.bf16 %v2560_v41, %v2559_v29  ;;  %v7431_v27 = vsel %vm2873_vm1, %v2919_v60, %v2920_v30 }
 0x1e3   : > { %4903 = vmatprep.subr.bf16.mxu1 %v5165_v12  ;;  %v3131_v12 = vsel %vm3024_vm2, %v7385_v10, %v2952_v23  ;;  %v2812_v63 = vpop.permute.xlu0 %2811 }
 0x1e4   : > { %3680 = vmatprep.mubr.bf16.mxu1 %v3131_v12  ;;  %v7393_v31 = vsel %vm2616_vm0, %v2743_v34, %v2747_v38  ;;  %2943 = vrot.lane.b32.xlu1 %v7389_v16, %s5472_s29  ;;  %v3029_v20 = vsel %vm3024_vm2, %v6806_v15, %v2812_v63  ;;  %v2752_v39 = vshll.u32 %v7389_v16, 16  ;;  %v2907_v38 = vrot.slane %v7389_v16, 1 }
 0x1e5   : > { %2829 = vrot.lane.b32.xlu0 %v7393_v31, %s5472_s29  ;;  %3577 = vmatmul.mubr.bf16.gmra.mrb[4].mxu0 %v3029_v20  ;;  %v2750_v63 = vshrl.u32 %v7389_v16, 16 }
 0x1e6   : > { %4904 = vmatpush3.bf16.msra.mxu1 %v5166_v62  ;;  %v7407_v62 = vsel %vm2873_vm1, %v2898_v24, %v2899_v7  ;;  %5028 = vmatpush3.bf16.msra.mxu0 %v5170_v28  ;;  %v2754_v41 = vrot.slane %v2752_v39, 1 }
 0x1e7   : > { %v2838_v9 = vpop.permute.xlu0 %2837 }
 0x1e8   : > { %2985 = vrot.lane.b32.xlu1 %v7407_v62, %s5472_s29  ;;  %v7417_v15 = vsel %vm3024_vm2, %v6831_v26, %v2838_v9  ;;  %v2755_v44 = vor.u32 %v2754_v41, %v2750_v63 }
 0x1e9   : > { %2945 = vrot.lane.b32.xlu0 %v6785_v17, %s5472_s29  ;;  %3681 = vmatmul.mubr.bf16.gmra.mrb[8].mxu1 %v7417_v15 }
 0x1ea   : > { %v2434_v26 = vpop.permute.xlu1 %2433 }
 0x1eb   : > { %v2928_v45 = vpop.permute.xlu0 %2927  ;;  %v2561_v53 = vmul.f32 %v2434_v26, %v2237_v36 }
 0x1ec   : > { %v3083_v17 = vsel %vm3024_vm2, %v7158_v56, %v2928_v45  ;;  %v2904_v45 = vrot.slane %v7292_v25, 1 }
 0x1ed   : > { %2987 = vrot.lane.b32.xlu0 %v7422_v55, %s5472_s29  ;;  %3584 = vmatprep.mubr.bf16.mxu0 %v3083_v17  ;;  %v2603_v14 = vpack.c.bf16 %v2561_v53, %v2561_v53 }
 0x1ee   : > { %v2814_v23 = vpop.permute.xlu1 %2813  ;;  %v7461_v17 = vsel %vm2873_vm1, %v2904_v45, %v2905_v1 }
 0x1ef   : > { %v2954_v2 = vpop.permute.xlu0 %2953  ;;  %v2757_v34 = vshll.u32 %v2603_v14, 16  ;;  %v2908_v12 = vrot.slane %v2603_v14, 1  ;;  %v3032_v7 = vsel %vm3024_vm2, %v6852_v43, %v2814_v23 }
 0x1f0   : > { %v3135_v29 = vsel %vm3024_vm2, %v7431_v27, %v2954_v2  ;;  %3585 = vmatmul.mubr.bf16.gmra.mrb[8].mxu0 %v3032_v7 }
 0x1f1   : > { %3688 = vmatprep.mubr.bf16.mxu1 %v3135_v29  ;;  %v2759_v20 = vrot.slane %v2757_v34, 1  ;;  %v7440_v24 = vsel %vm2873_vm1, %v2907_v38, %v2908_v12 }
 0x1f2   : > { %2991 = vrot.lane.b32.xlu0 %v7440_v24, %s5472_s29  ;;  %v2840_v33 = vpop.permute.xlu1 %2839 }
 0x1f3   : > { %v2930_v28 = vpop.permute.xlu0 %2929  ;;  %v7448_v43 = vsel %vm2616_vm0, %v2755_v44, %v2759_v20  ;;  %v7452_v36 = vsel %vm3024_vm2, %v6990_v57, %v2840_v33 }
 0x1f4   : > { %v3087_v9 = vsel %vm3024_vm2, %v7168_v47, %v2930_v28  ;;  %2831 = vrot.lane.b32.xlu1 %v7448_v43, %s5472_s29  ;;  %3689 = vmatmul.mubr.bf16.gmra.mrb[12].mxu1 %v7452_v36 }
 0x1f5   : > { %3592 = vmatprep.mubr.bf16.mxu0 %v3087_v9  ;;  %3729 = vmatprep.mubr.bf16.mxu1 %v3032_v7 }
 0x1f6   : > { %2995 = vrot.lane.b32.xlu0 %v7312_v42, %s5472_s29  ;;  %v2816_v6 = vpop.permute.xlu1 %2815 }
 0x1f7   : > { %v2972_v30 = vpop.permute.xlu0 %2971  ;;  %v3035_v57 = vsel %vm3024_vm2, %v7023_v3, %v2816_v6  ;;  %v2198_v6 = vld [vmem:[%s6761_s23 + $0xc8] sm:$0x1] }
 0x1f8   : > { %2989 = vrot.lane.b32.xlu1 %v7461_v17, %s5472_s29  ;;  %3593 = vmatmul.mubr.bf16.gmra.mrb[12].mxu0 %v3035_v57  ;;  %v3139_v53 = vsel %vm3024_vm2, %v7003_v49, %v2972_v30 }
 0x1fa   : > { %v2932_v26 = vpop.permute.xlu1 %2931 }
 0x1fb   : > { %v2818_v39 = vpop.permute.xlu0 %2817  ;;  %v3091_v60 = vsel %vm3024_vm2, %v7206_v58, %v2932_v26  ;;  %v2200_v26 = vld [vmem:[%s6761_s23 + $0xcc] sm:$0xff]  }
 0x1fc   : > { %2993 = vrot.lane.b32.xlu1 %v7297_v50, %s5472_s29  ;;  %3600 = vmatprep.mubr.bf16.mxu0 %v3091_v60  ;;  %v3038_v29 = vsel %vm3024_vm2, %v7054_v59, %v2818_v39 }
 0x1fd   : > { %3730 = vmatmul.mubr.bf16.vlgmr.msra.gmra.mrb[16].mxu1 %v3139_v53 }
 0x1fe   : > { %3737 = vmatprep.mubr.bf16.mxu1 %v3035_v57  ;;  %v2974_v3 = vpop.permute.xlu1 %2973  ;;  %v2958_v57 = vshll.u32 %v7060_v18, 16 }
 0x1ff   : > { %v2934_v2 = vpop.permute.xlu0 %2933  ;;  %v3143_v41 = vsel %vm3024_vm2, %v7075_v32, %v2974_v3 }
 0x200   : > { %v3095_v14 = vsel %vm3024_vm2, %v7247_v35, %v2934_v2  ;;  %2997 = vrot.lane.b32.xlu1 %v7385_v10, %s5472_s29  ;;  %3601 = vmatmul.mubr.bf16.gmra.mrb[16].mxu0 %v3038_v29  ;;  %v2960_v2 = vrot.slane %v2958_v57, 1 }
 0x201   : > { %3608 = vmatprep.mubr.bf16.mxu0 %v3095_v14  ;;  %v2254_v14 = vunpack.c.h.bf16 %v2200_v26 }
 0x202   : > { %v2820_v49 = vpop.permute.xlu1 %2819 }
 0x203   : > { %v2976_v38 = vpop.permute.xlu0 %2975  ;;  %v3041_v34 = vsel %vm3024_vm2, %v7091_v48, %v2820_v49 }
 0x204   : > { %2999 = vrot.lane.b32.xlu1 %v7431_v27, %s5472_s29  ;;  %v3147_v12 = vsel %vm3024_vm2, %v7114_v11, %v2976_v38  ;;  %v2968_v38 = vrot.slane %v7060_v18, 1 }
 0x205   : > { %3738 = vmatmul.mubr.bf16.gmra.mrb[20].mxu1 %v3143_v41  ;;  %v2956_v41 = vshrl.u32 %v7060_v18, 16 }
 0x206   : > { %3745 = vmatprep.mubr.bf16.mxu1 %v3038_v29  ;;  %v2253_v29 = vunpack.c.l.bf16 %v2200_v26 }
 0x208   : > { %v2936_v23 = vpop.permute.xlu1 %2935  ;;  %3609 = vmatmul.mubr.bf16.gmra.mrb[20].mxu0 %v3041_v34 }
 0x209   : > { %v3099_v59 = vsel %vm3024_vm2, %v7255_v4, %v2936_v23 }
 0x20a   : > { %3616 = vmatprep.mubr.bf16.mxu0 %v3099_v59 }
 0x20c   : > { %v2978_v32 = vpop.permute.xlu1 %2977 }
 0x20d   : > { %3746 = vmatmul.mubr.bf16.gmra.mrb[24].mxu1 %v3147_v12  ;;  %v3151_v20 = vsel %vm3024_vm2, %v7129_v52, %v2978_v32 }
 0x20e   : > { %3753 = vmatprep.mubr.bf16.mxu1 %v3041_v34  ;;  %v2961_v34 = vor.u32 %v2960_v2, %v2956_v41 }
 0x212   : > { %v2824_v11 = vpop.permute.xlu1 %2823 }
 0x213   : > { %v3047_v33 = vsel %vm3024_vm2, %v7193_v37, %v2824_v11 }
 0x215   : > { %3754 = vmatmul.mubr.bf16.gmra.mrb[28].mxu1 %v3151_v20 }
 0x217   : > { %v2938_v7 = vpop.permute.xlu0 %2937 }
 0x218   : > { %v3103_v48 = vsel %vm3024_vm2, %v7289_v61, %v2938_v7 }
 0x21b   : > { %v2822_v63 = vpop.permute.xlu0 %2821 }
 0x21c   : > { %v3044_v28 = vsel %vm3024_vm2, %v7142_v22, %v2822_v63 }
 0x21d   : > { %3617 = vmatmul.mubr.bf16.gmra.mrb[24].mxu0 %v3044_v28  ;;  %3761 = vmatprep.mubr.bf16.mxu1 %v3044_v28 }
 0x21e   : > { %3624 = vmatprep.mubr.bf16.mxu0 %v3103_v48 }
 0x21f   : > { %v2980_v44 = vpop.permute.xlu0 %2979 }
 0x220   : > { %v3155_v22 = vsel %vm3024_vm2, %v7178_v40, %v2980_v44  ;;  %v2252_v40 = vunpack.c.l.bf16 %v2198_v6  ;;  %v2201_v44 = vld [vmem:[%s6761_s23 + $0xd4] sm:$0x1] }
 0x221   : > { %3762 = vmatmul.mubr.bf16.gmra.mrb[32].mxu1 %v3155_v22  ;;  %v2255_v22 = vunpack.c.l.bf16 %v2201_v44 }
 0x222   : > { %3769 = vmatprep.mubr.bf16.mxu1 %v3047_v33 }
 0x223   : > { %v2982_v9 = vpop.permute.xlu0 %2981 }
 0x224   : > { %v3159_v37 = vsel %vm3024_vm2, %v7240_v5, %v2982_v9 }
 0x225   : > { %3625 = vmatmul.mubr.bf16.gmra.mrb[28].mxu0 %v3047_v33 }
 0x227   : > { %v2940_v1 = vpop.permute.xlu1 %2939  ;;  %v2826_v52 = vpop.permute.xlu0 %2825 }
 0x228   : > { %v3107_v30 = vsel %vm3024_vm2, %v7407_v62, %v2940_v1  ;;  %v3050_v45 = vsel %vm3024_vm2, %v7230_v54, %v2826_v52 }
 0x229   : > { %3632 = vmatprep.mubr.bf16.mxu0 %v3107_v30  ;;  %3770 = vmatmul.mubr.bf16.gmra.mrb[36].mxu1 %v3159_v37 }
 0x22a   : > { %3777 = vmatprep.mubr.bf16.mxu1 %v3050_v45 }
 0x22d   : > { %3633 = vmatmul.mubr.bf16.gmra.mrb[32].mxu0 %v3050_v45 }
 0x238   : > { %v2509_v39 = vpop.permute.xlu1 %2508  ;;  %v2519_v60 = vpop.permute.xlu0 %2518 }
 0x239   : > { %v2576_v53 = vmul.f32 %v2509_v39, %v2252_v40  ;;  %v2578_v12 = vmul.f32 %v2519_v60, %v2254_v14 }
 0x23b   : > { %v2613_v3 = vpack.c.bf16 %v2576_v53, %v2576_v53 }
 0x23c   : > { %v2514_v49 = vpop.permute.xlu1 %2513  ;;  %v2828_v54 = vpop.permute.xlu0 %2827 }
 0x23d   : > { %v2963_v5 = vshll.u32 %v2613_v3, 16  ;;  %v2969_v23 = vrot.slane %v2613_v3, 1  ;;  %v2577_v7 = vmul.f32 %v2514_v49, %v2253_v29  ;;  %v3053_v11 = vsel %vm3024_vm2, %v7260_v19, %v2828_v54 }
 0x23f   : > { %v2965_v59 = vrot.slane %v2963_v5, 1  ;;  %v7511_v63 = vsel %vm2873_vm1, %v2968_v38, %v2969_v23  ;;  %v7527_v33 = vpack.c.bf16 %v2578_v12, %v2577_v7 }
 0x240   : > { %3001 = vrot.lane.b32.xlu1 %v7511_v63, %s5472_s29  ;;  %v2942_v32 = vpop.permute.xlu1 %2941  ;;  %v2984_v28 = vpop.permute.xlu0 %2983 }
 0x241   : > { %v7516_v48 = vsel %vm2616_vm0, %v2961_v34, %v2965_v59  ;;  %v3111_v20 = vsel %vm3024_vm2, %v7422_v55, %v2942_v32  ;;  %v3163_v9 = vsel %vm3024_vm2, %v7220_v51, %v2984_v28  ;;  %v3006_v1 = vshll.u32 %v7527_v33, 16 }
 0x242   : > { %3015 = vrot.lane.b32.xlu0 %v7516_v48, %s5472_s29  ;;  %3640 = vmatprep.mubr.bf16.mxu0 %v3111_v20  ;;  %v3004_v19 = vshrl.u32 %v7527_v33, 16 }
 0x243   : > { %3641 = vmatmul.mubr.bf16.gmra.mrb[36].mxu0 %v3053_v11  ;;  %3778 = vmatmul.mubr.bf16.gmra.mrb[40].mxu1 %v3163_v9  ;;  %v3008_v37 = vrot.slane %v3006_v1, 1 }
 0x244   : > { %3785 = vmatprep.mubr.bf16.mxu1 %v3053_v11 }
 0x245   : > { %v3009_v57 = vor.u32 %v3008_v37, %v3004_v19 }
 0x248   : > { %v2524_v30 = vpop.permute.xlu1 %2523 }
 0x249   : > { %v2579_v52 = vmul.f32 %v2524_v30, %v2255_v22 }
 0x24b   : > { %v7530_v45 = vpack.c.bf16 %v2579_v52, %v2579_v52 }
 0x24d   : > { %v3011_v6 = vshll.u32 %v7530_v45, 16 }
 0x24f   : > { %v3013_v40 = vrot.slane %v3011_v6, 1 }
 0x251   : > { %v3014_v51 = vsel %vm2616_vm0, %v3009_v57, %v3013_v40 }
 0x252   : > { %3017 = vrot.lane.b32.xlu0 %v3014_v51, %s5472_s29 }
 0x256   : > { %v2944_v39 = vpop.permute.xlu1 %2943 }
 0x257   : > { %v2830_v26 = vpop.permute.xlu0 %2829  ;;  %v3115_v60 = vsel %vm3024_vm2, %v7461_v17, %v2944_v39 }
 0x258   : > { %v3056_v53 = vsel %vm3024_vm2, %v7292_v25, %v2830_v26  ;;  %3648 = vmatprep.mubr.bf16.mxu0 %v3115_v60 }
 0x259   : > { %3649 = vmatmul.mubr.bf16.gmra.mrb[40].mxu0 %v3056_v53 }
 0x25a   : > { %v2986_v2 = vpop.permute.xlu1 %2985 }
 0x25b   : > { %v2946_v3 = vpop.permute.xlu0 %2945  ;;  %v3167_v14 = vsel %vm3024_vm2, %v7263_v13, %v2986_v2 }
 0x25c   : > { %v3119_v29 = vsel %vm3024_vm2, %v7440_v24, %v2946_v3  ;;  %3786 = vmatmul.mubr.bf16.gmra.mrb[44].mxu1 %v3167_v14 }
 0x25d   : > { %3656 = vmatprep.mubr.bf16.mxu0 %v3119_v29  ;;  %3793 = vmatprep.mubr.bf16.mxu1 %v3056_v53 }
 0x25f   : > { %v2988_v49 = vpop.permute.xlu0 %2987 }
 0x260   : > { %v3171_v54 = vsel %vm3024_vm2, %v7279_v8, %v2988_v49 }
 0x264   : > { %3794 = vmatmul.mubr.bf16.gmra.mrb[48].mxu1 %v3171_v54  ;;  %v2992_v23 = vpop.permute.xlu0 %2991 }
 0x265   : > { %v3179_v8 = vsel %vm3024_vm2, %v7448_v43, %v2992_v23 }
 0x266   : > { %v2832_v41 = vpop.permute.xlu1 %2831 }
 0x267   : > { %v3059_v25 = vsel %vm3024_vm2, %v7389_v16, %v2832_v41 }
 0x268   : > { %3657 = vmatmul.mubr.bf16.gmra.mrb[44].mxu0 %v3059_v25  ;;  %3801 = vmatprep.mubr.bf16.mxu1 %v3059_v25 }
 0x269   : > { %5029 = vmatprep.mubr.msk.bf16.mxu0 %vm3024_vm2, %v7158_v56 }
 0x26a   : > { %v2990_v13 = vpop.permute.xlu1 %2989 }
 0x26b   : > { %v3175_v5 = vsel %vm3024_vm2, %v7393_v31, %v2990_v13 }
 0x26c   : > { %3802 = vmatmul.mubr.bf16.gmra.mrb[52].mxu1 %v3175_v5 }
 0x26d   : > { %3809 = vmatprep.mubr.bf16.mxu1 %v7309_v46 }
 0x26e   : > { %v2994_v56 = vpop.permute.xlu1 %2993 }
 0x26f   : > { %v3183_v46 = vsel %vm3024_vm2, %v6858_v21, %v2994_v56  ;;  %v7976_v21 = vld [vmem:[#allocation9_spill] sm:$0xff] }
 0x270   : > { %5030 = vmatmul.mubr.msk.bf16.vlgmr.msra.gmra.mrb[48].mxu0 %vm3024_vm2, %v7168_v47  ;;  %v2996_v47 = vpop.permute.xlu0 %2995 }
 0x271   : > { %5033 = vmatprep.mubr.msk.bf16.mxu0 %vm3024_vm2, %v7206_v58  ;;  %v7975_v58 = vld [vmem:[#allocation8_spill] sm:$0xff] }
 0x274   : > { %3810 = vmatmul.mubr.bf16.gmra.mrb[56].mxu1 %v3179_v8 }
 0x275   : > { %3817 = vmatprep.mubr.bf16.mxu1 %v7375_v0  ;;  %v3187_v0 = vsel %vm3024_vm2, %v7975_v58, %v2996_v47 }
 0x278   : > { %5034 = vmatmul.mubr.msk.bf16.gmra.mrb[52].mxu0 %vm3024_vm2, %v7247_v35  ;;  %v2998_v35 = vpop.permute.xlu1 %2997 }
 0x279   : > { %5037 = vmatprep.mubr.msk.bf16.mxu0 %vm3024_vm2, %v7255_v4  ;;  %v3191_v4 = vsel %vm3024_vm2, %v7976_v21, %v2998_v35  ;;  %v7623_v35 = vld [vmem:[%s7957_s5] ss:$0 sm:$0xff] }
 0x27c   : > { %3818 = vmatmul.mubr.bf16.gmra.mrb[60].mxu1 %v3183_v46 }
 0x27d   : > { %3825 = vmatprep.mubr.bf16.mxu1 %v7417_v15 }
 0x280   : > { %5038 = vmatmul.mubr.msk.bf16.gmra.mrb[56].mxu0 %vm3024_vm2, %v7289_v61 }
 0x281   : > { %5041 = vmatprep.mubr.msk.bf16.mxu0 %vm3024_vm2, %v7407_v62 }
 0x284   : > { %3826 = vmatmul.mubr.bf16.gmra.mrb[64].mxu1 %v3187_v0 }
 0x285   : > { %3833 = vmatprep.mubr.bf16.mxu1 %v7452_v36  ;;  %v3000_v36 = vpop.permute.xlu1 %2999 }
 0x288   : > { %5042 = vmatmul.mubr.msk.bf16.gmra.mrb[60].mxu0 %vm3024_vm2, %v7422_v55 }
 0x289   : > { %5045 = vmatprep.mubr.msk.bf16.mxu0 %vm3024_vm2, %v7461_v17 }
 0x28c   : > { %3834 = vmatmul.mubr.bf16.gmra.mrb[68].mxu1 %v3191_v4 }
 0x290   : > { %5046 = vmatmul.mubr.msk.bf16.gmra.mrb[64].mxu0 %vm3024_vm2, %v7440_v24  ;;  %v3021_v24 = vrot.slane %v7527_v33, 1 }
 0x291   : > { %5049 = vmatprep.mubr.msk.bf16.mxu0 %vm3024_vm2, %v7297_v50  ;;  %v3022_v50 = vrot.slane %v7530_v45, 1 }
 0x293   : > { %v3023_v43 = vsel %vm2873_vm1, %v3021_v24, %v3022_v50 }
 0x298   : > { %5050 = vmatmul.mubr.msk.bf16.gmra.mrb[68].mxu0 %vm3024_vm2, %v7312_v42 }
 0x299   : > { %5053 = vmatprep.mubr.msk.bf16.mxu0 %vm3024_vm2, %v7385_v10 }
 0x29c   : > { %v4865_v61 = vpop.f32.mrb[0].mxu1 }
 0x29d   : > { %v4866_v16 = vpop.f32.mrb[1].mxu1 }
 0x29e   : > { %v7584_v31 = vadd.f32 %v4866_v16, %v4865_v61  ;;  %v4868_v62 = vpop.f32.mrb[2].mxu1 }
 0x29f   : > { %v4869_v15 = vpop.f32.mrb[3].mxu1 }
 0x2a0   : > { %v7586_v55 = vadd.f32 %v4869_v15, %v4868_v62  ;;  %5054 = vmatmul.mubr.msk.bf16.gmra.mrb[72].mxu0 %vm3024_vm2, %v7431_v27  ;;  %v7977_v27 = vld [vmem:[#allocation10_spill] sm:$0xff] }
 0x2a1   : > { %5057 = vmatprep.mubr.msk.bf16.mxu0 %vm3024_vm2, %v7511_v63  ;;  %v3195_v34 = vsel %vm3024_vm2, %v7977_v27, %v3000_v36 }
 0x2a8   : > { %5058 = vmatmul.mubr.msk.bf16.gmra.mrb[76].mxu0 %vm3024_vm2, %v3023_v43 }
 0x2a9   : > { %v4793_v42 = vpop.f32.mrb[0].mxu0 }
 0x2aa   : > { %v4794_v38 = vpop.f32.mrb[1].mxu0 }
 0x2ab   : > { %v4795_v59 = vadd.f32 %v4794_v38, %v4793_v42  ;;  %v4796_v12 = vpop.f32.mrb[2].mxu0 }
 0x2ac   : > { %v4797_v7 = vpop.f32.mrb[3].mxu0 }
 0x2ad   : > { %v4798_v63 = vadd.f32 %v4797_v7, %v4796_v12  ;;  %v3571_v4 = vadd.f32 %v4795_v59, %v7623_v35 }
 0x2ae   : > { %v4871_v32 = vpop.f32.mrb[4].mxu1 }
 0x2af   : > { %v4872_v28 = vpop.f32.mrb[5].mxu1  ;;  %v3574_v50 = vadd.f32 %v4798_v63, %v7623_v35 }
 0x2b0   : > { %v7604_v20 = vadd.f32 %v4872_v28, %v4871_v32  ;;  %v4874_v44 = vpop.f32.mrb[6].mxu1 }
 0x2b1   : > { %v4875_v11 = vpop.f32.mrb[7].mxu1 }
 0x2b2   : > { %v7606_v9 = vadd.f32 %v4875_v11, %v4874_v44  ;;  %v3002_v45 = vpop.permute.xlu1 %3001 }
 0x2b3   : > { %v3199_v26 = vsel %vm3024_vm2, %v7516_v48, %v3002_v45 }
 0x2b4   : > { %v3016_v17 = vpop.permute.xlu0 %3015 }
 0x2b5   : > { %v3202_v10 = vsel %vm3024_vm2, %v7060_v18, %v3016_v17 }
 0x2b6   : > { %3841 = vmatprep.mubr.bf16.mxu1 %v3202_v10 }
 0x2b7   : > { %3842 = vmatmul.mubr.bf16.gmra.mrb[72].mxu1 %v3195_v34 }
 0x2b8   : > { %v4799_v22 = vpop.f32.mrb[4].mxu0 }
 0x2b9   : > { %v4800_v18 = vpop.f32.mrb[5].mxu0 }
 0x2ba   : > { %v4801_v1 = vadd.f32 %v4800_v18, %v4799_v22  ;;  %v4802_v30 = vpop.f32.mrb[6].mxu0 }
 0x2bb   : > { %v4803_v52 = vpop.f32.mrb[7].mxu0 }
 0x2bc   : > { %v4804_v37 = vadd.f32 %v4803_v52, %v4802_v30  ;;  %v4877_v6 = vpop.f32.mrb[8].mxu1  ;;  %v3579_v59 = vadd.f32 %v4801_v1, %v7623_v35 }
 0x2bd   : > { %v4878_v40 = vpop.f32.mrb[9].mxu1 }
 0x2be   : > { %v7610_v51 = vadd.f32 %v4878_v40, %v4877_v6  ;;  %v4880_v39 = vpop.f32.mrb[10].mxu1  ;;  %v3582_v63 = vadd.f32 %v4804_v37, %v7623_v35 }
 0x2bf   : > { %v4881_v60 = vpop.f32.mrb[11].mxu1 }
 0x2c0   : > { %v7614_v53 = vadd.f32 %v4881_v60, %v4880_v39 }
 0x2c3   : > { %v4805_v2 = vpop.f32.mrb[8].mxu0 }
 0x2c4   : > { %v3018_v19 = vpop.permute.xlu0 %3017  ;;  %v4806_v3 = vpop.f32.mrb[9].mxu0 }
 0x2c5   : > { %v3205_v57 = vsel %vm3024_vm2, %v7527_v33, %v3018_v19  ;;  %v4807_v14 = vadd.f32 %v4806_v3, %v4805_v2  ;;  %v4808_v29 = vpop.f32.mrb[10].mxu0 }
 0x2c6   : > { %3849 = vmatprep.mubr.bf16.mxu1 %v3205_v57  ;;  %v4809_v49 = vpop.f32.mrb[11].mxu0 }
 0x2c7   : > { %3850 = vmatmul.mubr.bf16.gmra.mrb[76].mxu1 %v3199_v26  ;;  %v4810_v54 = vadd.f32 %v4809_v49, %v4808_v29  ;;  %v4883_v41 = vpop.f32.mrb[12].mxu1  ;;  %v3587_v1 = vadd.f32 %v4807_v14, %v7623_v35 }
 0x2c8   : > { %v4884_v25 = vpop.f32.mrb[13].mxu1 }
 0x2c9   : > { %v7616_v33 = vadd.f32 %v4884_v25, %v4883_v41  ;;  %v4886_v13 = vpop.f32.mrb[14].mxu1  ;;  %v3590_v2 = vadd.f32 %v4810_v54, %v7623_v35 }
 0x2ca   : > { %v4887_v5 = vpop.f32.mrb[15].mxu1 }
 0x2cb   : > { %v7618_v23 = vadd.f32 %v4887_v5, %v4886_v13  ;;  %v4811_v8 = vpop.f32.mrb[12].mxu0 }
 0x2cc   : > { %v4812_v48 = vpop.f32.mrb[13].mxu0 }
 0x2cd   : > { %v4813_v56 = vadd.f32 %v4812_v48, %v4811_v8  ;;  %v4814_v46 = vpop.f32.mrb[14].mxu0 }
 0x2ce   : > { %v4815_v47 = vpop.f32.mrb[15].mxu0 }
 0x2cf   : > { %v4816_v58 = vadd.f32 %v4815_v47, %v4814_v46  ;;  %v3595_v46 = vadd.f32 %v4813_v56, %v7623_v35 }
 0x2d0   : > { %v4905_v0 = vpop.f32.mrb[16].mxu1 }
 0x2d1   : > { %v4906_v21 = vpop.f32.mrb[17].mxu1  ;;  %v3598_v54 = vadd.f32 %v4816_v58, %v7623_v35 }
 0x2d2   : > { %v4907_v61 = vadd.f32 %v4906_v21, %v4905_v0  ;;  %v4908_v16 = vpop.f32.mrb[18].mxu1 }
 0x2d3   : > { %v4909_v62 = vpop.f32.mrb[19].mxu1  ;;  %v4817_v15 = vpop.f32.mrb[16].mxu0 }
 0x2d4   : > { %v4910_v24 = vadd.f32 %v4909_v62, %v4908_v16  ;;  %v4818_v43 = vpop.f32.mrb[17].mxu0  ;;  %v7627_v36 = vadd.f32 %v4907_v61, %v3571_v4 }
 0x2d5   : > { %v4819_v17 = vadd.f32 %v4818_v43, %v4817_v15  ;;  %v4820_v42 = vpop.f32.mrb[18].mxu0 }
 0x2d6   : > { %v4821_v10 = vpop.f32.mrb[19].mxu0  ;;  %v7629_v38 = vadd.f32 %v4910_v24, %v3574_v50 }
 0x2d7   : > { %v4822_v27 = vadd.f32 %v4821_v10, %v4820_v42  ;;  %v3603_v56 = vadd.f32 %v4819_v17, %v7623_v35 }
 0x2d8   : > { %v4911_v34 = vpop.f32.mrb[20].mxu1 }
 0x2d9   : > { %v4912_v12 = vpop.f32.mrb[21].mxu1  ;;  %v3606_v58 = vadd.f32 %v4822_v27, %v7623_v35 }
 0x2da   : > { %v4913_v7 = vadd.f32 %v4912_v12, %v4911_v34  ;;  %v4914_v32 = vpop.f32.mrb[22].mxu1 }
 0x2db   : > { %v4915_v28 = vpop.f32.mrb[23].mxu1  ;;  %v4823_v44 = vpop.f32.mrb[20].mxu0 }
 0x2dc   : > { %v4916_v11 = vadd.f32 %v4915_v28, %v4914_v32  ;;  %v4824_v22 = vpop.f32.mrb[21].mxu0  ;;  %v7633_v18 = vadd.f32 %v4913_v7, %v3579_v59 }
 0x2dd   : > { %v4825_v30 = vadd.f32 %v4824_v22, %v4823_v44  ;;  %v4826_v52 = vpop.f32.mrb[22].mxu0 }
 0x2de   : > { %v4827_v45 = vpop.f32.mrb[23].mxu0  ;;  %v7635_v6 = vadd.f32 %v4916_v11, %v3582_v63 }
 0x2df   : > { %v4828_v19 = vadd.f32 %v4827_v45, %v4826_v52  ;;  %v3611_v17 = vadd.f32 %v4825_v30, %v7623_v35 }
 0x2e0   : > { %v4917_v40 = vpop.f32.mrb[24].mxu1 }
 0x2e1   : > { %v4918_v57 = vpop.f32.mrb[25].mxu1  ;;  %v3614_v27 = vadd.f32 %v4828_v19, %v7623_v35 }
 0x2e2   : > { %v4919_v39 = vadd.f32 %v4918_v57, %v4917_v40  ;;  %v4920_v26 = vpop.f32.mrb[26].mxu1 }
 0x2e3   : > { %v4921_v60 = vpop.f32.mrb[27].mxu1 }
 0x2e4   : > { %v4922_v37 = vadd.f32 %v4921_v60, %v4920_v26  ;;  %v7639_v3 = vadd.f32 %v4919_v39, %v3587_v1 }
 0x2e6   : > { %v7641_v49 = vadd.f32 %v4922_v37, %v3590_v2 }
 0x2e8   : > { %v4923_v5 = vpop.f32.mrb[28].mxu1 }
 0x2e9   : > { %v4924_v48 = vpop.f32.mrb[29].mxu1 }
 0x2ea   : > { %v4925_v47 = vadd.f32 %v4924_v48, %v4923_v5  ;;  %v4926_v0 = vpop.f32.mrb[30].mxu1 }
 0x2eb   : > { %v4927_v21 = vpop.f32.mrb[31].mxu1 }
 0x2ec   : > { %v4928_v4 = vadd.f32 %v4927_v21, %v4926_v0  ;;  %v7645_v61 = vadd.f32 %v4925_v47, %v3595_v46 }
 0x2ee   : > { %v7647_v62 = vadd.f32 %v4928_v4, %v3598_v54 }
 0x2f0   : > { %v4829_v29 = vpop.f32.mrb[24].mxu0 }
 0x2f1   : > { %v4830_v41 = vpop.f32.mrb[25].mxu0 }
 0x2f2   : > { %v4831_v25 = vadd.f32 %v4830_v41, %v4829_v29  ;;  %v4832_v13 = vpop.f32.mrb[26].mxu0 }
 0x2f3   : > { %v4833_v8 = vpop.f32.mrb[27].mxu0 }
 0x2f4   : > { %v4834_v14 = vadd.f32 %v4833_v8, %v4832_v13  ;;  %v4929_v43 = vpop.f32.mrb[32].mxu1  ;;  %v3619_v48 = vadd.f32 %v4831_v25, %v7623_v35 }
 0x2f5   : > { %v4930_v10 = vpop.f32.mrb[33].mxu1 }
 0x2f6   : > { %v4931_v12 = vadd.f32 %v4930_v10, %v4929_v43  ;;  %v4932_v59 = vpop.f32.mrb[34].mxu1  ;;  %v3622_v4 = vadd.f32 %v4834_v14, %v7623_v35 }
 0x2f7   : > { %v4933_v7 = vpop.f32.mrb[35].mxu1 }
 0x2f8   : > { %v4835_v16 = vpop.f32.mrb[28].mxu0  ;;  %v4934_v32 = vadd.f32 %v4933_v7, %v4932_v59  ;;  %v7651_v28 = vadd.f32 %v4931_v12, %v3603_v56 }
 0x2f9   : > { %v4836_v15 = vpop.f32.mrb[29].mxu0 }
 0x2fa   : > { %v4837_v50 = vadd.f32 %v4836_v15, %v4835_v16  ;;  %v4838_v24 = vpop.f32.mrb[30].mxu0  ;;  %v7653_v63 = vadd.f32 %v4934_v32, %v3606_v58 }
 0x2fb   : > { %v4839_v42 = vpop.f32.mrb[31].mxu0 }
 0x2fc   : > { %v4840_v34 = vadd.f32 %v4839_v42, %v4838_v24  ;;  %v4935_v45 = vpop.f32.mrb[36].mxu1  ;;  %v3627_v58 = vadd.f32 %v4837_v50, %v7623_v35 }
 0x2fd   : > { %v4936_v57 = vpop.f32.mrb[37].mxu1 }
 0x2fe   : > { %v4937_v39 = vadd.f32 %v4936_v57, %v4935_v45  ;;  %v4938_v26 = vpop.f32.mrb[38].mxu1 }
 0x2ff   : > { %v4939_v60 = vpop.f32.mrb[39].mxu1 }
 0x300   : > { %v4841_v44 = vpop.f32.mrb[32].mxu0  ;;  %v4940_v2 = vadd.f32 %v4939_v60, %v4938_v26  ;;  %v7657_v37 = vadd.f32 %v4937_v39, %v3611_v17 }
 0x301   : > { %v4842_v11 = vpop.f32.mrb[33].mxu0 }
 0x302   : > { %v4843_v22 = vadd.f32 %v4842_v11, %v4841_v44  ;;  %v4844_v52 = vpop.f32.mrb[34].mxu0  ;;  %v7659_v29 = vadd.f32 %v4940_v2, %v3614_v27  ;;  %v3630_v11 = vadd.f32 %v4840_v34, %v7623_v35 }
 0x303   : > { %v4845_v40 = vpop.f32.mrb[35].mxu0 }
 0x304   : > { %v4846_v1 = vadd.f32 %v4845_v40, %v4844_v52  ;;  %v3635_v39 = vadd.f32 %v4843_v22, %v7623_v35 }
 0x306   : > { %v3638_v50 = vadd.f32 %v4846_v1, %v7623_v35 }
 0x316   : > { %v4847_v41 = vpop.f32.mrb[36].mxu0  ;;  %v4941_v13 = vpop.f32.mrb[40].mxu1 }
 0x317   : > { %v4848_v5 = vpop.f32.mrb[37].mxu0  ;;  %v4942_v8 = vpop.f32.mrb[41].mxu1 }
 0x318   : > { %v4849_v46 = vadd.f32 %v4848_v5, %v4847_v41  ;;  %v4850_v47 = vpop.f32.mrb[38].mxu0  ;;  %v4943_v30 = vadd.f32 %v4942_v8, %v4941_v13  ;;  %v4944_v0 = vpop.f32.mrb[42].mxu1 }
 0x319   : > { %v4851_v21 = vpop.f32.mrb[39].mxu0  ;;  %v4945_v54 = vpop.f32.mrb[43].mxu1 }
 0x31a   : > { %v4852_v19 = vadd.f32 %v4851_v21, %v4850_v47  ;;  %v4946_v16 = vadd.f32 %v4945_v54, %v4944_v0  ;;  %v7663_v15 = vadd.f32 %v4943_v30, %v3619_v48  ;;  %v3643_v1 = vadd.f32 %v4849_v46, %v7623_v35 }
 0x31c   : > { %v7665_v24 = vadd.f32 %v4946_v16, %v3622_v4  ;;  %v3646_v16 = vadd.f32 %v4852_v19, %v7623_v35 }
 0x32c   : > { %v4853_v43 = vpop.f32.mrb[40].mxu0 }
 0x32d   : > { %v4854_v42 = vpop.f32.mrb[41].mxu0 }
 0x32e   : > { %v7667_v10 = vadd.f32 %v4854_v42, %v4853_v43  ;;  %v4856_v56 = vpop.f32.mrb[42].mxu0 }
 0x32f   : > { %v4857_v25 = vpop.f32.mrb[43].mxu0  ;;  %v4947_v12 = vpop.f32.mrb[44].mxu1 }
 0x330   : > { %v7669_v59 = vadd.f32 %v4857_v25, %v4856_v56  ;;  %v4948_v7 = vpop.f32.mrb[45].mxu1  ;;  %v7700_v56 = vld [vmem:[%s339_s9] ss:$0 sm:$0xff]  ;;  %s5406_s9 = sshll.u32 %s5473_s8, 4  ;;  %s5407_s9 = int_to_ptr.vmem [resolvable:$false] %s5406_s9 }
 0x331   : > { %v4949_v32 = vadd.f32 %v4948_v7, %v4947_v12  ;;  %v4950_v14 = vpop.f32.mrb[46].mxu1  ;;  %v4060_v7 = vld [vmem:[%s7697_s16 + $0x10] sm:$0xff]  ;;  %s5408_s14 = scalar_lea.vmem %s5407_s9, 8192  ;;  %p5409_p13 = scmp.lt.s32.totalorder %s7903_s19, %s5407_s9 }
 0x332   : > { %v4951_v44 = vpop.f32.mrb[47].mxu1  ;;  %p5410_p0 = scmp.lt.s32.totalorder %s5408_s14, %s5402_s21 }
 0x333   : > { %v4952_v52 = vadd.f32 %v4951_v44, %v4950_v14  ;;  %v7673_v45 = vadd.f32 %v4949_v32, %v3627_v58  ;;  %v4058_v44 = vld [vmem:[%s7697_s16] sm:$0xff] }
 0x334   : > { %p5411_p1 = por %p5410_p0, %p5409_p13 }
 0x335   : > { %v7675_v40 = vadd.f32 %v4952_v52, %v3630_v11 }
 0x336   : > { %p5412_p2 = pnand %p5411_p1, %p5405_p12 }
 0x337   : > { %v4953_v57 = vpop.f32.mrb[48].mxu1 }
 0x338   : > { %v4954_v17 = vpop.f32.mrb[49].mxu1 }
 0x339   : > { %v4955_v26 = vadd.f32 %v4954_v17, %v4953_v57  ;;  %v4956_v60 = vpop.f32.mrb[50].mxu1  ;;  %v4061_v17 = vld [vmem:[%s7697_s16 + $0x18] sm:$0xff] }
 0x33a   : > { %v4957_v27 = vpop.f32.mrb[51].mxu1 }
 0x33b   : > { %v4958_v2 = vadd.f32 %v4957_v27, %v4956_v60  ;;  %v7679_v41 = vadd.f32 %v4955_v26, %v3635_v39  ;;  %v4859_v13 = vpop.f32.mrb[44].mxu0  ;;  %v4059_v27 = vld [vmem:[%s7697_s16 + $0x8] sm:$0xff] }
 0x33c   : > { %v4860_v5 = vpop.f32.mrb[45].mxu0 }
 0x33d   : > { %v7681_v34 = vadd.f32 %v4958_v2, %v3638_v50  ;;  %v7683_v8 = vadd.f32 %v4860_v5, %v4859_v13  ;;  %v4862_v48 = vpop.f32.mrb[46].mxu0  ;;  %v3651_v50 = vadd.f32 %v7667_v10, %v7623_v35  ;;  %v3654_v10 = vadd.f32 %v7669_v59, %v7623_v35 }
 0x33e   : > { %v4863_v47 = vpop.f32.mrb[47].mxu0 }
 0x33f   : > { %v7685_v30 = vadd.f32 %v4863_v47, %v4862_v48  ;;  %v4959_v22 = vpop.f32.mrb[52].mxu1 }
 0x340   : > { %v4960_v0 = vpop.f32.mrb[53].mxu1 }
 0x341   : > { %v4961_v21 = vadd.f32 %v4960_v0, %v4959_v22  ;;  %v4962_v54 = vpop.f32.mrb[54].mxu1 }
 0x342   : > { %v4963_v4 = vpop.f32.mrb[55].mxu1 }
 0x343   : > { %v4964_v43 = vadd.f32 %v4963_v4, %v4962_v54  ;;  %v5031_v42 = vpop.f32.mrb[48].mxu0  ;;  %v7702_v25 = vadd.f32 %v4961_v21, %v3643_v1  ;;  %v4064_v4 = vld [vmem:[%s7697_s16 + $0x30] sm:$0xff] }
 0x344   : > { %v3901_v46 = vadd.f32 %v5031_v42, %v7633_v18  ;;  %v3892_v12 = vpop.f32.mrb[49].mxu0 }
 0x345   : > { %v3893_v58 = vadd.f32 %v3892_v12, %v7627_v36  ;;  %v5032_v32 = vpop.f32.mrb[50].mxu0  ;;  %v7709_v14 = vadd.f32 %v4964_v43, %v3646_v16 }
 0x346   : > { %v4028_v19 = vmul.f32 %v7700_v56, %v3901_v46  ;;  %v3904_v11 = vadd.f32 %v5032_v32, %v7635_v6  ;;  %v3895_v52 = vpop.f32.mrb[51].mxu0  ;;  %v4062_v46 = vld [vmem:[%s7697_s16 + $0x20] sm:$0xff] }
 0x347   : > { %v4026_v57 = vmul.f32 %v7700_v56, %v3893_v58  ;;  %v3896_v39 = vadd.f32 %v3895_v52, %v7629_v38  ;;  %v4965_v18 = vpop.f32.mrb[56].mxu1 }
 0x348   : > { %v4092_v26 = vadd.f32 %v4060_v7, %v4028_v19  ;;  %v4029_v60 = vmul.f32 %v7700_v56, %v3904_v11  ;;  %v4966_v36 = vpop.f32.mrb[57].mxu1  ;;  %v4063_v11 = vld [vmem:[%s7697_s16 + $0x28] sm:$0xff] }
 0x349   : > { %v4090_v2 = vadd.f32 %v4058_v44, %v4026_v57  ;;  %v4027_v13 = vmul.f32 %v7700_v56, %v3896_v39  ;;  %v4967_v5 = vadd.f32 %v4966_v36, %v4965_v18  ;;  %v4968_v6 = vpop.f32.mrb[58].mxu1  ;;  %v3659_v57 = vadd.f32 %v7683_v8, %v7623_v35 }
 0x34a   : > { %4124 = vst.msk [vmem:[%s7722_s17 + $0x10] sm:$0xff] %vm3024_vm2, %v4092_v26  ;;  %v4093_v38 = vadd.f32 %v4061_v17, %v4029_v60  ;;  %v4969_v48 = vpop.f32.mrb[59].mxu1  ;;  %v3662_v60 = vadd.f32 %v7685_v30, %v7623_v35 }
 0x34b   : > { %4122 = vst.msk [vmem:[%s7722_s17] sm:$0xff] %vm3024_vm2, %v4090_v2  ;;  %v4091_v47 = vadd.f32 %v4059_v27, %v4027_v13  ;;  %v4970_v22 = vadd.f32 %v4969_v48, %v4968_v6  ;;  %v5035_v0 = vpop.f32.mrb[52].mxu0  ;;  %v7730_v1 = vadd.f32 %v4967_v5, %v3651_v50  ;;  %v4068_v5 = vld [vmem:[%s7697_s16 + $0x50] sm:$0xff] }
 0x34c   : > { %4125 = vst.msk [vmem:[%s7722_s17 + $0x18] sm:$0xff] %vm3024_vm2, %v4093_v38  ;;  %v3917_v21 = vadd.f32 %v5035_v0, %v7645_v61  ;;  %v3908_v54 = vpop.f32.mrb[53].mxu0  ;;  %v4065_v61 = vld [vmem:[%s7697_s16 + $0x38] sm:$0xff] }
 0x34d   : > { %4123 = vst.msk [vmem:[%s7722_s17 + $0x8] sm:$0xff] %vm3024_vm2, %v4091_v47  ;;  %v3909_v16 = vadd.f32 %v3908_v54, %v7639_v3  ;;  %v5036_v59 = vpop.f32.mrb[54].mxu0  ;;  %v7739_v43 = vadd.f32 %v4970_v22, %v3654_v10  ;;  %v4066_v10 = vld [vmem:[%s7697_s16 + $0x40] sm:$0xff] }
 0x34e   : > { %v4032_v42 = vmul.f32 %v7700_v56, %v3917_v21  ;;  %v3920_v12 = vadd.f32 %v5036_v59, %v7647_v62  ;;  %v3911_v7 = vpop.f32.mrb[55].mxu0 }
 0x34f   : > { %v4030_v58 = vmul.f32 %v7700_v56, %v3909_v16  ;;  %v3912_v32 = vadd.f32 %v3911_v7, %v7641_v49  ;;  %v4971_v19 = vpop.f32.mrb[60].mxu1  ;;  %v4067_v16 = vld [vmem:[%s7697_s16 + $0x48] sm:$0xff] }
 0x350   : > { %v4096_v44 = vadd.f32 %v4064_v4, %v4032_v42  ;;  %v4033_v3 = vmul.f32 %v7700_v56, %v3920_v12  ;;  %v4972_v52 = vpop.f32.mrb[61].mxu1  ;;  %v3667_v42 = vadd.f32 %v7584_v31, %v7623_v35 }
 0x351   : > { %v4094_v17 = vadd.f32 %v4062_v46, %v4030_v58  ;;  %v4031_v62 = vmul.f32 %v7700_v56, %v3912_v32  ;;  %v4973_v39 = vadd.f32 %v4972_v52, %v4971_v19  ;;  %v4974_v18 = vpop.f32.mrb[62].mxu1  ;;  %v4072_v52 = vld [vmem:[%s7697_s16 + $0x70] sm:$0xff] }
 0x352   : > { %4128 = vst.msk [vmem:[%s7722_s17 + $0x30] sm:$0xff] %vm3024_vm2, %v4096_v44  ;;  %v4097_v49 = vadd.f32 %v4065_v61, %v4033_v3  ;;  %v4975_v26 = vpop.f32.mrb[63].mxu1  ;;  %v3670_v61 = vadd.f32 %v7586_v55, %v7623_v35 }
 0x353   : > { %4126 = vst.msk [vmem:[%s7722_s17 + $0x20] sm:$0xff] %vm3024_vm2, %v4094_v17  ;;  %v4095_v27 = vadd.f32 %v4063_v11, %v4031_v62  ;;  %v4976_v36 = vadd.f32 %v4975_v26, %v4974_v18  ;;  %v5039_v8 = vpop.f32.mrb[56].mxu0  ;;  %v7758_v50 = vadd.f32 %v4973_v39, %v3659_v57  ;;  %v4070_v39 = vld [vmem:[%s7697_s16 + $0x60] sm:$0xff] }
 0x354   : > { %4129 = vst.msk [vmem:[%s7722_s17 + $0x38] sm:$0xff] %vm3024_vm2, %v4097_v49  ;;  %v3933_v2 = vadd.f32 %v5039_v8, %v7657_v37  ;;  %v3924_v13 = vpop.f32.mrb[57].mxu0  ;;  %v4069_v37 = vld [vmem:[%s7697_s16 + $0x58] sm:$0xff]  ;;  %v4071_v8 = vld [vmem:[%s7697_s16 + $0x68] sm:$0xff] }
 0x355   : > { %4127 = vst.msk [vmem:[%s7722_s17 + $0x28] sm:$0xff] %vm3024_vm2, %v4095_v27  ;;  %v3925_v6 = vadd.f32 %v3924_v13, %v7651_v28  ;;  %v5040_v30 = vpop.f32.mrb[58].mxu0  ;;  %v7767_v38 = vadd.f32 %v4976_v36, %v3662_v60  ;;  %v3675_v13 = vadd.f32 %v7604_v20, %v7623_v35 }
 0x356   : > { %v4036_v48 = vmul.f32 %v7700_v56, %v3933_v2  ;;  %v3936_v47 = vadd.f32 %v5040_v30, %v7659_v29  ;;  %v3927_v22 = vpop.f32.mrb[59].mxu0 }
 0x357   : > { %v4034_v0 = vmul.f32 %v7700_v56, %v3925_v6  ;;  %v3928_v21 = vadd.f32 %v3927_v22, %v7653_v63  ;;  %v4977_v54 = vpop.f32.mrb[64].mxu1 }
 0x358   : > { %v4100_v4 = vadd.f32 %v4068_v5, %v4036_v48  ;;  %v4037_v28 = vmul.f32 %v7700_v56, %v3936_v47  ;;  %v4978_v59 = vpop.f32.mrb[65].mxu1 }
 0x359   : > { %v4098_v46 = vadd.f32 %v4066_v10, %v4034_v0  ;;  %v4035_v29 = vmul.f32 %v7700_v56, %v3928_v21  ;;  %v4979_v12 = vadd.f32 %v4978_v59, %v4977_v54  ;;  %v4980_v7 = vpop.f32.mrb[66].mxu1  ;;  %v3678_v10 = vadd.f32 %v7606_v9, %v7623_v35  ;;  %v4076_v54 = vld [vmem:[%s7697_s16 + $0x90] sm:$0xff]  ;;  %v4074_v59 = vld [vmem:[%s7697_s16 + $0x80] sm:$0xff] }
 0x35a   : > { %4132 = vst.msk [vmem:[%s7722_s17 + $0x50] sm:$0xff] %vm3024_vm2, %v4100_v4  ;;  %v4101_v63 = vadd.f32 %v4069_v37, %v4037_v28  ;;  %v4981_v58 = vpop.f32.mrb[67].mxu1 }
 0x35b   : > { %4130 = vst.msk [vmem:[%s7722_s17 + $0x40] sm:$0xff] %vm3024_vm2, %v4098_v46  ;;  %v4099_v32 = vadd.f32 %v4067_v16, %v4035_v29  ;;  %v4982_v19 = vadd.f32 %v4981_v58, %v4980_v7  ;;  %v5043_v31 = vpop.f32.mrb[60].mxu0  ;;  %v7786_v44 = vadd.f32 %v4979_v12, %v3667_v42  ;;  %v4077_v29 = vld [vmem:[%s7697_s16 + $0x98] sm:$0xff] }
 0x35c   : > { %4133 = vst.msk [vmem:[%s7722_s17 + $0x58] sm:$0xff] %vm3024_vm2, %v4101_v63  ;;  %v3949_v3 = vadd.f32 %v5043_v31, %v7673_v45  ;;  %v3940_v11 = vpop.f32.mrb[61].mxu0  ;;  %v4073_v45 = vld [vmem:[%s7697_s16 + $0x78] sm:$0xff]  ;;  %v4075_v63 = vld [vmem:[%s7697_s16 + $0x88] sm:$0xff] }
 0x35d   : > { %4131 = vst.msk [vmem:[%s7722_s17 + $0x48] sm:$0xff] %vm3024_vm2, %v4099_v32  ;;  %v3941_v57 = vadd.f32 %v3940_v11, %v7663_v15  ;;  %v5044_v55 = vpop.f32.mrb[62].mxu0  ;;  %v7795_v17 = vadd.f32 %v4982_v19, %v3670_v61 }
 0x35e   : > { %v4040_v62 = vmul.f32 %v7700_v56, %v3949_v3  ;;  %v3952_v18 = vadd.f32 %v5044_v55, %v7675_v40  ;;  %v3943_v49 = vpop.f32.mrb[63].mxu0  ;;  %v4080_v3 = vld [vmem:[%s7697_s16 + $0xb0] sm:$0xff]  ;;  %v4078_v55 = vld [vmem:[%s7697_s16 + $0xa0] sm:$0xff] }
 0x35f   : > { %v4038_v26 = vmul.f32 %v7700_v56, %v3941_v57  ;;  %v3944_v60 = vadd.f32 %v3943_v49, %v7665_v24  ;;  %v4983_v27 = vpop.f32.mrb[68].mxu1 }
 0x360   : > { %v4104_v36 = vadd.f32 %v4072_v52, %v4040_v62  ;;  %v4041_v15 = vmul.f32 %v7700_v56, %v3952_v18  ;;  %v4984_v2 = vpop.f32.mrb[69].mxu1 }
 0x361   : > { %v4102_v5 = vadd.f32 %v4070_v39, %v4038_v26  ;;  %v4039_v40 = vmul.f32 %v7700_v56, %v3944_v60  ;;  %v4985_v6 = vadd.f32 %v4984_v2, %v4983_v27  ;;  %v4986_v30 = vpop.f32.mrb[70].mxu1  ;;  %v4084_v2 = vld [vmem:[%s7697_s16 + $0xd0] sm:$0xff] }
 0x362   : > { %4136 = vst.msk [vmem:[%s7722_s17 + $0x70] sm:$0xff] %vm3024_vm2, %v4104_v36  ;;  %v4105_v24 = vadd.f32 %v4073_v45, %v4041_v15  ;;  %v4987_v48 = vpop.f32.mrb[71].mxu1 }
 0x363   : > { %4134 = vst.msk [vmem:[%s7722_s17 + $0x60] sm:$0xff] %vm3024_vm2, %v4102_v5  ;;  %v4103_v47 = vadd.f32 %v4071_v8, %v4039_v40  ;;  %v4988_v22 = vadd.f32 %v4987_v48, %v4986_v30  ;;  %v5047_v20 = vpop.f32.mrb[64].mxu0  ;;  %v3836_v0 = vadd.f32 %v4985_v6, %v3675_v13  ;;  %v4082_v6 = vld [vmem:[%s7697_s16 + $0xc0] sm:$0xff] }
 0x364   : > { %4137 = vst.msk [vmem:[%s7722_s17 + $0x78] sm:$0xff] %vm3024_vm2, %v4105_v24  ;;  %v3965_v37 = vadd.f32 %v5047_v20, %v7702_v25  ;;  %v3956_v21 = vpop.f32.mrb[65].mxu0 }
 0x365   : > { %4135 = vst.msk [vmem:[%s7722_s17 + $0x68] sm:$0xff] %vm3024_vm2, %v4103_v47  ;;  %v3957_v4 = vadd.f32 %v3956_v21, %v7679_v41  ;;  %v5048_v9 = vpop.f32.mrb[66].mxu0  ;;  %v3839_v28 = vadd.f32 %v4988_v22, %v3678_v10  ;;  %v4085_v10 = vld [vmem:[%s7697_s16 + $0xd8] sm:$0xff] }
 0x366   : > { %v4044_v16 = vmul.f32 %v7700_v56, %v3965_v37  ;;  %v3968_v42 = vadd.f32 %v5048_v9, %v7709_v14  ;;  %v3959_v46 = vpop.f32.mrb[67].mxu0 }
 0x367   : > { %v4042_v25 = vmul.f32 %v7700_v56, %v3957_v4  ;;  %v3960_v12 = vadd.f32 %v3959_v46, %v7681_v34 }
 0x368   : > { %v4108_v7 = vadd.f32 %v4076_v54, %v4044_v16  ;;  %v4045_v41 = vmul.f32 %v7700_v56, %v3968_v42  ;;  %v3683_v42 = vadd.f32 %v7610_v51, %v7623_v35 }
 0x369   : > { %v4106_v58 = vadd.f32 %v4074_v59, %v4042_v25  ;;  %v4043_v61 = vmul.f32 %v7700_v56, %v3960_v12  ;;  %v3686_v12 = vadd.f32 %v7614_v53, %v7623_v35 }
 0x36a   : > { %4140 = vst.msk [vmem:[%s7722_s17 + $0x90] sm:$0xff] %vm3024_vm2, %v4108_v7  ;;  %v4109_v32 = vadd.f32 %v4077_v29, %v4045_v41 }
 0x36b   : > { %4138 = vst.msk [vmem:[%s7722_s17 + $0x80] sm:$0xff] %vm3024_vm2, %v4106_v58  ;;  %v4107_v14 = vadd.f32 %v4075_v63, %v4043_v61  ;;  %v5051_v19 = vpop.f32.mrb[68].mxu0  ;;  %v4086_v61 = vld [vmem:[%s7697_s16 + $0xe0] sm:$0xff] }
 0x36c   : > { %4141 = vst.msk [vmem:[%s7722_s17 + $0x98] sm:$0xff] %vm3024_vm2, %v4109_v32  ;;  %v3981_v34 = vadd.f32 %v5051_v19, %v7758_v50  ;;  %v3972_v31 = vpop.f32.mrb[69].mxu0  ;;  %v4081_v50 = vld [vmem:[%s7697_s16 + $0xb8] sm:$0xff]  ;;  %v4087_v19 = vld [vmem:[%s7697_s16 + $0xe8] sm:$0xff] }
 0x36d   : > { %4139 = vst.msk [vmem:[%s7722_s17 + $0x88] sm:$0xff] %vm3024_vm2, %v4107_v14  ;;  %v3973_v11 = vadd.f32 %v3972_v31, %v7730_v1  ;;  %v5052_v52 = vpop.f32.mrb[70].mxu0  ;;  %v4079_v1 = vld [vmem:[%s7697_s16 + $0xa8] sm:$0xff] }
 0x36e   : > { %v4048_v57 = vmul.f32 %v7700_v56, %v3981_v34  ;;  %v3984_v62 = vadd.f32 %v5052_v52, %v7767_v38  ;;  %v3975_v39 = vpop.f32.mrb[71].mxu0 }
 0x36f   : > { %v4046_v18 = vmul.f32 %v7700_v56, %v3973_v11  ;;  %v3976_v49 = vadd.f32 %v3975_v39, %v7739_v43  ;;  %v3691_v11 = vadd.f32 %v7616_v33, %v7623_v35  ;;  %v4089_v33 = vld [vmem:[%s7697_s16 + $0xf8] sm:$0xff] }
 0x370   : > { %v4112_v26 = vadd.f32 %v4080_v3, %v4048_v57  ;;  %v4049_v45 = vmul.f32 %v7700_v56, %v3984_v62  ;;  %v3694_v62 = vadd.f32 %v7618_v23, %v7623_v35 }
 0x371   : > { %v4110_v60 = vadd.f32 %v4078_v55, %v4046_v18  ;;  %v4047_v27 = vmul.f32 %v7700_v56, %v3976_v49 }
 0x372   : > { %4144 = vst.msk [vmem:[%s7722_s17 + $0xb0] sm:$0xff] %vm3024_vm2, %v4112_v26  ;;  %v4113_v36 = vadd.f32 %v4081_v50, %v4049_v45  ;;  %v4088_v26 = vld [vmem:[%s7697_s16 + $0xf0] sm:$0xff] }
 0x373   : > { %4142 = vst.msk [vmem:[%s7722_s17 + $0xa0] sm:$0xff] %vm3024_vm2, %v4110_v60  ;;  %v4111_v38 = vadd.f32 %v4079_v1, %v4047_v27  ;;  %v5055_v15 = vpop.f32.mrb[72].mxu0 }
 0x374   : > { %4145 = vst.msk [vmem:[%s7722_s17 + $0xb8] sm:$0xff] %vm3024_vm2, %v4113_v36  ;;  %v3997_v43 = vadd.f32 %v5055_v15, %v3836_v0  ;;  %v3988_v8 = vpop.f32.mrb[73].mxu0  ;;  %v4083_v0 = vld [vmem:[%s7697_s16 + $0xc8] sm:$0xff] }
 0x375   : > { %4143 = vst.msk [vmem:[%s7722_s17 + $0xa8] sm:$0xff] %vm3024_vm2, %v4111_v38  ;;  %v3989_v13 = vadd.f32 %v3988_v8, %v7786_v44  ;;  %v5056_v5 = vpop.f32.mrb[74].mxu0 }
 0x376   : > { %v4052_v40 = vmul.f32 %v7700_v56, %v3997_v43  ;;  %v4000_v30 = vadd.f32 %v5056_v5, %v3839_v28  ;;  %v3991_v24 = vpop.f32.mrb[75].mxu0 }
 0x377   : > { %v4050_v48 = vmul.f32 %v7700_v56, %v3989_v13  ;;  %v3992_v47 = vadd.f32 %v3991_v24, %v7795_v17 }
 0x378   : > { %v4116_v22 = vadd.f32 %v4084_v2, %v4052_v40  ;;  %v4053_v20 = vmul.f32 %v7700_v56, %v4000_v30 }
 0x379   : > { %v4114_v37 = vadd.f32 %v4082_v6, %v4050_v48  ;;  %v4051_v44 = vmul.f32 %v7700_v56, %v3992_v47 }
 0x37a   : > { %4148 = vst.msk [vmem:[%s7722_s17 + $0xd0] sm:$0xff] %vm3024_vm2, %v4116_v22  ;;  %v4117_v21 = vadd.f32 %v4085_v10, %v4053_v20 }
 0x37b   : > { %4146 = vst.msk [vmem:[%s7722_s17 + $0xc0] sm:$0xff] %vm3024_vm2, %v4114_v37  ;;  %v4115_v54 = vadd.f32 %v4083_v0, %v4051_v44  ;;  %v5059_v4 = vpop.f32.mrb[76].mxu0 }
 0x37c   : > { %4149 = vst.msk [vmem:[%s7722_s17 + $0xd8] sm:$0xff] %vm3024_vm2, %v4117_v21  ;;  %v4004_v9 = vpop.f32.mrb[77].mxu0 }
 0x37d   : > { %4147 = vst.msk [vmem:[%s7722_s17 + $0xc8] sm:$0xff] %vm3024_vm2, %v4115_v54  ;;  %v5060_v17 = vpop.f32.mrb[78].mxu0 }
 0x37e   : > { %v4007_v28 = vpop.f32.mrb[79].mxu0 }
 0x38a   : > { %v4989_v16 = vpop.f32.mrb[72].mxu1 }
 0x38b   : > { %v4990_v59 = vpop.f32.mrb[73].mxu1 }
 0x38c   : > { %v4991_v46 = vadd.f32 %v4990_v59, %v4989_v16  ;;  %v4992_v25 = vpop.f32.mrb[74].mxu1 }
 0x38d   : > { %v4993_v29 = vpop.f32.mrb[75].mxu1 }
 0x38e   : > { %v4994_v7 = vadd.f32 %v4993_v29, %v4992_v25  ;;  %v3844_v41 = vadd.f32 %v4991_v46, %v3683_v42 }
 0x390   : > { %v4005_v63 = vadd.f32 %v4004_v9, %v3844_v41  ;;  %v3847_v58 = vadd.f32 %v4994_v7, %v3686_v12 }
 0x392   : > { %v4054_v32 = vmul.f32 %v7700_v56, %v4005_v63  ;;  %v4008_v14 = vadd.f32 %v4007_v28, %v3847_v58 }
 0x394   : > { %v4118_v34 = vadd.f32 %v4086_v61, %v4054_v32  ;;  %v4055_v51 = vmul.f32 %v7700_v56, %v4008_v14 }
 0x396   : > { %4150 = vst.msk [vmem:[%s7722_s17 + $0xe0] sm:$0xff] %vm3024_vm2, %v4118_v34  ;;  %v4119_v31 = vadd.f32 %v4087_v19, %v4055_v51 }
 0x398   : > { %4151 = vst.msk [vmem:[%s7722_s17 + $0xe8] sm:$0xff] %vm3024_vm2, %v4119_v31 }
 0x39a   : > { %v4995_v53 = vpop.f32.mrb[76].mxu1 }
 0x39b   : > { %v4996_v3 = vpop.f32.mrb[77].mxu1 }
 0x39c   : > { %v4997_v52 = vadd.f32 %v4996_v3, %v4995_v53  ;;  %v4998_v57 = vpop.f32.mrb[78].mxu1 }
 0x39d   : > { %v4999_v55 = vpop.f32.mrb[79].mxu1 }
 0x39e   : > { %v5000_v39 = vadd.f32 %v4999_v55, %v4998_v57  ;;  %v3852_v18 = vadd.f32 %v4997_v52, %v3691_v11 }
 0x3a0   : > { %v4013_v50 = vadd.f32 %v5059_v4, %v3852_v18  ;;  %v3855_v49 = vadd.f32 %v5000_v39, %v3694_v62 }
 0x3a2   : > { %v4056_v45 = vmul.f32 %v7700_v56, %v4013_v50  ;;  %v4016_v1 = vadd.f32 %v5060_v17, %v3855_v49 }
 0x3a4   : > { %v4120_v60 = vadd.f32 %v4088_v26, %v4056_v45  ;;  %v4057_v27 = vmul.f32 %v7700_v56, %v4016_v1 }
 0x3a6   : > { %4152 = vst.msk [vmem:[%s7722_s17 + $0xf0] sm:$0xff] %vm3024_vm2, %v4120_v60  ;;  %v4121_v23 = vadd.f32 %v4089_v33, %v4057_v27 }
 0x3a8   : > { %4153 = vst.msk [vmem:[%s7722_s17 + $0xf8] sm:$0xff] %vm3024_vm2, %v4121_v23 }
 0x3a9   : > { %5415 = shalt.err (!%p5412_p2)
}
 0x3aa   : > { %s5416_s13 = scalar_lea.hbm %s7901_s20, 4096  ;;  %s5420_s22 = scalar_lea.hbm %s7959_s7, 8192 }
 0x3ab   : > { %p5417_p3 = scmp.ne.s32.totalorder %s7901_s20, %s5416_s13  ;;  %p5421_p8 = scmp.lt.u32.totalorder %s7901_s20, %s7959_s7 }
 0x3ac   : > { %p5422_p11 = scmp.lt.u32.totalorder %s5420_s22, %s5416_s13  ;;  %p5424_p10 = scmp.lt.u32.totalorder %s5416_s13, %s7901_s20 }
 0x3ad   : > { %p5418_p4 = pnand %p5417_p3, %p5554_p5 }
 0x3ae   : > { %p5423_p9 = por %p5422_p11, %p5421_p8 }
 0x3af   : > { %p5419_p7 = pneg %p5418_p4 }
 0x3b0   : > { %p5425_p12 = por %p5424_p10, %p5423_p9 }
 0x3b2   : > { %p5426_p13 = pnand %p5425_p12, %p5419_p7 }
 0x3b4   : > { %5429 = shalt.err (!%p5426_p13)
}
 0x3b5   : > { %s5474_s23 = smov 128   ;;  %s5475_s29 = smov 8  }
 0x3b6   : > { %5083 = dma.vmem_to_hbm [thread:$0]  (%p5554_p5), %s7903_s19, 4096, %s7901_s20, %s7911_s28, %s5474_s23, %s5474_s23, %s5475_s29  }
 0x3b7 PF: > { %p5095_p0 = scmp.ge.s32.totalorder %s5468_s27, 2  ;;  %s4183_s21 = sand.u32 1, %s5456_s24  }
 0x3b8   : > { %s4184_s8 = scalar_lea.sflag [#allocation3], %s4183_s21 }
 0x3b9   : > { %p5090_p1 = pnand %p5095_p0, %p5558_p6 }
 0x3bb   : > { %5451 = dma.done.wait (!%p5090_p1), %s4184_s8, 4096  }
 0x3bc   : > { %5453 = vsyncadd (!%p5090_p1), %s4184_s8, 4294963200  ;;  %p18_p2 = scmp.ge.s32.totalorder %s5541_s30, 4   ;;  %s7978_s24 = smov %s5460_s25 }
 0x3bd   : > { %s7979_s25 = smov %s5464_s26  ;;  %s7980_s26 = smov %s5552_s10 }
 0x3be   : > { %s7981_s27 = smov %s5541_s30  ;;  %20 = sbr.rel (!%p18_p2) target bundleno = 4 (0x4), region = 99 }
 0x3c5   :  { %4189 = vsyncpa [#allocation3], 1 }
 0x3c6   :  { %4191 = vsyncpa [#allocation3 + $0x1], 1 }
 0x3c7   :  { %4192 = vsyncpa [#allocation4], 1 }
 0x3c8   :  { %4194 = vsyncpa [#allocation4 + $0x1], 1 }

</bundles_post_ra>
